<compile_context>
chip_gen: v6e
topology: v6e:2x2x1
jax: 0.10.0
libtpu: 0.0.40
codegen_flags: <defaults>
</compile_context>

<pallas_src>
import functools
import math

import jax
import jax.numpy as jnp
from jax.experimental import pallas as pl
from jax.experimental.pallas import tpu as pltpu

IN_FEATURES = 3 * 64 * 64          # 12288
N_PARTS = 4
K_TILE = 6144                      # layer-1 K tiling (bf16 tile = 6 MiB)
K_STEPS = IN_FEATURES // K_TILE    # 2
HEAD_PAD = 128                     # fused (adv|classify) head padded to 128 lanes


def _leaky_relu(h):
    return jnp.where(h > 0, h, 0.2 * h)


def parts_disc_kernel(x_ref,
                      w1_ref, b1_ref, w2_ref, b2_ref, w3_ref, b3_ref,
                      w4_ref, b4_ref, wh_ref, bh_ref,
                      out_ref,
                      acc_ref):
    """Grid = (part, k_tile).  Layer-1 (bf16 x bf16 -> f32) is accumulated over
    k tiles in a VMEM scratch; on the last k tile the small f32 MLP layers and
    the fused head run entirely in VMEM and one lane-dense (B, 128) block is
    stored per part."""
    k = pl.program_id(1)

    @pl.when(k == 0)
    def _():
        # initialize the accumulator with the layer-1 bias
        acc_ref[...] = jnp.broadcast_to(b1_ref[0], acc_ref.shape)

    # Layer-1 partial product: (B, K_TILE)bf16 @ (K_TILE, 512)bf16 -> f32
    acc_ref[...] += jnp.dot(x_ref[...], w1_ref[0],
                            preferred_element_type=jnp.float32)

    @pl.when(k == pl.num_programs(1) - 1)
    def _():
        h = _leaky_relu(acc_ref[...])                                    # (B, 512)
        h = _leaky_relu(jnp.dot(h, w2_ref[0],
                                preferred_element_type=jnp.float32) + b2_ref[0])
        h = _leaky_relu(jnp.dot(h, w3_ref[0],
                                preferred_element_type=jnp.float32) + b3_ref[0])
        h = _leaky_relu(jnp.dot(h, w4_ref[0],
                                preferred_element_type=jnp.float32) + b4_ref[0])
        # fused adv + classify head, padded to 128 lanes (col 0 = validity,
        # cols 1..4 = label, rest zero)
        head = jnp.dot(h, wh_ref[0],
                       preferred_element_type=jnp.float32) + bh_ref[0]   # (B, 128)
        out_ref[0] = head.astype(out_ref.dtype)


def parts_discriminator_forward(parts, params):
    """parts: (B, 4, 3, 64, 64) float32.  Returns 4 tuples (validity, label)
    matching Parts_Discriminator.forward (eye1, eye2, nose, mouth)."""
    B = parts.shape[0]
    # Flatten; part p's features are contiguous columns [p*12288, (p+1)*12288).
    x = parts.reshape(B, N_PARTS * IN_FEATURES).astype(jnp.bfloat16)

    (w1, b1, w2, b2, w3, b3, w4, b4, wa, ba, wc, bc) = params

    # Stream the dominant layer-1 weights as bf16 (f32 accumulation on MXU).
    w1_bf = w1.astype(jnp.bfloat16)

    # Fuse + lane-pad the two heads: (64,1)+(64,4) -> (64,128).
    wh = jnp.zeros((N_PARTS, 64, HEAD_PAD), jnp.float32)
    wh = wh.at[:, :, 0:1].set(wa).at[:, :, 1:5].set(wc)
    bh = jnp.zeros((N_PARTS, 1, HEAD_PAD), jnp.float32)
    bh = bh.at[:, :, 0:1].set(ba).at[:, :, 1:5].set(bc)

    grid = (N_PARTS, K_STEPS)

    def per_part(shape):
        # weight blocks constant over the k axis
        return pl.BlockSpec(shape, lambda p, k: (p,) + (0,) * (len(shape) - 1))

    in_specs = [
        pl.BlockSpec((B, K_TILE), lambda p, k: (0, p * K_STEPS + k)),     # x slice
        pl.BlockSpec((1, K_TILE, 512), lambda p, k: (p, k, 0)),           # W1 tile (bf16)
        per_part((1, 1, 512)),                                            # b1
        per_part((1, 512, 256)), per_part((1, 1, 256)),                   # W2, b2
        per_part((1, 256, 128)), per_part((1, 1, 128)),                   # W3, b3
        per_part((1, 128, 64)),  per_part((1, 1, 64)),                    # W4, b4
        per_part((1, 64, HEAD_PAD)), per_part((1, 1, HEAD_PAD)),          # fused head
    ]
    out_specs = pl.BlockSpec((1, B, HEAD_PAD), lambda p, k: (p, 0, 0))

    flops = 2 * N_PARTS * B * (IN_FEATURES * 512 + 512 * 256
                               + 256 * 128 + 128 * 64 + 64 * HEAD_PAD)
    bytes_accessed = (
        w1_bf.size * 2 + x.size * 2
        + (b1.size + w2.size + b2.size + w3.size + b3.size
           + w4.size + b4.size + wh.size + bh.size) * 4
        + N_PARTS * B * HEAD_PAD * 4)

    out = pl.pallas_call(
        parts_disc_kernel,
        out_shape=jax.ShapeDtypeStruct((N_PARTS, B, HEAD_PAD), jnp.float32),
        grid_spec=pltpu.PrefetchScalarGridSpec(
            num_scalar_prefetch=0,
            grid=grid,
            in_specs=in_specs,
            out_specs=out_specs,
            scratch_shapes=[pltpu.VMEM((B, 512), jnp.float32)],
        ),
        compiler_params=pltpu.CompilerParams(
            dimension_semantics=("parallel", "arbitrary"),
            vmem_limit_bytes=48 << 20,       # leave headroom on v7x (64 MiB/TC)
        ),
        cost_estimate=pl.CostEstimate(flops=flops, transcendentals=0,
                                      bytes_accessed=bytes_accessed),
    )(x, w1_bf, b1, w2, b2, w3, b3, w4, b4, wh, bh)

    # (eye1, eye2, nose, mouth), each (validity (B,1), label (B,4))
    return tuple((out[p, :, 0:1], out[p, :, 1:5]) for p in range(N_PARTS))


def init_params(key):
    """Deterministic PyTorch-style Linear init: U(-1/sqrt(fan_in), 1/sqrt(fan_in)).
    Weights stored as (part, in, out) so the forward uses x @ W + b."""
    dims = [(IN_FEATURES, 512), (512, 256), (256, 128), (128, 64), (64, 1), (64, 4)]
    params = []
    for (fin, fout) in dims:
        key, kw, kb = jax.random.split(key, 3)
        bound = 1.0 / math.sqrt(fin)
        w = jax.random.uniform(kw, (N_PARTS, fin, fout), jnp.float32, -bound, bound)
        b = jax.random.uniform(kb, (N_PARTS, 1, fout), jnp.float32, -bound, bound)
        params += [w, b]
    return tuple(params)


def reference_forward(parts, params):
    """Pure-JAX reference.  Mimics the kernel's bf16 streaming of the layer-1
    operands (weights + inputs) so the comparison isolates kernel correctness."""
    B = parts.shape[0]
    x = parts.reshape(B, N_PARTS, IN_FEATURES)
    (w1, b1, w2, b2, w3, b3, w4, b4, wa, ba, wc, bc) = params
    xq = x.astype(jnp.bfloat16).astype(jnp.float32)
    w1q = w1.astype(jnp.bfloat16).astype(jnp.float32)
    outs = []
    for p in range(N_PARTS):
        h = _leaky_relu(xq[:, p] @ w1q[p] + b1[p])
        h = _leaky_relu(h @ w2[p] + b2[p])
        h = _leaky_relu(h @ w3[p] + b3[p])
        h = _leaky_relu(h @ w4[p] + b4[p])
        outs.append((h @ wa[p] + ba[p], h @ wc[p] + bc[p]))
    return tuple(outs)


if __name__ == "__main__":
    key = jax.random.PRNGKey(0)
    key, kx = jax.random.split(key)
    B = 2
    parts = jax.random.normal(kx, (B, N_PARTS, 3, 64, 64), jnp.float32)
    params = init_params(key)

    fwd = jax.jit(functools.partial(parts_discriminator_forward, params=params))
    outs = fwd(parts)
    jax.block_until_ready(outs)

    refs = reference_forward(parts, params)
    for (v, l), (rv, rl) in zip(outs, refs):
        assert v.shape == (B, 1) and l.shape == (B, 4)
        assert jnp.allclose(v, rv, atol=5e-3, rtol=5e-3)
        assert jnp.allclose(l, rl, atol=5e-3, rtol=5e-3)

    print("KERNEL_OK")
</pallas_src>

<mosaic_0001>
module attributes {stable_mosaic.version = 11 : i64} {
  func.func @parts_disc_kernel(%arg0: i32, %arg1: i32, %arg2: memref<2x6144xbf16, #tpu.memory_space<vmem>>, %arg3: memref<1x6144x512xbf16, #tpu.memory_space<vmem>>, %arg4: memref<1x1x512xf32, #tpu.memory_space<vmem>>, %arg5: memref<1x512x256xf32, #tpu.memory_space<vmem>>, %arg6: memref<1x1x256xf32, #tpu.memory_space<vmem>>, %arg7: memref<1x256x128xf32, #tpu.memory_space<vmem>>, %arg8: memref<1x1x128xf32, #tpu.memory_space<vmem>>, %arg9: memref<1x128x64xf32, #tpu.memory_space<vmem>>, %arg10: memref<1x1x64xf32, #tpu.memory_space<vmem>>, %arg11: memref<1x64x128xf32, #tpu.memory_space<vmem>>, %arg12: memref<1x1x128xf32, #tpu.memory_space<vmem>>, %arg13: memref<1x2x128xf32, #tpu.memory_space<vmem>>, %arg14: memref<2x512xf32, #tpu.memory_space<vmem>>) attributes {dimension_semantics = [#tpu.dimension_semantics<parallel>, #tpu.dimension_semantics<arbitrary>], iteration_bounds = array<i64: 4, 2>, scalar_prefetch = 0 : i64, scratch_operands = 1 : i64, tpu.core_type = #tpu.core_type<tc>, window_params = [{transform_indices = @transform_0, window_bounds = array<i64: 2, 6144>}, {transform_indices = @transform_1, window_bounds = array<i64: 1, 6144, 512>}, {transform_indices = @transform_2, window_bounds = array<i64: 1, 1, 512>}, {transform_indices = @transform_3, window_bounds = array<i64: 1, 512, 256>}, {transform_indices = @transform_4, window_bounds = array<i64: 1, 1, 256>}, {transform_indices = @transform_5, window_bounds = array<i64: 1, 256, 128>}, {transform_indices = @transform_6, window_bounds = array<i64: 1, 1, 128>}, {transform_indices = @transform_7, window_bounds = array<i64: 1, 128, 64>}, {transform_indices = @transform_8, window_bounds = array<i64: 1, 1, 64>}, {transform_indices = @transform_9, window_bounds = array<i64: 1, 64, 128>}, {transform_indices = @transform_10, window_bounds = array<i64: 1, 1, 128>}, {transform_indices = @transform_11, window_bounds = array<i64: 1, 2, 128>}]} {
    %c0_i32 = arith.constant 0 : i32
    %0 = arith.cmpi eq, %arg1, %c0_i32 : i32
    %1 = arith.extui %0 : i1 to i32
    %c0_i32_0 = arith.constant 0 : i32
    %2 = arith.cmpi ne, %1, %c0_i32_0 : i32
    scf.if %2 {
      %c0_10 = arith.constant 0 : index
      %c0_11 = arith.constant 0 : index
      %c0_12 = arith.constant 0 : index
      %13 = vector.load %arg4[%c0_10, %c0_11, %c0_12] : memref<1x1x512xf32, #tpu.memory_space<vmem>>, vector<1x1x512xf32>
      %14 = vector.shape_cast %13 : vector<1x1x512xf32> to vector<1x512xf32>
      %15 = vector.shape_cast %14 : vector<1x512xf32> to vector<1x512xf32>
      %16 = vector.broadcast %15 : vector<1x512xf32> to vector<2x512xf32>
      %c0_13 = arith.constant 0 : index
      %c0_14 = arith.constant 0 : index
      %17 = vector.load %arg14[%c0_13, %c0_14] : memref<2x512xf32, #tpu.memory_space<vmem>>, vector<2x512xf32>
      tpu.vector_store %arg14[%c0_13, %c0_14], %16 {strides = array<i32>} : memref<2x512xf32, #tpu.memory_space<vmem>>, vector<2x512xf32>,
    } else {
    }
    %c0 = arith.constant 0 : index
    %c0_1 = arith.constant 0 : index
    %3 = vector.load %arg14[%c0, %c0_1] : memref<2x512xf32, #tpu.memory_space<vmem>>, vector<2x512xf32>
    %c0_2 = arith.constant 0 : index
    %c0_3 = arith.constant 0 : index
    %4 = vector.load %arg2[%c0_2, %c0_3] : memref<2x6144xbf16, #tpu.memory_space<vmem>>, vector<2x6144xbf16>
    %c0_4 = arith.constant 0 : index
    %c0_5 = arith.constant 0 : index
    %c0_6 = arith.constant 0 : index
    %5 = vector.load %arg3[%c0_4, %c0_5, %c0_6] : memref<1x6144x512xbf16, #tpu.memory_space<vmem>>, vector<1x6144x512xbf16>
    %6 = vector.shape_cast %5 : vector<1x6144x512xbf16> to vector<6144x512xbf16>
    %cst = arith.constant dense<0.000000e+00> : vector<2x512xf32>
    %7 = tpu.matmul %4, %6, %cst {dimension_numbers = #tpu.dot_dimension_numbers<[1], [0], [0], [1], [0, 0, 1, 1], [], []>} : vector<2x6144xbf16>, vector<6144x512xbf16>, vector<2x512xf32> -> vector<2x512xf32>
    %8 = arith.addf %3, %7 : vector<2x512xf32>
    %c0_7 = arith.constant 0 : index
    %c0_8 = arith.constant 0 : index
    %9 = vector.load %arg14[%c0_7, %c0_8] : memref<2x512xf32, #tpu.memory_space<vmem>>, vector<2x512xf32>
    tpu.vector_store %arg14[%c0_7, %c0_8], %8 {strides = array<i32>} : memref<2x512xf32, #tpu.memory_space<vmem>>, vector<2x512xf32>,
    %c1_i32 = arith.constant 1 : i32
    %10 = arith.cmpi eq, %arg1, %c1_i32 : i32
    %11 = arith.extui %10 : i1 to i32
    %c0_i32_9 = arith.constant 0 : i32
    %12 = arith.cmpi ne, %11, %c0_i32_9 : i32
    scf.if %12 {
      %c0_10 = arith.constant 0 : index
      %c0_11 = arith.constant 0 : index
      %13 = vector.load %arg14[%c0_10, %c0_11] : memref<2x512xf32, #tpu.memory_space<vmem>>, vector<2x512xf32>
      %cst_12 = arith.constant 0.000000e+00 : f32
      %14 = vector.broadcast %cst_12 : f32 to vector<2x512xf32>
      %15 = arith.cmpf ogt, %13, %14 : vector<2x512xf32>
      %cst_13 = arith.constant 2.000000e-01 : f32
      %16 = vector.broadcast %cst_13 : f32 to vector<2x512xf32>
      %17 = arith.mulf %16, %13 : vector<2x512xf32>
      %18 = arith.select %15, %13, %17 : vector<2x512xi1>, vector<2x512xf32>
      %c0_14 = arith.constant 0 : index
      %c0_15 = arith.constant 0 : index
      %c0_16 = arith.constant 0 : index
      %19 = vector.load %arg5[%c0_14, %c0_15, %c0_16] : memref<1x512x256xf32, #tpu.memory_space<vmem>>, vector<1x512x256xf32>
      %20 = vector.shape_cast %19 : vector<1x512x256xf32> to vector<512x256xf32>
      %cst_17 = arith.constant dense<0.000000e+00> : vector<2x256xf32>
      %21 = tpu.matmul %18, %20, %cst_17 {dimension_numbers = #tpu.dot_dimension_numbers<[1], [0], [0], [1], [0, 0, 1, 1], [], []>} : vector<2x512xf32>, vector<512x256xf32>, vector<2x256xf32> -> vector<2x256xf32>
      %c0_18 = arith.constant 0 : index
      %c0_19 = arith.constant 0 : index
      %c0_20 = arith.constant 0 : index
      %22 = vector.load %arg6[%c0_18, %c0_19, %c0_20] : memref<1x1x256xf32, #tpu.memory_space<vmem>>, vector<1x1x256xf32>
      %23 = vector.shape_cast %22 : vector<1x1x256xf32> to vector<1x256xf32>
      %24 = vector.broadcast %23 : vector<1x256xf32> to vector<2x256xf32>
      %25 = arith.addf %21, %24 : vector<2x256xf32>
      %cst_21 = arith.constant 0.000000e+00 : f32
      %26 = vector.broadcast %cst_21 : f32 to vector<2x256xf32>
      %27 = arith.cmpf ogt, %25, %26 : vector<2x256xf32>
      %cst_22 = arith.constant 2.000000e-01 : f32
      %28 = vector.broadcast %cst_22 : f32 to vector<2x256xf32>
      %29 = arith.mulf %28, %25 : vector<2x256xf32>
      %30 = arith.select %27, %25, %29 : vector<2x256xi1>, vector<2x256xf32>
      %c0_23 = arith.constant 0 : index
      %c0_24 = arith.constant 0 : index
      %c0_25 = arith.constant 0 : index
      %31 = vector.load %arg7[%c0_23, %c0_24, %c0_25] : memref<1x256x128xf32, #tpu.memory_space<vmem>>, vector<1x256x128xf32>
      %32 = vector.shape_cast %31 : vector<1x256x128xf32> to vector<256x128xf32>
      %cst_26 = arith.constant dense<0.000000e+00> : vector<2x128xf32>
      %33 = tpu.matmul %30, %32, %cst_26 {dimension_numbers = #tpu.dot_dimension_numbers<[1], [0], [0], [1], [0, 0, 1, 1], [], []>} : vector<2x256xf32>, vector<256x128xf32>, vector<2x128xf32> -> vector<2x128xf32>
      %c0_27 = arith.constant 0 : index
      %c0_28 = arith.constant 0 : index
      %c0_29 = arith.constant 0 : index
      %34 = vector.load %arg8[%c0_27, %c0_28, %c0_29] : memref<1x1x128xf32, #tpu.memory_space<vmem>>, vector<1x1x128xf32>
      %35 = vector.shape_cast %34 : vector<1x1x128xf32> to vector<1x128xf32>
      %36 = vector.broadcast %35 : vector<1x128xf32> to vector<2x128xf32>
      %37 = arith.addf %33, %36 : vector<2x128xf32>
      %cst_30 = arith.constant 0.000000e+00 : f32
      %38 = vector.broadcast %cst_30 : f32 to vector<2x128xf32>
      %39 = arith.cmpf ogt, %37, %38 : vector<2x128xf32>
      %cst_31 = arith.constant 2.000000e-01 : f32
      %40 = vector.broadcast %cst_31 : f32 to vector<2x128xf32>
      %41 = arith.mulf %40, %37 : vector<2x128xf32>
      %42 = arith.select %39, %37, %41 : vector<2x128xi1>, vector<2x128xf32>
      %c0_32 = arith.constant 0 : index
      %c0_33 = arith.constant 0 : index
      %c0_34 = arith.constant 0 : index
      %43 = vector.load %arg9[%c0_32, %c0_33, %c0_34] : memref<1x128x64xf32, #tpu.memory_space<vmem>>, vector<1x128x64xf32>
      %44 = vector.shape_cast %43 : vector<1x128x64xf32> to vector<128x64xf32>
      %cst_35 = arith.constant dense<0.000000e+00> : vector<2x64xf32>
      %45 = tpu.matmul %42, %44, %cst_35 {dimension_numbers = #tpu.dot_dimension_numbers<[1], [0], [0], [1], [0, 0, 1, 1], [], []>} : vector<2x128xf32>, vector<128x64xf32>, vector<2x64xf32> -> vector<2x64xf32>
      %c0_36 = arith.constant 0 : index
      %c0_37 = arith.constant 0 : index
      %c0_38 = arith.constant 0 : index
      %46 = vector.load %arg10[%c0_36, %c0_37, %c0_38] : memref<1x1x64xf32, #tpu.memory_space<vmem>>, vector<1x1x64xf32>
      %47 = vector.shape_cast %46 : vector<1x1x64xf32> to vector<1x64xf32>
      %48 = vector.broadcast %47 : vector<1x64xf32> to vector<2x64xf32>
      %49 = arith.addf %45, %48 : vector<2x64xf32>
      %cst_39 = arith.constant 0.000000e+00 : f32
      %50 = vector.broadcast %cst_39 : f32 to vector<2x64xf32>
      %51 = arith.cmpf ogt, %49, %50 : vector<2x64xf32>
      %cst_40 = arith.constant 2.000000e-01 : f32
      %52 = vector.broadcast %cst_40 : f32 to vector<2x64xf32>
      %53 = arith.mulf %52, %49 : vector<2x64xf32>
      %54 = arith.select %51, %49, %53 : vector<2x64xi1>, vector<2x64xf32>
      %c0_41 = arith.constant 0 : index
      %c0_42 = arith.constant 0 : index
      %c0_43 = arith.constant 0 : index
      %55 = vector.load %arg11[%c0_41, %c0_42, %c0_43] : memref<1x64x128xf32, #tpu.memory_space<vmem>>, vector<1x64x128xf32>
      %56 = vector.shape_cast %55 : vector<1x64x128xf32> to vector<64x128xf32>
      %cst_44 = arith.constant dense<0.000000e+00> : vector<2x128xf32>
      %57 = tpu.matmul %54, %56, %cst_44 {dimension_numbers = #tpu.dot_dimension_numbers<[1], [0], [0], [1], [0, 0, 1, 1], [], []>} : vector<2x64xf32>, vector<64x128xf32>, vector<2x128xf32> -> vector<2x128xf32>
      %c0_45 = arith.constant 0 : index
      %c0_46 = arith.constant 0 : index
      %c0_47 = arith.constant 0 : index
      %58 = vector.load %arg12[%c0_45, %c0_46, %c0_47] : memref<1x1x128xf32, #tpu.memory_space<vmem>>, vector<1x1x128xf32>
      %59 = vector.shape_cast %58 : vector<1x1x128xf32> to vector<1x128xf32>
      %60 = vector.broadcast %59 : vector<1x128xf32> to vector<2x128xf32>
      %61 = arith.addf %57, %60 : vector<2x128xf32>
      %c0_48 = arith.constant 0 : index
      %c0_49 = arith.constant 0 : index
      %c0_50 = arith.constant 0 : index
      %62 = vector.load %arg13[%c0_48, %c0_49, %c0_50] : memref<1x2x128xf32, #tpu.memory_space<vmem>>, vector<1x2x128xf32>
      %63 = vector.shape_cast %62 : vector<1x2x128xf32> to vector<2x128xf32>
      %64 = vector.shape_cast %61 : vector<2x128xf32> to vector<1x2x128xf32>
      tpu.vector_store %arg13[%c0_48, %c0_49, %c0_50], %64 {strides = array<i32>} : memref<1x2x128xf32, #tpu.memory_space<vmem>>, vector<1x2x128xf32>,
    } else {
    }
    return
  }
  func.func @transform_0(%arg0: i32, %arg1: i32) -> (i32, i32) {
    %c2_i32 = arith.constant 2 : i32
    %0 = arith.muli %arg0, %c2_i32 : i32
    %1 = arith.addi %0, %arg1 : i32
    %c0_i32 = arith.constant 0 : i32
    %c0_i32_0 = arith.constant 0 : i32
    return %c0_i32, %1 : i32, i32
  }
  func.func @transform_1(%arg0: i32, %arg1: i32) -> (i32, i32, i32) {
    %c0_i32 = arith.constant 0 : i32
    %c0_i32_0 = arith.constant 0 : i32
    return %arg0, %arg1, %c0_i32 : i32, i32, i32
  }
  func.func @transform_2(%arg0: i32, %arg1: i32) -> (i32, i32, i32) {
    %c0_i32 = arith.constant 0 : i32
    %c0_i32_0 = arith.constant 0 : i32
    %c0_i32_1 = arith.constant 0 : i32
    return %arg0, %c0_i32, %c0_i32_0 : i32, i32, i32
  }
  func.func @transform_3(%arg0: i32, %arg1: i32) -> (i32, i32, i32) {
    %c0_i32 = arith.constant 0 : i32
    %c0_i32_0 = arith.constant 0 : i32
    %c0_i32_1 = arith.constant 0 : i32
    return %arg0, %c0_i32, %c0_i32_0 : i32, i32, i32
  }
  func.func @transform_4(%arg0: i32, %arg1: i32) -> (i32, i32, i32) {
    %c0_i32 = arith.constant 0 : i32
    %c0_i32_0 = arith.constant 0 : i32
    %c0_i32_1 = arith.constant 0 : i32
    return %arg0, %c0_i32, %c0_i32_0 : i32, i32, i32
  }
  func.func @transform_5(%arg0: i32, %arg1: i32) -> (i32, i32, i32) {
    %c0_i32 = arith.constant 0 : i32
    %c0_i32_0 = arith.constant 0 : i32
    %c0_i32_1 = arith.constant 0 : i32
    return %arg0, %c0_i32, %c0_i32_0 : i32, i32, i32
  }
  func.func @transform_6(%arg0: i32, %arg1: i32) -> (i32, i32, i32) {
    %c0_i32 = arith.constant 0 : i32
    %c0_i32_0 = arith.constant 0 : i32
    %c0_i32_1 = arith.constant 0 : i32
    return %arg0, %c0_i32, %c0_i32_0 : i32, i32, i32
  }
  func.func @transform_7(%arg0: i32, %arg1: i32) -> (i32, i32, i32) {
    %c0_i32 = arith.constant 0 : i32
    %c0_i32_0 = arith.constant 0 : i32
    %c0_i32_1 = arith.constant 0 : i32
    return %arg0, %c0_i32, %c0_i32_0 : i32, i32, i32
  }
  func.func @transform_8(%arg0: i32, %arg1: i32) -> (i32, i32, i32) {
    %c0_i32 = arith.constant 0 : i32
    %c0_i32_0 = arith.constant 0 : i32
    %c0_i32_1 = arith.constant 0 : i32
    return %arg0, %c0_i32, %c0_i32_0 : i32, i32, i32
  }
  func.func @transform_9(%arg0: i32, %arg1: i32) -> (i32, i32, i32) {
    %c0_i32 = arith.constant 0 : i32
    %c0_i32_0 = arith.constant 0 : i32
    %c0_i32_1 = arith.constant 0 : i32
    return %arg0, %c0_i32, %c0_i32_0 : i32, i32, i32
  }
  func.func @transform_10(%arg0: i32, %arg1: i32) -> (i32, i32, i32) {
    %c0_i32 = arith.constant 0 : i32
    %c0_i32_0 = arith.constant 0 : i32
    %c0_i32_1 = arith.constant 0 : i32
    return %arg0, %c0_i32, %c0_i32_0 : i32, i32, i32
  }
  func.func @transform_11(%arg0: i32, %arg1: i32) -> (i32, i32, i32) {
    %c0_i32 = arith.constant 0 : i32
    %c0_i32_0 = arith.constant 0 : i32
    %c0_i32_1 = arith.constant 0 : i32
    return %arg0, %c0_i32, %c0_i32_0 : i32, i32, i32
  }
}

</mosaic_0001>

<bundles_post_ra>
// kernel: parts_discriminator_forward.1
= control target key start
LH: loop header
LB: loop body
LE: loop exit
PB: predicated region body
PF: predicated region fallthrough
CT: control target
= control target key end

     0   :  { %s20535_s0 = inlined_call_operand.vmem [shape: bf16[2,49152], index: 0, kind: input, shape index: {}]   ;;  %s20536_s1 = inlined_call_operand.hbm [shape: bf16[4,12288,512], index: 1, kind: input, shape index: {}]   ;;  %s20537_s2 = inlined_call_operand.hbm [shape: f32[4,1,512], index: 2, kind: input, shape index: {}]   ;;  %s20538_s3 = inlined_call_operand.hbm [shape: f32[4,512,256], index: 3, kind: input, shape index: {}]   ;;  %s20539_s4 = inlined_call_operand.hbm [shape: f32[4,1,256], index: 4, kind: input, shape index: {}]   ;;  %s20540_s5 = inlined_call_operand.hbm [shape: f32[4,256,128], index: 5, kind: input, shape index: {}]   ;;  %s20541_s6 = inlined_call_operand.hbm [shape: f32[4,1,128], index: 6, kind: input, shape index: {}]   ;;  %s20542_s7 = inlined_call_operand.hbm [shape: f32[4,128,64], index: 7, kind: input, shape index: {}]   ;;  %s20543_s8 = inlined_call_operand.hbm [shape: f32[4,1,64], index: 8, kind: input, shape index: {}]   ;;  %s20544_s9 = inlined_call_operand.hbm [shape: f32[4,64,128], index: 9, kind: input, shape index: {}]   ;;  %s20545_s10 = inlined_call_operand.hbm [shape: f32[4,1,128], index: 10, kind: input, shape index: {}]   ;;  %s20546_s11 = inlined_call_operand.vmem [shape: f32[4,2,128], index: 11, kind: output, shape index: {}]  }
   0x1   :  { %20566 = sst [smem:[#allocation38_spill]] %s20535_s0 }
   0x2   :  { %20567 = sst [smem:[#allocation39_spill]] %s20536_s1 }
   0x3   :  { %20568 = sst [smem:[#allocation40_spill]] %s20537_s2 }
   0x4   :  { %20569 = sst [smem:[#allocation41_spill]] %s20539_s4 }
   0x5   :  { %20570 = sst [smem:[#allocation42_spill]] %s20540_s5 }
   0x6   :  { %20571 = sst [smem:[#allocation43_spill]] %s20541_s6 }
   0x7   :  { %20572 = sst [smem:[#allocation44_spill]] %s20542_s7 }
   0x8   :  { %20573 = sst [smem:[#allocation45_spill]] %s20543_s8 }
   0x9   :  { %20574 = sst [smem:[#allocation46_spill]] %s20544_s9 }
   0xa   :  { %20575 = sst [smem:[#allocation47_spill]] %s20545_s10 }
   0xb   :  { %20576 = sst [smem:[#allocation48_spill]] %s20546_s11 }
   0xc   :  { %16 = vsyncpa [#allocation4], 0 }
   0xd   :  { %18 = vsyncpa [#allocation4 + $0x1], 0 }
   0xe   :  { %19 = vsyncpa [#allocation6], 0 }
   0xf   :  { %21 = vsyncpa [#allocation6 + $0x1], 0 }
  0x10   :  { %22 = vsyncpa [#allocation9], 0 }
  0x11   :  { %24 = vsyncpa [#allocation9 + $0x1], 0 }
  0x12   :  { %25 = vsyncpa [#allocation12], 0 }
  0x13   :  { %27 = vsyncpa [#allocation12 + $0x1], 0 }
  0x14   :  { %28 = vsyncpa [#allocation15], 0 }
  0x15   :  { %30 = vsyncpa [#allocation15 + $0x1], 0 }
  0x16   :  { %31 = vsyncpa [#allocation18], 0 }
  0x17   :  { %33 = vsyncpa [#allocation18 + $0x1], 0  ;;  %s17913_s17 = smov 0   ;;  %s17915_s18 = smov 0  }
  0x18   :  { %s17917_s19 = smov 0   ;;  %s17919_s20 = smov 0  }
  0x19   :  { %s17921_s21 = smov 0   ;;  %s17923_s22 = smov 0  }
  0x1a   :  { %s17925_s23 = smov 0   ;;  %s17927_s24 = smov 0  }
  0x1b   :  { %s17929_s25 = smov 0   ;;  %s17931_s26 = smov 0  }
  0x1c   :  { %s17933_s27 = smov 0  }
  0x1d LB: > { %20577 = sst [smem:[#allocation25_spill]] %s17796_s18  ;;  %p98_p0 = scmp.eq.s32.totalorder %s17832_s27, 0  ;;  %s17832_s27 = sphi %s17933_s27, %s39_s27   ;;  %s17828_s26 = sphi %s17931_s26, %s20634_s26   ;;  %s17824_s25 = sphi %s17929_s25, %s20627_s25   ;;  %s17820_s24 = sphi %s17927_s24, %s20633_s24   ;;  %s17816_s23 = sphi %s17925_s23, %s20626_s23   ;;  %s17812_s22 = sphi %s17923_s22, %s20625_s22   ;;  %s17808_s21 = sphi %s17921_s21, %s20632_s21   ;;  %s17804_s20 = sphi %s17919_s20, %s20631_s20   ;;  %s17800_s19 = sphi %s17917_s19, %s20630_s19   ;;  %s17796_s18 = sphi %s17915_s18, %s20629_s18   ;;  %s17792_s17 = sphi %s17913_s17, %s20623_s17  }
  0x1e   : > { %20578 = sst [smem:[#allocation26_spill]] %s17812_s22  ;;  %p123_p1 = scmp.ne.s32.totalorder %s17800_s19, %s17796_s18 }
  0x1f   : > { %20579 = sst [smem:[#allocation27_spill]] %s17816_s23  ;;  %p15034_p2 = scmp.lt.s32.totalorder %s17832_s27, 8 }
  0x20   : > { %20580 = sst [smem:[#allocation28_spill]] %s17820_s24  ;;  %p125_p3 = por %p123_p1, %p98_p0 }
  0x21   : > { %20581 = sst [smem:[#allocation29_spill]] %s17824_s25  ;;  %s17975_s28 = sand.u32 1, %s17832_s27  }
  0x22   : > { %s17978_s29 = sand.u32 1, %s17800_s19   ;;  %s14859_s12 = sshll.u32 %s17828_s26, 6 }
  0x23   : > { %s13284_s30 = sshll.u32 %s17978_s29, 2  ;;  %s20582_s2 = sld [smem:[#allocation40_spill]] }
  0x24   : > { %s427_s16 = scalar_lea.vmem [#allocation5], %s13284_s30  ;;  %p17987_p4 = pnand %p15034_p2, %p125_p3 }
  0x25   : > { %s435_s0 = sshll.u32 %s427_s16, 4  ;;  %p13305_p5 = scmp.ge.s32.totalorder %s17832_s27, 1  ;;  %s436_s0 = int_to_ptr.vmem [resolvable:$true] %s435_s0 }
  0x26   : > { %p594_p6 = scmp.lt.s32.totalorder %s17832_s27, 9  ;;  %s20549_s23 = scalar_lea.sflag [#allocation6], %s17975_s28 }
  0x27   : > { %p17996_p7 = pneg %p17987_p4  ;;  %s17455_s13 = scalar_lea.vmem %s436_s0, 64 }
  0x28   : > { %p17456_p8 = scmp.ne.s32.totalorder %s436_s0, %s17455_s13  ;;  %s17834_s30 = smov [#allocation5]  }
  0x29   : > { %s433_s15 = scalar_lea.hbm %s20582_s2, %s14859_s12  ;;  %s17460_s12 = sshll.u32 %s17834_s30, 4  ;;  %s17461_s12 = int_to_ptr.vmem [resolvable:$false] %s17460_s12 }
  0x2a   : > { %p17458_p9 = pnand %p17456_p8, %p17996_p7  ;;  %s17462_s14 = scalar_lea.vmem %s17461_s12, 128 }
  0x2b   : > { %p17463_p11 = scmp.lt.s32.totalorder %s436_s0, %s17461_s12  ;;  %p17464_p12 = scmp.lt.s32.totalorder %s17462_s14, %s17455_s13 }
  0x2c   : > { %p17459_p10 = pneg %p17458_p9 }
  0x2d   : > { %p17465_p13 = por %p17464_p12, %p17463_p11 }
  0x2f   : > { %p17466_p1 = pnand %p17465_p13, %p17459_p10 }
  0x31   : > { %17469 = shalt.err (!%p17466_p1)
}
  0x32   : > { %15009 = dma.hbm_to_vmem [thread:$0]  (!%p17987_p4), %s433_s15, 64, %s436_s0, %s20549_s23  }
  0x33   : > { %p18010_p3 = pnand %p13305_p5, %p594_p6  ;;  %s13290_s13 = sshll.u32 %s17978_s29, 1 }
  0x34   : > { %s14861_s30 = sshll.u32 %s17828_s26, 5  ;;  %s20586_s4 = sld [smem:[#allocation41_spill]] }
  0x35   : > { %s467_s10 = scalar_lea.vmem [#allocation8], %s13290_s13  ;;  %s20550_s7 = scalar_lea.sflag [#allocation9], %s17975_s28 }
  0x36   : > { %s475_s9 = sshll.u32 %s467_s10, 4  ;;  %s17835_s0 = smov [#allocation8]   ;;  %s476_s9 = int_to_ptr.vmem [resolvable:$true] %s475_s9 }
  0x37   : > { %s17483_s5 = scalar_lea.vmem %s476_s9, 32  ;;  %s17488_s15 = sshll.u32 %s17835_s0, 4  ;;  %s17489_s15 = int_to_ptr.vmem [resolvable:$false] %s17488_s15 }
  0x38   : > { %p17484_p8 = scmp.ne.s32.totalorder %s476_s9, %s17483_s5  ;;  %s17490_s23 = scalar_lea.vmem %s17489_s15, 64 }
  0x39   : > { %p17491_p5 = scmp.lt.s32.totalorder %s476_s9, %s17489_s15  ;;  %p17492_p6 = scmp.lt.s32.totalorder %s17490_s23, %s17483_s5 }
  0x3a   : > { %s473_s2 = scalar_lea.hbm %s20586_s4, %s14861_s30  ;;  %p17486_p9 = pnand %p17484_p8, %p17996_p7 }
  0x3b   : > { %p17493_p11 = por %p17492_p6, %p17491_p5 }
  0x3c   : > { %p17487_p10 = pneg %p17486_p9 }
  0x3e   : > { %p17494_p12 = pnand %p17493_p11, %p17487_p10 }
  0x40   : > { %17497 = shalt.err (!%p17494_p12)
}
  0x41   : > { %15015 = dma.hbm_to_vmem [thread:$0]  (!%p17987_p4), %s473_s2, 32, %s476_s9, %s20550_s7  }
  0x42   : > { %s18027_s10 = sshll.u32 %s17828_s26, 4  ;;  %s506_s13 = scalar_lea.vmem [#allocation11], %s17978_s29 }
  0x43   : > { %s513_s30 = sshll.u32 %s506_s13, 4  ;;  %s20587_s6 = sld [smem:[#allocation43_spill]]  ;;  %s514_s30 = int_to_ptr.vmem [resolvable:$true] %s513_s30 }
  0x44   : > { %s20553_s23 = scalar_lea.sflag [#allocation12], %s17975_s28  ;;  %s17511_s0 = scalar_lea.vmem %s514_s30, 16 }
  0x45   : > { %p17512_p13 = scmp.ne.s32.totalorder %s514_s30, %s17511_s0  ;;  %s17836_s15 = smov [#allocation11]  }
  0x46   : > { %s17516_s4 = sshll.u32 %s17836_s15, 4  ;;  %s17517_s4 = int_to_ptr.vmem [resolvable:$false] %s17516_s4 }
  0x47   : > { %p17514_p1 = pnand %p17512_p13, %p17996_p7  ;;  %s17518_s2 = scalar_lea.vmem %s17517_s4, 32 }
  0x48   : > { %p17519_p9 = scmp.lt.s32.totalorder %s514_s30, %s17517_s4  ;;  %p17520_p10 = scmp.lt.s32.totalorder %s17518_s2, %s17511_s0 }
  0x49   : > { %s511_s5 = scalar_lea.hbm %s20587_s6, %s18027_s10  ;;  %p17515_p8 = pneg %p17514_p1 }
  0x4a   : > { %p17521_p5 = por %p17520_p10, %p17519_p9 }
  0x4c   : > { %p17522_p6 = pnand %p17521_p5, %p17515_p8 }
  0x4e   : > { %17525 = shalt.err (!%p17522_p6)
}
  0x4f   : > { %15021 = dma.hbm_to_vmem [thread:$0]  (!%p17987_p4), %s511_s5, 16, %s514_s30, %s20553_s23  }
  0x50   : > { %s20588_s8 = sld [smem:[#allocation45_spill]]  ;;  %s544_s14 = scalar_lea.vmem [#allocation14], %s17978_s29 }
  0x51   : > { %s551_s15 = sshll.u32 %s544_s14, 4  ;;  %s20552_s4 = scalar_lea.sflag [#allocation15], %s17975_s28  ;;  %s552_s15 = int_to_ptr.vmem [resolvable:$true] %s551_s15 }
  0x52   : > { %s17539_s0 = scalar_lea.vmem %s552_s15, 16  ;;  %s17837_s2 = smov [#allocation14]  }
  0x53   : > { %p17540_p11 = scmp.ne.s32.totalorder %s552_s15, %s17539_s0  ;;  %s17544_s7 = sshll.u32 %s17837_s2, 4  ;;  %s17545_s7 = int_to_ptr.vmem [resolvable:$false] %s17544_s7 }
  0x54   : > { %s17546_s6 = scalar_lea.vmem %s17545_s7, 32  ;;  %p17547_p1 = scmp.lt.s32.totalorder %s552_s15, %s17545_s7 }
  0x55   : > { %p17542_p12 = pnand %p17540_p11, %p17996_p7  ;;  %p17548_p8 = scmp.lt.s32.totalorder %s17546_s6, %s17539_s0 }
  0x56   : > { %s549_s12 = scalar_lea.hbm %s20588_s8, %s18027_s10 }
  0x57   : > { %p17543_p13 = pneg %p17542_p12  ;;  %p17549_p9 = por %p17548_p8, %p17547_p1 }
  0x59   : > { %p17550_p10 = pnand %p17549_p9, %p17543_p13 }
  0x5b   : > { %17553 = shalt.err (!%p17550_p10)
}
  0x5c   : > { %15027 = dma.hbm_to_vmem [thread:$0]  (!%p17987_p4), %s549_s12, 16, %s552_s15, %s20552_s4  }
  0x5d   : > { %s20551_s6 = sadd.s32 4294967295, %s17832_s27   ;;  %s48_s7 = sadd.s32 1, %s17824_s25 }
  0x5e   : > { %s51_s30 = sadd.s32 1, %s17828_s26  ;;  %p49_p5 = scmp.ge.s32.totalorder %s48_s7, 2 }
  0x5f   : > { %s90_s5 = sadd.s32 1, %s17812_s22  ;;  %p97_p6 = scmp.ne.s32.totalorder %s17812_s22, %s17808_s21 }
  0x60   : > { %p103_p11 = scmp.ne.s32.totalorder %s17808_s21, %s17804_s20  ;;  %s20636_s7 = smov (%p49_p5, %s48_s7), 0 }
  0x61   : > { %20589 = sst [smem:[#allocation30_spill]] %s20636_s7  ;;  %s20638_s30 = smov (!%p49_p5, %s51_s30), %s17828_s26 }
  0x62   : > { %s86_s9 = ssub.s32 %s17824_s25, %s20636_s7  ;;  %p18068_p12 = por %p98_p0, %p97_p6 }
  0x63   : > { %p53_p13 = scmp.ge.s32.totalorder %s20638_s30, 4  ;;  %p104_p1 = scmp.eq.s32.totalorder %s20551_s6, 0 }
  0x64   : > { %s116_s20 = sadd.s32 1, %s17800_s19  ;;  %p129_p8 = scmp.ne.s32.totalorder %s17796_s18, %s17792_s17 }
  0x65   : > { %s20640_s30 = smov (%p53_p13, %s20638_s30), 0  ;;  %p18079_p9 = por %p104_p1, %p103_p11 }
  0x66   : > { %20591 = sst [smem:[#allocation31_spill]] %s20640_s30  ;;  %p18083_p0 = por %p129_p8, %p104_p1 }
  0x67   : > { %s85_s15 = ssub.s32 %s17828_s26, %s20640_s30  ;;  %s399_s0 = sand.u32 1, %s17812_s22  }
  0x68   : > { %s20593_s14 = scalar_select %p18083_p0, 1, 0 }
  0x69   : > { %s87_s2 = sor.u32 %s86_s9, %s85_s15  ;;  %p114_p10 = scmp.eq.s32.totalorder %s85_s15, 0 }
  0x6a   : > { %20594 = sst [smem:[#allocation32_spill]] %s20593_s14  ;;  %p88_p5 = scmp.eq.s32.totalorder %s87_s2, 0 }
  0x6b   : > { %s18091_s6 = scalar_select %p114_p10, %s17800_s19, %s116_s20  }
  0x6c   : > { %s18094_s17 = scalar_select %p88_p5, %s17812_s22, %s90_s5  }
  0x6d   : > { %s14980_s4 = smul.u32 12288, %s399_s0  ;;  %p18100_p6 = pnand %p15034_p2, %p18068_p12 }
  0x6e   : > { %20595 = sst [smem:[#allocation33_spill]] %s18094_s17  ;;  %s14858_s8 = smul.u32 3072, %s17824_s25 }
  0x6f   : > { %s14981_s7 = smul.u32 6144, %s17828_s26  ;;  %s403_s30 = scalar_lea.vmem [#allocation3], %s14980_s4 }
  0x70   : > { %s413_s14 = sshll.u32 %s403_s30, 4  ;;  %s20597_s1 = sld [smem:[#allocation39_spill]]  ;;  %s414_s14 = int_to_ptr.vmem [resolvable:$true] %s413_s14 }
  0x71   : > { %s410_s18 = sadd.s32 %s14981_s7, %s14858_s8  ;;  %s13287_s2 = sshll.u32 %s17978_s29, 10 }
  0x72   : > { %s13283_s9 = sshll.u32 %s410_s18, 6  ;;  %s400_s17 = scalar_lea.sflag [#allocation4], %s399_s0 }
  0x73   : > { %p17556_p11 = pneg %p18100_p6  ;;  %s17567_s13 = scalar_lea.vmem %s414_s14, 196608 }
  0x74   : > { %p17568_p2 = scmp.ne.s32.totalorder %s414_s14, %s17567_s13  ;;  %s17838_s22 = smov [#allocation3]  }
  0x75   : > { %s17572_s25 = sshll.u32 %s17838_s22, 4  ;;  %s17573_s25 = int_to_ptr.vmem [resolvable:$false] %s17572_s25 }
  0x76   : > { %s412_s5 = scalar_lea.hbm %s20597_s1, %s13283_s9  ;;  %p17570_p12 = pnand %p17568_p2, %p17556_p11 }
  0x77   : > { %s17574_s4 = scalar_lea.vmem %s17573_s25, 393216  ;;  %p17575_p1 = scmp.lt.s32.totalorder %s414_s14, %s17573_s25 }
  0x78   : > { %p17571_p13 = pneg %p17570_p12  ;;  %p17576_p8 = scmp.lt.s32.totalorder %s17574_s4, %s17567_s13 }
  0x7a   : > { %p17577_p10 = por %p17576_p8, %p17575_p1 }
  0x7c   : > { %p17578_p5 = pnand %p17577_p10, %p17571_p13 }
  0x7e   : > { %17581 = shalt.err (!%p17578_p5)
}
  0x7f   : > { %s17839_s8 = smov 256   ;;  %s17840_s18 = smov 16  }
  0x80   : > { %15006 = dma.hbm_to_vmem [thread:$0]  (!%p18100_p6), %s412_s5, 196608, %s414_s14, %s400_s17, %s17839_s8, %s17839_s8, %s17840_s18  }
  0x81   : > { %s14860_s7 = sshll.u32 %s17828_s26, 14  ;;  %s446_s9 = scalar_lea.vmem [#allocation7], %s13287_s2 }
  0x82   : > { %s452_s22 = scalar_lea.hbm %s20538_s3, %s14860_s7  ;;  %s453_s15 = sshll.u32 %s446_s9, 4  ;;  %s454_s15 = int_to_ptr.vmem [resolvable:$true] %s453_s15 }
  0x83   : > { %s13293_s25 = sshll.u32 %s17978_s29, 8  ;;  %s17595_s20 = scalar_lea.vmem %s454_s15, 16384 }
  0x84   : > { %p17596_p11 = scmp.ne.s32.totalorder %s454_s15, %s17595_s20  ;;  %s17841_s13 = smov [#allocation7]  }
  0x85   : > { %s17600_s4 = sshll.u32 %s17841_s13, 4  ;;  %s17601_s4 = int_to_ptr.vmem [resolvable:$false] %s17600_s4 }
  0x86   : > { %p17598_p2 = pnand %p17596_p11, %p17996_p7  ;;  %s17602_s1 = scalar_lea.vmem %s17601_s4, 32768 }
  0x87   : > { %p17603_p13 = scmp.lt.s32.totalorder %s454_s15, %s17601_s4  ;;  %p17604_p6 = scmp.lt.s32.totalorder %s17602_s1, %s17595_s20 }
  0x88   : > { %p17599_p12 = pneg %p17598_p2 }
  0x89   : > { %p17605_p1 = por %p17604_p6, %p17603_p13 }
  0x8b   : > { %p17606_p8 = pnand %p17605_p1, %p17599_p12 }
  0x8d   : > { %17609 = shalt.err (!%p17606_p8)
}
  0x8e   : > { %s20598_s23 = scalar_lea.sflag [#allocation6], %s17975_s28  ;;  %s14862_s14 = sshll.u32 %s17828_s26, 12 }
  0x8f   : > { %15012 = dma.hbm_to_vmem [thread:$0]  (!%p17987_p4), %s452_s22, 16384, %s454_s15, %s20598_s23, %s17839_s8, %s17839_s8, %s17840_s18  }
  0x90   : > { %s20599_s2 = sld [smem:[#allocation42_spill]]  ;;  %s486_s30 = scalar_lea.vmem [#allocation10], %s13293_s25 }
  0x91   : > { %s493_s0 = sshll.u32 %s486_s30, 4  ;;  %s13297_s1 = sshll.u32 %s17978_s29, 7  ;;  %s494_s0 = int_to_ptr.vmem [resolvable:$true] %s493_s0 }
  0x92   : > { %s17623_s9 = scalar_lea.vmem %s494_s0, 4096  ;;  %s17842_s20 = smov [#allocation10]  }
  0x93   : > { %p17624_p10 = scmp.ne.s32.totalorder %s494_s0, %s17623_s9  ;;  %s17628_s13 = sshll.u32 %s17842_s20, 4  ;;  %s17629_s13 = int_to_ptr.vmem [resolvable:$false] %s17628_s13 }
  0x94   : > { %s17630_s4 = scalar_lea.vmem %s17629_s13, 8192  ;;  %p17631_p2 = scmp.lt.s32.totalorder %s494_s0, %s17629_s13 }
  0x95   : > { %p17626_p5 = pnand %p17624_p10, %p17996_p7  ;;  %p17632_p12 = scmp.lt.s32.totalorder %s17630_s4, %s17623_s9 }
  0x96   : > { %s492_s7 = scalar_lea.hbm %s20599_s2, %s14862_s14 }
  0x97   : > { %p17627_p11 = pneg %p17626_p5  ;;  %p17633_p13 = por %p17632_p12, %p17631_p2 }
  0x99   : > { %p17634_p6 = pnand %p17633_p13, %p17627_p11 }
  0x9b   : > { %17637 = shalt.err (!%p17634_p6)
}
  0x9c   : > { %s17843_s8 = smov 128   ;;  %s17844_s18 = smov 8  }
  0x9d   : > { %s20600_s22 = scalar_lea.sflag [#allocation9], %s17975_s28  ;;  %s14863_s15 = sshll.u32 %s17828_s26, 11 }
  0x9e   : > { %15018 = dma.hbm_to_vmem [thread:$0]  (!%p17987_p4), %s492_s7, 4096, %s494_s0, %s20600_s22, %s17843_s8, %s17843_s8, %s17844_s18  }
  0x9f   : > { %s20601_s14 = sld [smem:[#allocation44_spill]]  ;;  %s524_s5 = scalar_lea.vmem [#allocation13], %s13297_s1 }
  0xa0   : > { %s531_s2 = sshll.u32 %s524_s5, 4  ;;  %s13301_s30 = sshll.u32 %s17978_s29, 6  ;;  %s532_s2 = int_to_ptr.vmem [resolvable:$true] %s531_s2 }
  0xa1   : > { %s17651_s9 = scalar_lea.vmem %s532_s2, 2048  ;;  %s17845_s20 = smov [#allocation13]  }
  0xa2   : > { %p17652_p1 = scmp.ne.s32.totalorder %s532_s2, %s17651_s9  ;;  %s17656_s13 = sshll.u32 %s17845_s20, 4  ;;  %s17657_s13 = int_to_ptr.vmem [resolvable:$false] %s17656_s13 }
  0xa3   : > { %s17658_s4 = scalar_lea.vmem %s17657_s13, 4096  ;;  %p17659_p5 = scmp.lt.s32.totalorder %s532_s2, %s17657_s13 }
  0xa4   : > { %p17654_p8 = pnand %p17652_p1, %p17996_p7  ;;  %p17660_p11 = scmp.lt.s32.totalorder %s17658_s4, %s17651_s9 }
  0xa5   : > { %s530_s17 = scalar_lea.hbm %s20601_s14, %s14863_s15 }
  0xa6   : > { %p17655_p10 = pneg %p17654_p8  ;;  %p17661_p2 = por %p17660_p11, %p17659_p5 }
  0xa8   : > { %p17662_p12 = pnand %p17661_p2, %p17655_p10 }
  0xaa   : > { %17665 = shalt.err (!%p17662_p12)
}
  0xab   : > { %s20602_s7 = scalar_lea.sflag [#allocation12], %s17975_s28  ;;  %s14864_s0 = sshll.u32 %s17828_s26, 10 }
  0xac   : > { %15024 = dma.hbm_to_vmem [thread:$0]  (!%p17987_p4), %s530_s17, 2048, %s532_s2, %s20602_s7, %s17843_s8, %s17843_s8, %s17844_s18  }
  0xad   : > { %s20603_s15 = sld [smem:[#allocation46_spill]]  ;;  %s562_s23 = scalar_lea.vmem [#allocation16], %s13301_s30 }
  0xae   : > { %s569_s14 = sshll.u32 %s562_s23, 4  ;;  %s17846_s9 = smov [#allocation16]   ;;  %s570_s14 = int_to_ptr.vmem [resolvable:$true] %s569_s14 }
  0xaf   : > { %s17679_s5 = scalar_lea.vmem %s570_s14, 1024  ;;  %s17684_s20 = sshll.u32 %s17846_s9, 4  ;;  %s17685_s20 = int_to_ptr.vmem [resolvable:$false] %s17684_s20 }
  0xb0   : > { %p17680_p13 = scmp.ne.s32.totalorder %s570_s14, %s17679_s5  ;;  %s17686_s13 = scalar_lea.vmem %s17685_s20, 2048 }
  0xb1   : > { %p17687_p8 = scmp.lt.s32.totalorder %s570_s14, %s17685_s20  ;;  %p17688_p10 = scmp.lt.s32.totalorder %s17686_s13, %s17679_s5 }
  0xb2   : > { %p17682_p6 = pnand %p17680_p13, %p17996_p7 }
  0xb3   : > { %s568_s25 = scalar_lea.hbm %s20603_s15, %s14864_s0  ;;  %p17689_p5 = por %p17688_p10, %p17687_p8 }
  0xb4   : > { %p17683_p1 = pneg %p17682_p6 }
  0xb6   : > { %p17690_p11 = pnand %p17689_p5, %p17683_p1 }
  0xb8   : > { %17693 = shalt.err (!%p17690_p11)
}
  0xb9   : > { %s20604_s17 = scalar_lea.sflag [#allocation15], %s17975_s28  ;;  %s20605_s4 = sld [smem:[#allocation47_spill]] }
  0xba   : > { %15030 = dma.hbm_to_vmem [thread:$0]  (!%p17987_p4), %s568_s25, 1024, %s570_s14, %s20604_s17, %s17843_s8, %s17843_s8, %s17844_s18  }
  0xbb   : > { %s582_s0 = scalar_lea.vmem [#allocation17], %s17978_s29  ;;  %s580_s22 = scalar_lea.sflag [#allocation18], %s17978_s29 }
  0xbc   : > { %s589_s1 = sshll.u32 %s582_s0, 4  ;;  %s17847_s23 = smov [#allocation17]   ;;  %s590_s1 = int_to_ptr.vmem [resolvable:$true] %s589_s1 }
  0xbd   : > { %s17707_s15 = scalar_lea.vmem %s590_s1, 16  ;;  %s17712_s28 = sshll.u32 %s17847_s23, 4  ;;  %s17713_s28 = int_to_ptr.vmem [resolvable:$false] %s17712_s28 }
  0xbe   : > { %p17708_p2 = scmp.ne.s32.totalorder %s590_s1, %s17707_s15  ;;  %s17714_s5 = scalar_lea.vmem %s17713_s28, 32 }
  0xbf   : > { %s587_s7 = scalar_lea.hbm %s20605_s4, %s18027_s10  ;;  %p17715_p6 = scmp.lt.s32.totalorder %s590_s1, %s17713_s28 }
  0xc0   : > { %p17710_p12 = pnand %p17708_p2, %p17996_p7  ;;  %p17716_p1 = scmp.lt.s32.totalorder %s17714_s5, %s17707_s15 }
  0xc2   : > { %p17711_p13 = pneg %p17710_p12  ;;  %p17717_p8 = por %p17716_p1, %p17715_p6 }
  0xc4   : > { %p17718_p10 = pnand %p17717_p8, %p17711_p13 }
  0xc6   : > { %17721 = shalt.err (!%p17718_p10)
}
  0xc7   : > { %15033 = dma.hbm_to_vmem [thread:$0]  (!%p17987_p4), %s587_s7, 16, %s590_s1, %s580_s22  }
  0xc8   : > { %598 = sbr.rel (%p18010_p3) target bundleno = 2872 (0xb38), region = 64 }
  0xcd   : > { %s600_s24 = sand.u32 1, %s17808_s21  }
  0xce   : > { %s14982_s29 = smul.u32 12288, %s600_s24  ;;  %s601_s10 = scalar_lea.sflag [#allocation4], %s600_s24 }
  0xd0   : > { %s18179_s8 = scalar_lea.vmem [#allocation3], %s14982_s29 }
  0xd1   : > { %17767 = dma.done.wait (%p18079_p9), %s601_s10, 196608  }
  0xd2   : > { %17769 = vsyncadd (%p18079_p9), %s601_s10, 4294770688  ;;  %s20606_s18 = sadd.s32 4294967295, %s17832_s27   ;;  %s20607_s25 = sld [smem:[#allocation25_spill]] }
  0xd3   : > { %s609_s14 = sand.u32 1, %s20606_s18  }
  0xd4   : > { %s610_s20 = scalar_lea.sflag [#allocation6], %s609_s14 }
  0xd8   : > { %s18188_s9 = sand.u32 1, %s20607_s25  }
  0xd9   : > { %s13306_s16 = sshll.u32 %s18188_s9, 2 }
  0xda   : > { %s18191_s13 = scalar_lea.vmem [#allocation5], %s13306_s16 }
  0xdb   : > { %17771 = dma.done.wait (%p18083_p0), %s610_s20, 16448  }
  0xdc   : > { %17773 = vsyncadd (%p18083_p0), %s610_s20, 4294950848  ;;  %s13307_s12 = sshll.u32 %s18188_s9, 10  ;;  %s13308_s17 = sshll.u32 %s18188_s9, 1 }
  0xdd   : > { %s18199_s2 = scalar_lea.vmem [#allocation7], %s13307_s12  ;;  %s628_s30 = scalar_lea.sflag [#allocation9], %s609_s14 }
  0xde   : > { %s18201_s4 = scalar_lea.vmem [#allocation8], %s13308_s17 }
  0xdf   : > { %17775 = dma.done.wait (%p18083_p0), %s628_s30, 4128  }
  0xe0   : > { %17777 = vsyncadd (%p18083_p0), %s628_s30, 4294963168  ;;  %s13309_s7 = sshll.u32 %s18188_s9, 8  ;;  %s646_s1 = scalar_lea.sflag [#allocation12], %s609_s14 }
  0xe1   : > { %s18208_s0 = scalar_lea.vmem [#allocation10], %s13309_s7  ;;  %s648_s22 = scalar_lea.vmem [#allocation11], %s18188_s9 }
  0xe2   : > { %17779 = dma.done.wait (%p18083_p0), %s646_s1, 2064  }
  0xe3   : > { %17781 = vsyncadd (%p18083_p0), %s646_s1, 4294965232  ;;  %s13310_s15 = sshll.u32 %s18188_s9, 7  ;;  %s663_s28 = scalar_lea.sflag [#allocation15], %s609_s14 }
  0xe4   : > { %s18216_s23 = scalar_lea.vmem [#allocation13], %s13310_s15  ;;  %s665_s5 = scalar_lea.vmem [#allocation14], %s18188_s9 }
  0xe5   : > { %17783 = dma.done.wait (%p18083_p0), %s663_s28, 1040  }
  0xe6   : > { %17785 = vsyncadd (%p18083_p0), %s663_s28, 4294966256  ;;  %s13311_s24 = sshll.u32 %s18188_s9, 6  ;;  %s680_s10 = scalar_lea.sflag [#allocation18], %s18188_s9 }
  0xe7   : > { %s18224_s29 = scalar_lea.vmem [#allocation16], %s13311_s24  ;;  %s682_s18 = scalar_lea.vmem [#allocation17], %s18188_s9 }
  0xe8   : > { %17787 = dma.done.wait (%p18083_p0), %s680_s10, 16  }
  0xe9   : > { %17789 = vsyncadd (%p18083_p0), %s680_s10, 4294967280  ;;  %s20609_s25 = sld [smem:[#allocation28_spill]] }
  0xea   : > { %s20610_s14 = sld [smem:[#allocation27_spill]] }
  0xeb   : > { %s20611_s1 = sld [smem:[#allocation48_spill]] }
  0xec   : > { %s20612_s24 = sld [smem:[#allocation38_spill]] }
  0xef   : > { %s13312_s16 = sshll.u32 %s20609_s25, 1  ;;  %p778_p4 = scmp.lt.s32.totalorder %s20609_s25, 3 }
  0xf0   : > { %s769_s20 = sadd.s32 %s20610_s14, %s13312_s16  ;;  %p13314_p3 = scmp.ne.s32.totalorder %s20610_s14, 0 }
  0xf1   : > { %s770_s12 = smul.u32 48, %s769_s20  ;;  %s20642_s25 = smov (!%p778_p4, %s20609_s25), 3 }
  0xf2   : > { %s13313_s17 = sshll.u32 %s20642_s25, 1  ;;  %785 = sbr.rel (%p13314_p3) target bundleno = 262 (0x106), region = 108 }
  0xf3   : > { %p771_p7 = scmp.lt.s32.totalorder %s770_s12, 383  ;;  %s18239_s15 = scalar_lea.vmem %s20611_s1, %s13313_s17 }
  0xf5   : > { %s20644_s12 = smov (!%p771_p7, %s770_s12), 383 }
  0xf6   : > { %s18244_s10 = scalar_lea.vmem %s20612_s24, %s20644_s12 }
  0xf7   : > { %v788_v0 = vlaneseq  ;;  %v17848_v1 = vmov 1983009808   ;;  %v786_v4 = vld [vmem:[%s18191_s13] sm:$0xf] }
  0xf8   : > { %v807_v2 = vunpack.c.l.s4 %v17848_v1 }
  0xf9   : > { %v789_v3 = vshrl.u32 %v788_v0, 7 }
  0xfa   : > { %v808_v5 = vunpack.c.0.s8 %v807_v2 }
  0xfb   : > { %v790_v6 = vsub.s32 0, %v789_v3  ;;  %v794_v7 = vsub.s32 1, %v789_v3  ;;  %v798_v8 = vsub.s32 2, %v789_v3  ;;  %v802_v9 = vsub.s32 3, %v789_v3 }
  0xfc   : > { %v811_v10 = vsub.s32 %v808_v5, %v789_v3 }
  0xfd   : > { %v791_v11 = vrot.slane %v786_v4, %v790_v6  ;;  %v795_v12 = vrot.slane %v786_v4, %v794_v7  ;;  %v799_v13 = vrot.slane %v786_v4, %v798_v8  ;;  %v803_v14 = vrot.slane %v786_v4, %v802_v9 }
  0xff   : > { %v804_v15 = vcombine.low %v791_v11, %v795_v12  ;;  %v805_v16 = vcombine.low %v799_v13, %v803_v14 }
 0x101   : > { %v812_v17 = vrot.slane %v804_v15, %v811_v10  ;;  %v819_v18 = vrot.slane %v805_v16, %v811_v10 }
 0x103   : > { %v820_v19 = vcombine.low %v812_v17, %v819_v18 }
 0x105   : > { %822 = vst [vmem:[#allocation2] sm:$0xff] %v820_v19 }
 0x106 PF: > { %v15132_v20 = vld [vmem:[%s18179_s8 + $0xe4] ss:$16 sps:$4 sm:$0xff]   ;;  %v15136_v22 = vld [vmem:[%s18179_s8 + $0xe0] ss:$16 sps:$4 sm:$0xff]   ;;  %v17849_v56 = vmov 1966171168   ;;  %v2376_v58 = vlaneseq }
 0x107   : > { %v15134_v21 = vld [vmem:[%s18179_s8 + $0x2e4] ss:$16 sps:$4 sm:$0xff]   ;;  %10394 = vmatprep.subr.bf16.mxu0 %v15132_v20  ;;  %v15137_v23 = vld [vmem:[%s18179_s8 + $0x2e0] ss:$16 sps:$4 sm:$0xff]   ;;  %v2374_v57 = vunpack.c.l.s4 %v17849_v56  ;;  %v824_v8 = vld [vmem:[%s18244_s10] sm:$0xff] }
 0x108   : > { %10435 = vmatprep.subr.bf16.mxu1 %v15134_v21  ;;  %v15138_v24 = vld [vmem:[%s18179_s8 + $0xc4] ss:$16 sps:$4 sm:$0xff]   ;;  %10395 = vmatpush1.bf16.msra.mxu0 %v15136_v22  ;;  %v15142_v26 = vld [vmem:[%s18179_s8 + $0xc0] ss:$16 sps:$4 sm:$0xff]   ;;  %v18287_v63 = vshrl.u32 %v2376_v58, 7  ;;  %v2372_v21 = vcombine.high %v824_v8, %v824_v8 }
 0x109   : > { %10436 = vmatpush1.bf16.msra.mxu1 %v15137_v23  ;;  %v15140_v25 = vld [vmem:[%s18179_s8 + $0x2c4] ss:$16 sps:$4 sm:$0xff]   ;;  %10396 = vmatprep.subr.bf16.mxu0 %v15138_v24  ;;  %v15143_v27 = vld [vmem:[%s18179_s8 + $0x2c0] ss:$16 sps:$4 sm:$0xff]   ;;  %v2375_v62 = vunpack.c.0.s8 %v2374_v57 }
 0x10a   : > { %10437 = vmatprep.subr.bf16.mxu1 %v15140_v25  ;;  %v15144_v28 = vld [vmem:[%s18179_s8 + $0xa4] ss:$16 sps:$4 sm:$0xff]   ;;  %v15148_v30 = vld [vmem:[%s18179_s8 + $0xa0] ss:$16 sps:$4 sm:$0xff]   ;;  %20613 = vst [vmem:[#allocation34_spill] sm:$0xff] %v18287_v63 }
 0x10b   : > { %v15146_v29 = vld [vmem:[%s18179_s8 + $0x2a4] ss:$16 sps:$4 sm:$0xff]   ;;  %v15149_v31 = vld [vmem:[%s18179_s8 + $0x2a0] ss:$16 sps:$4 sm:$0xff]   ;;  %v18295_v5 = vsub.s32 %v2375_v62, %v18287_v63 }
 0x10c   : > { %10397 = vmatpush1.bf16.msra.mxu0 %v15142_v26  ;;  %v15150_v32 = vld [vmem:[%s18179_s8 + $0x84] ss:$16 sps:$4 sm:$0xff]   ;;  %v15154_v34 = vld [vmem:[%s18179_s8 + $0x80] ss:$16 sps:$4 sm:$0xff]  }
 0x10d   : > { %10438 = vmatpush1.bf16.msra.mxu1 %v15143_v27  ;;  %10398 = vmatprep.subr.bf16.mxu0 %v15144_v28  ;;  %v15152_v33 = vld [vmem:[%s18179_s8 + $0x284] ss:$16 sps:$4 sm:$0xff]   ;;  %v15155_v35 = vld [vmem:[%s18179_s8 + $0x280] ss:$16 sps:$4 sm:$0xff]   ;;  %v2379_v10 = vrot.slane %v824_v8, %v18295_v5  ;;  %v18323_v26 = vrot.slane %v2372_v21, %v18295_v5 }
 0x10e   : > { %10439 = vmatprep.subr.bf16.mxu1 %v15146_v29  ;;  %v15156_v36 = vld [vmem:[%s18179_s8 + $0x64] ss:$16 sps:$4 sm:$0xff]   ;;  %v15160_v38 = vld [vmem:[%s18179_s8 + $0x60] ss:$16 sps:$4 sm:$0xff]  }
 0x10f   : > { %v15158_v37 = vld [vmem:[%s18179_s8 + $0x264] ss:$16 sps:$4 sm:$0xff]   ;;  %v15161_v39 = vld [vmem:[%s18179_s8 + $0x260] ss:$16 sps:$4 sm:$0xff]   ;;  %v2387_v14 = vcombine.high %v2379_v10, %v2379_v10 }
 0x110   : > { %10399 = vmatpush1.bf16.msra.mxu0 %v15148_v30  ;;  %v15162_v40 = vld [vmem:[%s18179_s8 + $0x44] ss:$16 sps:$4 sm:$0xff]   ;;  %v15166_v42 = vld [vmem:[%s18179_s8 + $0x40] ss:$16 sps:$4 sm:$0xff]  }
 0x111   : > { %10440 = vmatpush1.bf16.msra.mxu1 %v15149_v31  ;;  %10400 = vmatprep.subr.bf16.mxu0 %v15150_v32  ;;  %v15164_v41 = vld [vmem:[%s18179_s8 + $0x244] ss:$16 sps:$4 sm:$0xff]   ;;  %v15167_v43 = vld [vmem:[%s18179_s8 + $0x240] ss:$16 sps:$4 sm:$0xff]   ;;  %v18307_v16 = vrot.slane %v2387_v14, %v18295_v5  ;;  %v2388_v31 = vcombine.high %v18323_v26, %v18323_v26 }
 0x112   : > { %10441 = vmatprep.subr.bf16.mxu1 %v15152_v33  ;;  %v15168_v44 = vld [vmem:[%s18179_s8 + $0x24] ss:$16 sps:$4 sm:$0xff]   ;;  %v15172_v46 = vld [vmem:[%s18179_s8 + $0x20] ss:$16 sps:$4 sm:$0xff]   ;;  %v18333_v33 = vrot.slane %v2379_v10, %v18295_v5 }
 0x113   : > { %v15170_v45 = vld [vmem:[%s18179_s8 + $0x224] ss:$16 sps:$4 sm:$0xff]   ;;  %v15173_v47 = vld [vmem:[%s18179_s8 + $0x220] ss:$16 sps:$4 sm:$0xff]   ;;  %v18314_v20 = vcombine.high %v18307_v16, %v18307_v16  ;;  %10426 = vmatprep.mubr.bf16.mxu0 %v18307_v16 }
 0x114   : > { %10401 = vmatpush1.bf16.msra.mxu0 %v15154_v34  ;;  %v15174_v48 = vld [vmem:[%s18179_s8 + $0x4] ss:$16 sps:$4 sm:$0xff]   ;;  %v15178_v50 = vld [vmem:[%s18179_s8] ss:$16 sps:$4 sm:$0xff]  }
 0x115   : > { %10442 = vmatpush1.bf16.msra.mxu1 %v15155_v35  ;;  %10402 = vmatprep.subr.bf16.mxu0 %v15156_v36  ;;  %v15176_v49 = vld [vmem:[%s18179_s8 + $0x204] ss:$16 sps:$4 sm:$0xff]   ;;  %v15179_v51 = vld [vmem:[%s18179_s8 + $0x200] ss:$16 sps:$4 sm:$0xff]  }
 0x116   : > { %10443 = vmatprep.subr.bf16.mxu1 %v15158_v37  ;;  %v15180_v52 = vld [vmem:[%s18179_s8 + $0x1e4] ss:$16 sps:$4 sm:$0xff]   ;;  %v15184_v54 = vld [vmem:[%s18179_s8 + $0x1e0] ss:$16 sps:$4 sm:$0xff]   ;;  %10467 = vmatprep.mubr.bf16.mxu1 %v18314_v20  ;;  %v18339_v37 = vrot.slane %v2388_v31, %v18295_v5 }
 0x117   : > { %v15182_v53 = vld [vmem:[%s18179_s8 + $0x3e4] ss:$16 sps:$4 sm:$0xff]   ;;  %v15185_v55 = vld [vmem:[%s18179_s8 + $0x3e0] ss:$16 sps:$4 sm:$0xff]  }
 0x118   : > { %10403 = vmatpush1.bf16.msra.mxu0 %v15160_v38  ;;  %v15186_v59 = vld [vmem:[%s18179_s8 + $0x1c4] ss:$16 sps:$4 sm:$0xff]   ;;  %v15190_v61 = vld [vmem:[%s18179_s8 + $0x1c0] ss:$16 sps:$4 sm:$0xff]   ;;  %v18343_v38 = vcombine.high %v18333_v33, %v18333_v33 }
 0x119   : > { %10444 = vmatpush1.bf16.msra.mxu1 %v15161_v39  ;;  %10404 = vmatprep.subr.bf16.mxu0 %v15162_v40  ;;  %v15188_v60 = vld [vmem:[%s18179_s8 + $0x3c4] ss:$16 sps:$4 sm:$0xff]   ;;  %v15191_v0 = vld [vmem:[%s18179_s8 + $0x3c0] ss:$16 sps:$4 sm:$0xff]  }
 0x11a   : > { %10445 = vmatprep.subr.bf16.mxu1 %v15164_v41  ;;  %v15192_v1 = vld [vmem:[%s18179_s8 + $0x1a4] ss:$16 sps:$4 sm:$0xff]   ;;  %v15196_v3 = vld [vmem:[%s18179_s8 + $0x1a0] ss:$16 sps:$4 sm:$0xff]  }
 0x11b   : > { %v15194_v2 = vld [vmem:[%s18179_s8 + $0x3a4] ss:$16 sps:$4 sm:$0xff]   ;;  %v15197_v4 = vld [vmem:[%s18179_s8 + $0x3a0] ss:$16 sps:$4 sm:$0xff]  }
 0x11c   : > { %10405 = vmatpush1.bf16.msra.mxu0 %v15166_v42  ;;  %v15198_v6 = vld [vmem:[%s18179_s8 + $0x184] ss:$16 sps:$4 sm:$0xff]   ;;  %v15202_v9 = vld [vmem:[%s18179_s8 + $0x180] ss:$16 sps:$4 sm:$0xff]  }
 0x11d   : > { %10446 = vmatpush1.bf16.msra.mxu1 %v15167_v43  ;;  %10406 = vmatprep.subr.bf16.mxu0 %v15168_v44  ;;  %v15200_v7 = vld [vmem:[%s18179_s8 + $0x384] ss:$16 sps:$4 sm:$0xff]   ;;  %v15203_v11 = vld [vmem:[%s18179_s8 + $0x380] ss:$16 sps:$4 sm:$0xff]   ;;  %v18351_v43 = vcombine.high %v18339_v37, %v18339_v37 }
 0x11e   : > { %10447 = vmatprep.subr.bf16.mxu1 %v15170_v45  ;;  %v15204_v12 = vld [vmem:[%s18179_s8 + $0x164] ss:$16 sps:$4 sm:$0xff]   ;;  %v15208_v15 = vld [vmem:[%s18179_s8 + $0x160] ss:$16 sps:$4 sm:$0xff]  }
 0x11f   : > { %v15206_v13 = vld [vmem:[%s18179_s8 + $0x364] ss:$16 sps:$4 sm:$0xff]   ;;  %v15209_v17 = vld [vmem:[%s18179_s8 + $0x360] ss:$16 sps:$4 sm:$0xff]  }
 0x120   : > { %10407 = vmatpush1.bf16.msra.mxu0 %v15172_v46  ;;  %v15210_v18 = vld [vmem:[%s18179_s8 + $0x144] ss:$16 sps:$4 sm:$0xff]   ;;  %v15214_v22 = vld [vmem:[%s18179_s8 + $0x140] ss:$16 sps:$4 sm:$0xff]  }
 0x121   : > { %10448 = vmatpush1.bf16.msra.mxu1 %v15173_v47  ;;  %10408 = vmatprep.subr.bf16.mxu0 %v15174_v48  ;;  %v15212_v19 = vld [vmem:[%s18179_s8 + $0x344] ss:$16 sps:$4 sm:$0xff]   ;;  %v15215_v23 = vld [vmem:[%s18179_s8 + $0x340] ss:$16 sps:$4 sm:$0xff]  }
 0x122   : > { %10449 = vmatprep.subr.bf16.mxu1 %v15176_v49  ;;  %v15216_v24 = vld [vmem:[%s18179_s8 + $0x124] ss:$16 sps:$4 sm:$0xff]   ;;  %v15220_v27 = vld [vmem:[%s18179_s8 + $0x120] ss:$16 sps:$4 sm:$0xff]  }
 0x123   : > { %v15218_v25 = vld [vmem:[%s18179_s8 + $0x324] ss:$16 sps:$4 sm:$0xff]   ;;  %v15221_v28 = vld [vmem:[%s18179_s8 + $0x320] ss:$16 sps:$4 sm:$0xff]  }
 0x124   : > { %10409 = vmatpush1.bf16.msra.mxu0 %v15178_v50  ;;  %v15222_v29 = vld [vmem:[%s18179_s8 + $0x104] ss:$16 sps:$4 sm:$0xff]   ;;  %v15226_v32 = vld [vmem:[%s18179_s8 + $0x100] ss:$16 sps:$4 sm:$0xff]  }
 0x125   : > { %10450 = vmatpush1.bf16.msra.mxu1 %v15179_v51  ;;  %10410 = vmatprep.subr.bf16.mxu0 %v15180_v52  ;;  %v15224_v30 = vld [vmem:[%s18179_s8 + $0x304] ss:$16 sps:$4 sm:$0xff]   ;;  %v15227_v34 = vld [vmem:[%s18179_s8 + $0x300] ss:$16 sps:$4 sm:$0xff]  }
 0x126   : > { %10451 = vmatprep.subr.bf16.mxu1 %v15182_v53  ;;  %v15230_v35 = vld [vmem:[%s18179_s8 + $0x4e4] ss:$16 sps:$4 sm:$0xff]   ;;  %v15228_v39 = vld [vmem:[%s18179_s8 + $0x4e0] ss:$16 sps:$4 sm:$0xff]  }
 0x127   : > { %v15233_v36 = vld [vmem:[%s18179_s8 + $0x6e4] ss:$16 sps:$4 sm:$0xff]   ;;  %v15231_v40 = vld [vmem:[%s18179_s8 + $0x6e0] ss:$16 sps:$4 sm:$0xff]  }
 0x128   : > { %10411 = vmatpush2.bf16.msra.mxu0 %v15184_v54  ;;  %v15236_v41 = vld [vmem:[%s18179_s8 + $0x4c4] ss:$16 sps:$4 sm:$0xff]   ;;  %v15234_v44 = vld [vmem:[%s18179_s8 + $0x4c0] ss:$16 sps:$4 sm:$0xff]  }
 0x129   : > { %10452 = vmatpush2.bf16.msra.mxu1 %v15185_v55  ;;  %10412 = vmatprep.subr.bf16.mxu0 %v15186_v59  ;;  %v15239_v42 = vld [vmem:[%s18179_s8 + $0x6c4] ss:$16 sps:$4 sm:$0xff]   ;;  %v15237_v45 = vld [vmem:[%s18179_s8 + $0x6c0] ss:$16 sps:$4 sm:$0xff]  }
 0x12a   : > { %10453 = vmatprep.subr.bf16.mxu1 %v15188_v60  ;;  %v15242_v46 = vld [vmem:[%s18179_s8 + $0x4a4] ss:$16 sps:$4 sm:$0xff]   ;;  %v15240_v48 = vld [vmem:[%s18179_s8 + $0x4a0] ss:$16 sps:$4 sm:$0xff]  }
 0x12b   : > { %v15245_v47 = vld [vmem:[%s18179_s8 + $0x6a4] ss:$16 sps:$4 sm:$0xff]   ;;  %v15243_v49 = vld [vmem:[%s18179_s8 + $0x6a0] ss:$16 sps:$4 sm:$0xff]  }
 0x12c   : > { %10413 = vmatpush2.bf16.msra.mxu0 %v15190_v61  ;;  %v15248_v50 = vld [vmem:[%s18179_s8 + $0x484] ss:$16 sps:$4 sm:$0xff]   ;;  %v15246_v52 = vld [vmem:[%s18179_s8 + $0x480] ss:$16 sps:$4 sm:$0xff]  }
 0x12d   : > { %10454 = vmatpush2.bf16.msra.mxu1 %v15191_v0  ;;  %10414 = vmatprep.subr.bf16.mxu0 %v15192_v1  ;;  %v15251_v51 = vld [vmem:[%s18179_s8 + $0x684] ss:$16 sps:$4 sm:$0xff]   ;;  %v15249_v53 = vld [vmem:[%s18179_s8 + $0x680] ss:$16 sps:$4 sm:$0xff]  }
 0x12e   : > { %10455 = vmatprep.subr.bf16.mxu1 %v15194_v2  ;;  %v15254_v54 = vld [vmem:[%s18179_s8 + $0x464] ss:$16 sps:$4 sm:$0xff]   ;;  %v15252_v56 = vld [vmem:[%s18179_s8 + $0x460] ss:$16 sps:$4 sm:$0xff]  }
 0x12f   : > { %v15257_v55 = vld [vmem:[%s18179_s8 + $0x664] ss:$16 sps:$4 sm:$0xff]   ;;  %v15255_v57 = vld [vmem:[%s18179_s8 + $0x660] ss:$16 sps:$4 sm:$0xff]  }
 0x130   : > { %10415 = vmatpush2.bf16.msra.mxu0 %v15196_v3  ;;  %v15260_v58 = vld [vmem:[%s18179_s8 + $0x444] ss:$16 sps:$4 sm:$0xff]   ;;  %v15258_v60 = vld [vmem:[%s18179_s8 + $0x440] ss:$16 sps:$4 sm:$0xff]  }
 0x131   : > { %10456 = vmatpush2.bf16.msra.mxu1 %v15197_v4  ;;  %10416 = vmatprep.subr.bf16.mxu0 %v15198_v6  ;;  %v15263_v59 = vld [vmem:[%s18179_s8 + $0x644] ss:$16 sps:$4 sm:$0xff]   ;;  %v15261_v61 = vld [vmem:[%s18179_s8 + $0x640] ss:$16 sps:$4 sm:$0xff]  }
 0x132   : > { %10457 = vmatprep.subr.bf16.mxu1 %v15200_v7  ;;  %v15266_v62 = vld [vmem:[%s18179_s8 + $0x424] ss:$16 sps:$4 sm:$0xff]   ;;  %v15264_v1 = vld [vmem:[%s18179_s8 + $0x420] ss:$16 sps:$4 sm:$0xff]  }
 0x133   : > { %v15269_v0 = vld [vmem:[%s18179_s8 + $0x624] ss:$16 sps:$4 sm:$0xff]   ;;  %v15267_v2 = vld [vmem:[%s18179_s8 + $0x620] ss:$16 sps:$4 sm:$0xff]  }
 0x134   : > { %10417 = vmatpush2.bf16.msra.mxu0 %v15202_v9  ;;  %v15272_v3 = vld [vmem:[%s18179_s8 + $0x404] ss:$16 sps:$4 sm:$0xff]   ;;  %v15270_v6 = vld [vmem:[%s18179_s8 + $0x400] ss:$16 sps:$4 sm:$0xff]  }
 0x135   : > { %10458 = vmatpush2.bf16.msra.mxu1 %v15203_v11  ;;  %10418 = vmatprep.subr.bf16.mxu0 %v15204_v12  ;;  %v15275_v4 = vld [vmem:[%s18179_s8 + $0x604] ss:$16 sps:$4 sm:$0xff]   ;;  %v15273_v7 = vld [vmem:[%s18179_s8 + $0x600] ss:$16 sps:$4 sm:$0xff]  }
 0x136   : > { %10459 = vmatprep.subr.bf16.mxu1 %v15206_v13  ;;  %v15278_v8 = vld [vmem:[%s18179_s8 + $0x5e4] ss:$16 sps:$4 sm:$0xff]   ;;  %v15276_v10 = vld [vmem:[%s18179_s8 + $0x5e0] ss:$16 sps:$4 sm:$0xff]  }
 0x137   : > { %v15281_v9 = vld [vmem:[%s18179_s8 + $0x7e4] ss:$16 sps:$4 sm:$0xff]   ;;  %v15279_v11 = vld [vmem:[%s18179_s8 + $0x7e0] ss:$16 sps:$4 sm:$0xff]  }
 0x138   : > { %10419 = vmatpush2.bf16.msra.mxu0 %v15208_v15  ;;  %v15284_v12 = vld [vmem:[%s18179_s8 + $0x5c4] ss:$16 sps:$4 sm:$0xff]   ;;  %v15282_v14 = vld [vmem:[%s18179_s8 + $0x5c0] ss:$16 sps:$4 sm:$0xff]  }
 0x139   : > { %10460 = vmatpush2.bf16.msra.mxu1 %v15209_v17  ;;  %10420 = vmatprep.subr.bf16.mxu0 %v15210_v18  ;;  %v15287_v13 = vld [vmem:[%s18179_s8 + $0x7c4] ss:$16 sps:$4 sm:$0xff]   ;;  %v15285_v15 = vld [vmem:[%s18179_s8 + $0x7c0] ss:$16 sps:$4 sm:$0xff]  }
 0x13a   : > { %10461 = vmatprep.subr.bf16.mxu1 %v15212_v19  ;;  %v15290_v17 = vld [vmem:[%s18179_s8 + $0x5a4] ss:$16 sps:$4 sm:$0xff]   ;;  %v15288_v19 = vld [vmem:[%s18179_s8 + $0x5a0] ss:$16 sps:$4 sm:$0xff]  }
 0x13b   : > { %v15293_v18 = vld [vmem:[%s18179_s8 + $0x7a4] ss:$16 sps:$4 sm:$0xff]   ;;  %v15291_v21 = vld [vmem:[%s18179_s8 + $0x7a0] ss:$16 sps:$4 sm:$0xff]  }
 0x13c   : > { %10421 = vmatpush2.bf16.msra.mxu0 %v15214_v22  ;;  %v15296_v22 = vld [vmem:[%s18179_s8 + $0x584] ss:$16 sps:$4 sm:$0xff]   ;;  %v16112_v63 = vld [vmem:[%s18179_s8 + $0x2aa0] ss:$16 sps:$4 sm:$0xff]  }
 0x13d   : > { %10462 = vmatpush2.bf16.msra.mxu1 %v15215_v23  ;;  %10422 = vmatprep.subr.bf16.mxu0 %v15216_v24  ;;  %v15299_v23 = vld [vmem:[%s18179_s8 + $0x784] ss:$16 sps:$4 sm:$0xff]   ;;  %v15294_v24 = vld [vmem:[%s18179_s8 + $0x580] ss:$16 sps:$4 sm:$0xff]  }
 0x13e   : > { %10463 = vmatprep.subr.bf16.mxu1 %v15218_v25  ;;  %v15297_v25 = vld [vmem:[%s18179_s8 + $0x780] ss:$16 sps:$4 sm:$0xff]   ;;  %v15308_v31 = vld [vmem:[%s18179_s8 + $0x544] ss:$16 sps:$4 sm:$0xff]  }
 0x140   : > { %10423 = vmatpush2.bf16.msra.mxu0 %v15220_v27  ;;  %v15302_v27 = vld [vmem:[%s18179_s8 + $0x564] ss:$16 sps:$4 sm:$0xff]  }
 0x141   : > { %10464 = vmatpush2.bf16.msra.mxu1 %v15221_v28  ;;  %10424 = vmatprep.subr.bf16.mxu0 %v15222_v29  ;;  %v15305_v28 = vld [vmem:[%s18179_s8 + $0x764] ss:$16 sps:$4 sm:$0xff]   ;;  %v15300_v29 = vld [vmem:[%s18179_s8 + $0x560] ss:$16 sps:$4 sm:$0xff]  }
 0x142   : > { %10465 = vmatprep.subr.bf16.mxu1 %v15224_v30  ;;  %v15303_v30 = vld [vmem:[%s18179_s8 + $0x760] ss:$16 sps:$4 sm:$0xff]  }
 0x144   : > { %10425 = vmatpush2.bf16.msra.mxu0 %v15226_v32  ;;  %v15311_v32 = vld [vmem:[%s18179_s8 + $0x744] ss:$16 sps:$4 sm:$0xff]  }
 0x145   : > { %10466 = vmatpush2.bf16.msra.mxu1 %v15227_v34  ;;  %10476 = vmatprep.subr.bf16.mxu0 %v15230_v35  ;;  %v15306_v34 = vld [vmem:[%s18179_s8 + $0x540] ss:$16 sps:$4 sm:$0xff]  }
 0x146   : > { %10517 = vmatprep.subr.bf16.mxu1 %v15233_v36  ;;  %v15309_v35 = vld [vmem:[%s18179_s8 + $0x740] ss:$16 sps:$4 sm:$0xff]   ;;  %v15314_v36 = vld [vmem:[%s18179_s8 + $0x524] ss:$16 sps:$4 sm:$0xff]  }
 0x147   : > { %10427 = vmatmul.mubr.bf16.vlgmr.msra.gmra.mxu0 %v18333_v33 }
 0x148   : > { %10468 = vmatmul.mubr.bf16.vlgmr.msra.gmra.mxu1 %v18343_v38  ;;  %10477 = vmatpush1.bf16.msra.mxu0 %v15228_v39  ;;  %v15317_v39 = vld [vmem:[%s18179_s8 + $0x724] ss:$16 sps:$4 sm:$0xff]  }
 0x149   : > { %10518 = vmatpush1.bf16.msra.mxu1 %v15231_v40  ;;  %10478 = vmatprep.subr.bf16.mxu0 %v15236_v41  ;;  %v15312_v40 = vld [vmem:[%s18179_s8 + $0x520] ss:$16 sps:$4 sm:$0xff]  }
 0x14a   : > { %10519 = vmatprep.subr.bf16.mxu1 %v15239_v42  ;;  %10508 = vmatprep.mubr.bf16.mxu0 %v18339_v37  ;;  %v15315_v41 = vld [vmem:[%s18179_s8 + $0x720] ss:$16 sps:$4 sm:$0xff]   ;;  %v15320_v42 = vld [vmem:[%s18179_s8 + $0x504] ss:$16 sps:$4 sm:$0xff]  }
 0x14b   : > { %10549 = vmatprep.mubr.bf16.mxu1 %v18351_v43 }
 0x14c   : > { %10479 = vmatpush1.bf16.msra.mxu0 %v15234_v44  ;;  %v15323_v44 = vld [vmem:[%s18179_s8 + $0x704] ss:$16 sps:$4 sm:$0xff]  }
 0x14d   : > { %10520 = vmatpush1.bf16.msra.mxu1 %v15237_v45  ;;  %10480 = vmatprep.subr.bf16.mxu0 %v15242_v46  ;;  %v15318_v45 = vld [vmem:[%s18179_s8 + $0x500] ss:$16 sps:$4 sm:$0xff]   ;;  %v18416_v46 = vrot.slane %v18323_v26, %v18295_v5 }
 0x14e   : > { %10521 = vmatprep.subr.bf16.mxu1 %v15245_v47  ;;  %v15321_v47 = vld [vmem:[%s18179_s8 + $0x700] ss:$16 sps:$4 sm:$0xff]  }
 0x14f   : > { %v15328_v26 = vld [vmem:[%s18179_s8 + $0xae0] ss:$16 sps:$4 sm:$0xff]  }
 0x150   : > { %10481 = vmatpush1.bf16.msra.mxu0 %v15240_v48  ;;  %v15327_v48 = vld [vmem:[%s18179_s8 + $0x8e4] ss:$16 sps:$4 sm:$0xff]  }
 0x151   : > { %10522 = vmatpush1.bf16.msra.mxu1 %v15243_v49  ;;  %10482 = vmatprep.subr.bf16.mxu0 %v15248_v50  ;;  %v15330_v49 = vld [vmem:[%s18179_s8 + $0xae4] ss:$16 sps:$4 sm:$0xff]   ;;  %v18423_v50 = vcombine.high %v18416_v46, %v18416_v46 }
 0x152   : > { %10523 = vmatprep.subr.bf16.mxu1 %v15251_v51  ;;  %v15325_v51 = vld [vmem:[%s18179_s8 + $0x8e0] ss:$16 sps:$4 sm:$0xff]  }
 0x154   : > { %10483 = vmatpush1.bf16.msra.mxu0 %v15246_v52  ;;  %v18428_v52 = vld [vmem:[%s18244_s10 + $0x8] sm:$0xff] }
 0x155   : > { %10524 = vmatpush1.bf16.msra.mxu1 %v15249_v53  ;;  %10484 = vmatprep.subr.bf16.mxu0 %v15254_v54  ;;  %v15333_v53 = vld [vmem:[%s18179_s8 + $0x8c4] ss:$16 sps:$4 sm:$0xff]  }
 0x156   : > { %10525 = vmatprep.subr.bf16.mxu1 %v15257_v55  ;;  %v15336_v54 = vld [vmem:[%s18179_s8 + $0xac4] ss:$16 sps:$4 sm:$0xff]   ;;  %v18434_v55 = vrot.slane %v18428_v52, %v18295_v5 }
 0x158   : > { %10485 = vmatpush1.bf16.msra.mxu0 %v15252_v56  ;;  %v2436_v56 = vcombine.high %v18434_v55, %v18434_v55 }
 0x159   : > { %10526 = vmatpush1.bf16.msra.mxu1 %v15255_v57  ;;  %10486 = vmatprep.subr.bf16.mxu0 %v15260_v58  ;;  %v15331_v57 = vld [vmem:[%s18179_s8 + $0x8c0] ss:$16 sps:$4 sm:$0xff]  }
 0x15a   : > { %10527 = vmatprep.subr.bf16.mxu1 %v15263_v59  ;;  %v15334_v58 = vld [vmem:[%s18179_s8 + $0xac0] ss:$16 sps:$4 sm:$0xff]   ;;  %v15339_v59 = vld [vmem:[%s18179_s8 + $0x8a4] ss:$16 sps:$4 sm:$0xff]  }
 0x15c   : > { %10487 = vmatpush1.bf16.msra.mxu0 %v15258_v60  ;;  %v15342_v60 = vld [vmem:[%s18179_s8 + $0xaa4] ss:$16 sps:$4 sm:$0xff]  }
 0x15d   : > { %10528 = vmatpush1.bf16.msra.mxu1 %v15261_v61  ;;  %10488 = vmatprep.subr.bf16.mxu0 %v15266_v62  ;;  %v18445_v61 = vrot.slane %v2436_v56, %v18295_v5  ;;  %v15403_v56 = vld [vmem:[%s18179_s8 + $0x940] ss:$16 sps:$4 sm:$0xff]  }
 0x15e   : > { %10529 = vmatprep.subr.bf16.mxu1 %v15269_v0  ;;  %v15337_v0 = vld [vmem:[%s18179_s8 + $0x8a0] ss:$16 sps:$4 sm:$0xff]  }
 0x15f   : > { %v18450_v62 = vcombine.high %v18445_v61, %v18445_v61 }
 0x160   : > { %10489 = vmatpush1.bf16.msra.mxu0 %v15264_v1  ;;  %v15340_v1 = vld [vmem:[%s18179_s8 + $0xaa0] ss:$16 sps:$4 sm:$0xff]  }
 0x161   : > { %10530 = vmatpush1.bf16.msra.mxu1 %v15267_v2  ;;  %10490 = vmatprep.subr.bf16.mxu0 %v15272_v3  ;;  %v15345_v2 = vld [vmem:[%s18179_s8 + $0x884] ss:$16 sps:$4 sm:$0xff]  }
 0x162   : > { %10531 = vmatprep.subr.bf16.mxu1 %v15275_v4  ;;  %v15348_v3 = vld [vmem:[%s18179_s8 + $0xa84] ss:$16 sps:$4 sm:$0xff]   ;;  %v15343_v4 = vld [vmem:[%s18179_s8 + $0x880] ss:$16 sps:$4 sm:$0xff]  }
 0x164   : > { %10491 = vmatpush1.bf16.msra.mxu0 %v15270_v6  ;;  %v15346_v6 = vld [vmem:[%s18179_s8 + $0xa80] ss:$16 sps:$4 sm:$0xff]  }
 0x165   : > { %10532 = vmatpush1.bf16.msra.mxu1 %v15273_v7  ;;  %10492 = vmatprep.subr.bf16.mxu0 %v15278_v8  ;;  %v15351_v7 = vld [vmem:[%s18179_s8 + $0x864] ss:$16 sps:$4 sm:$0xff]  }
 0x166   : > { %10533 = vmatprep.subr.bf16.mxu1 %v15281_v9  ;;  %v15354_v8 = vld [vmem:[%s18179_s8 + $0xa64] ss:$16 sps:$4 sm:$0xff]   ;;  %v15349_v9 = vld [vmem:[%s18179_s8 + $0x860] ss:$16 sps:$4 sm:$0xff]  }
 0x168   : > { %10493 = vmatpush2.bf16.msra.mxu0 %v15276_v10  ;;  %v15352_v10 = vld [vmem:[%s18179_s8 + $0xa60] ss:$16 sps:$4 sm:$0xff]  }
 0x169   : > { %10534 = vmatpush2.bf16.msra.mxu1 %v15279_v11  ;;  %10494 = vmatprep.subr.bf16.mxu0 %v15284_v12  ;;  %v15357_v11 = vld [vmem:[%s18179_s8 + $0x844] ss:$16 sps:$4 sm:$0xff]  }
 0x16a   : > { %10535 = vmatprep.subr.bf16.mxu1 %v15287_v13  ;;  %v15360_v12 = vld [vmem:[%s18179_s8 + $0xa44] ss:$16 sps:$4 sm:$0xff]   ;;  %v15355_v13 = vld [vmem:[%s18179_s8 + $0x840] ss:$16 sps:$4 sm:$0xff]  }
 0x16c   : > { %10495 = vmatpush2.bf16.msra.mxu0 %v15282_v14  ;;  %v15358_v14 = vld [vmem:[%s18179_s8 + $0xa40] ss:$16 sps:$4 sm:$0xff]  }
 0x16d   : > { %10536 = vmatpush2.bf16.msra.mxu1 %v15285_v15  ;;  %10496 = vmatprep.subr.bf16.mxu0 %v15290_v17  ;;  %v15363_v15 = vld [vmem:[%s18179_s8 + $0x824] ss:$16 sps:$4 sm:$0xff]  }
 0x16e   : > { %10537 = vmatprep.subr.bf16.mxu1 %v15293_v18  ;;  %v15366_v17 = vld [vmem:[%s18179_s8 + $0xa24] ss:$16 sps:$4 sm:$0xff]   ;;  %v15361_v18 = vld [vmem:[%s18179_s8 + $0x820] ss:$16 sps:$4 sm:$0xff]  }
 0x170   : > { %10497 = vmatpush2.bf16.msra.mxu0 %v15288_v19  ;;  %v15364_v19 = vld [vmem:[%s18179_s8 + $0xa20] ss:$16 sps:$4 sm:$0xff]  }
 0x171   : > { %10538 = vmatpush2.bf16.msra.mxu1 %v15291_v21  ;;  %10498 = vmatprep.subr.bf16.mxu0 %v15296_v22  ;;  %v15369_v21 = vld [vmem:[%s18179_s8 + $0x804] ss:$16 sps:$4 sm:$0xff]  }
 0x172   : > { %10539 = vmatprep.subr.bf16.mxu1 %v15299_v23  ;;  %v15372_v22 = vld [vmem:[%s18179_s8 + $0xa04] ss:$16 sps:$4 sm:$0xff]   ;;  %v15367_v23 = vld [vmem:[%s18179_s8 + $0x800] ss:$16 sps:$4 sm:$0xff]  }
 0x174   : > { %10499 = vmatpush2.bf16.msra.mxu0 %v15294_v24  ;;  %v15370_v24 = vld [vmem:[%s18179_s8 + $0xa00] ss:$16 sps:$4 sm:$0xff]  }
 0x175   : > { %10540 = vmatpush2.bf16.msra.mxu1 %v15297_v25  ;;  %10500 = vmatprep.subr.bf16.mxu0 %v15302_v27  ;;  %v15375_v25 = vld [vmem:[%s18179_s8 + $0x9e4] ss:$16 sps:$4 sm:$0xff]  }
 0x176   : > { %10541 = vmatprep.subr.bf16.mxu1 %v15305_v28  ;;  %v15378_v27 = vld [vmem:[%s18179_s8 + $0xbe4] ss:$16 sps:$4 sm:$0xff]   ;;  %v15373_v28 = vld [vmem:[%s18179_s8 + $0x9e0] ss:$16 sps:$4 sm:$0xff]  }
 0x178   : > { %10501 = vmatpush2.bf16.msra.mxu0 %v15300_v29  ;;  %v15376_v29 = vld [vmem:[%s18179_s8 + $0xbe0] ss:$16 sps:$4 sm:$0xff]  }
 0x179   : > { %10542 = vmatpush2.bf16.msra.mxu1 %v15303_v30  ;;  %10502 = vmatprep.subr.bf16.mxu0 %v15308_v31  ;;  %v15381_v30 = vld [vmem:[%s18179_s8 + $0x9c4] ss:$16 sps:$4 sm:$0xff]  }
 0x17a   : > { %10543 = vmatprep.subr.bf16.mxu1 %v15311_v32  ;;  %v15384_v31 = vld [vmem:[%s18179_s8 + $0xbc4] ss:$16 sps:$4 sm:$0xff]   ;;  %v15379_v32 = vld [vmem:[%s18179_s8 + $0x9c0] ss:$16 sps:$4 sm:$0xff]  }
 0x17c   : > { %10503 = vmatpush2.bf16.msra.mxu0 %v15306_v34  ;;  %v15382_v34 = vld [vmem:[%s18179_s8 + $0xbc0] ss:$16 sps:$4 sm:$0xff]  }
 0x17d   : > { %10544 = vmatpush2.bf16.msra.mxu1 %v15309_v35  ;;  %10504 = vmatprep.subr.bf16.mxu0 %v15314_v36  ;;  %v15387_v35 = vld [vmem:[%s18179_s8 + $0x9a4] ss:$16 sps:$4 sm:$0xff]  }
 0x17e   : > { %10545 = vmatprep.subr.bf16.mxu1 %v15317_v39  ;;  %v15390_v36 = vld [vmem:[%s18179_s8 + $0xba4] ss:$16 sps:$4 sm:$0xff]   ;;  %v15385_v39 = vld [vmem:[%s18179_s8 + $0x9a0] ss:$16 sps:$4 sm:$0xff]  }
 0x180   : > { %10505 = vmatpush2.bf16.msra.mxu0 %v15312_v40  ;;  %v15388_v40 = vld [vmem:[%s18179_s8 + $0xba0] ss:$16 sps:$4 sm:$0xff]  }
 0x181   : > { %10546 = vmatpush2.bf16.msra.mxu1 %v15315_v41  ;;  %10506 = vmatprep.subr.bf16.mxu0 %v15320_v42  ;;  %v15393_v41 = vld [vmem:[%s18179_s8 + $0x984] ss:$16 sps:$4 sm:$0xff]  }
 0x182   : > { %10547 = vmatprep.subr.bf16.mxu1 %v15323_v44  ;;  %v15396_v42 = vld [vmem:[%s18179_s8 + $0xb84] ss:$16 sps:$4 sm:$0xff]   ;;  %v15391_v44 = vld [vmem:[%s18179_s8 + $0x980] ss:$16 sps:$4 sm:$0xff]  }
 0x184   : > { %10507 = vmatpush2.bf16.msra.mxu0 %v15318_v45  ;;  %v15394_v45 = vld [vmem:[%s18179_s8 + $0xb80] ss:$16 sps:$4 sm:$0xff]  }
 0x185   : > { %10548 = vmatpush2.bf16.msra.mxu1 %v15321_v47  ;;  %10558 = vmatprep.subr.bf16.mxu0 %v15327_v48  ;;  %v15399_v47 = vld [vmem:[%s18179_s8 + $0x964] ss:$16 sps:$4 sm:$0xff]  }
 0x186   : > { %10599 = vmatprep.subr.bf16.mxu1 %v15330_v49  ;;  %v15402_v48 = vld [vmem:[%s18179_s8 + $0xb64] ss:$16 sps:$4 sm:$0xff]   ;;  %v15397_v49 = vld [vmem:[%s18179_s8 + $0x960] ss:$16 sps:$4 sm:$0xff]  }
 0x187   : > { %10509 = vmatmul.mubr.bf16.vlgmr.msra.gmra.mxu0 %v18416_v46 }
 0x188   : > { %10550 = vmatmul.mubr.bf16.vlgmr.msra.gmra.mxu1 %v18423_v50  ;;  %10559 = vmatpush1.bf16.msra.mxu0 %v15325_v51  ;;  %v15400_v51 = vld [vmem:[%s18179_s8 + $0xb60] ss:$16 sps:$4 sm:$0xff]  }
 0x189   : > { %10600 = vmatpush1.bf16.msra.mxu1 %v15328_v26  ;;  %10560 = vmatprep.subr.bf16.mxu0 %v15333_v53  ;;  %v15405_v26 = vld [vmem:[%s18179_s8 + $0x944] ss:$16 sps:$4 sm:$0xff]  }
 0x18a   : > { %10601 = vmatprep.subr.bf16.mxu1 %v15336_v54  ;;  %10590 = vmatprep.mubr.bf16.mxu0 %v18445_v61  ;;  %v15408_v53 = vld [vmem:[%s18179_s8 + $0xb44] ss:$16 sps:$4 sm:$0xff]   ;;  %v2421_v54 = vcombine.high %v18428_v52, %v18428_v52  ;;  %v15409_v52 = vld [vmem:[%s18179_s8 + $0x920] ss:$16 sps:$4 sm:$0xff]  }
 0x18b   : > { %10631 = vmatprep.mubr.bf16.mxu1 %v18450_v62 }
 0x18c   : > { %10561 = vmatpush1.bf16.msra.mxu0 %v15331_v57  ;;  %v15406_v57 = vld [vmem:[%s18179_s8 + $0xb40] ss:$16 sps:$4 sm:$0xff]  }
 0x18d   : > { %10602 = vmatpush1.bf16.msra.mxu1 %v15334_v58  ;;  %10562 = vmatprep.subr.bf16.mxu0 %v15339_v59  ;;  %v15411_v58 = vld [vmem:[%s18179_s8 + $0x924] ss:$16 sps:$4 sm:$0xff]  }
 0x18e   : > { %10603 = vmatprep.subr.bf16.mxu1 %v15342_v60  ;;  %v15414_v59 = vld [vmem:[%s18179_s8 + $0xb24] ss:$16 sps:$4 sm:$0xff]   ;;  %v18504_v60 = vrot.slane %v2421_v54, %v18295_v5  ;;  %v15472_v54 = vld [vmem:[%s18179_s8 + $0xfe0] ss:$16 sps:$4 sm:$0xff]  }
 0x190   : > { %10563 = vmatpush1.bf16.msra.mxu0 %v15337_v0  ;;  %v15412_v0 = vld [vmem:[%s18179_s8 + $0xb20] ss:$16 sps:$4 sm:$0xff]  }
 0x191   : > { %10604 = vmatpush1.bf16.msra.mxu1 %v15340_v1  ;;  %10564 = vmatprep.subr.bf16.mxu0 %v15345_v2  ;;  %v15417_v1 = vld [vmem:[%s18179_s8 + $0x904] ss:$16 sps:$4 sm:$0xff]  }
 0x192   : > { %10605 = vmatprep.subr.bf16.mxu1 %v15348_v3  ;;  %v15420_v2 = vld [vmem:[%s18179_s8 + $0xb04] ss:$16 sps:$4 sm:$0xff]   ;;  %v2437_v3 = vcombine.high %v18504_v60, %v18504_v60 }
 0x194   : > { %10565 = vmatpush1.bf16.msra.mxu0 %v15343_v4  ;;  %v18514_v4 = vrot.slane %v18434_v55, %v18295_v5  ;;  %v15421_v55 = vld [vmem:[%s18179_s8 + $0xce0] ss:$16 sps:$4 sm:$0xff]  }
 0x195   : > { %10606 = vmatpush1.bf16.msra.mxu1 %v15346_v6  ;;  %10566 = vmatprep.subr.bf16.mxu0 %v15351_v7  ;;  %v15415_v6 = vld [vmem:[%s18179_s8 + $0x900] ss:$16 sps:$4 sm:$0xff]  }
 0x196   : > { %10607 = vmatprep.subr.bf16.mxu1 %v15354_v8  ;;  %v15418_v7 = vld [vmem:[%s18179_s8 + $0xb00] ss:$16 sps:$4 sm:$0xff]   ;;  %v15423_v8 = vld [vmem:[%s18179_s8 + $0xce4] ss:$16 sps:$4 sm:$0xff]  }
 0x198   : > { %10567 = vmatpush1.bf16.msra.mxu0 %v15349_v9  ;;  %v15426_v9 = vld [vmem:[%s18179_s8 + $0xee4] ss:$16 sps:$4 sm:$0xff]  }
 0x199   : > { %10608 = vmatpush1.bf16.msra.mxu1 %v15352_v10  ;;  %10568 = vmatprep.subr.bf16.mxu0 %v15357_v11  ;;  %v18521_v10 = vrot.slane %v2437_v3, %v18295_v5  ;;  %v18525_v11 = vcombine.high %v18514_v4, %v18514_v4  ;;  %v15489_v3 = vld [vmem:[%s18179_s8 + $0xd84] ss:$16 sps:$4 sm:$0xff]  }
 0x19a   : > { %10609 = vmatprep.subr.bf16.mxu1 %v15360_v12  ;;  %v15424_v12 = vld [vmem:[%s18179_s8 + $0xee0] ss:$16 sps:$4 sm:$0xff]  }
 0x19c   : > { %10569 = vmatpush1.bf16.msra.mxu0 %v15355_v13  ;;  %v15429_v13 = vld [vmem:[%s18179_s8 + $0xcc4] ss:$16 sps:$4 sm:$0xff]  }
 0x19d   : > { %10610 = vmatpush1.bf16.msra.mxu1 %v15358_v14  ;;  %10570 = vmatprep.subr.bf16.mxu0 %v15363_v15  ;;  %v15432_v14 = vld [vmem:[%s18179_s8 + $0xec4] ss:$16 sps:$4 sm:$0xff]   ;;  %v18533_v15 = vcombine.high %v18521_v10, %v18521_v10 }
 0x19e   : > { %10611 = vmatprep.subr.bf16.mxu1 %v15366_v17  ;;  %v15427_v17 = vld [vmem:[%s18179_s8 + $0xcc0] ss:$16 sps:$4 sm:$0xff]  }
 0x1a0   : > { %10571 = vmatpush1.bf16.msra.mxu0 %v15361_v18  ;;  %v15430_v18 = vld [vmem:[%s18179_s8 + $0xec0] ss:$16 sps:$4 sm:$0xff]  }
 0x1a1   : > { %10612 = vmatpush1.bf16.msra.mxu1 %v15364_v19  ;;  %10572 = vmatprep.subr.bf16.mxu0 %v15369_v21  ;;  %v15435_v19 = vld [vmem:[%s18179_s8 + $0xca4] ss:$16 sps:$4 sm:$0xff]  }
 0x1a2   : > { %10613 = vmatprep.subr.bf16.mxu1 %v15372_v22  ;;  %v15438_v21 = vld [vmem:[%s18179_s8 + $0xea4] ss:$16 sps:$4 sm:$0xff]   ;;  %v15433_v22 = vld [vmem:[%s18179_s8 + $0xca0] ss:$16 sps:$4 sm:$0xff]  }
 0x1a4   : > { %10573 = vmatpush1.bf16.msra.mxu0 %v15367_v23  ;;  %v15436_v23 = vld [vmem:[%s18179_s8 + $0xea0] ss:$16 sps:$4 sm:$0xff]  }
 0x1a5   : > { %10614 = vmatpush1.bf16.msra.mxu1 %v15370_v24  ;;  %10574 = vmatprep.subr.bf16.mxu0 %v15375_v25  ;;  %v15441_v24 = vld [vmem:[%s18179_s8 + $0xc84] ss:$16 sps:$4 sm:$0xff]  }
 0x1a6   : > { %10615 = vmatprep.subr.bf16.mxu1 %v15378_v27  ;;  %v15444_v25 = vld [vmem:[%s18179_s8 + $0xe84] ss:$16 sps:$4 sm:$0xff]   ;;  %v15439_v27 = vld [vmem:[%s18179_s8 + $0xc80] ss:$16 sps:$4 sm:$0xff]  }
 0x1a8   : > { %10575 = vmatpush2.bf16.msra.mxu0 %v15373_v28  ;;  %v15442_v28 = vld [vmem:[%s18179_s8 + $0xe80] ss:$16 sps:$4 sm:$0xff]  }
 0x1a9   : > { %10616 = vmatpush2.bf16.msra.mxu1 %v15376_v29  ;;  %10576 = vmatprep.subr.bf16.mxu0 %v15381_v30  ;;  %v15447_v29 = vld [vmem:[%s18179_s8 + $0xc64] ss:$16 sps:$4 sm:$0xff]  }
 0x1aa   : > { %10617 = vmatprep.subr.bf16.mxu1 %v15384_v31  ;;  %v15450_v30 = vld [vmem:[%s18179_s8 + $0xe64] ss:$16 sps:$4 sm:$0xff]   ;;  %v15445_v31 = vld [vmem:[%s18179_s8 + $0xc60] ss:$16 sps:$4 sm:$0xff]  }
 0x1ac   : > { %10577 = vmatpush2.bf16.msra.mxu0 %v15379_v32  ;;  %v15448_v32 = vld [vmem:[%s18179_s8 + $0xe60] ss:$16 sps:$4 sm:$0xff]  }
 0x1ad   : > { %10618 = vmatpush2.bf16.msra.mxu1 %v15382_v34  ;;  %10578 = vmatprep.subr.bf16.mxu0 %v15387_v35  ;;  %v15453_v34 = vld [vmem:[%s18179_s8 + $0xc44] ss:$16 sps:$4 sm:$0xff]  }
 0x1ae   : > { %10619 = vmatprep.subr.bf16.mxu1 %v15390_v36  ;;  %v15456_v35 = vld [vmem:[%s18179_s8 + $0xe44] ss:$16 sps:$4 sm:$0xff]   ;;  %v15451_v36 = vld [vmem:[%s18179_s8 + $0xc40] ss:$16 sps:$4 sm:$0xff]  }
 0x1b0   : > { %10579 = vmatpush2.bf16.msra.mxu0 %v15385_v39  ;;  %v15454_v39 = vld [vmem:[%s18179_s8 + $0xe40] ss:$16 sps:$4 sm:$0xff]  }
 0x1b1   : > { %10620 = vmatpush2.bf16.msra.mxu1 %v15388_v40  ;;  %10580 = vmatprep.subr.bf16.mxu0 %v15393_v41  ;;  %v15459_v40 = vld [vmem:[%s18179_s8 + $0xc24] ss:$16 sps:$4 sm:$0xff]  }
 0x1b2   : > { %10621 = vmatprep.subr.bf16.mxu1 %v15396_v42  ;;  %v15462_v41 = vld [vmem:[%s18179_s8 + $0xe24] ss:$16 sps:$4 sm:$0xff]   ;;  %v15457_v42 = vld [vmem:[%s18179_s8 + $0xc20] ss:$16 sps:$4 sm:$0xff]  }
 0x1b4   : > { %10581 = vmatpush2.bf16.msra.mxu0 %v15391_v44  ;;  %v15460_v44 = vld [vmem:[%s18179_s8 + $0xe20] ss:$16 sps:$4 sm:$0xff]  }
 0x1b5   : > { %10622 = vmatpush2.bf16.msra.mxu1 %v15394_v45  ;;  %10582 = vmatprep.subr.bf16.mxu0 %v15399_v47  ;;  %v15465_v45 = vld [vmem:[%s18179_s8 + $0xc04] ss:$16 sps:$4 sm:$0xff]  }
 0x1b6   : > { %10623 = vmatprep.subr.bf16.mxu1 %v15402_v48  ;;  %v15468_v47 = vld [vmem:[%s18179_s8 + $0xe04] ss:$16 sps:$4 sm:$0xff]   ;;  %v15463_v48 = vld [vmem:[%s18179_s8 + $0xc00] ss:$16 sps:$4 sm:$0xff]  }
 0x1b8   : > { %10583 = vmatpush2.bf16.msra.mxu0 %v15397_v49  ;;  %v15466_v49 = vld [vmem:[%s18179_s8 + $0xe00] ss:$16 sps:$4 sm:$0xff]  }
 0x1b9   : > { %10624 = vmatpush2.bf16.msra.mxu1 %v15400_v51  ;;  %10584 = vmatprep.subr.bf16.mxu0 %v15405_v26  ;;  %v15471_v51 = vld [vmem:[%s18179_s8 + $0xde4] ss:$16 sps:$4 sm:$0xff]  }
 0x1ba   : > { %10625 = vmatprep.subr.bf16.mxu1 %v15408_v53  ;;  %v15474_v26 = vld [vmem:[%s18179_s8 + $0xfe4] ss:$16 sps:$4 sm:$0xff]   ;;  %v15469_v53 = vld [vmem:[%s18179_s8 + $0xde0] ss:$16 sps:$4 sm:$0xff]  }
 0x1bc   : > { %10585 = vmatpush2.bf16.msra.mxu0 %v15403_v56  ;;  %v15477_v56 = vld [vmem:[%s18179_s8 + $0xdc4] ss:$16 sps:$4 sm:$0xff]  }
 0x1bd   : > { %10626 = vmatpush2.bf16.msra.mxu1 %v15406_v57  ;;  %10586 = vmatprep.subr.bf16.mxu0 %v15411_v58  ;;  %v15480_v57 = vld [vmem:[%s18179_s8 + $0xfc4] ss:$16 sps:$4 sm:$0xff]   ;;  %v15475_v58 = vld [vmem:[%s18179_s8 + $0xdc0] ss:$16 sps:$4 sm:$0xff]  }
 0x1be   : > { %10627 = vmatprep.subr.bf16.mxu1 %v15414_v59  ;;  %v15478_v59 = vld [vmem:[%s18179_s8 + $0xfc0] ss:$16 sps:$4 sm:$0xff]  }
 0x1c0   : > { %10587 = vmatpush2.bf16.msra.mxu0 %v15409_v52  ;;  %v15483_v52 = vld [vmem:[%s18179_s8 + $0xda4] ss:$16 sps:$4 sm:$0xff]  }
 0x1c1   : > { %10628 = vmatpush2.bf16.msra.mxu1 %v15412_v0  ;;  %10588 = vmatprep.subr.bf16.mxu0 %v15417_v1  ;;  %v15486_v0 = vld [vmem:[%s18179_s8 + $0xfa4] ss:$16 sps:$4 sm:$0xff]   ;;  %v15481_v1 = vld [vmem:[%s18179_s8 + $0xda0] ss:$16 sps:$4 sm:$0xff]  }
 0x1c2   : > { %10629 = vmatprep.subr.bf16.mxu1 %v15420_v2  ;;  %v15484_v2 = vld [vmem:[%s18179_s8 + $0xfa0] ss:$16 sps:$4 sm:$0xff]  }
 0x1c4   : > { %10589 = vmatpush2.bf16.msra.mxu0 %v15415_v6  ;;  %v15492_v6 = vld [vmem:[%s18179_s8 + $0xf84] ss:$16 sps:$4 sm:$0xff]  }
 0x1c5   : > { %10630 = vmatpush2.bf16.msra.mxu1 %v15418_v7  ;;  %10640 = vmatprep.subr.bf16.mxu0 %v15423_v8  ;;  %v15487_v7 = vld [vmem:[%s18179_s8 + $0xd80] ss:$16 sps:$4 sm:$0xff]  }
 0x1c6   : > { %10681 = vmatprep.subr.bf16.mxu1 %v15426_v9  ;;  %v15490_v8 = vld [vmem:[%s18179_s8 + $0xf80] ss:$16 sps:$4 sm:$0xff]   ;;  %v15495_v9 = vld [vmem:[%s18179_s8 + $0xd64] ss:$16 sps:$4 sm:$0xff]  }
 0x1c7   : > { %10591 = vmatmul.mubr.bf16.vlgmr.msra.gmra.mxu0 %v18514_v4 }
 0x1c8   : > { %10632 = vmatmul.mubr.bf16.vlgmr.msra.gmra.mxu1 %v18525_v11  ;;  %10641 = vmatpush1.bf16.msra.mxu0 %v15421_v55  ;;  %v15498_v55 = vld [vmem:[%s18179_s8 + $0xf64] ss:$16 sps:$4 sm:$0xff]  }
 0x1c9   : > { %10682 = vmatpush1.bf16.msra.mxu1 %v15424_v12  ;;  %10642 = vmatprep.subr.bf16.mxu0 %v15429_v13  ;;  %v15493_v12 = vld [vmem:[%s18179_s8 + $0xd60] ss:$16 sps:$4 sm:$0xff]  }
 0x1ca   : > { %10683 = vmatprep.subr.bf16.mxu1 %v15432_v14  ;;  %10672 = vmatprep.mubr.bf16.mxu0 %v18521_v10  ;;  %v15496_v13 = vld [vmem:[%s18179_s8 + $0xf60] ss:$16 sps:$4 sm:$0xff]   ;;  %v15501_v14 = vld [vmem:[%s18179_s8 + $0xd44] ss:$16 sps:$4 sm:$0xff]  }
 0x1cb   : > { %10713 = vmatprep.mubr.bf16.mxu1 %v18533_v15 }
 0x1cc   : > { %10643 = vmatpush1.bf16.msra.mxu0 %v15427_v17  ;;  %v15504_v17 = vld [vmem:[%s18179_s8 + $0xf44] ss:$16 sps:$4 sm:$0xff]  }
 0x1cd   : > { %10684 = vmatpush1.bf16.msra.mxu1 %v15430_v18  ;;  %10644 = vmatprep.subr.bf16.mxu0 %v15435_v19  ;;  %v15499_v18 = vld [vmem:[%s18179_s8 + $0xd40] ss:$16 sps:$4 sm:$0xff]   ;;  %v18589_v19 = vld [vmem:[%s18244_s10 + $0x10] sm:$0xff] }
 0x1ce   : > { %10685 = vmatprep.subr.bf16.mxu1 %v15438_v21  ;;  %v15502_v21 = vld [vmem:[%s18179_s8 + $0xf40] ss:$16 sps:$4 sm:$0xff]  }
 0x1d0   : > { %10645 = vmatpush1.bf16.msra.mxu0 %v15433_v22  ;;  %v15507_v22 = vld [vmem:[%s18179_s8 + $0xd24] ss:$16 sps:$4 sm:$0xff]  }
 0x1d1   : > { %10686 = vmatpush1.bf16.msra.mxu1 %v15436_v23  ;;  %10646 = vmatprep.subr.bf16.mxu0 %v15441_v24  ;;  %v15510_v23 = vld [vmem:[%s18179_s8 + $0xf24] ss:$16 sps:$4 sm:$0xff]   ;;  %v18596_v24 = vrot.slane %v18589_v19, %v18295_v5 }
 0x1d2   : > { %10687 = vmatprep.subr.bf16.mxu1 %v15444_v25  ;;  %v15505_v25 = vld [vmem:[%s18179_s8 + $0xd20] ss:$16 sps:$4 sm:$0xff]  }
 0x1d4   : > { %10647 = vmatpush1.bf16.msra.mxu0 %v15439_v27  ;;  %v15508_v27 = vld [vmem:[%s18179_s8 + $0xf20] ss:$16 sps:$4 sm:$0xff]  }
 0x1d5   : > { %10688 = vmatpush1.bf16.msra.mxu1 %v15442_v28  ;;  %10648 = vmatprep.subr.bf16.mxu0 %v15447_v29  ;;  %v15513_v28 = vld [vmem:[%s18179_s8 + $0xd04] ss:$16 sps:$4 sm:$0xff]  }
 0x1d6   : > { %10689 = vmatprep.subr.bf16.mxu1 %v15450_v30  ;;  %v15516_v29 = vld [vmem:[%s18179_s8 + $0xf04] ss:$16 sps:$4 sm:$0xff]   ;;  %v2485_v30 = vcombine.high %v18596_v24, %v18596_v24 }
 0x1d8   : > { %10649 = vmatpush1.bf16.msra.mxu0 %v15445_v31  ;;  %v15511_v31 = vld [vmem:[%s18179_s8 + $0xd00] ss:$16 sps:$4 sm:$0xff]  }
 0x1d9   : > { %10690 = vmatpush1.bf16.msra.mxu1 %v15448_v32  ;;  %10650 = vmatprep.subr.bf16.mxu0 %v15453_v34  ;;  %v18607_v32 = vrot.slane %v18504_v60, %v18295_v5  ;;  %v15514_v34 = vld [vmem:[%s18179_s8 + $0xf00] ss:$16 sps:$4 sm:$0xff]  }
 0x1da   : > { %10691 = vmatprep.subr.bf16.mxu1 %v15456_v35  ;;  %v15520_v35 = vld [vmem:[%s18179_s8 + $0x10e4] ss:$16 sps:$4 sm:$0xff]   ;;  %v15521_v60 = vld [vmem:[%s18179_s8 + $0x12e0] ss:$16 sps:$4 sm:$0xff]  }
 0x1dc   : > { %10651 = vmatpush1.bf16.msra.mxu0 %v15451_v36  ;;  %v15523_v36 = vld [vmem:[%s18179_s8 + $0x12e4] ss:$16 sps:$4 sm:$0xff]  }
 0x1dd   : > { %10692 = vmatpush1.bf16.msra.mxu1 %v15454_v39  ;;  %10652 = vmatprep.subr.bf16.mxu0 %v15459_v40  ;;  %v18613_v39 = vrot.slane %v2485_v30, %v18295_v5  ;;  %v18617_v40 = vcombine.high %v18607_v32, %v18607_v32  ;;  %v15565_v30 = vld [vmem:[%s18179_s8 + $0x1204] ss:$16 sps:$4 sm:$0xff]  }
 0x1de   : > { %10693 = vmatprep.subr.bf16.mxu1 %v15462_v41  ;;  %v15518_v41 = vld [vmem:[%s18179_s8 + $0x10e0] ss:$16 sps:$4 sm:$0xff]  }
 0x1e0   : > { %10653 = vmatpush1.bf16.msra.mxu0 %v15457_v42  ;;  %v15526_v42 = vld [vmem:[%s18179_s8 + $0x10c4] ss:$16 sps:$4 sm:$0xff]  }
 0x1e1   : > { %10694 = vmatpush1.bf16.msra.mxu1 %v15460_v44  ;;  %10654 = vmatprep.subr.bf16.mxu0 %v15465_v45  ;;  %v15529_v44 = vld [vmem:[%s18179_s8 + $0x12c4] ss:$16 sps:$4 sm:$0xff]   ;;  %v18625_v45 = vcombine.high %v18613_v39, %v18613_v39 }
 0x1e2   : > { %10695 = vmatprep.subr.bf16.mxu1 %v15468_v47 }
 0x1e4   : > { %10655 = vmatpush1.bf16.msra.mxu0 %v15463_v48 }
 0x1e5   : > { %10696 = vmatpush1.bf16.msra.mxu1 %v15466_v49  ;;  %10656 = vmatprep.subr.bf16.mxu0 %v15471_v51  ;;  %v15524_v49 = vld [vmem:[%s18179_s8 + $0x10c0] ss:$16 sps:$4 sm:$0xff]  }
 0x1e6   : > { %10697 = vmatprep.subr.bf16.mxu1 %v15474_v26  ;;  %v15527_v51 = vld [vmem:[%s18179_s8 + $0x12c0] ss:$16 sps:$4 sm:$0xff]  }
 0x1e8   : > { %10657 = vmatpush2.bf16.msra.mxu0 %v15469_v53 }
 0x1e9   : > { %10698 = vmatpush2.bf16.msra.mxu1 %v15472_v54  ;;  %10658 = vmatprep.subr.bf16.mxu0 %v15477_v56  ;;  %v15532_v56 = vld [vmem:[%s18179_s8 + $0x10a4] ss:$16 sps:$4 sm:$0xff]  }
 0x1ea   : > { %10699 = vmatprep.subr.bf16.mxu1 %v15480_v57  ;;  %v15535_v57 = vld [vmem:[%s18179_s8 + $0x12a4] ss:$16 sps:$4 sm:$0xff]  }
 0x1ec   : > { %10659 = vmatpush2.bf16.msra.mxu0 %v15475_v58 }
 0x1ed   : > { %10700 = vmatpush2.bf16.msra.mxu1 %v15478_v59  ;;  %10660 = vmatprep.subr.bf16.mxu0 %v15483_v52  ;;  %v15530_v59 = vld [vmem:[%s18179_s8 + $0x10a0] ss:$16 sps:$4 sm:$0xff]  }
 0x1ee   : > { %10701 = vmatprep.subr.bf16.mxu1 %v15486_v0  ;;  %v15533_v52 = vld [vmem:[%s18179_s8 + $0x12a0] ss:$16 sps:$4 sm:$0xff]  }
 0x1f0   : > { %10661 = vmatpush2.bf16.msra.mxu0 %v15481_v1 }
 0x1f1   : > { %10702 = vmatpush2.bf16.msra.mxu1 %v15484_v2  ;;  %10662 = vmatprep.subr.bf16.mxu0 %v15489_v3 }
 0x1f2   : > { %10703 = vmatprep.subr.bf16.mxu1 %v15492_v6  ;;  %v15538_v6 = vld [vmem:[%s18179_s8 + $0x1084] ss:$16 sps:$4 sm:$0xff]  }
 0x1f4   : > { %10663 = vmatpush2.bf16.msra.mxu0 %v15487_v7  ;;  %v15541_v7 = vld [vmem:[%s18179_s8 + $0x1284] ss:$16 sps:$4 sm:$0xff]  }
 0x1f5   : > { %10704 = vmatpush2.bf16.msra.mxu1 %v15490_v8  ;;  %10664 = vmatprep.subr.bf16.mxu0 %v15495_v9  ;;  %v15536_v8 = vld [vmem:[%s18179_s8 + $0x1080] ss:$16 sps:$4 sm:$0xff]  }
 0x1f6   : > { %10705 = vmatprep.subr.bf16.mxu1 %v15498_v55  ;;  %v15539_v9 = vld [vmem:[%s18179_s8 + $0x1280] ss:$16 sps:$4 sm:$0xff]   ;;  %v15544_v55 = vld [vmem:[%s18179_s8 + $0x1064] ss:$16 sps:$4 sm:$0xff]  }
 0x1f8   : > { %10665 = vmatpush2.bf16.msra.mxu0 %v15493_v12  ;;  %v15547_v12 = vld [vmem:[%s18179_s8 + $0x1264] ss:$16 sps:$4 sm:$0xff]  }
 0x1f9   : > { %10706 = vmatpush2.bf16.msra.mxu1 %v15496_v13  ;;  %10666 = vmatprep.subr.bf16.mxu0 %v15501_v14  ;;  %v15542_v13 = vld [vmem:[%s18179_s8 + $0x1060] ss:$16 sps:$4 sm:$0xff]  }
 0x1fa   : > { %10707 = vmatprep.subr.bf16.mxu1 %v15504_v17  ;;  %v15545_v14 = vld [vmem:[%s18179_s8 + $0x1260] ss:$16 sps:$4 sm:$0xff]   ;;  %v15550_v17 = vld [vmem:[%s18179_s8 + $0x1044] ss:$16 sps:$4 sm:$0xff]  }
 0x1fc   : > { %10667 = vmatpush2.bf16.msra.mxu0 %v15499_v18  ;;  %v15553_v18 = vld [vmem:[%s18179_s8 + $0x1244] ss:$16 sps:$4 sm:$0xff]  }
 0x1fd   : > { %10708 = vmatpush2.bf16.msra.mxu1 %v15502_v21  ;;  %10668 = vmatprep.subr.bf16.mxu0 %v15507_v22  ;;  %v15548_v21 = vld [vmem:[%s18179_s8 + $0x1040] ss:$16 sps:$4 sm:$0xff]  }
 0x1fe   : > { %10709 = vmatprep.subr.bf16.mxu1 %v15510_v23  ;;  %v15551_v22 = vld [vmem:[%s18179_s8 + $0x1240] ss:$16 sps:$4 sm:$0xff]   ;;  %v15556_v23 = vld [vmem:[%s18179_s8 + $0x1024] ss:$16 sps:$4 sm:$0xff]  }
 0x200   : > { %10669 = vmatpush2.bf16.msra.mxu0 %v15505_v25  ;;  %v15559_v25 = vld [vmem:[%s18179_s8 + $0x1224] ss:$16 sps:$4 sm:$0xff]  }
 0x201   : > { %10710 = vmatpush2.bf16.msra.mxu1 %v15508_v27  ;;  %10670 = vmatprep.subr.bf16.mxu0 %v15513_v28  ;;  %v15554_v27 = vld [vmem:[%s18179_s8 + $0x1020] ss:$16 sps:$4 sm:$0xff]  }
 0x202   : > { %10711 = vmatprep.subr.bf16.mxu1 %v15516_v29  ;;  %v15557_v28 = vld [vmem:[%s18179_s8 + $0x1220] ss:$16 sps:$4 sm:$0xff]   ;;  %v15562_v29 = vld [vmem:[%s18179_s8 + $0x1004] ss:$16 sps:$4 sm:$0xff]  }
 0x204   : > { %10671 = vmatpush2.bf16.msra.mxu0 %v15511_v31  ;;  %v15560_v31 = vld [vmem:[%s18179_s8 + $0x1000] ss:$16 sps:$4 sm:$0xff]  }
 0x205   : > { %10712 = vmatpush2.bf16.msra.mxu1 %v15514_v34  ;;  %10722 = vmatprep.subr.bf16.mxu0 %v15520_v35  ;;  %v15563_v34 = vld [vmem:[%s18179_s8 + $0x1200] ss:$16 sps:$4 sm:$0xff]   ;;  %v15568_v35 = vld [vmem:[%s18179_s8 + $0x11e4] ss:$16 sps:$4 sm:$0xff]  }
 0x206   : > { %10763 = vmatprep.subr.bf16.mxu1 %v15523_v36  ;;  %v15571_v36 = vld [vmem:[%s18179_s8 + $0x13e4] ss:$16 sps:$4 sm:$0xff]  }
 0x207   : > { %v10428_v47 = vpop.f32.mrf.mxu0  ;;  %10673 = vmatmul.mubr.bf16.vlgmr.msra.gmra.mxu0 %v18607_v32 }
 0x208   : > { %v10469_v48 = vpop.f32.mrf.mxu1  ;;  %10714 = vmatmul.mubr.bf16.vlgmr.msra.gmra.mxu1 %v18617_v40  ;;  %10723 = vmatpush1.bf16.msra.mxu0 %v15518_v41  ;;  %v15566_v41 = vld [vmem:[%s18179_s8 + $0x11e0] ss:$16 sps:$4 sm:$0xff]  }
 0x209   : > { %v18631_v26 = vadd.f32 %v10469_v48, %v10428_v47  ;;  %10764 = vmatpush1.bf16.msra.mxu1 %v15521_v60  ;;  %v10430_v53 = vpop.f32.mrf.mxu0  ;;  %10724 = vmatprep.subr.bf16.mxu0 %v15526_v42  ;;  %v15569_v60 = vld [vmem:[%s18179_s8 + $0x13e0] ss:$16 sps:$4 sm:$0xff]   ;;  %v15574_v42 = vld [vmem:[%s18179_s8 + $0x11c4] ss:$16 sps:$4 sm:$0xff]  }
 0x20a   : > { %v10471_v54 = vpop.f32.mrf.mxu1  ;;  %10765 = vmatprep.subr.bf16.mxu1 %v15529_v44  ;;  %10754 = vmatprep.mubr.bf16.mxu0 %v18613_v39  ;;  %v15577_v44 = vld [vmem:[%s18179_s8 + $0x13c4] ss:$16 sps:$4 sm:$0xff]   ;;  %v15572_v47 = vld [vmem:[%s18179_s8 + $0x11c0] ss:$16 sps:$4 sm:$0xff]  }
 0x20b   : > { %v18635_v58 = vadd.f32 %v10471_v54, %v10430_v53  ;;  %10795 = vmatprep.mubr.bf16.mxu1 %v18625_v45  ;;  %v10432_v0 = vpop.f32.mrf.mxu0  ;;  %v15575_v48 = vld [vmem:[%s18179_s8 + $0x13c0] ss:$16 sps:$4 sm:$0xff]  }
 0x20c   : > { %v10473_v1 = vpop.f32.mrf.mxu1  ;;  %10725 = vmatpush1.bf16.msra.mxu0 %v15524_v49  ;;  %v15580_v49 = vld [vmem:[%s18179_s8 + $0x11a4] ss:$16 sps:$4 sm:$0xff]   ;;  %v15578_v53 = vld [vmem:[%s18179_s8 + $0x11a0] ss:$16 sps:$4 sm:$0xff]  }
 0x20d   : > { %10766 = vmatpush1.bf16.msra.mxu1 %v15527_v51  ;;  %v10433_v2 = vpop.f32.mrf.mxu0  ;;  %10726 = vmatprep.subr.bf16.mxu0 %v15532_v56  ;;  %v15583_v51 = vld [vmem:[%s18179_s8 + $0x13a4] ss:$16 sps:$4 sm:$0xff]   ;;  %v15581_v54 = vld [vmem:[%s18179_s8 + $0x13a0] ss:$16 sps:$4 sm:$0xff]  }
 0x20e   : > { %v10474_v3 = vpop.f32.mrf.mxu1  ;;  %10767 = vmatprep.subr.bf16.mxu1 %v15535_v57  ;;  %v15586_v56 = vld [vmem:[%s18179_s8 + $0x1184] ss:$16 sps:$4 sm:$0xff]   ;;  %v15590_v2 = vld [vmem:[%s18179_s8 + $0x1160] ss:$16 sps:$4 sm:$0xff]  }
 0x20f   : > { %v15589_v57 = vld [vmem:[%s18179_s8 + $0x1384] ss:$16 sps:$4 sm:$0xff]   ;;  %v15593_v3 = vld [vmem:[%s18179_s8 + $0x1360] ss:$16 sps:$4 sm:$0xff]  }
 0x210   : > { %10727 = vmatpush1.bf16.msra.mxu0 %v15530_v59  ;;  %v15584_v59 = vld [vmem:[%s18179_s8 + $0x1180] ss:$16 sps:$4 sm:$0xff]   ;;  %v15592_v0 = vld [vmem:[%s18179_s8 + $0x1164] ss:$16 sps:$4 sm:$0xff]  }
 0x211   : > { %10768 = vmatpush1.bf16.msra.mxu1 %v15533_v52  ;;  %10728 = vmatprep.subr.bf16.mxu0 %v15538_v6  ;;  %v15587_v52 = vld [vmem:[%s18179_s8 + $0x1380] ss:$16 sps:$4 sm:$0xff]   ;;  %v15595_v1 = vld [vmem:[%s18179_s8 + $0x1364] ss:$16 sps:$4 sm:$0xff]  }
 0x212   : > { %10769 = vmatprep.subr.bf16.mxu1 %v15541_v7  ;;  %v15598_v6 = vld [vmem:[%s18179_s8 + $0x1144] ss:$16 sps:$4 sm:$0xff]  }
 0x213   : > { %v15601_v7 = vld [vmem:[%s18179_s8 + $0x1344] ss:$16 sps:$4 sm:$0xff]  }
 0x214   : > { %10729 = vmatpush1.bf16.msra.mxu0 %v15536_v8  ;;  %v2470_v8 = vcombine.high %v18589_v19, %v18589_v19  ;;  %v15602_v19 = vld [vmem:[%s18179_s8 + $0x1120] ss:$16 sps:$4 sm:$0xff]  }
 0x215   : > { %10770 = vmatpush1.bf16.msra.mxu1 %v15539_v9  ;;  %10730 = vmatprep.subr.bf16.mxu0 %v15544_v55  ;;  %v15596_v9 = vld [vmem:[%s18179_s8 + $0x1140] ss:$16 sps:$4 sm:$0xff]  }
 0x216   : > { %10771 = vmatprep.subr.bf16.mxu1 %v15547_v12  ;;  %v15599_v55 = vld [vmem:[%s18179_s8 + $0x1340] ss:$16 sps:$4 sm:$0xff]   ;;  %v15604_v12 = vld [vmem:[%s18179_s8 + $0x1124] ss:$16 sps:$4 sm:$0xff]  }
 0x218   : > { %10731 = vmatpush1.bf16.msra.mxu0 %v15542_v13  ;;  %v15607_v13 = vld [vmem:[%s18179_s8 + $0x1324] ss:$16 sps:$4 sm:$0xff]  }
 0x219   : > { %10772 = vmatpush1.bf16.msra.mxu1 %v15545_v14  ;;  %10732 = vmatprep.subr.bf16.mxu0 %v15550_v17  ;;  %v18690_v14 = vrot.slane %v2470_v8, %v18295_v5  ;;  %v15605_v17 = vld [vmem:[%s18179_s8 + $0x1320] ss:$16 sps:$4 sm:$0xff]  }
 0x21a   : > { %10773 = vmatprep.subr.bf16.mxu1 %v15553_v18  ;;  %v15610_v18 = vld [vmem:[%s18179_s8 + $0x1104] ss:$16 sps:$4 sm:$0xff]   ;;  %v15635_v8 = vld [vmem:[%s18179_s8 + $0x1680] ss:$16 sps:$4 sm:$0xff]  }
 0x21c   : > { %10733 = vmatpush1.bf16.msra.mxu0 %v15548_v21  ;;  %v15613_v21 = vld [vmem:[%s18179_s8 + $0x1304] ss:$16 sps:$4 sm:$0xff]  }
 0x21d   : > { %10774 = vmatpush1.bf16.msra.mxu1 %v15551_v22  ;;  %10734 = vmatprep.subr.bf16.mxu0 %v15556_v23  ;;  %v2486_v22 = vcombine.high %v18690_v14, %v18690_v14  ;;  %v18700_v23 = vrot.slane %v18596_v24, %v18295_v5 }
 0x21e   : > { %10775 = vmatprep.subr.bf16.mxu1 %v15559_v25  ;;  %v15608_v25 = vld [vmem:[%s18179_s8 + $0x1100] ss:$16 sps:$4 sm:$0xff]  }
 0x21f   : > { %v18713_v24 = vcombine.high %v18700_v23, %v18700_v23 }
 0x220   : > { %10735 = vmatpush1.bf16.msra.mxu0 %v15554_v27  ;;  %v15611_v27 = vld [vmem:[%s18179_s8 + $0x1300] ss:$16 sps:$4 sm:$0xff]  }
 0x221   : > { %10776 = vmatpush1.bf16.msra.mxu1 %v15557_v28  ;;  %10736 = vmatprep.subr.bf16.mxu0 %v15562_v29  ;;  %v15616_v28 = vld [vmem:[%s18179_s8 + $0x14e4] ss:$16 sps:$4 sm:$0xff]  }
 0x222   : > { %10777 = vmatprep.subr.bf16.mxu1 %v15565_v30  ;;  %v15619_v29 = vld [vmem:[%s18179_s8 + $0x16e4] ss:$16 sps:$4 sm:$0xff]   ;;  %v15614_v30 = vld [vmem:[%s18179_s8 + $0x14e0] ss:$16 sps:$4 sm:$0xff]  }
 0x224   : > { %10737 = vmatpush1.bf16.msra.mxu0 %v15560_v31  ;;  %v15617_v31 = vld [vmem:[%s18179_s8 + $0x16e0] ss:$16 sps:$4 sm:$0xff]  }
 0x225   : > { %10778 = vmatpush1.bf16.msra.mxu1 %v15563_v34  ;;  %10738 = vmatprep.subr.bf16.mxu0 %v15568_v35  ;;  %v18709_v34 = vrot.slane %v2486_v22, %v18295_v5  ;;  %v15622_v35 = vld [vmem:[%s18179_s8 + $0x14c4] ss:$16 sps:$4 sm:$0xff]  }
 0x226   : > { %10779 = vmatprep.subr.bf16.mxu1 %v15571_v36  ;;  %v15625_v36 = vld [vmem:[%s18179_s8 + $0x16c4] ss:$16 sps:$4 sm:$0xff]  }
 0x227   : > { %v15652_v22 = vld [vmem:[%s18179_s8 + $0x1424] ss:$16 sps:$4 sm:$0xff]  }
 0x228   : > { %10739 = vmatpush2.bf16.msra.mxu0 %v15566_v41  ;;  %v15620_v41 = vld [vmem:[%s18179_s8 + $0x14c0] ss:$16 sps:$4 sm:$0xff]  }
 0x229   : > { %10780 = vmatpush2.bf16.msra.mxu1 %v15569_v60  ;;  %10740 = vmatprep.subr.bf16.mxu0 %v15574_v42  ;;  %v15623_v60 = vld [vmem:[%s18179_s8 + $0x16c0] ss:$16 sps:$4 sm:$0xff]   ;;  %v18721_v42 = vcombine.high %v18709_v34, %v18709_v34 }
 0x22a   : > { %10781 = vmatprep.subr.bf16.mxu1 %v15577_v44 }
 0x22c   : > { %10741 = vmatpush2.bf16.msra.mxu0 %v15572_v47 }
 0x22d   : > { %10782 = vmatpush2.bf16.msra.mxu1 %v15575_v48  ;;  %10742 = vmatprep.subr.bf16.mxu0 %v15580_v49 }
 0x22e   : > { %10783 = vmatprep.subr.bf16.mxu1 %v15583_v51 }
 0x230   : > { %10743 = vmatpush2.bf16.msra.mxu0 %v15578_v53  ;;  %v15628_v53 = vld [vmem:[%s18179_s8 + $0x14a4] ss:$16 sps:$4 sm:$0xff]  }
 0x231   : > { %10784 = vmatpush2.bf16.msra.mxu1 %v15581_v54  ;;  %10744 = vmatprep.subr.bf16.mxu0 %v15586_v56  ;;  %v15631_v54 = vld [vmem:[%s18179_s8 + $0x16a4] ss:$16 sps:$4 sm:$0xff]  }
 0x232   : > { %10785 = vmatprep.subr.bf16.mxu1 %v15589_v57 }
 0x234   : > { %10745 = vmatpush2.bf16.msra.mxu0 %v15584_v59  ;;  %v15626_v59 = vld [vmem:[%s18179_s8 + $0x14a0] ss:$16 sps:$4 sm:$0xff]  }
 0x235   : > { %10786 = vmatpush2.bf16.msra.mxu1 %v15587_v52  ;;  %10746 = vmatprep.subr.bf16.mxu0 %v15592_v0  ;;  %v15629_v52 = vld [vmem:[%s18179_s8 + $0x16a0] ss:$16 sps:$4 sm:$0xff]  }
 0x236   : > { %10787 = vmatprep.subr.bf16.mxu1 %v15595_v1 }
 0x238   : > { %10747 = vmatpush2.bf16.msra.mxu0 %v15590_v2 }
 0x239   : > { %10788 = vmatpush2.bf16.msra.mxu1 %v15593_v3  ;;  %10748 = vmatprep.subr.bf16.mxu0 %v15598_v6  ;;  %v15637_v6 = vld [vmem:[%s18179_s8 + $0x1684] ss:$16 sps:$4 sm:$0xff]  }
 0x23a   : > { %10789 = vmatprep.subr.bf16.mxu1 %v15601_v7  ;;  %v15632_v7 = vld [vmem:[%s18179_s8 + $0x1480] ss:$16 sps:$4 sm:$0xff]  }
 0x23c   : > { %10749 = vmatpush2.bf16.msra.mxu0 %v15596_v9  ;;  %v15640_v9 = vld [vmem:[%s18179_s8 + $0x1464] ss:$16 sps:$4 sm:$0xff]  }
 0x23d   : > { %10790 = vmatpush2.bf16.msra.mxu1 %v15599_v55  ;;  %10750 = vmatprep.subr.bf16.mxu0 %v15604_v12  ;;  %v15643_v55 = vld [vmem:[%s18179_s8 + $0x1664] ss:$16 sps:$4 sm:$0xff]   ;;  %v15638_v12 = vld [vmem:[%s18179_s8 + $0x1460] ss:$16 sps:$4 sm:$0xff]  }
 0x23e   : > { %10791 = vmatprep.subr.bf16.mxu1 %v15607_v13  ;;  %v15641_v13 = vld [vmem:[%s18179_s8 + $0x1660] ss:$16 sps:$4 sm:$0xff]  }
 0x240   : > { %10751 = vmatpush2.bf16.msra.mxu0 %v15602_v19  ;;  %v15646_v19 = vld [vmem:[%s18179_s8 + $0x1444] ss:$16 sps:$4 sm:$0xff]  }
 0x241   : > { %10792 = vmatpush2.bf16.msra.mxu1 %v15605_v17  ;;  %10752 = vmatprep.subr.bf16.mxu0 %v15610_v18  ;;  %v15649_v17 = vld [vmem:[%s18179_s8 + $0x1644] ss:$16 sps:$4 sm:$0xff]   ;;  %v15644_v18 = vld [vmem:[%s18179_s8 + $0x1440] ss:$16 sps:$4 sm:$0xff]  }
 0x242   : > { %10793 = vmatprep.subr.bf16.mxu1 %v15613_v21  ;;  %v15647_v21 = vld [vmem:[%s18179_s8 + $0x1640] ss:$16 sps:$4 sm:$0xff]  }
 0x244   : > { %10753 = vmatpush2.bf16.msra.mxu0 %v15608_v25  ;;  %v15655_v25 = vld [vmem:[%s18179_s8 + $0x1624] ss:$16 sps:$4 sm:$0xff]  }
 0x245   : > { %10794 = vmatpush2.bf16.msra.mxu1 %v15611_v27  ;;  %10804 = vmatprep.subr.bf16.mxu0 %v15616_v28  ;;  %v15650_v27 = vld [vmem:[%s18179_s8 + $0x1420] ss:$16 sps:$4 sm:$0xff]  }
 0x246   : > { %10845 = vmatprep.subr.bf16.mxu1 %v15619_v29  ;;  %v15653_v28 = vld [vmem:[%s18179_s8 + $0x1620] ss:$16 sps:$4 sm:$0xff]   ;;  %v15658_v29 = vld [vmem:[%s18179_s8 + $0x1404] ss:$16 sps:$4 sm:$0xff]  }
 0x247   : > { %v10510_v44 = vpop.f32.mrf.mxu0  ;;  %10755 = vmatmul.mubr.bf16.vlgmr.msra.gmra.mxu0 %v18700_v23 }
 0x248   : > { %v10551_v47 = vpop.f32.mrf.mxu1  ;;  %10796 = vmatmul.mubr.bf16.vlgmr.msra.gmra.mxu1 %v18713_v24  ;;  %v10511_v48 = vadd.f32 %v10510_v44, %v18631_v26  ;;  %10805 = vmatpush1.bf16.msra.mxu0 %v15614_v30  ;;  %v15661_v30 = vld [vmem:[%s18179_s8 + $0x1604] ss:$16 sps:$4 sm:$0xff]   ;;  %v15665_v44 = vld [vmem:[%s18179_s8 + $0x17e0] ss:$16 sps:$4 sm:$0xff]  }
 0x249   : > { %10846 = vmatpush1.bf16.msra.mxu1 %v15617_v31  ;;  %v10512_v49 = vpop.f32.mrf.mxu0  ;;  %10806 = vmatprep.subr.bf16.mxu0 %v15622_v35  ;;  %v15656_v31 = vld [vmem:[%s18179_s8 + $0x1400] ss:$16 sps:$4 sm:$0xff]  }
 0x24a   : > { %v10553_v51 = vpop.f32.mrf.mxu1  ;;  %10847 = vmatprep.subr.bf16.mxu1 %v15625_v36  ;;  %v18728_v56 = vadd.f32 %v10551_v47, %v10511_v48  ;;  %v10513_v57 = vadd.f32 %v10512_v49, %v18635_v58  ;;  %10836 = vmatprep.mubr.bf16.mxu0 %v18709_v34  ;;  %v15634_v58 = vld [vmem:[%s18179_s8 + $0x1484] ss:$16 sps:$4 sm:$0xff]   ;;  %v15659_v35 = vld [vmem:[%s18179_s8 + $0x1600] ss:$16 sps:$4 sm:$0xff]  }
 0x24b   : > { %10877 = vmatprep.mubr.bf16.mxu1 %v18721_v42  ;;  %v10514_v26 = vpop.f32.mrf.mxu0  ;;  %v15664_v36 = vld [vmem:[%s18179_s8 + $0x15e4] ss:$16 sps:$4 sm:$0xff]   ;;  %v15668_v49 = vld [vmem:[%s18179_s8 + $0x15c0] ss:$16 sps:$4 sm:$0xff]  }
 0x24c   : > { %v10555_v0 = vpop.f32.mrf.mxu1  ;;  %v18735_v1 = vadd.f32 %v10553_v51, %v10513_v57  ;;  %10807 = vmatpush1.bf16.msra.mxu0 %v15620_v41  ;;  %v15667_v41 = vld [vmem:[%s18179_s8 + $0x17e4] ss:$16 sps:$4 sm:$0xff]   ;;  %v15671_v51 = vld [vmem:[%s18179_s8 + $0x17c0] ss:$16 sps:$4 sm:$0xff]  }
 0x24d   : > { %10848 = vmatpush1.bf16.msra.mxu1 %v15623_v60  ;;  %v10515_v2 = vpop.f32.mrf.mxu0  ;;  %10808 = vmatprep.subr.bf16.mxu0 %v15628_v53  ;;  %v15662_v60 = vld [vmem:[%s18179_s8 + $0x15e0] ss:$16 sps:$4 sm:$0xff]   ;;  %v15670_v47 = vld [vmem:[%s18179_s8 + $0x15c4] ss:$16 sps:$4 sm:$0xff]  }
 0x24e   : > { %v10556_v3 = vpop.f32.mrf.mxu1  ;;  %10849 = vmatprep.subr.bf16.mxu1 %v15631_v54  ;;  %v15673_v48 = vld [vmem:[%s18179_s8 + $0x17c4] ss:$16 sps:$4 sm:$0xff]   ;;  %v15674_v57 = vld [vmem:[%s18179_s8 + $0x15a0] ss:$16 sps:$4 sm:$0xff]  }
 0x24f   : > { %v15676_v53 = vld [vmem:[%s18179_s8 + $0x15a4] ss:$16 sps:$4 sm:$0xff]   ;;  %v15680_v0 = vld [vmem:[%s18179_s8 + $0x1580] ss:$16 sps:$4 sm:$0xff]  }
 0x250   : > { %10809 = vmatpush1.bf16.msra.mxu0 %v15626_v59  ;;  %v15679_v54 = vld [vmem:[%s18179_s8 + $0x17a4] ss:$16 sps:$4 sm:$0xff]   ;;  %v15677_v59 = vld [vmem:[%s18179_s8 + $0x17a0] ss:$16 sps:$4 sm:$0xff]  }
 0x251   : > { %10850 = vmatpush1.bf16.msra.mxu1 %v15629_v52  ;;  %10810 = vmatprep.subr.bf16.mxu0 %v15634_v58  ;;  %v15682_v52 = vld [vmem:[%s18179_s8 + $0x1584] ss:$16 sps:$4 sm:$0xff]   ;;  %v15683_v2 = vld [vmem:[%s18179_s8 + $0x1780] ss:$16 sps:$4 sm:$0xff]  }
 0x252   : > { %10851 = vmatprep.subr.bf16.mxu1 %v15637_v6  ;;  %v15685_v26 = vld [vmem:[%s18179_s8 + $0x1784] ss:$16 sps:$4 sm:$0xff]   ;;  %v15686_v6 = vld [vmem:[%s18179_s8 + $0x1560] ss:$16 sps:$4 sm:$0xff]  }
 0x253   : > { %v15688_v3 = vld [vmem:[%s18179_s8 + $0x1564] ss:$16 sps:$4 sm:$0xff]  }
 0x254   : > { %10811 = vmatpush1.bf16.msra.mxu0 %v15632_v7  ;;  %v15691_v58 = vld [vmem:[%s18179_s8 + $0x1764] ss:$16 sps:$4 sm:$0xff]   ;;  %v15689_v7 = vld [vmem:[%s18179_s8 + $0x1760] ss:$16 sps:$4 sm:$0xff]  }
 0x255   : > { %10852 = vmatpush1.bf16.msra.mxu1 %v15635_v8  ;;  %10812 = vmatprep.subr.bf16.mxu0 %v15640_v9  ;;  %v15694_v8 = vld [vmem:[%s18179_s8 + $0x1544] ss:$16 sps:$4 sm:$0xff]  }
 0x256   : > { %10853 = vmatprep.subr.bf16.mxu1 %v15643_v55  ;;  %v15697_v9 = vld [vmem:[%s18179_s8 + $0x1744] ss:$16 sps:$4 sm:$0xff]  }
 0x257   : > { %v18780_v55 = vld [vmem:[%s18244_s10 + $0x18] sm:$0xff] }
 0x258   : > { %10813 = vmatpush1.bf16.msra.mxu0 %v15638_v12  ;;  %v15692_v12 = vld [vmem:[%s18179_s8 + $0x1540] ss:$16 sps:$4 sm:$0xff]  }
 0x259   : > { %10854 = vmatpush1.bf16.msra.mxu1 %v15641_v13  ;;  %10814 = vmatprep.subr.bf16.mxu0 %v15646_v19  ;;  %v15695_v13 = vld [vmem:[%s18179_s8 + $0x1740] ss:$16 sps:$4 sm:$0xff]   ;;  %v15700_v19 = vld [vmem:[%s18179_s8 + $0x1524] ss:$16 sps:$4 sm:$0xff]  }
 0x25a   : > { %10855 = vmatprep.subr.bf16.mxu1 %v15649_v17  ;;  %v15703_v17 = vld [vmem:[%s18179_s8 + $0x1724] ss:$16 sps:$4 sm:$0xff]  }
 0x25c   : > { %10815 = vmatpush1.bf16.msra.mxu0 %v15644_v18  ;;  %v18788_v18 = vrot.slane %v18780_v55, %v18295_v5 }
 0x25d   : > { %10856 = vmatpush1.bf16.msra.mxu1 %v15647_v21  ;;  %10816 = vmatprep.subr.bf16.mxu0 %v15652_v22  ;;  %v15698_v21 = vld [vmem:[%s18179_s8 + $0x1520] ss:$16 sps:$4 sm:$0xff]  }
 0x25e   : > { %10857 = vmatprep.subr.bf16.mxu1 %v15655_v25  ;;  %v15701_v22 = vld [vmem:[%s18179_s8 + $0x1720] ss:$16 sps:$4 sm:$0xff]   ;;  %v15706_v25 = vld [vmem:[%s18179_s8 + $0x1504] ss:$16 sps:$4 sm:$0xff]  }
 0x260   : > { %10817 = vmatpush1.bf16.msra.mxu0 %v15650_v27  ;;  %v15709_v27 = vld [vmem:[%s18179_s8 + $0x1704] ss:$16 sps:$4 sm:$0xff]  }
 0x261   : > { %10858 = vmatpush1.bf16.msra.mxu1 %v15653_v28  ;;  %10818 = vmatprep.subr.bf16.mxu0 %v15658_v29  ;;  %v2534_v28 = vcombine.high %v18788_v18, %v18788_v18  ;;  %v18798_v29 = vrot.slane %v18690_v14, %v18295_v5 }
 0x262   : > { %10859 = vmatprep.subr.bf16.mxu1 %v15661_v30  ;;  %v15704_v30 = vld [vmem:[%s18179_s8 + $0x1500] ss:$16 sps:$4 sm:$0xff]  }
 0x263   : > { %v18811_v14 = vcombine.high %v18798_v29, %v18798_v29 }
 0x264   : > { %10819 = vmatpush1.bf16.msra.mxu0 %v15656_v31  ;;  %v15707_v31 = vld [vmem:[%s18179_s8 + $0x1700] ss:$16 sps:$4 sm:$0xff]  }
 0x265   : > { %10860 = vmatpush1.bf16.msra.mxu1 %v15659_v35  ;;  %10820 = vmatprep.subr.bf16.mxu0 %v15664_v36  ;;  %v15713_v35 = vld [vmem:[%s18179_s8 + $0x18e4] ss:$16 sps:$4 sm:$0xff]  }
 0x266   : > { %10861 = vmatprep.subr.bf16.mxu1 %v15667_v41  ;;  %v15716_v36 = vld [vmem:[%s18179_s8 + $0x1ae4] ss:$16 sps:$4 sm:$0xff]   ;;  %v15711_v41 = vld [vmem:[%s18179_s8 + $0x18e0] ss:$16 sps:$4 sm:$0xff]  }
 0x268   : > { %10821 = vmatpush2.bf16.msra.mxu0 %v15662_v60  ;;  %v15714_v60 = vld [vmem:[%s18179_s8 + $0x1ae0] ss:$16 sps:$4 sm:$0xff]  }
 0x269   : > { %10862 = vmatpush2.bf16.msra.mxu1 %v15665_v44  ;;  %10822 = vmatprep.subr.bf16.mxu0 %v15670_v47  ;;  %v18807_v44 = vrot.slane %v2534_v28, %v18295_v5  ;;  %v15719_v47 = vld [vmem:[%s18179_s8 + $0x18c4] ss:$16 sps:$4 sm:$0xff]   ;;  %v15738_v28 = vld [vmem:[%s18179_s8 + $0x1a60] ss:$16 sps:$4 sm:$0xff]  }
 0x26a   : > { %10863 = vmatprep.subr.bf16.mxu1 %v15673_v48  ;;  %v15722_v48 = vld [vmem:[%s18179_s8 + $0x1ac4] ss:$16 sps:$4 sm:$0xff]  }
 0x26c   : > { %10823 = vmatpush2.bf16.msra.mxu0 %v15668_v49  ;;  %v15717_v49 = vld [vmem:[%s18179_s8 + $0x18c0] ss:$16 sps:$4 sm:$0xff]  }
 0x26d   : > { %10864 = vmatpush2.bf16.msra.mxu1 %v15671_v51  ;;  %10824 = vmatprep.subr.bf16.mxu0 %v15676_v53  ;;  %v15720_v51 = vld [vmem:[%s18179_s8 + $0x1ac0] ss:$16 sps:$4 sm:$0xff]   ;;  %v18819_v53 = vcombine.high %v18807_v44, %v18807_v44 }
 0x26e   : > { %10865 = vmatprep.subr.bf16.mxu1 %v15679_v54 }
 0x270   : > { %10825 = vmatpush2.bf16.msra.mxu0 %v15674_v57 }
 0x271   : > { %10866 = vmatpush2.bf16.msra.mxu1 %v15677_v59  ;;  %10826 = vmatprep.subr.bf16.mxu0 %v15682_v52 }
 0x272   : > { %10867 = vmatprep.subr.bf16.mxu1 %v15685_v26 }
 0x274   : > { %10827 = vmatpush2.bf16.msra.mxu0 %v15680_v0  ;;  %v15725_v0 = vld [vmem:[%s18179_s8 + $0x18a4] ss:$16 sps:$4 sm:$0xff]  }
 0x275   : > { %10868 = vmatpush2.bf16.msra.mxu1 %v15683_v2  ;;  %10828 = vmatprep.subr.bf16.mxu0 %v15688_v3  ;;  %v15728_v2 = vld [vmem:[%s18179_s8 + $0x1aa4] ss:$16 sps:$4 sm:$0xff]  }
 0x276   : > { %10869 = vmatprep.subr.bf16.mxu1 %v15691_v58 }
 0x278   : > { %10829 = vmatpush2.bf16.msra.mxu0 %v15686_v6  ;;  %v15723_v6 = vld [vmem:[%s18179_s8 + $0x18a0] ss:$16 sps:$4 sm:$0xff]  }
 0x279   : > { %10870 = vmatpush2.bf16.msra.mxu1 %v15689_v7  ;;  %10830 = vmatprep.subr.bf16.mxu0 %v15694_v8  ;;  %v15726_v7 = vld [vmem:[%s18179_s8 + $0x1aa0] ss:$16 sps:$4 sm:$0xff]  }
 0x27a   : > { %10871 = vmatprep.subr.bf16.mxu1 %v15697_v9 }
 0x27c   : > { %10831 = vmatpush2.bf16.msra.mxu0 %v15692_v12 }
 0x27d   : > { %10872 = vmatpush2.bf16.msra.mxu1 %v15695_v13  ;;  %10832 = vmatprep.subr.bf16.mxu0 %v15700_v19  ;;  %v15734_v19 = vld [vmem:[%s18179_s8 + $0x1a84] ss:$16 sps:$4 sm:$0xff]  }
 0x27e   : > { %10873 = vmatprep.subr.bf16.mxu1 %v15703_v17  ;;  %v15729_v17 = vld [vmem:[%s18179_s8 + $0x1880] ss:$16 sps:$4 sm:$0xff]  }
 0x280   : > { %10833 = vmatpush2.bf16.msra.mxu0 %v15698_v21  ;;  %v15732_v21 = vld [vmem:[%s18179_s8 + $0x1a80] ss:$16 sps:$4 sm:$0xff]  }
 0x281   : > { %10874 = vmatpush2.bf16.msra.mxu1 %v15701_v22  ;;  %10834 = vmatprep.subr.bf16.mxu0 %v15706_v25  ;;  %v15737_v22 = vld [vmem:[%s18179_s8 + $0x1864] ss:$16 sps:$4 sm:$0xff]  }
 0x282   : > { %10875 = vmatprep.subr.bf16.mxu1 %v15709_v27  ;;  %v15740_v25 = vld [vmem:[%s18179_s8 + $0x1a64] ss:$16 sps:$4 sm:$0xff]   ;;  %v15735_v27 = vld [vmem:[%s18179_s8 + $0x1860] ss:$16 sps:$4 sm:$0xff]  }
 0x284   : > { %10835 = vmatpush2.bf16.msra.mxu0 %v15704_v30  ;;  %v15743_v30 = vld [vmem:[%s18179_s8 + $0x1844] ss:$16 sps:$4 sm:$0xff]  }
 0x285   : > { %10876 = vmatpush2.bf16.msra.mxu1 %v15707_v31  ;;  %10886 = vmatprep.subr.bf16.mxu0 %v15713_v35  ;;  %v15746_v31 = vld [vmem:[%s18179_s8 + $0x1a44] ss:$16 sps:$4 sm:$0xff]   ;;  %v15741_v35 = vld [vmem:[%s18179_s8 + $0x1840] ss:$16 sps:$4 sm:$0xff]  }
 0x286   : > { %10927 = vmatprep.subr.bf16.mxu1 %v15716_v36  ;;  %v15744_v36 = vld [vmem:[%s18179_s8 + $0x1a40] ss:$16 sps:$4 sm:$0xff]  }
 0x287   : > { %v10592_v54 = vpop.f32.mrf.mxu0  ;;  %10837 = vmatmul.mubr.bf16.vlgmr.msra.gmra.mxu0 %v18798_v29 }
 0x288   : > { %v10633_v57 = vpop.f32.mrf.mxu1  ;;  %10878 = vmatmul.mubr.bf16.vlgmr.msra.gmra.mxu1 %v18811_v14  ;;  %v10593_v59 = vadd.f32 %v10592_v54, %v18728_v56  ;;  %10887 = vmatpush1.bf16.msra.mxu0 %v15711_v41  ;;  %v15749_v41 = vld [vmem:[%s18179_s8 + $0x1824] ss:$16 sps:$4 sm:$0xff]   ;;  %v15753_v54 = vld [vmem:[%s18179_s8 + $0x1800] ss:$16 sps:$4 sm:$0xff]  }
 0x289   : > { %10928 = vmatpush1.bf16.msra.mxu1 %v15714_v60  ;;  %v10594_v52 = vpop.f32.mrf.mxu0  ;;  %10888 = vmatprep.subr.bf16.mxu0 %v15719_v47  ;;  %v15752_v60 = vld [vmem:[%s18179_s8 + $0x1a24] ss:$16 sps:$4 sm:$0xff]   ;;  %v15747_v47 = vld [vmem:[%s18179_s8 + $0x1820] ss:$16 sps:$4 sm:$0xff]  }
 0x28a   : > { %v10635_v26 = vpop.f32.mrf.mxu1  ;;  %10929 = vmatprep.subr.bf16.mxu1 %v15722_v48  ;;  %v18826_v3 = vadd.f32 %v10633_v57, %v10593_v59  ;;  %v10595_v58 = vadd.f32 %v10594_v52, %v18735_v1  ;;  %10918 = vmatprep.mubr.bf16.mxu0 %v18807_v44  ;;  %v15731_v1 = vld [vmem:[%s18179_s8 + $0x1884] ss:$16 sps:$4 sm:$0xff]   ;;  %v15750_v48 = vld [vmem:[%s18179_s8 + $0x1a20] ss:$16 sps:$4 sm:$0xff]  }
 0x28b   : > { %10959 = vmatprep.mubr.bf16.mxu1 %v18819_v53  ;;  %v10596_v56 = vpop.f32.mrf.mxu0  ;;  %v15756_v57 = vld [vmem:[%s18179_s8 + $0x1a00] ss:$16 sps:$4 sm:$0xff]   ;;  %v15761_v59 = vld [vmem:[%s18179_s8 + $0x19e4] ss:$16 sps:$4 sm:$0xff]  }
 0x28c   : > { %v10637_v8 = vpop.f32.mrf.mxu1  ;;  %v18833_v9 = vadd.f32 %v10635_v26, %v10595_v58  ;;  %10889 = vmatpush1.bf16.msra.mxu0 %v15717_v49  ;;  %v15755_v49 = vld [vmem:[%s18179_s8 + $0x1804] ss:$16 sps:$4 sm:$0xff]   ;;  %v15759_v26 = vld [vmem:[%s18179_s8 + $0x19e0] ss:$16 sps:$4 sm:$0xff]  }
 0x28d   : > { %10930 = vmatpush1.bf16.msra.mxu1 %v15720_v51  ;;  %v10597_v12 = vpop.f32.mrf.mxu0  ;;  %10890 = vmatprep.subr.bf16.mxu0 %v15725_v0  ;;  %v15758_v51 = vld [vmem:[%s18179_s8 + $0x1a04] ss:$16 sps:$4 sm:$0xff]   ;;  %v15762_v0 = vld [vmem:[%s18179_s8 + $0x1be0] ss:$16 sps:$4 sm:$0xff]  }
 0x28e   : > { %v10638_v13 = vpop.f32.mrf.mxu1  ;;  %10931 = vmatprep.subr.bf16.mxu1 %v15728_v2  ;;  %v15764_v52 = vld [vmem:[%s18179_s8 + $0x1be4] ss:$16 sps:$4 sm:$0xff]   ;;  %v15771_v12 = vld [vmem:[%s18179_s8 + $0x19a0] ss:$16 sps:$4 sm:$0xff]  }
 0x28f   : > { %v15767_v2 = vld [vmem:[%s18179_s8 + $0x19c4] ss:$16 sps:$4 sm:$0xff]   ;;  %v15774_v13 = vld [vmem:[%s18179_s8 + $0x1ba0] ss:$16 sps:$4 sm:$0xff]  }
 0x290   : > { %10891 = vmatpush1.bf16.msra.mxu0 %v15723_v6  ;;  %v15770_v58 = vld [vmem:[%s18179_s8 + $0x1bc4] ss:$16 sps:$4 sm:$0xff]   ;;  %v15765_v6 = vld [vmem:[%s18179_s8 + $0x19c0] ss:$16 sps:$4 sm:$0xff]  }
 0x291   : > { %10932 = vmatpush1.bf16.msra.mxu1 %v15726_v7  ;;  %10892 = vmatprep.subr.bf16.mxu0 %v15731_v1  ;;  %v15768_v7 = vld [vmem:[%s18179_s8 + $0x1bc0] ss:$16 sps:$4 sm:$0xff]   ;;  %v15773_v56 = vld [vmem:[%s18179_s8 + $0x19a4] ss:$16 sps:$4 sm:$0xff]  }
 0x292   : > { %10933 = vmatprep.subr.bf16.mxu1 %v15734_v19  ;;  %v15776_v8 = vld [vmem:[%s18179_s8 + $0x1ba4] ss:$16 sps:$4 sm:$0xff]  }
 0x293   : > { %v15779_v1 = vld [vmem:[%s18179_s8 + $0x1984] ss:$16 sps:$4 sm:$0xff]  }
 0x294   : > { %10893 = vmatpush1.bf16.msra.mxu0 %v15729_v17  ;;  %v15782_v19 = vld [vmem:[%s18179_s8 + $0x1b84] ss:$16 sps:$4 sm:$0xff]   ;;  %v15777_v17 = vld [vmem:[%s18179_s8 + $0x1980] ss:$16 sps:$4 sm:$0xff]  }
 0x295   : > { %10934 = vmatpush1.bf16.msra.mxu1 %v15732_v21  ;;  %10894 = vmatprep.subr.bf16.mxu0 %v15737_v22  ;;  %v15780_v21 = vld [vmem:[%s18179_s8 + $0x1b80] ss:$16 sps:$4 sm:$0xff]   ;;  %v15785_v22 = vld [vmem:[%s18179_s8 + $0x1964] ss:$16 sps:$4 sm:$0xff]  }
 0x296   : > { %10935 = vmatprep.subr.bf16.mxu1 %v15740_v25  ;;  %v15788_v25 = vld [vmem:[%s18179_s8 + $0x1b64] ss:$16 sps:$4 sm:$0xff]  }
 0x298   : > { %10895 = vmatpush1.bf16.msra.mxu0 %v15735_v27  ;;  %v15783_v27 = vld [vmem:[%s18179_s8 + $0x1960] ss:$16 sps:$4 sm:$0xff]  }
 0x299   : > { %10936 = vmatpush1.bf16.msra.mxu1 %v15738_v28  ;;  %10896 = vmatprep.subr.bf16.mxu0 %v15743_v30  ;;  %v15786_v28 = vld [vmem:[%s18179_s8 + $0x1b60] ss:$16 sps:$4 sm:$0xff]   ;;  %v15791_v30 = vld [vmem:[%s18179_s8 + $0x1944] ss:$16 sps:$4 sm:$0xff]  }
 0x29a   : > { %10937 = vmatprep.subr.bf16.mxu1 %v15746_v31  ;;  %v15794_v31 = vld [vmem:[%s18179_s8 + $0x1b44] ss:$16 sps:$4 sm:$0xff]  }
 0x29c   : > { %10897 = vmatpush1.bf16.msra.mxu0 %v15741_v35  ;;  %v2519_v35 = vcombine.high %v18780_v55, %v18780_v55  ;;  %v15795_v55 = vld [vmem:[%s18179_s8 + $0x1920] ss:$16 sps:$4 sm:$0xff]  }
 0x29d   : > { %10938 = vmatpush1.bf16.msra.mxu1 %v15744_v36  ;;  %10898 = vmatprep.subr.bf16.mxu0 %v15749_v41  ;;  %v15789_v36 = vld [vmem:[%s18179_s8 + $0x1940] ss:$16 sps:$4 sm:$0xff]  }
 0x29e   : > { %10939 = vmatprep.subr.bf16.mxu1 %v15752_v60  ;;  %v15792_v41 = vld [vmem:[%s18179_s8 + $0x1b40] ss:$16 sps:$4 sm:$0xff]   ;;  %v15797_v60 = vld [vmem:[%s18179_s8 + $0x1924] ss:$16 sps:$4 sm:$0xff]  }
 0x2a0   : > { %10899 = vmatpush1.bf16.msra.mxu0 %v15747_v47  ;;  %v15800_v47 = vld [vmem:[%s18179_s8 + $0x1b24] ss:$16 sps:$4 sm:$0xff]  }
 0x2a1   : > { %10940 = vmatpush1.bf16.msra.mxu1 %v15750_v48  ;;  %10900 = vmatprep.subr.bf16.mxu0 %v15755_v49  ;;  %v18884_v48 = vrot.slane %v2519_v35, %v18295_v5  ;;  %v15798_v49 = vld [vmem:[%s18179_s8 + $0x1b20] ss:$16 sps:$4 sm:$0xff]  }
 0x2a2   : > { %10941 = vmatprep.subr.bf16.mxu1 %v15758_v51  ;;  %v15803_v51 = vld [vmem:[%s18179_s8 + $0x1904] ss:$16 sps:$4 sm:$0xff]   ;;  %v15819_v35 = vld [vmem:[%s18179_s8 + $0x1ca0] ss:$16 sps:$4 sm:$0xff]  }
 0x2a4   : > { %10901 = vmatpush1.bf16.msra.mxu0 %v15753_v54  ;;  %v15806_v54 = vld [vmem:[%s18179_s8 + $0x1b04] ss:$16 sps:$4 sm:$0xff]  }
 0x2a5   : > { %10942 = vmatpush1.bf16.msra.mxu1 %v15756_v57  ;;  %10902 = vmatprep.subr.bf16.mxu0 %v15761_v59  ;;  %v2535_v57 = vcombine.high %v18884_v48, %v18884_v48  ;;  %v18894_v59 = vrot.slane %v18788_v18, %v18295_v5 }
 0x2a6   : > { %10943 = vmatprep.subr.bf16.mxu1 %v15764_v52  ;;  %v15801_v52 = vld [vmem:[%s18179_s8 + $0x1900] ss:$16 sps:$4 sm:$0xff]  }
 0x2a7   : > { %v18907_v18 = vcombine.high %v18894_v59, %v18894_v59 }
 0x2a8   : > { %10903 = vmatpush2.bf16.msra.mxu0 %v15759_v26  ;;  %v15804_v26 = vld [vmem:[%s18179_s8 + $0x1b00] ss:$16 sps:$4 sm:$0xff]  }
 0x2a9   : > { %10944 = vmatpush2.bf16.msra.mxu1 %v15762_v0  ;;  %10904 = vmatprep.subr.bf16.mxu0 %v15767_v2  ;;  %v15809_v0 = vld [vmem:[%s18179_s8 + $0x1ce4] ss:$16 sps:$4 sm:$0xff]  }
 0x2aa   : > { %10945 = vmatprep.subr.bf16.mxu1 %v15770_v58  ;;  %v15812_v2 = vld [vmem:[%s18179_s8 + $0x1ee4] ss:$16 sps:$4 sm:$0xff]   ;;  %v15807_v58 = vld [vmem:[%s18179_s8 + $0x1ce0] ss:$16 sps:$4 sm:$0xff]  }
 0x2ac   : > { %10905 = vmatpush2.bf16.msra.mxu0 %v15765_v6  ;;  %v15810_v6 = vld [vmem:[%s18179_s8 + $0x1ee0] ss:$16 sps:$4 sm:$0xff]  }
 0x2ad   : > { %10946 = vmatpush2.bf16.msra.mxu1 %v15768_v7  ;;  %10906 = vmatprep.subr.bf16.mxu0 %v15773_v56  ;;  %v18903_v7 = vrot.slane %v2535_v57, %v18295_v5  ;;  %v15815_v56 = vld [vmem:[%s18179_s8 + $0x1cc4] ss:$16 sps:$4 sm:$0xff]  }
 0x2ae   : > { %10947 = vmatprep.subr.bf16.mxu1 %v15776_v8  ;;  %v15818_v8 = vld [vmem:[%s18179_s8 + $0x1ec4] ss:$16 sps:$4 sm:$0xff]  }
 0x2af   : > { %v15833_v57 = vld [vmem:[%s18179_s8 + $0x1c64] ss:$16 sps:$4 sm:$0xff]  }
 0x2b0   : > { %10907 = vmatpush2.bf16.msra.mxu0 %v15771_v12  ;;  %v15813_v12 = vld [vmem:[%s18179_s8 + $0x1cc0] ss:$16 sps:$4 sm:$0xff]  }
 0x2b1   : > { %10948 = vmatpush2.bf16.msra.mxu1 %v15774_v13  ;;  %10908 = vmatprep.subr.bf16.mxu0 %v15779_v1  ;;  %v15816_v13 = vld [vmem:[%s18179_s8 + $0x1ec0] ss:$16 sps:$4 sm:$0xff]   ;;  %v18915_v1 = vcombine.high %v18903_v7, %v18903_v7 }
 0x2b2   : > { %10949 = vmatprep.subr.bf16.mxu1 %v15782_v19 }
 0x2b4   : > { %10909 = vmatpush2.bf16.msra.mxu0 %v15777_v17 }
 0x2b5   : > { %10950 = vmatpush2.bf16.msra.mxu1 %v15780_v21  ;;  %10910 = vmatprep.subr.bf16.mxu0 %v15785_v22 }
 0x2b6   : > { %10951 = vmatprep.subr.bf16.mxu1 %v15788_v25 }
 0x2b8   : > { %10911 = vmatpush2.bf16.msra.mxu0 %v15783_v27  ;;  %v15821_v27 = vld [vmem:[%s18179_s8 + $0x1ca4] ss:$16 sps:$4 sm:$0xff]  }
 0x2b9   : > { %10952 = vmatpush2.bf16.msra.mxu1 %v15786_v28  ;;  %10912 = vmatprep.subr.bf16.mxu0 %v15791_v30  ;;  %v15824_v28 = vld [vmem:[%s18179_s8 + $0x1ea4] ss:$16 sps:$4 sm:$0xff]  }
 0x2ba   : > { %10953 = vmatprep.subr.bf16.mxu1 %v15794_v31 }
 0x2bc   : > { %10913 = vmatpush2.bf16.msra.mxu0 %v15789_v36  ;;  %v15822_v36 = vld [vmem:[%s18179_s8 + $0x1ea0] ss:$16 sps:$4 sm:$0xff]  }
 0x2bd   : > { %10954 = vmatpush2.bf16.msra.mxu1 %v15792_v41  ;;  %10914 = vmatprep.subr.bf16.mxu0 %v15797_v60 }
 0x2be   : > { %10955 = vmatprep.subr.bf16.mxu1 %v15800_v47 }
 0x2c0   : > { %10915 = vmatpush2.bf16.msra.mxu0 %v15795_v55 }
 0x2c1   : > { %10956 = vmatpush2.bf16.msra.mxu1 %v15798_v49  ;;  %10916 = vmatprep.subr.bf16.mxu0 %v15803_v51  ;;  %v15830_v49 = vld [vmem:[%s18179_s8 + $0x1e84] ss:$16 sps:$4 sm:$0xff]   ;;  %v15825_v51 = vld [vmem:[%s18179_s8 + $0x1c80] ss:$16 sps:$4 sm:$0xff]  }
 0x2c2   : > { %10957 = vmatprep.subr.bf16.mxu1 %v15806_v54  ;;  %v15828_v54 = vld [vmem:[%s18179_s8 + $0x1e80] ss:$16 sps:$4 sm:$0xff]  }
 0x2c4   : > { %10917 = vmatpush2.bf16.msra.mxu0 %v15801_v52  ;;  %v15836_v52 = vld [vmem:[%s18179_s8 + $0x1e64] ss:$16 sps:$4 sm:$0xff]  }
 0x2c5   : > { %10958 = vmatpush2.bf16.msra.mxu1 %v15804_v26  ;;  %10968 = vmatprep.subr.bf16.mxu0 %v15809_v0  ;;  %v15831_v26 = vld [vmem:[%s18179_s8 + $0x1c60] ss:$16 sps:$4 sm:$0xff]  }
 0x2c6   : > { %11009 = vmatprep.subr.bf16.mxu1 %v15812_v2  ;;  %v15834_v0 = vld [vmem:[%s18179_s8 + $0x1e60] ss:$16 sps:$4 sm:$0xff]   ;;  %v15839_v2 = vld [vmem:[%s18179_s8 + $0x1c44] ss:$16 sps:$4 sm:$0xff]  }
 0x2c7   : > { %v10674_v19 = vpop.f32.mrf.mxu0  ;;  %10919 = vmatmul.mubr.bf16.vlgmr.msra.gmra.mxu0 %v18894_v59 }
 0x2c8   : > { %v10715_v17 = vpop.f32.mrf.mxu1  ;;  %10960 = vmatmul.mubr.bf16.vlgmr.msra.gmra.mxu1 %v18907_v18  ;;  %v10675_v21 = vadd.f32 %v10674_v19, %v18826_v3  ;;  %10969 = vmatpush1.bf16.msra.mxu0 %v15807_v58  ;;  %v15842_v58 = vld [vmem:[%s18179_s8 + $0x1e44] ss:$16 sps:$4 sm:$0xff]   ;;  %v15846_v19 = vld [vmem:[%s18179_s8 + $0x1e20] ss:$16 sps:$4 sm:$0xff]  }
 0x2c9   : > { %11010 = vmatpush1.bf16.msra.mxu1 %v15810_v6  ;;  %v10676_v22 = vpop.f32.mrf.mxu0  ;;  %10970 = vmatprep.subr.bf16.mxu0 %v15815_v56  ;;  %v15837_v6 = vld [vmem:[%s18179_s8 + $0x1c40] ss:$16 sps:$4 sm:$0xff]  }
 0x2ca   : > { %v10717_v25 = vpop.f32.mrf.mxu1  ;;  %11011 = vmatprep.subr.bf16.mxu1 %v15818_v8  ;;  %v18922_v30 = vadd.f32 %v10715_v17, %v10675_v21  ;;  %v10677_v31 = vadd.f32 %v10676_v22, %v18833_v9  ;;  %11000 = vmatprep.mubr.bf16.mxu0 %v18903_v7  ;;  %v15827_v9 = vld [vmem:[%s18179_s8 + $0x1c84] ss:$16 sps:$4 sm:$0xff]   ;;  %v15840_v56 = vld [vmem:[%s18179_s8 + $0x1e40] ss:$16 sps:$4 sm:$0xff]  }
 0x2cb   : > { %11041 = vmatprep.mubr.bf16.mxu1 %v18915_v1  ;;  %v10678_v3 = vpop.f32.mrf.mxu0  ;;  %v15845_v8 = vld [vmem:[%s18179_s8 + $0x1c24] ss:$16 sps:$4 sm:$0xff]   ;;  %v15849_v22 = vld [vmem:[%s18179_s8 + $0x1c00] ss:$16 sps:$4 sm:$0xff]  }
 0x2cc   : > { %v10719_v41 = vpop.f32.mrf.mxu1  ;;  %v18929_v60 = vadd.f32 %v10717_v25, %v10677_v31  ;;  %10971 = vmatpush1.bf16.msra.mxu0 %v15813_v12  ;;  %v15848_v12 = vld [vmem:[%s18179_s8 + $0x1e24] ss:$16 sps:$4 sm:$0xff]   ;;  %v15852_v25 = vld [vmem:[%s18179_s8 + $0x1e00] ss:$16 sps:$4 sm:$0xff]  }
 0x2cd   : > { %11012 = vmatpush1.bf16.msra.mxu1 %v15816_v13  ;;  %v10679_v47 = vpop.f32.mrf.mxu0  ;;  %10972 = vmatprep.subr.bf16.mxu0 %v15821_v27  ;;  %v15843_v13 = vld [vmem:[%s18179_s8 + $0x1c20] ss:$16 sps:$4 sm:$0xff]   ;;  %v15851_v17 = vld [vmem:[%s18179_s8 + $0x1c04] ss:$16 sps:$4 sm:$0xff]  }
 0x2ce   : > { %v10720_v55 = vpop.f32.mrf.mxu1  ;;  %11013 = vmatprep.subr.bf16.mxu1 %v15824_v28  ;;  %v15854_v21 = vld [vmem:[%s18179_s8 + $0x1e04] ss:$16 sps:$4 sm:$0xff]   ;;  %v15855_v31 = vld [vmem:[%s18179_s8 + $0x1de0] ss:$16 sps:$4 sm:$0xff]  }
 0x2cf   : > { %v15857_v27 = vld [vmem:[%s18179_s8 + $0x1de4] ss:$16 sps:$4 sm:$0xff]   ;;  %v15861_v41 = vld [vmem:[%s18179_s8 + $0x1dc0] ss:$16 sps:$4 sm:$0xff]  }
 0x2d0   : > { %10973 = vmatpush1.bf16.msra.mxu0 %v15819_v35  ;;  %v15860_v28 = vld [vmem:[%s18179_s8 + $0x1fe4] ss:$16 sps:$4 sm:$0xff]   ;;  %v15858_v35 = vld [vmem:[%s18179_s8 + $0x1fe0] ss:$16 sps:$4 sm:$0xff]  }
 0x2d1   : > { %11014 = vmatpush1.bf16.msra.mxu1 %v15822_v36  ;;  %10974 = vmatprep.subr.bf16.mxu0 %v15827_v9  ;;  %v15863_v36 = vld [vmem:[%s18179_s8 + $0x1dc4] ss:$16 sps:$4 sm:$0xff]   ;;  %v15864_v47 = vld [vmem:[%s18179_s8 + $0x1fc0] ss:$16 sps:$4 sm:$0xff]  }
 0x2d2   : > { %11015 = vmatprep.subr.bf16.mxu1 %v15830_v49  ;;  %v15866_v3 = vld [vmem:[%s18179_s8 + $0x1fc4] ss:$16 sps:$4 sm:$0xff]   ;;  %v15867_v49 = vld [vmem:[%s18179_s8 + $0x1da0] ss:$16 sps:$4 sm:$0xff]  }
 0x2d3   : > { %v15869_v55 = vld [vmem:[%s18179_s8 + $0x1da4] ss:$16 sps:$4 sm:$0xff]  }
 0x2d4   : > { %10975 = vmatpush1.bf16.msra.mxu0 %v15825_v51  ;;  %v15872_v9 = vld [vmem:[%s18179_s8 + $0x1fa4] ss:$16 sps:$4 sm:$0xff]   ;;  %v15870_v51 = vld [vmem:[%s18179_s8 + $0x1fa0] ss:$16 sps:$4 sm:$0xff]  }
 0x2d5   : > { %11016 = vmatpush1.bf16.msra.mxu1 %v15828_v54  ;;  %10976 = vmatprep.subr.bf16.mxu0 %v15833_v57  ;;  %v15875_v54 = vld [vmem:[%s18179_s8 + $0x1d84] ss:$16 sps:$4 sm:$0xff]  }
 0x2d6   : > { %11017 = vmatprep.subr.bf16.mxu1 %v15836_v52  ;;  %v15878_v57 = vld [vmem:[%s18179_s8 + $0x1f84] ss:$16 sps:$4 sm:$0xff]   ;;  %v15873_v52 = vld [vmem:[%s18179_s8 + $0x1d80] ss:$16 sps:$4 sm:$0xff]  }
 0x2d8   : > { %10977 = vmatpush1.bf16.msra.mxu0 %v15831_v26  ;;  %v15876_v26 = vld [vmem:[%s18179_s8 + $0x1f80] ss:$16 sps:$4 sm:$0xff]  }
 0x2d9   : > { %11018 = vmatpush1.bf16.msra.mxu1 %v15834_v0  ;;  %10978 = vmatprep.subr.bf16.mxu0 %v15839_v2  ;;  %v15881_v0 = vld [vmem:[%s18179_s8 + $0x1d64] ss:$16 sps:$4 sm:$0xff]  }
 0x2da   : > { %11019 = vmatprep.subr.bf16.mxu1 %v15842_v58  ;;  %v15884_v2 = vld [vmem:[%s18179_s8 + $0x1f64] ss:$16 sps:$4 sm:$0xff]   ;;  %v15879_v58 = vld [vmem:[%s18179_s8 + $0x1d60] ss:$16 sps:$4 sm:$0xff]  }
 0x2dc   : > { %10979 = vmatpush1.bf16.msra.mxu0 %v15837_v6  ;;  %v15882_v6 = vld [vmem:[%s18179_s8 + $0x1f60] ss:$16 sps:$4 sm:$0xff]  }
 0x2dd   : > { %11020 = vmatpush1.bf16.msra.mxu1 %v15840_v56  ;;  %10980 = vmatprep.subr.bf16.mxu0 %v15845_v8  ;;  %v15887_v56 = vld [vmem:[%s18179_s8 + $0x1d44] ss:$16 sps:$4 sm:$0xff]  }
 0x2de   : > { %11021 = vmatprep.subr.bf16.mxu1 %v15848_v12  ;;  %v15890_v8 = vld [vmem:[%s18179_s8 + $0x1f44] ss:$16 sps:$4 sm:$0xff]   ;;  %v18974_v12 = vld [vmem:[%s18244_s10 + $0x20] sm:$0xff] }
 0x2e0   : > { %10981 = vmatpush1.bf16.msra.mxu0 %v15843_v13  ;;  %v15885_v13 = vld [vmem:[%s18179_s8 + $0x1d40] ss:$16 sps:$4 sm:$0xff]  }
 0x2e1   : > { %11022 = vmatpush1.bf16.msra.mxu1 %v15846_v19  ;;  %10982 = vmatprep.subr.bf16.mxu0 %v15851_v17  ;;  %v15888_v19 = vld [vmem:[%s18179_s8 + $0x1f40] ss:$16 sps:$4 sm:$0xff]   ;;  %v15893_v17 = vld [vmem:[%s18179_s8 + $0x1d24] ss:$16 sps:$4 sm:$0xff]  }
 0x2e2   : > { %11023 = vmatprep.subr.bf16.mxu1 %v15854_v21  ;;  %v15896_v21 = vld [vmem:[%s18179_s8 + $0x1f24] ss:$16 sps:$4 sm:$0xff]  }
 0x2e4   : > { %10983 = vmatpush1.bf16.msra.mxu0 %v15849_v22  ;;  %v18982_v22 = vrot.slane %v18974_v12, %v18295_v5 }
 0x2e5   : > { %11024 = vmatpush1.bf16.msra.mxu1 %v15852_v25  ;;  %10984 = vmatprep.subr.bf16.mxu0 %v15857_v27  ;;  %v15891_v25 = vld [vmem:[%s18179_s8 + $0x1d20] ss:$16 sps:$4 sm:$0xff]  }
 0x2e6   : > { %11025 = vmatprep.subr.bf16.mxu1 %v15860_v28  ;;  %v15894_v27 = vld [vmem:[%s18179_s8 + $0x1f20] ss:$16 sps:$4 sm:$0xff]   ;;  %v15899_v28 = vld [vmem:[%s18179_s8 + $0x1d04] ss:$16 sps:$4 sm:$0xff]  }
 0x2e8   : > { %10985 = vmatpush2.bf16.msra.mxu0 %v15855_v31  ;;  %v15902_v31 = vld [vmem:[%s18179_s8 + $0x1f04] ss:$16 sps:$4 sm:$0xff]  }
 0x2e9   : > { %11026 = vmatpush2.bf16.msra.mxu1 %v15858_v35  ;;  %10986 = vmatprep.subr.bf16.mxu0 %v15863_v36  ;;  %v2583_v35 = vcombine.high %v18982_v22, %v18982_v22  ;;  %v18992_v36 = vrot.slane %v18884_v48, %v18295_v5 }
 0x2ea   : > { %11027 = vmatprep.subr.bf16.mxu1 %v15866_v3  ;;  %v15897_v3 = vld [vmem:[%s18179_s8 + $0x1d00] ss:$16 sps:$4 sm:$0xff]  }
 0x2eb   : > { %v19005_v48 = vcombine.high %v18992_v36, %v18992_v36 }
 0x2ec   : > { %10987 = vmatpush2.bf16.msra.mxu0 %v15861_v41  ;;  %v15900_v41 = vld [vmem:[%s18179_s8 + $0x1f00] ss:$16 sps:$4 sm:$0xff]  }
 0x2ed   : > { %11028 = vmatpush2.bf16.msra.mxu1 %v15864_v47  ;;  %10988 = vmatprep.subr.bf16.mxu0 %v15869_v55  ;;  %v15906_v47 = vld [vmem:[%s18179_s8 + $0x20e4] ss:$16 sps:$4 sm:$0xff]  }
 0x2ee   : > { %11029 = vmatprep.subr.bf16.mxu1 %v15872_v9  ;;  %v15909_v55 = vld [vmem:[%s18179_s8 + $0x22e4] ss:$16 sps:$4 sm:$0xff]   ;;  %v15904_v9 = vld [vmem:[%s18179_s8 + $0x20e0] ss:$16 sps:$4 sm:$0xff]  }
 0x2f0   : > { %10989 = vmatpush2.bf16.msra.mxu0 %v15867_v49  ;;  %v15907_v49 = vld [vmem:[%s18179_s8 + $0x22e0] ss:$16 sps:$4 sm:$0xff]  }
 0x2f1   : > { %11030 = vmatpush2.bf16.msra.mxu1 %v15870_v51  ;;  %10990 = vmatprep.subr.bf16.mxu0 %v15875_v54  ;;  %v19001_v51 = vrot.slane %v2583_v35, %v18295_v5  ;;  %v15912_v54 = vld [vmem:[%s18179_s8 + $0x20c4] ss:$16 sps:$4 sm:$0xff]  }
 0x2f2   : > { %11031 = vmatprep.subr.bf16.mxu1 %v15878_v57  ;;  %v15915_v57 = vld [vmem:[%s18179_s8 + $0x22c4] ss:$16 sps:$4 sm:$0xff]  }
 0x2f4   : > { %10991 = vmatpush2.bf16.msra.mxu0 %v15873_v52  ;;  %v15910_v52 = vld [vmem:[%s18179_s8 + $0x20c0] ss:$16 sps:$4 sm:$0xff]  }
 0x2f5   : > { %11032 = vmatpush2.bf16.msra.mxu1 %v15876_v26  ;;  %10992 = vmatprep.subr.bf16.mxu0 %v15881_v0  ;;  %v15913_v26 = vld [vmem:[%s18179_s8 + $0x22c0] ss:$16 sps:$4 sm:$0xff]   ;;  %v19013_v0 = vcombine.high %v19001_v51, %v19001_v51 }
 0x2f6   : > { %11033 = vmatprep.subr.bf16.mxu1 %v15884_v2 }
 0x2f8   : > { %10993 = vmatpush2.bf16.msra.mxu0 %v15879_v58 }
 0x2f9   : > { %11034 = vmatpush2.bf16.msra.mxu1 %v15882_v6  ;;  %10994 = vmatprep.subr.bf16.mxu0 %v15887_v56 }
 0x2fa   : > { %11035 = vmatprep.subr.bf16.mxu1 %v15890_v8 }
 0x2fc   : > { %10995 = vmatpush2.bf16.msra.mxu0 %v15885_v13  ;;  %v15918_v13 = vld [vmem:[%s18179_s8 + $0x20a4] ss:$16 sps:$4 sm:$0xff]  }
 0x2fd   : > { %11036 = vmatpush2.bf16.msra.mxu1 %v15888_v19  ;;  %10996 = vmatprep.subr.bf16.mxu0 %v15893_v17  ;;  %v15921_v19 = vld [vmem:[%s18179_s8 + $0x22a4] ss:$16 sps:$4 sm:$0xff]  }
 0x2fe   : > { %11037 = vmatprep.subr.bf16.mxu1 %v15896_v21 }
 0x300   : > { %10997 = vmatpush2.bf16.msra.mxu0 %v15891_v25  ;;  %v15916_v25 = vld [vmem:[%s18179_s8 + $0x20a0] ss:$16 sps:$4 sm:$0xff]  }
 0x301   : > { %11038 = vmatpush2.bf16.msra.mxu1 %v15894_v27  ;;  %10998 = vmatprep.subr.bf16.mxu0 %v15899_v28  ;;  %v15919_v27 = vld [vmem:[%s18179_s8 + $0x22a0] ss:$16 sps:$4 sm:$0xff]  }
 0x302   : > { %11039 = vmatprep.subr.bf16.mxu1 %v15902_v31 }
 0x304   : > { %10999 = vmatpush2.bf16.msra.mxu0 %v15897_v3 }
 0x305   : > { %11040 = vmatpush2.bf16.msra.mxu1 %v15900_v41  ;;  %11050 = vmatprep.subr.bf16.mxu0 %v15906_v47  ;;  %v15927_v41 = vld [vmem:[%s18179_s8 + $0x2284] ss:$16 sps:$4 sm:$0xff]   ;;  %v15922_v47 = vld [vmem:[%s18179_s8 + $0x2080] ss:$16 sps:$4 sm:$0xff]  }
 0x306   : > { %11091 = vmatprep.subr.bf16.mxu1 %v15909_v55  ;;  %v15925_v55 = vld [vmem:[%s18179_s8 + $0x2280] ss:$16 sps:$4 sm:$0xff]  }
 0x307   : > { %v10756_v2 = vpop.f32.mrf.mxu0  ;;  %11001 = vmatmul.mubr.bf16.vlgmr.msra.gmra.mxu0 %v18992_v36 }
 0x308   : > { %v10797_v58 = vpop.f32.mrf.mxu1  ;;  %11042 = vmatmul.mubr.bf16.vlgmr.msra.gmra.mxu1 %v19005_v48  ;;  %v10757_v6 = vadd.f32 %v10756_v2, %v18922_v30  ;;  %11051 = vmatpush1.bf16.msra.mxu0 %v15904_v9  ;;  %v15930_v9 = vld [vmem:[%s18179_s8 + $0x2064] ss:$16 sps:$4 sm:$0xff]   ;;  %v15934_v2 = vld [vmem:[%s18179_s8 + $0x2040] ss:$16 sps:$4 sm:$0xff]  }
 0x309   : > { %11092 = vmatpush1.bf16.msra.mxu1 %v15907_v49  ;;  %v10758_v56 = vpop.f32.mrf.mxu0  ;;  %11052 = vmatprep.subr.bf16.mxu0 %v15912_v54  ;;  %v15933_v49 = vld [vmem:[%s18179_s8 + $0x2264] ss:$16 sps:$4 sm:$0xff]   ;;  %v15928_v54 = vld [vmem:[%s18179_s8 + $0x2060] ss:$16 sps:$4 sm:$0xff]  }
 0x30a   : > { %v10799_v8 = vpop.f32.mrf.mxu1  ;;  %11093 = vmatprep.subr.bf16.mxu1 %v15915_v57  ;;  %v19020_v17 = vadd.f32 %v10797_v58, %v10757_v6  ;;  %v10759_v21 = vadd.f32 %v10758_v56, %v18929_v60  ;;  %11082 = vmatprep.mubr.bf16.mxu0 %v19001_v51  ;;  %v15924_v60 = vld [vmem:[%s18179_s8 + $0x2084] ss:$16 sps:$4 sm:$0xff]   ;;  %v15931_v57 = vld [vmem:[%s18179_s8 + $0x2260] ss:$16 sps:$4 sm:$0xff]  }
 0x30b   : > { %11123 = vmatprep.mubr.bf16.mxu1 %v19013_v0  ;;  %v10760_v30 = vpop.f32.mrf.mxu0  ;;  %v15937_v58 = vld [vmem:[%s18179_s8 + $0x2240] ss:$16 sps:$4 sm:$0xff]   ;;  %v15942_v6 = vld [vmem:[%s18179_s8 + $0x2024] ss:$16 sps:$4 sm:$0xff]  }
 0x30c   : > { %v10801_v28 = vpop.f32.mrf.mxu1  ;;  %v19027_v31 = vadd.f32 %v10799_v8, %v10759_v21  ;;  %11053 = vmatpush1.bf16.msra.mxu0 %v15910_v52  ;;  %v15936_v52 = vld [vmem:[%s18179_s8 + $0x2044] ss:$16 sps:$4 sm:$0xff]   ;;  %v15940_v8 = vld [vmem:[%s18179_s8 + $0x2020] ss:$16 sps:$4 sm:$0xff]  }
 0x30d   : > { %11094 = vmatpush1.bf16.msra.mxu1 %v15913_v26  ;;  %v10761_v35 = vpop.f32.mrf.mxu0  ;;  %11054 = vmatprep.subr.bf16.mxu0 %v15918_v13  ;;  %v15939_v26 = vld [vmem:[%s18179_s8 + $0x2244] ss:$16 sps:$4 sm:$0xff]   ;;  %v15943_v13 = vld [vmem:[%s18179_s8 + $0x2220] ss:$16 sps:$4 sm:$0xff]  }
 0x30e   : > { %v10802_v3 = vpop.f32.mrf.mxu1  ;;  %11095 = vmatprep.subr.bf16.mxu1 %v15921_v19  ;;  %v15945_v56 = vld [vmem:[%s18179_s8 + $0x2224] ss:$16 sps:$4 sm:$0xff]   ;;  %v15952_v35 = vld [vmem:[%s18179_s8 + $0x21e0] ss:$16 sps:$4 sm:$0xff]  }
 0x30f   : > { %v15948_v19 = vld [vmem:[%s18179_s8 + $0x2004] ss:$16 sps:$4 sm:$0xff]   ;;  %v15955_v3 = vld [vmem:[%s18179_s8 + $0x23e0] ss:$16 sps:$4 sm:$0xff]  }
 0x310   : > { %11055 = vmatpush1.bf16.msra.mxu0 %v15916_v25  ;;  %v15951_v21 = vld [vmem:[%s18179_s8 + $0x2204] ss:$16 sps:$4 sm:$0xff]   ;;  %v15946_v25 = vld [vmem:[%s18179_s8 + $0x2000] ss:$16 sps:$4 sm:$0xff]  }
 0x311   : > { %11096 = vmatpush1.bf16.msra.mxu1 %v15919_v27  ;;  %11056 = vmatprep.subr.bf16.mxu0 %v15924_v60  ;;  %v15949_v27 = vld [vmem:[%s18179_s8 + $0x2200] ss:$16 sps:$4 sm:$0xff]   ;;  %v15954_v30 = vld [vmem:[%s18179_s8 + $0x21e4] ss:$16 sps:$4 sm:$0xff]  }
 0x312   : > { %11097 = vmatprep.subr.bf16.mxu1 %v15927_v41  ;;  %v15957_v28 = vld [vmem:[%s18179_s8 + $0x23e4] ss:$16 sps:$4 sm:$0xff]  }
 0x313   : > { %v15960_v60 = vld [vmem:[%s18179_s8 + $0x21c4] ss:$16 sps:$4 sm:$0xff]  }
 0x314   : > { %11057 = vmatpush1.bf16.msra.mxu0 %v15922_v47  ;;  %v15963_v41 = vld [vmem:[%s18179_s8 + $0x23c4] ss:$16 sps:$4 sm:$0xff]   ;;  %v15958_v47 = vld [vmem:[%s18179_s8 + $0x21c0] ss:$16 sps:$4 sm:$0xff]  }
 0x315   : > { %11098 = vmatpush1.bf16.msra.mxu1 %v15925_v55  ;;  %11058 = vmatprep.subr.bf16.mxu0 %v15930_v9  ;;  %v15961_v55 = vld [vmem:[%s18179_s8 + $0x23c0] ss:$16 sps:$4 sm:$0xff]   ;;  %v15966_v9 = vld [vmem:[%s18179_s8 + $0x21a4] ss:$16 sps:$4 sm:$0xff]  }
 0x316   : > { %11099 = vmatprep.subr.bf16.mxu1 %v15933_v49  ;;  %v15969_v49 = vld [vmem:[%s18179_s8 + $0x23a4] ss:$16 sps:$4 sm:$0xff]  }
 0x318   : > { %11059 = vmatpush1.bf16.msra.mxu0 %v15928_v54  ;;  %v15964_v54 = vld [vmem:[%s18179_s8 + $0x21a0] ss:$16 sps:$4 sm:$0xff]  }
 0x319   : > { %11100 = vmatpush1.bf16.msra.mxu1 %v15931_v57  ;;  %11060 = vmatprep.subr.bf16.mxu0 %v15936_v52  ;;  %v15967_v57 = vld [vmem:[%s18179_s8 + $0x23a0] ss:$16 sps:$4 sm:$0xff]   ;;  %v15972_v52 = vld [vmem:[%s18179_s8 + $0x2184] ss:$16 sps:$4 sm:$0xff]  }
 0x31a   : > { %11101 = vmatprep.subr.bf16.mxu1 %v15939_v26  ;;  %v15975_v26 = vld [vmem:[%s18179_s8 + $0x2384] ss:$16 sps:$4 sm:$0xff]  }
 0x31c   : > { %11061 = vmatpush1.bf16.msra.mxu0 %v15934_v2  ;;  %v15970_v2 = vld [vmem:[%s18179_s8 + $0x2180] ss:$16 sps:$4 sm:$0xff]  }
 0x31d   : > { %11102 = vmatpush1.bf16.msra.mxu1 %v15937_v58  ;;  %11062 = vmatprep.subr.bf16.mxu0 %v15942_v6  ;;  %v15973_v58 = vld [vmem:[%s18179_s8 + $0x2380] ss:$16 sps:$4 sm:$0xff]   ;;  %v15978_v6 = vld [vmem:[%s18179_s8 + $0x2164] ss:$16 sps:$4 sm:$0xff]  }
 0x31e   : > { %11103 = vmatprep.subr.bf16.mxu1 %v15945_v56  ;;  %v15981_v56 = vld [vmem:[%s18179_s8 + $0x2364] ss:$16 sps:$4 sm:$0xff]  }
 0x320   : > { %11063 = vmatpush1.bf16.msra.mxu0 %v15940_v8  ;;  %v15976_v8 = vld [vmem:[%s18179_s8 + $0x2160] ss:$16 sps:$4 sm:$0xff]  }
 0x321   : > { %11104 = vmatpush1.bf16.msra.mxu1 %v15943_v13  ;;  %11064 = vmatprep.subr.bf16.mxu0 %v15948_v19  ;;  %v15979_v13 = vld [vmem:[%s18179_s8 + $0x2360] ss:$16 sps:$4 sm:$0xff]   ;;  %v15984_v19 = vld [vmem:[%s18179_s8 + $0x2144] ss:$16 sps:$4 sm:$0xff]  }
 0x322   : > { %11105 = vmatprep.subr.bf16.mxu1 %v15951_v21  ;;  %v15987_v21 = vld [vmem:[%s18179_s8 + $0x2344] ss:$16 sps:$4 sm:$0xff]  }
 0x324   : > { %11065 = vmatpush1.bf16.msra.mxu0 %v15946_v25  ;;  %v2568_v25 = vcombine.high %v18974_v12, %v18974_v12  ;;  %v15988_v12 = vld [vmem:[%s18179_s8 + $0x2120] ss:$16 sps:$4 sm:$0xff]  }
 0x325   : > { %11106 = vmatpush1.bf16.msra.mxu1 %v15949_v27  ;;  %11066 = vmatprep.subr.bf16.mxu0 %v15954_v30  ;;  %v15982_v27 = vld [vmem:[%s18179_s8 + $0x2140] ss:$16 sps:$4 sm:$0xff]  }
 0x326   : > { %11107 = vmatprep.subr.bf16.mxu1 %v15957_v28  ;;  %v15985_v30 = vld [vmem:[%s18179_s8 + $0x2340] ss:$16 sps:$4 sm:$0xff]   ;;  %v15990_v28 = vld [vmem:[%s18179_s8 + $0x2124] ss:$16 sps:$4 sm:$0xff]  }
 0x328   : > { %11067 = vmatpush2.bf16.msra.mxu0 %v15952_v35  ;;  %v15993_v35 = vld [vmem:[%s18179_s8 + $0x2324] ss:$16 sps:$4 sm:$0xff]  }
 0x329   : > { %11108 = vmatpush2.bf16.msra.mxu1 %v15955_v3  ;;  %11068 = vmatprep.subr.bf16.mxu0 %v15960_v60  ;;  %v19078_v3 = vrot.slane %v2568_v25, %v18295_v5  ;;  %v15991_v60 = vld [vmem:[%s18179_s8 + $0x2320] ss:$16 sps:$4 sm:$0xff]  }
 0x32a   : > { %11109 = vmatprep.subr.bf16.mxu1 %v15963_v41  ;;  %v15996_v41 = vld [vmem:[%s18179_s8 + $0x2104] ss:$16 sps:$4 sm:$0xff]  }
 0x32c   : > { %11069 = vmatpush2.bf16.msra.mxu0 %v15958_v47  ;;  %v15999_v47 = vld [vmem:[%s18179_s8 + $0x2304] ss:$16 sps:$4 sm:$0xff]  }
 0x32d   : > { %11110 = vmatpush2.bf16.msra.mxu1 %v15961_v55  ;;  %11070 = vmatprep.subr.bf16.mxu0 %v15966_v9  ;;  %v2584_v55 = vcombine.high %v19078_v3, %v19078_v3  ;;  %v19088_v9 = vrot.slane %v18982_v22, %v18295_v5 }
 0x32e   : > { %11111 = vmatprep.subr.bf16.mxu1 %v15969_v49  ;;  %v15994_v49 = vld [vmem:[%s18179_s8 + $0x2100] ss:$16 sps:$4 sm:$0xff]  }
 0x32f   : > { %v19101_v22 = vcombine.high %v19088_v9, %v19088_v9 }
 0x330   : > { %11071 = vmatpush2.bf16.msra.mxu0 %v15964_v54  ;;  %v15997_v54 = vld [vmem:[%s18179_s8 + $0x2300] ss:$16 sps:$4 sm:$0xff]  }
 0x331   : > { %11112 = vmatpush2.bf16.msra.mxu1 %v15967_v57  ;;  %11072 = vmatprep.subr.bf16.mxu0 %v15972_v52  ;;  %v16002_v57 = vld [vmem:[%s18179_s8 + $0x24e4] ss:$16 sps:$4 sm:$0xff]  }
 0x332   : > { %11113 = vmatprep.subr.bf16.mxu1 %v15975_v26  ;;  %v16005_v52 = vld [vmem:[%s18179_s8 + $0x26e4] ss:$16 sps:$4 sm:$0xff]   ;;  %v16000_v26 = vld [vmem:[%s18179_s8 + $0x24e0] ss:$16 sps:$4 sm:$0xff]  }
 0x334   : > { %11073 = vmatpush2.bf16.msra.mxu0 %v15970_v2  ;;  %v16003_v2 = vld [vmem:[%s18179_s8 + $0x26e0] ss:$16 sps:$4 sm:$0xff]  }
 0x335   : > { %11114 = vmatpush2.bf16.msra.mxu1 %v15973_v58  ;;  %11074 = vmatprep.subr.bf16.mxu0 %v15978_v6  ;;  %v19097_v58 = vrot.slane %v2584_v55, %v18295_v5  ;;  %v16008_v6 = vld [vmem:[%s18179_s8 + $0x24c4] ss:$16 sps:$4 sm:$0xff]   ;;  %v16015_v55 = vld [vmem:[%s18179_s8 + $0x26a0] ss:$16 sps:$4 sm:$0xff]  }
 0x336   : > { %11115 = vmatprep.subr.bf16.mxu1 %v15981_v56  ;;  %v16011_v56 = vld [vmem:[%s18179_s8 + $0x26c4] ss:$16 sps:$4 sm:$0xff]  }
 0x338   : > { %11075 = vmatpush2.bf16.msra.mxu0 %v15976_v8  ;;  %v16006_v8 = vld [vmem:[%s18179_s8 + $0x24c0] ss:$16 sps:$4 sm:$0xff]  }
 0x339   : > { %11116 = vmatpush2.bf16.msra.mxu1 %v15979_v13  ;;  %11076 = vmatprep.subr.bf16.mxu0 %v15984_v19  ;;  %v16009_v13 = vld [vmem:[%s18179_s8 + $0x26c0] ss:$16 sps:$4 sm:$0xff]   ;;  %v19109_v19 = vcombine.high %v19097_v58, %v19097_v58 }
 0x33a   : > { %11117 = vmatprep.subr.bf16.mxu1 %v15987_v21 }
 0x33c   : > { %11077 = vmatpush2.bf16.msra.mxu0 %v15982_v27 }
 0x33d   : > { %11118 = vmatpush2.bf16.msra.mxu1 %v15985_v30  ;;  %11078 = vmatprep.subr.bf16.mxu0 %v15990_v28 }
 0x33e   : > { %11119 = vmatprep.subr.bf16.mxu1 %v15993_v35  ;;  %v16014_v35 = vld [vmem:[%s18179_s8 + $0x24a4] ss:$16 sps:$4 sm:$0xff]  }
 0x340   : > { %11079 = vmatpush2.bf16.msra.mxu0 %v15988_v12  ;;  %v16017_v12 = vld [vmem:[%s18179_s8 + $0x26a4] ss:$16 sps:$4 sm:$0xff]  }
 0x341   : > { %11120 = vmatpush2.bf16.msra.mxu1 %v15991_v60  ;;  %11080 = vmatprep.subr.bf16.mxu0 %v15996_v41 }
 0x342   : > { %11121 = vmatprep.subr.bf16.mxu1 %v15999_v47  ;;  %v16012_v47 = vld [vmem:[%s18179_s8 + $0x24a0] ss:$16 sps:$4 sm:$0xff]  }
 0x344   : > { %11081 = vmatpush2.bf16.msra.mxu0 %v15994_v49 }
 0x345   : > { %11122 = vmatpush2.bf16.msra.mxu1 %v15997_v54  ;;  %11132 = vmatprep.subr.bf16.mxu0 %v16002_v57 }
 0x346   : > { %11173 = vmatprep.subr.bf16.mxu1 %v16005_v52 }
 0x347   : > { %v10838_v21 = vpop.f32.mrf.mxu0  ;;  %11083 = vmatmul.mubr.bf16.vlgmr.msra.gmra.mxu0 %v19088_v9 }
 0x348   : > { %v10879_v25 = vpop.f32.mrf.mxu1  ;;  %11124 = vmatmul.mubr.bf16.vlgmr.msra.gmra.mxu1 %v19101_v22  ;;  %v10839_v27 = vadd.f32 %v10838_v21, %v19020_v17  ;;  %11133 = vmatpush1.bf16.msra.mxu0 %v16000_v26  ;;  %v16023_v26 = vld [vmem:[%s18179_s8 + $0x2684] ss:$16 sps:$4 sm:$0xff]   ;;  %v16027_v21 = vld [vmem:[%s18179_s8 + $0x2660] ss:$16 sps:$4 sm:$0xff]  }
 0x349   : > { %11174 = vmatpush1.bf16.msra.mxu1 %v16003_v2  ;;  %v10840_v30 = vpop.f32.mrf.mxu0  ;;  %11134 = vmatprep.subr.bf16.mxu0 %v16008_v6  ;;  %v16018_v2 = vld [vmem:[%s18179_s8 + $0x2480] ss:$16 sps:$4 sm:$0xff]  }
 0x34a   : > { %v10881_v28 = vpop.f32.mrf.mxu1  ;;  %11175 = vmatprep.subr.bf16.mxu1 %v16011_v56  ;;  %v19116_v60 = vadd.f32 %v10879_v25, %v10839_v27  ;;  %v10841_v41 = vadd.f32 %v10840_v30, %v19027_v31  ;;  %11164 = vmatprep.mubr.bf16.mxu0 %v19097_v58  ;;  %v16020_v31 = vld [vmem:[%s18179_s8 + $0x2484] ss:$16 sps:$4 sm:$0xff]   ;;  %v16021_v6 = vld [vmem:[%s18179_s8 + $0x2680] ss:$16 sps:$4 sm:$0xff]  }
 0x34b   : > { %11205 = vmatprep.mubr.bf16.mxu1 %v19109_v19  ;;  %v10842_v17 = vpop.f32.mrf.mxu0  ;;  %v16026_v56 = vld [vmem:[%s18179_s8 + $0x2464] ss:$16 sps:$4 sm:$0xff]   ;;  %v16030_v30 = vld [vmem:[%s18179_s8 + $0x2440] ss:$16 sps:$4 sm:$0xff]  }
 0x34c   : > { %v10883_v49 = vpop.f32.mrf.mxu1  ;;  %v19123_v54 = vadd.f32 %v10881_v28, %v10841_v41  ;;  %11135 = vmatpush1.bf16.msra.mxu0 %v16006_v8  ;;  %v16029_v8 = vld [vmem:[%s18179_s8 + $0x2664] ss:$16 sps:$4 sm:$0xff]   ;;  %v16033_v28 = vld [vmem:[%s18179_s8 + $0x2640] ss:$16 sps:$4 sm:$0xff]  }
 0x34d   : > { %11176 = vmatpush1.bf16.msra.mxu1 %v16009_v13  ;;  %v10843_v57 = vpop.f32.mrf.mxu0  ;;  %11136 = vmatprep.subr.bf16.mxu0 %v16014_v35  ;;  %v16024_v13 = vld [vmem:[%s18179_s8 + $0x2460] ss:$16 sps:$4 sm:$0xff]   ;;  %v16032_v25 = vld [vmem:[%s18179_s8 + $0x2444] ss:$16 sps:$4 sm:$0xff]  }
 0x34e   : > { %v10884_v52 = vpop.f32.mrf.mxu1  ;;  %11177 = vmatprep.subr.bf16.mxu1 %v16017_v12  ;;  %v16035_v27 = vld [vmem:[%s18179_s8 + $0x2644] ss:$16 sps:$4 sm:$0xff]   ;;  %v16036_v41 = vld [vmem:[%s18179_s8 + $0x2420] ss:$16 sps:$4 sm:$0xff]  }
 0x34f   : > { %v16038_v35 = vld [vmem:[%s18179_s8 + $0x2424] ss:$16 sps:$4 sm:$0xff]   ;;  %v16042_v49 = vld [vmem:[%s18179_s8 + $0x2400] ss:$16 sps:$4 sm:$0xff]  }
 0x350   : > { %11137 = vmatpush1.bf16.msra.mxu0 %v16012_v47  ;;  %v16041_v12 = vld [vmem:[%s18179_s8 + $0x2624] ss:$16 sps:$4 sm:$0xff]   ;;  %v16039_v47 = vld [vmem:[%s18179_s8 + $0x2620] ss:$16 sps:$4 sm:$0xff]  }
 0x351   : > { %11178 = vmatpush1.bf16.msra.mxu1 %v16015_v55  ;;  %11138 = vmatprep.subr.bf16.mxu0 %v16020_v31  ;;  %v16044_v55 = vld [vmem:[%s18179_s8 + $0x2404] ss:$16 sps:$4 sm:$0xff]   ;;  %v16045_v57 = vld [vmem:[%s18179_s8 + $0x2600] ss:$16 sps:$4 sm:$0xff]  }
 0x352   : > { %11179 = vmatprep.subr.bf16.mxu1 %v16023_v26  ;;  %v16047_v17 = vld [vmem:[%s18179_s8 + $0x2604] ss:$16 sps:$4 sm:$0xff]   ;;  %v16048_v26 = vld [vmem:[%s18179_s8 + $0x25e0] ss:$16 sps:$4 sm:$0xff]  }
 0x353   : > { %v16050_v52 = vld [vmem:[%s18179_s8 + $0x25e4] ss:$16 sps:$4 sm:$0xff]  }
 0x354   : > { %11139 = vmatpush1.bf16.msra.mxu0 %v16018_v2  ;;  %v16053_v31 = vld [vmem:[%s18179_s8 + $0x27e4] ss:$16 sps:$4 sm:$0xff]   ;;  %v16051_v2 = vld [vmem:[%s18179_s8 + $0x27e0] ss:$16 sps:$4 sm:$0xff]  }
 0x355   : > { %11180 = vmatpush1.bf16.msra.mxu1 %v16021_v6  ;;  %11140 = vmatprep.subr.bf16.mxu0 %v16026_v56  ;;  %v16056_v6 = vld [vmem:[%s18179_s8 + $0x25c4] ss:$16 sps:$4 sm:$0xff]  }
 0x356   : > { %11181 = vmatprep.subr.bf16.mxu1 %v16029_v8  ;;  %v16059_v56 = vld [vmem:[%s18179_s8 + $0x27c4] ss:$16 sps:$4 sm:$0xff]   ;;  %v16054_v8 = vld [vmem:[%s18179_s8 + $0x25c0] ss:$16 sps:$4 sm:$0xff]  }
 0x358   : > { %11141 = vmatpush1.bf16.msra.mxu0 %v16024_v13  ;;  %v16057_v13 = vld [vmem:[%s18179_s8 + $0x27c0] ss:$16 sps:$4 sm:$0xff]  }
 0x359   : > { %11182 = vmatpush1.bf16.msra.mxu1 %v16027_v21  ;;  %11142 = vmatprep.subr.bf16.mxu0 %v16032_v25  ;;  %v16062_v21 = vld [vmem:[%s18179_s8 + $0x25a4] ss:$16 sps:$4 sm:$0xff]  }
 0x35a   : > { %11183 = vmatprep.subr.bf16.mxu1 %v16035_v27  ;;  %v16065_v25 = vld [vmem:[%s18179_s8 + $0x27a4] ss:$16 sps:$4 sm:$0xff]   ;;  %v16060_v27 = vld [vmem:[%s18179_s8 + $0x25a0] ss:$16 sps:$4 sm:$0xff]  }
 0x35c   : > { %11143 = vmatpush1.bf16.msra.mxu0 %v16030_v30  ;;  %v16063_v30 = vld [vmem:[%s18179_s8 + $0x27a0] ss:$16 sps:$4 sm:$0xff]  }
 0x35d   : > { %11184 = vmatpush1.bf16.msra.mxu1 %v16033_v28  ;;  %11144 = vmatprep.subr.bf16.mxu0 %v16038_v35  ;;  %v16068_v28 = vld [vmem:[%s18179_s8 + $0x2584] ss:$16 sps:$4 sm:$0xff]  }
 0x35e   : > { %11185 = vmatprep.subr.bf16.mxu1 %v16041_v12  ;;  %v16071_v35 = vld [vmem:[%s18179_s8 + $0x2784] ss:$16 sps:$4 sm:$0xff]   ;;  %v16066_v12 = vld [vmem:[%s18179_s8 + $0x2580] ss:$16 sps:$4 sm:$0xff]  }
 0x360   : > { %11145 = vmatpush1.bf16.msra.mxu0 %v16036_v41  ;;  %v16069_v41 = vld [vmem:[%s18179_s8 + $0x2780] ss:$16 sps:$4 sm:$0xff]  }
 0x361   : > { %11186 = vmatpush1.bf16.msra.mxu1 %v16039_v47  ;;  %11146 = vmatprep.subr.bf16.mxu0 %v16044_v55  ;;  %v16074_v47 = vld [vmem:[%s18179_s8 + $0x2564] ss:$16 sps:$4 sm:$0xff]  }
 0x362   : > { %11187 = vmatprep.subr.bf16.mxu1 %v16047_v17  ;;  %v16077_v55 = vld [vmem:[%s18179_s8 + $0x2764] ss:$16 sps:$4 sm:$0xff]   ;;  %v16072_v17 = vld [vmem:[%s18179_s8 + $0x2560] ss:$16 sps:$4 sm:$0xff]  }
 0x364   : > { %11147 = vmatpush1.bf16.msra.mxu0 %v16042_v49  ;;  %v16075_v49 = vld [vmem:[%s18179_s8 + $0x2760] ss:$16 sps:$4 sm:$0xff]  }
 0x365   : > { %11188 = vmatpush1.bf16.msra.mxu1 %v16045_v57  ;;  %11148 = vmatprep.subr.bf16.mxu0 %v16050_v52  ;;  %v16080_v57 = vld [vmem:[%s18179_s8 + $0x2544] ss:$16 sps:$4 sm:$0xff]  }
 0x366   : > { %11189 = vmatprep.subr.bf16.mxu1 %v16053_v31  ;;  %v16083_v52 = vld [vmem:[%s18179_s8 + $0x2744] ss:$16 sps:$4 sm:$0xff]  }
 0x367   : > { %v19168_v31 = vld [vmem:[%s18244_s10 + $0x28] sm:$0xff] }
 0x368   : > { %11149 = vmatpush2.bf16.msra.mxu0 %v16048_v26  ;;  %v16078_v26 = vld [vmem:[%s18179_s8 + $0x2540] ss:$16 sps:$4 sm:$0xff]  }
 0x369   : > { %11190 = vmatpush2.bf16.msra.mxu1 %v16051_v2  ;;  %11150 = vmatprep.subr.bf16.mxu0 %v16056_v6  ;;  %v16081_v2 = vld [vmem:[%s18179_s8 + $0x2740] ss:$16 sps:$4 sm:$0xff]   ;;  %v16086_v6 = vld [vmem:[%s18179_s8 + $0x2524] ss:$16 sps:$4 sm:$0xff]  }
 0x36a   : > { %11191 = vmatprep.subr.bf16.mxu1 %v16059_v56  ;;  %v16089_v56 = vld [vmem:[%s18179_s8 + $0x2724] ss:$16 sps:$4 sm:$0xff]  }
 0x36c   : > { %11151 = vmatpush2.bf16.msra.mxu0 %v16054_v8  ;;  %v19176_v8 = vrot.slane %v19168_v31, %v18295_v5 }
 0x36d   : > { %11192 = vmatpush2.bf16.msra.mxu1 %v16057_v13  ;;  %11152 = vmatprep.subr.bf16.mxu0 %v16062_v21  ;;  %v16084_v13 = vld [vmem:[%s18179_s8 + $0x2520] ss:$16 sps:$4 sm:$0xff]  }
 0x36e   : > { %11193 = vmatprep.subr.bf16.mxu1 %v16065_v25  ;;  %v16087_v21 = vld [vmem:[%s18179_s8 + $0x2720] ss:$16 sps:$4 sm:$0xff]   ;;  %v16092_v25 = vld [vmem:[%s18179_s8 + $0x2504] ss:$16 sps:$4 sm:$0xff]  }
 0x370   : > { %11153 = vmatpush2.bf16.msra.mxu0 %v16060_v27  ;;  %v16095_v27 = vld [vmem:[%s18179_s8 + $0x2704] ss:$16 sps:$4 sm:$0xff]  }
 0x371   : > { %11194 = vmatpush2.bf16.msra.mxu1 %v16063_v30  ;;  %11154 = vmatprep.subr.bf16.mxu0 %v16068_v28  ;;  %v2632_v30 = vcombine.high %v19176_v8, %v19176_v8  ;;  %v19186_v28 = vrot.slane %v19078_v3, %v18295_v5 }
 0x372   : > { %11195 = vmatprep.subr.bf16.mxu1 %v16071_v35  ;;  %v16090_v35 = vld [vmem:[%s18179_s8 + $0x2500] ss:$16 sps:$4 sm:$0xff]  }
 0x373   : > { %v19199_v3 = vcombine.high %v19186_v28, %v19186_v28 }
 0x374   : > { %11155 = vmatpush2.bf16.msra.mxu0 %v16066_v12  ;;  %v16093_v12 = vld [vmem:[%s18179_s8 + $0x2700] ss:$16 sps:$4 sm:$0xff]  }
 0x375   : > { %11196 = vmatpush2.bf16.msra.mxu1 %v16069_v41  ;;  %11156 = vmatprep.subr.bf16.mxu0 %v16074_v47  ;;  %v16099_v41 = vld [vmem:[%s18179_s8 + $0x28e4] ss:$16 sps:$4 sm:$0xff]  }
 0x376   : > { %11197 = vmatprep.subr.bf16.mxu1 %v16077_v55  ;;  %v16102_v47 = vld [vmem:[%s18179_s8 + $0x2ae4] ss:$16 sps:$4 sm:$0xff]   ;;  %v16097_v55 = vld [vmem:[%s18179_s8 + $0x28e0] ss:$16 sps:$4 sm:$0xff]  }
 0x378   : > { %11157 = vmatpush2.bf16.msra.mxu0 %v16072_v17  ;;  %v16100_v17 = vld [vmem:[%s18179_s8 + $0x2ae0] ss:$16 sps:$4 sm:$0xff]  }
 0x379   : > { %11198 = vmatpush2.bf16.msra.mxu1 %v16075_v49  ;;  %11158 = vmatprep.subr.bf16.mxu0 %v16080_v57  ;;  %v19195_v49 = vrot.slane %v2632_v30, %v18295_v5  ;;  %v16105_v57 = vld [vmem:[%s18179_s8 + $0x28c4] ss:$16 sps:$4 sm:$0xff]  }
 0x37a   : > { %11199 = vmatprep.subr.bf16.mxu1 %v16083_v52  ;;  %v16108_v52 = vld [vmem:[%s18179_s8 + $0x2ac4] ss:$16 sps:$4 sm:$0xff]  }
 0x37b   : > { %20614 = vst [vmem:[#allocation35_spill] sm:$0xff] %v19195_v49  ;;  %v16111_v30 = vld [vmem:[%s18179_s8 + $0x28a4] ss:$16 sps:$4 sm:$0xff]  }
 0x37c   : > { %11159 = vmatpush2.bf16.msra.mxu0 %v16078_v26  ;;  %v16103_v26 = vld [vmem:[%s18179_s8 + $0x28c0] ss:$16 sps:$4 sm:$0xff]  }
 0x37d   : > { %11200 = vmatpush2.bf16.msra.mxu1 %v16081_v2  ;;  %11160 = vmatprep.subr.bf16.mxu0 %v16086_v6  ;;  %v16106_v2 = vld [vmem:[%s18179_s8 + $0x2ac0] ss:$16 sps:$4 sm:$0xff]   ;;  %v19207_v6 = vcombine.high %v19195_v49, %v19195_v49 }
 0x37e   : > { %11201 = vmatprep.subr.bf16.mxu1 %v16089_v56 }
 0x37f   : > { %20615 = vst [vmem:[#allocation36_spill] sm:$0xff] %v19207_v6 }
 0x380   : > { %11161 = vmatpush2.bf16.msra.mxu0 %v16084_v13 }
 0x381   : > { %11202 = vmatpush2.bf16.msra.mxu1 %v16087_v21  ;;  %11162 = vmatprep.subr.bf16.mxu0 %v16092_v25 }
 0x382   : > { %11203 = vmatprep.subr.bf16.mxu1 %v16095_v27 }
 0x384   : > { %11163 = vmatpush2.bf16.msra.mxu0 %v16090_v35  ;;  %v16114_v35 = vld [vmem:[%s18179_s8 + $0x2aa4] ss:$16 sps:$4 sm:$0xff]  }
 0x385   : > { %11204 = vmatpush2.bf16.msra.mxu1 %v16093_v12  ;;  %11214 = vmatprep.subr.bf16.mxu0 %v16099_v41 }
 0x386   : > { %11255 = vmatprep.subr.bf16.mxu1 %v16102_v47  ;;  %v16109_v47 = vld [vmem:[%s18179_s8 + $0x28a0] ss:$16 sps:$4 sm:$0xff]  }
 0x387   : > { %v10920_v56 = vpop.f32.mrf.mxu0  ;;  %11165 = vmatmul.mubr.bf16.vlgmr.msra.gmra.mxu0 %v19186_v28 }
 0x388   : > { %v10961_v13 = vpop.f32.mrf.mxu1  ;;  %11206 = vmatmul.mubr.bf16.vlgmr.msra.gmra.mxu1 %v19199_v3  ;;  %v10921_v21 = vadd.f32 %v10920_v56, %v19116_v60  ;;  %11215 = vmatpush1.bf16.msra.mxu0 %v16097_v55  ;;  %v16120_v56 = vld [vmem:[%s18179_s8 + $0x2a84] ss:$16 sps:$4 sm:$0xff]  }
 0x389   : > { %11256 = vmatpush1.bf16.msra.mxu1 %v16100_v17  ;;  %v10922_v25 = vpop.f32.mrf.mxu0  ;;  %11216 = vmatprep.subr.bf16.mxu0 %v16105_v57 }
 0x38a   : > { %v10963_v27 = vpop.f32.mrf.mxu1  ;;  %11257 = vmatprep.subr.bf16.mxu1 %v16108_v52  ;;  %v19214_v12 = vadd.f32 %v10961_v13, %v10921_v21  ;;  %v10923_v41 = vadd.f32 %v10922_v25, %v19123_v54  ;;  %11246 = vmatprep.mubr.bf16.mxu0 %v19195_v49  ;;  %v16117_v54 = vld [vmem:[%s18179_s8 + $0x2884] ss:$16 sps:$4 sm:$0xff]   ;;  %v16115_v13 = vld [vmem:[%s18179_s8 + $0x2880] ss:$16 sps:$4 sm:$0xff]  }
 0x38b   : > { %11287 = vmatprep.mubr.bf16.mxu1 %v19207_v6  ;;  %v10924_v60 = vpop.f32.mrf.mxu0  ;;  %v16118_v21 = vld [vmem:[%s18179_s8 + $0x2a80] ss:$16 sps:$4 sm:$0xff]  }
 0x38c   : > { %v10965_v55 = vpop.f32.mrf.mxu1  ;;  %v19221_v17 = vadd.f32 %v10963_v27, %v10923_v41  ;;  %11217 = vmatpush1.bf16.msra.mxu0 %v16103_v26  ;;  %v16123_v26 = vld [vmem:[%s18179_s8 + $0x2864] ss:$16 sps:$4 sm:$0xff]   ;;  %v16121_v25 = vld [vmem:[%s18179_s8 + $0x2860] ss:$16 sps:$4 sm:$0xff]  }
 0x38d   : > { %11258 = vmatpush1.bf16.msra.mxu1 %v16106_v2  ;;  %v10925_v57 = vpop.f32.mrf.mxu0  ;;  %11218 = vmatprep.subr.bf16.mxu0 %v16111_v30  ;;  %v16126_v2 = vld [vmem:[%s18179_s8 + $0x2a64] ss:$16 sps:$4 sm:$0xff]   ;;  %v16124_v27 = vld [vmem:[%s18179_s8 + $0x2a60] ss:$16 sps:$4 sm:$0xff]  }
 0x38e   : > { %v10966_v52 = vpop.f32.mrf.mxu1  ;;  %11259 = vmatprep.subr.bf16.mxu1 %v16114_v35  ;;  %v16129_v30 = vld [vmem:[%s18179_s8 + $0x2844] ss:$16 sps:$4 sm:$0xff]   ;;  %v16127_v35 = vld [vmem:[%s18179_s8 + $0x2840] ss:$16 sps:$4 sm:$0xff]  }
 0x38f   : > { %v16130_v41 = vld [vmem:[%s18179_s8 + $0x2a40] ss:$16 sps:$4 sm:$0xff]   ;;  %v16138_v60 = vld [vmem:[%s18179_s8 + $0x2a24] ss:$16 sps:$4 sm:$0xff]  }
 0x390   : > { %11219 = vmatpush1.bf16.msra.mxu0 %v16109_v47  ;;  %v16135_v47 = vld [vmem:[%s18179_s8 + $0x2824] ss:$16 sps:$4 sm:$0xff]   ;;  %v16133_v55 = vld [vmem:[%s18179_s8 + $0x2820] ss:$16 sps:$4 sm:$0xff]  }
 0x391   : > { %11260 = vmatpush1.bf16.msra.mxu1 %v16112_v63  ;;  %11220 = vmatprep.subr.bf16.mxu0 %v16117_v54  ;;  %v16132_v63 = vld [vmem:[%s18179_s8 + $0x2a44] ss:$16 sps:$4 sm:$0xff]   ;;  %v16136_v57 = vld [vmem:[%s18179_s8 + $0x2a20] ss:$16 sps:$4 sm:$0xff]  }
 0x392   : > { %11261 = vmatprep.subr.bf16.mxu1 %v16120_v56  ;;  %v16141_v52 = vld [vmem:[%s18179_s8 + $0x2804] ss:$16 sps:$4 sm:$0xff]   ;;  %v16139_v56 = vld [vmem:[%s18179_s8 + $0x2800] ss:$16 sps:$4 sm:$0xff]  }
 0x393   : > { %v16144_v54 = vld [vmem:[%s18179_s8 + $0x2a04] ss:$16 sps:$4 sm:$0xff]   ;;  %v16205_v49 = vld [vmem:[%s18179_s8 + $0x2ca0] ss:$16 sps:$4 sm:$0xff]  }
 0x394   : > { %11221 = vmatpush1.bf16.msra.mxu0 %v16115_v13  ;;  %v16142_v13 = vld [vmem:[%s18179_s8 + $0x2a00] ss:$16 sps:$4 sm:$0xff]  }
 0x395   : > { %11262 = vmatpush1.bf16.msra.mxu1 %v16118_v21  ;;  %11222 = vmatprep.subr.bf16.mxu0 %v16123_v26  ;;  %v16147_v21 = vld [vmem:[%s18179_s8 + $0x29e4] ss:$16 sps:$4 sm:$0xff]  }
 0x396   : > { %11263 = vmatprep.subr.bf16.mxu1 %v16126_v2  ;;  %v16150_v26 = vld [vmem:[%s18179_s8 + $0x2be4] ss:$16 sps:$4 sm:$0xff]   ;;  %v16145_v2 = vld [vmem:[%s18179_s8 + $0x29e0] ss:$16 sps:$4 sm:$0xff]  }
 0x398   : > { %11223 = vmatpush1.bf16.msra.mxu0 %v16121_v25  ;;  %v16148_v25 = vld [vmem:[%s18179_s8 + $0x2be0] ss:$16 sps:$4 sm:$0xff]  }
 0x399   : > { %11264 = vmatpush1.bf16.msra.mxu1 %v16124_v27  ;;  %11224 = vmatprep.subr.bf16.mxu0 %v16129_v30  ;;  %v16153_v27 = vld [vmem:[%s18179_s8 + $0x29c4] ss:$16 sps:$4 sm:$0xff]  }
 0x39a   : > { %11265 = vmatprep.subr.bf16.mxu1 %v16132_v63  ;;  %v16156_v30 = vld [vmem:[%s18179_s8 + $0x2bc4] ss:$16 sps:$4 sm:$0xff]   ;;  %v16151_v63 = vld [vmem:[%s18179_s8 + $0x29c0] ss:$16 sps:$4 sm:$0xff]  }
 0x39c   : > { %11225 = vmatpush1.bf16.msra.mxu0 %v16127_v35  ;;  %v16154_v35 = vld [vmem:[%s18179_s8 + $0x2bc0] ss:$16 sps:$4 sm:$0xff]  }
 0x39d   : > { %11266 = vmatpush1.bf16.msra.mxu1 %v16130_v41  ;;  %11226 = vmatprep.subr.bf16.mxu0 %v16135_v47  ;;  %v16159_v41 = vld [vmem:[%s18179_s8 + $0x29a4] ss:$16 sps:$4 sm:$0xff]  }
 0x39e   : > { %11267 = vmatprep.subr.bf16.mxu1 %v16138_v60  ;;  %v16162_v47 = vld [vmem:[%s18179_s8 + $0x2ba4] ss:$16 sps:$4 sm:$0xff]   ;;  %v16157_v60 = vld [vmem:[%s18179_s8 + $0x29a0] ss:$16 sps:$4 sm:$0xff]  }
 0x3a0   : > { %11227 = vmatpush1.bf16.msra.mxu0 %v16133_v55  ;;  %v16160_v55 = vld [vmem:[%s18179_s8 + $0x2ba0] ss:$16 sps:$4 sm:$0xff]  }
 0x3a1   : > { %11268 = vmatpush1.bf16.msra.mxu1 %v16136_v57  ;;  %11228 = vmatprep.subr.bf16.mxu0 %v16141_v52  ;;  %v16165_v57 = vld [vmem:[%s18179_s8 + $0x2984] ss:$16 sps:$4 sm:$0xff]  }
 0x3a2   : > { %11269 = vmatprep.subr.bf16.mxu1 %v16144_v54  ;;  %v16168_v52 = vld [vmem:[%s18179_s8 + $0x2b84] ss:$16 sps:$4 sm:$0xff]   ;;  %v16163_v54 = vld [vmem:[%s18179_s8 + $0x2980] ss:$16 sps:$4 sm:$0xff]  }
 0x3a4   : > { %11229 = vmatpush1.bf16.msra.mxu0 %v16139_v56  ;;  %v16166_v56 = vld [vmem:[%s18179_s8 + $0x2b80] ss:$16 sps:$4 sm:$0xff]  }
 0x3a5   : > { %11270 = vmatpush1.bf16.msra.mxu1 %v16142_v13  ;;  %11230 = vmatprep.subr.bf16.mxu0 %v16147_v21  ;;  %v16171_v13 = vld [vmem:[%s18179_s8 + $0x2964] ss:$16 sps:$4 sm:$0xff]  }
 0x3a6   : > { %11271 = vmatprep.subr.bf16.mxu1 %v16150_v26  ;;  %v16174_v21 = vld [vmem:[%s18179_s8 + $0x2b64] ss:$16 sps:$4 sm:$0xff]   ;;  %v16169_v26 = vld [vmem:[%s18179_s8 + $0x2960] ss:$16 sps:$4 sm:$0xff]  }
 0x3a8   : > { %11231 = vmatpush2.bf16.msra.mxu0 %v16145_v2  ;;  %v16172_v2 = vld [vmem:[%s18179_s8 + $0x2b60] ss:$16 sps:$4 sm:$0xff]  }
 0x3a9   : > { %11272 = vmatpush2.bf16.msra.mxu1 %v16148_v25  ;;  %11232 = vmatprep.subr.bf16.mxu0 %v16153_v27  ;;  %v16177_v25 = vld [vmem:[%s18179_s8 + $0x2944] ss:$16 sps:$4 sm:$0xff]  }
 0x3aa   : > { %11273 = vmatprep.subr.bf16.mxu1 %v16156_v30  ;;  %v16180_v27 = vld [vmem:[%s18179_s8 + $0x2b44] ss:$16 sps:$4 sm:$0xff]   ;;  %v2617_v30 = vcombine.high %v19168_v31, %v19168_v31  ;;  %v16181_v31 = vld [vmem:[%s18179_s8 + $0x2920] ss:$16 sps:$4 sm:$0xff]  }
 0x3ac   : > { %11233 = vmatpush2.bf16.msra.mxu0 %v16151_v63  ;;  %v16175_v63 = vld [vmem:[%s18179_s8 + $0x2940] ss:$16 sps:$4 sm:$0xff]  }
 0x3ad   : > { %11274 = vmatpush2.bf16.msra.mxu1 %v16154_v35  ;;  %11234 = vmatprep.subr.bf16.mxu0 %v16159_v41  ;;  %v16178_v35 = vld [vmem:[%s18179_s8 + $0x2b40] ss:$16 sps:$4 sm:$0xff]   ;;  %v16183_v41 = vld [vmem:[%s18179_s8 + $0x2924] ss:$16 sps:$4 sm:$0xff]  }
 0x3ae   : > { %11275 = vmatprep.subr.bf16.mxu1 %v16162_v47  ;;  %v16186_v47 = vld [vmem:[%s18179_s8 + $0x2b24] ss:$16 sps:$4 sm:$0xff]  }
 0x3b0   : > { %11235 = vmatpush2.bf16.msra.mxu0 %v16157_v60  ;;  %v19272_v60 = vrot.slane %v2617_v30, %v18295_v5 }
 0x3b1   : > { %11276 = vmatpush2.bf16.msra.mxu1 %v16160_v55  ;;  %11236 = vmatprep.subr.bf16.mxu0 %v16165_v57  ;;  %v16184_v55 = vld [vmem:[%s18179_s8 + $0x2b20] ss:$16 sps:$4 sm:$0xff]   ;;  %v16189_v57 = vld [vmem:[%s18179_s8 + $0x2904] ss:$16 sps:$4 sm:$0xff]  }
 0x3b2   : > { %11277 = vmatprep.subr.bf16.mxu1 %v16168_v52  ;;  %v16192_v52 = vld [vmem:[%s18179_s8 + $0x2b04] ss:$16 sps:$4 sm:$0xff]  }
 0x3b4   : > { %11237 = vmatpush2.bf16.msra.mxu0 %v16163_v54  ;;  %v2633_v54 = vcombine.high %v19272_v60, %v19272_v60 }
 0x3b5   : > { %11278 = vmatpush2.bf16.msra.mxu1 %v16166_v56  ;;  %11238 = vmatprep.subr.bf16.mxu0 %v16171_v13  ;;  %v19282_v56 = vrot.slane %v19176_v8, %v18295_v5  ;;  %v16187_v13 = vld [vmem:[%s18179_s8 + $0x2900] ss:$16 sps:$4 sm:$0xff]  }
 0x3b6   : > { %11279 = vmatprep.subr.bf16.mxu1 %v16174_v21  ;;  %v16190_v21 = vld [vmem:[%s18179_s8 + $0x2b00] ss:$16 sps:$4 sm:$0xff]   ;;  %v19291_v30 = vrot.slane %v2633_v54, %v18295_v5 }
 0x3b7   : > { %20616 = vst [vmem:[#allocation37_spill] sm:$0xff] %v19282_v56  ;;  %v19295_v8 = vcombine.high %v19282_v56, %v19282_v56 }
 0x3b8   : > { %11239 = vmatpush2.bf16.msra.mxu0 %v16169_v26  ;;  %v16195_v26 = vld [vmem:[%s18179_s8 + $0x2ce4] ss:$16 sps:$4 sm:$0xff]  }
 0x3b9   : > { %11280 = vmatpush2.bf16.msra.mxu1 %v16172_v2  ;;  %11240 = vmatprep.subr.bf16.mxu0 %v16177_v25  ;;  %v16198_v2 = vld [vmem:[%s18179_s8 + $0x2ee4] ss:$16 sps:$4 sm:$0xff]   ;;  %v16193_v25 = vld [vmem:[%s18179_s8 + $0x2ce0] ss:$16 sps:$4 sm:$0xff]  }
 0x3ba   : > { %11281 = vmatprep.subr.bf16.mxu1 %v16180_v27  ;;  %v16196_v27 = vld [vmem:[%s18179_s8 + $0x2ee0] ss:$16 sps:$4 sm:$0xff]  }
 0x3bc   : > { %11241 = vmatpush2.bf16.msra.mxu0 %v16175_v63  ;;  %v16201_v63 = vld [vmem:[%s18179_s8 + $0x2cc4] ss:$16 sps:$4 sm:$0xff]  }
 0x3bd   : > { %11282 = vmatpush2.bf16.msra.mxu1 %v16178_v35  ;;  %11242 = vmatprep.subr.bf16.mxu0 %v16183_v41  ;;  %v16204_v35 = vld [vmem:[%s18179_s8 + $0x2ec4] ss:$16 sps:$4 sm:$0xff]   ;;  %v16199_v41 = vld [vmem:[%s18179_s8 + $0x2cc0] ss:$16 sps:$4 sm:$0xff]  }
 0x3be   : > { %11283 = vmatprep.subr.bf16.mxu1 %v16186_v47  ;;  %v16202_v47 = vld [vmem:[%s18179_s8 + $0x2ec0] ss:$16 sps:$4 sm:$0xff]  }
 0x3c0   : > { %11243 = vmatpush2.bf16.msra.mxu0 %v16181_v31  ;;  %v19303_v31 = vcombine.high %v19291_v30, %v19291_v30 }
 0x3c1   : > { %11284 = vmatpush2.bf16.msra.mxu1 %v16184_v55  ;;  %11244 = vmatprep.subr.bf16.mxu0 %v16189_v57 }
 0x3c2   : > { %11285 = vmatprep.subr.bf16.mxu1 %v16192_v52 }
 0x3c4   : > { %11245 = vmatpush2.bf16.msra.mxu0 %v16187_v13 }
 0x3c5   : > { %11286 = vmatpush2.bf16.msra.mxu1 %v16190_v21  ;;  %11296 = vmatprep.subr.bf16.mxu0 %v16195_v26  ;;  %v16207_v21 = vld [vmem:[%s18179_s8 + $0x2ca4] ss:$16 sps:$4 sm:$0xff]  }
 0x3c6   : > { %11337 = vmatprep.subr.bf16.mxu1 %v16198_v2  ;;  %v16210_v26 = vld [vmem:[%s18179_s8 + $0x2ea4] ss:$16 sps:$4 sm:$0xff]  }
 0x3c7   : > { %v11002_v55 = vpop.f32.mrf.mxu0  ;;  %11247 = vmatmul.mubr.bf16.vlgmr.msra.gmra.mxu0 %v19282_v56  ;;  %v16208_v56 = vld [vmem:[%s18179_s8 + $0x2ea0] ss:$16 sps:$4 sm:$0xff]  }
 0x3c8   : > { %v11043_v57 = vpop.f32.mrf.mxu1  ;;  %11288 = vmatmul.mubr.bf16.vlgmr.msra.gmra.mxu1 %v19295_v8  ;;  %v11003_v52 = vadd.f32 %v11002_v55, %v19214_v12  ;;  %11297 = vmatpush1.bf16.msra.mxu0 %v16193_v25  ;;  %v16216_v55 = vld [vmem:[%s18179_s8 + $0x2e84] ss:$16 sps:$4 sm:$0xff]  }
 0x3c9   : > { %11338 = vmatpush1.bf16.msra.mxu1 %v16196_v27  ;;  %v11004_v54 = vpop.f32.mrf.mxu0  ;;  %11298 = vmatprep.subr.bf16.mxu0 %v16201_v63 }
 0x3ca   : > { %v11045_v13 = vpop.f32.mrf.mxu1  ;;  %11339 = vmatprep.subr.bf16.mxu1 %v16204_v35  ;;  %v19310_v2 = vadd.f32 %v11043_v57, %v11003_v52  ;;  %v11005_v6 = vadd.f32 %v11004_v54, %v19221_v17  ;;  %11328 = vmatprep.mubr.bf16.mxu0 %v19291_v30  ;;  %v16213_v17 = vld [vmem:[%s18179_s8 + $0x2c84] ss:$16 sps:$4 sm:$0xff]   ;;  %v16211_v57 = vld [vmem:[%s18179_s8 + $0x2c80] ss:$16 sps:$4 sm:$0xff]  }
 0x3cb   : > { %11369 = vmatprep.mubr.bf16.mxu1 %v19303_v31  ;;  %v11006_v12 = vpop.f32.mrf.mxu0  ;;  %v16214_v52 = vld [vmem:[%s18179_s8 + $0x2e80] ss:$16 sps:$4 sm:$0xff]  }
 0x3cc   : > { %v11047_v25 = vpop.f32.mrf.mxu1  ;;  %v19317_v27 = vadd.f32 %v11045_v13, %v11005_v6  ;;  %11299 = vmatpush1.bf16.msra.mxu0 %v16199_v41  ;;  %v16219_v6 = vld [vmem:[%s18179_s8 + $0x2c64] ss:$16 sps:$4 sm:$0xff]   ;;  %v16220_v54 = vld [vmem:[%s18179_s8 + $0x2e60] ss:$16 sps:$4 sm:$0xff]  }
 0x3cd   : > { %11340 = vmatpush1.bf16.msra.mxu1 %v16202_v47  ;;  %v11007_v63 = vpop.f32.mrf.mxu0  ;;  %11300 = vmatprep.subr.bf16.mxu0 %v16207_v21  ;;  %v16222_v41 = vld [vmem:[%s18179_s8 + $0x2e64] ss:$16 sps:$4 sm:$0xff]   ;;  %v16217_v47 = vld [vmem:[%s18179_s8 + $0x2c60] ss:$16 sps:$4 sm:$0xff]  }
 0x3ce   : > { %v11048_v35 = vpop.f32.mrf.mxu1  ;;  %11341 = vmatprep.subr.bf16.mxu1 %v16210_v26  ;;  %v16223_v13 = vld [vmem:[%s18179_s8 + $0x2c40] ss:$16 sps:$4 sm:$0xff]   ;;  %v16231_v26 = vld [vmem:[%s18179_s8 + $0x2c24] ss:$16 sps:$4 sm:$0xff]  }
 0x3cf   : > { %v16226_v21 = vld [vmem:[%s18179_s8 + $0x2e40] ss:$16 sps:$4 sm:$0xff]   ;;  %v16234_v12 = vld [vmem:[%s18179_s8 + $0x2e24] ss:$16 sps:$4 sm:$0xff]  }
 0x3d0   : > { %11301 = vmatpush1.bf16.msra.mxu0 %v16205_v49  ;;  %v16225_v49 = vld [vmem:[%s18179_s8 + $0x2c44] ss:$16 sps:$4 sm:$0xff]   ;;  %v16229_v25 = vld [vmem:[%s18179_s8 + $0x2c20] ss:$16 sps:$4 sm:$0xff]  }
 0x3d1   : > { %11342 = vmatpush1.bf16.msra.mxu1 %v16208_v56  ;;  %11302 = vmatprep.subr.bf16.mxu0 %v16213_v17  ;;  %v16228_v56 = vld [vmem:[%s18179_s8 + $0x2e44] ss:$16 sps:$4 sm:$0xff]   ;;  %v16232_v63 = vld [vmem:[%s18179_s8 + $0x2e20] ss:$16 sps:$4 sm:$0xff]  }
 0x3d2   : > { %11343 = vmatprep.subr.bf16.mxu1 %v16216_v55  ;;  %v16237_v35 = vld [vmem:[%s18179_s8 + $0x2c04] ss:$16 sps:$4 sm:$0xff]   ;;  %v16235_v55 = vld [vmem:[%s18179_s8 + $0x2c00] ss:$16 sps:$4 sm:$0xff]  }
 0x3d3   : > { %v16240_v17 = vld [vmem:[%s18179_s8 + $0x2e04] ss:$16 sps:$4 sm:$0xff]  }
 0x3d4   : > { %11303 = vmatpush1.bf16.msra.mxu0 %v16211_v57  ;;  %v16238_v57 = vld [vmem:[%s18179_s8 + $0x2e00] ss:$16 sps:$4 sm:$0xff]  }
 0x3d5   : > { %11344 = vmatpush1.bf16.msra.mxu1 %v16214_v52  ;;  %11304 = vmatprep.subr.bf16.mxu0 %v16219_v6  ;;  %v16243_v52 = vld [vmem:[%s18179_s8 + $0x2de4] ss:$16 sps:$4 sm:$0xff]  }
 0x3d6   : > { %11345 = vmatprep.subr.bf16.mxu1 %v16222_v41  ;;  %v16246_v6 = vld [vmem:[%s18179_s8 + $0x2fe4] ss:$16 sps:$4 sm:$0xff]   ;;  %v16241_v41 = vld [vmem:[%s18179_s8 + $0x2de0] ss:$16 sps:$4 sm:$0xff]  }
 0x3d8   : > { %11305 = vmatpush1.bf16.msra.mxu0 %v16217_v47  ;;  %v16244_v47 = vld [vmem:[%s18179_s8 + $0x2fe0] ss:$16 sps:$4 sm:$0xff]  }
 0x3d9   : > { %11346 = vmatpush1.bf16.msra.mxu1 %v16220_v54  ;;  %11306 = vmatprep.subr.bf16.mxu0 %v16225_v49  ;;  %v16249_v54 = vld [vmem:[%s18179_s8 + $0x2dc4] ss:$16 sps:$4 sm:$0xff]  }
 0x3da   : > { %11347 = vmatprep.subr.bf16.mxu1 %v16228_v56  ;;  %v16252_v49 = vld [vmem:[%s18179_s8 + $0x2fc4] ss:$16 sps:$4 sm:$0xff]   ;;  %v16247_v56 = vld [vmem:[%s18179_s8 + $0x2dc0] ss:$16 sps:$4 sm:$0xff]  }
 0x3dc   : > { %11307 = vmatpush1.bf16.msra.mxu0 %v16223_v13  ;;  %v16250_v13 = vld [vmem:[%s18179_s8 + $0x2fc0] ss:$16 sps:$4 sm:$0xff]  }
 0x3dd   : > { %11348 = vmatpush1.bf16.msra.mxu1 %v16226_v21  ;;  %11308 = vmatprep.subr.bf16.mxu0 %v16231_v26  ;;  %v16255_v21 = vld [vmem:[%s18179_s8 + $0x2da4] ss:$16 sps:$4 sm:$0xff]  }
 0x3de   : > { %11349 = vmatprep.subr.bf16.mxu1 %v16234_v12  ;;  %v16258_v26 = vld [vmem:[%s18179_s8 + $0x2fa4] ss:$16 sps:$4 sm:$0xff]   ;;  %v16253_v12 = vld [vmem:[%s18179_s8 + $0x2da0] ss:$16 sps:$4 sm:$0xff]  }
 0x3e0   : > { %11309 = vmatpush1.bf16.msra.mxu0 %v16229_v25  ;;  %v16256_v25 = vld [vmem:[%s18179_s8 + $0x2fa0] ss:$16 sps:$4 sm:$0xff]  }
 0x3e1   : > { %11350 = vmatpush1.bf16.msra.mxu1 %v16232_v63  ;;  %11310 = vmatprep.subr.bf16.mxu0 %v16237_v35  ;;  %v16261_v63 = vld [vmem:[%s18179_s8 + $0x2d84] ss:$16 sps:$4 sm:$0xff]  }
 0x3e2   : > { %11351 = vmatprep.subr.bf16.mxu1 %v16240_v17  ;;  %v16264_v35 = vld [vmem:[%s18179_s8 + $0x2f84] ss:$16 sps:$4 sm:$0xff]   ;;  %v16259_v17 = vld [vmem:[%s18179_s8 + $0x2d80] ss:$16 sps:$4 sm:$0xff]  }
 0x3e4   : > { %11311 = vmatpush1.bf16.msra.mxu0 %v16235_v55  ;;  %v16262_v55 = vld [vmem:[%s18179_s8 + $0x2f80] ss:$16 sps:$4 sm:$0xff]  }
 0x3e5   : > { %11352 = vmatpush1.bf16.msra.mxu1 %v16238_v57  ;;  %11312 = vmatprep.subr.bf16.mxu0 %v16243_v52  ;;  %v16267_v57 = vld [vmem:[%s18179_s8 + $0x2d64] ss:$16 sps:$4 sm:$0xff]  }
 0x3e6   : > { %11353 = vmatprep.subr.bf16.mxu1 %v16246_v6  ;;  %v16270_v52 = vld [vmem:[%s18179_s8 + $0x2f64] ss:$16 sps:$4 sm:$0xff]   ;;  %v16265_v6 = vld [vmem:[%s18179_s8 + $0x2d60] ss:$16 sps:$4 sm:$0xff]  }
 0x3e8   : > { %11313 = vmatpush2.bf16.msra.mxu0 %v16241_v41  ;;  %v16268_v41 = vld [vmem:[%s18179_s8 + $0x2f60] ss:$16 sps:$4 sm:$0xff]  }
 0x3e9   : > { %11354 = vmatpush2.bf16.msra.mxu1 %v16244_v47  ;;  %11314 = vmatprep.subr.bf16.mxu0 %v16249_v54  ;;  %v16273_v47 = vld [vmem:[%s18179_s8 + $0x2d44] ss:$16 sps:$4 sm:$0xff]  }
 0x3ea   : > { %11355 = vmatprep.subr.bf16.mxu1 %v16252_v49  ;;  %v16276_v54 = vld [vmem:[%s18179_s8 + $0x2f44] ss:$16 sps:$4 sm:$0xff]   ;;  %v16271_v49 = vld [vmem:[%s18179_s8 + $0x2d40] ss:$16 sps:$4 sm:$0xff]  }
 0x3ec   : > { %11315 = vmatpush2.bf16.msra.mxu0 %v16247_v56  ;;  %v16274_v56 = vld [vmem:[%s18179_s8 + $0x2f40] ss:$16 sps:$4 sm:$0xff]  }
 0x3ed   : > { %11356 = vmatpush2.bf16.msra.mxu1 %v16250_v13  ;;  %11316 = vmatprep.subr.bf16.mxu0 %v16255_v21  ;;  %v16279_v13 = vld [vmem:[%s18179_s8 + $0x2d24] ss:$16 sps:$4 sm:$0xff]  }
 0x3ee   : > { %11357 = vmatprep.subr.bf16.mxu1 %v16258_v26  ;;  %v16282_v21 = vld [vmem:[%s18179_s8 + $0x2f24] ss:$16 sps:$4 sm:$0xff]   ;;  %v16277_v26 = vld [vmem:[%s18179_s8 + $0x2d20] ss:$16 sps:$4 sm:$0xff]  }
 0x3f0   : > { %11317 = vmatpush2.bf16.msra.mxu0 %v16253_v12  ;;  %v16280_v12 = vld [vmem:[%s18179_s8 + $0x2f20] ss:$16 sps:$4 sm:$0xff]  }
 0x3f1   : > { %11358 = vmatpush2.bf16.msra.mxu1 %v16256_v25  ;;  %11318 = vmatprep.subr.bf16.mxu0 %v16261_v63  ;;  %v16285_v25 = vld [vmem:[%s18179_s8 + $0x2d04] ss:$16 sps:$4 sm:$0xff]  }
 0x3f2   : > { %11359 = vmatprep.subr.bf16.mxu1 %v16264_v35  ;;  %v16288_v63 = vld [vmem:[%s18179_s8 + $0x2f04] ss:$16 sps:$4 sm:$0xff]   ;;  %v19371_v35 = vrot.slane %v19272_v60, %v18295_v5  ;;  %v16298_v5 = vld [vmem:[%s18179_s8 + $0xcc] ss:$16 sps:$4 sm:$0xff]  }
 0x3f3   : > { %v16301_v60 = vld [vmem:[%s18179_s8 + $0x2cc] ss:$16 sps:$4 sm:$0xff]  }
 0x3f4   : > { %11319 = vmatpush2.bf16.msra.mxu0 %v16259_v17  ;;  %v16283_v17 = vld [vmem:[%s18179_s8 + $0x2d00] ss:$16 sps:$4 sm:$0xff]  }
 0x3f5   : > { %11360 = vmatpush2.bf16.msra.mxu1 %v16262_v55  ;;  %11320 = vmatprep.subr.bf16.mxu0 %v16267_v57  ;;  %v16286_v55 = vld [vmem:[%s18179_s8 + $0x2f00] ss:$16 sps:$4 sm:$0xff]   ;;  %v16292_v57 = vld [vmem:[%s18179_s8 + $0xec] ss:$16 sps:$4 sm:$0xff]  }
 0x3f6   : > { %11361 = vmatprep.subr.bf16.mxu1 %v16270_v52  ;;  %v16295_v52 = vld [vmem:[%s18179_s8 + $0x2ec] ss:$16 sps:$4 sm:$0xff]  }
 0x3f8   : > { %11321 = vmatpush2.bf16.msra.mxu0 %v16265_v6  ;;  %v16290_v6 = vld [vmem:[%s18179_s8 + $0xe8] ss:$16 sps:$4 sm:$0xff]  }
 0x3f9   : > { %11362 = vmatpush2.bf16.msra.mxu1 %v16268_v41  ;;  %11322 = vmatprep.subr.bf16.mxu0 %v16273_v47  ;;  %v16293_v41 = vld [vmem:[%s18179_s8 + $0x2e8] ss:$16 sps:$4 sm:$0xff]   ;;  %v19381_v47 = vcombine.high %v19371_v35, %v19371_v35 }
 0x3fa   : > { %11363 = vmatprep.subr.bf16.mxu1 %v16276_v54  ;;  %v16296_v54 = vld [vmem:[%s18179_s8 + $0xc8] ss:$16 sps:$4 sm:$0xff]  }
 0x3fc   : > { %11323 = vmatpush2.bf16.msra.mxu0 %v16271_v49  ;;  %v16299_v49 = vld [vmem:[%s18179_s8 + $0x2c8] ss:$16 sps:$4 sm:$0xff]  }
 0x3fd   : > { %11364 = vmatpush2.bf16.msra.mxu1 %v16274_v56  ;;  %11324 = vmatprep.subr.bf16.mxu0 %v16279_v13 }
 0x3fe   : > { %11365 = vmatprep.subr.bf16.mxu1 %v16282_v21 }
 0x400   : > { %11325 = vmatpush2.bf16.msra.mxu0 %v16277_v26 }
 0x401   : > { %11366 = vmatpush2.bf16.msra.mxu1 %v16280_v12  ;;  %11326 = vmatprep.subr.bf16.mxu0 %v16285_v25  ;;  %v16304_v25 = vld [vmem:[%s18179_s8 + $0xac] ss:$16 sps:$4 sm:$0xff]  }
 0x402   : > { %11367 = vmatprep.subr.bf16.mxu1 %v16288_v63  ;;  %v16307_v63 = vld [vmem:[%s18179_s8 + $0x2ac] ss:$16 sps:$4 sm:$0xff]  }
 0x404   : > { %11327 = vmatpush2.bf16.msra.mxu0 %v16283_v17 }
 0x405   : > { %11368 = vmatpush2.bf16.msra.mxu1 %v16286_v55  ;;  %11378 = vmatprep.subr.bf16.mxu0 %v16292_v57  ;;  %v16302_v57 = vld [vmem:[%s18179_s8 + $0xa8] ss:$16 sps:$4 sm:$0xff]  }
 0x406   : > { %11419 = vmatprep.subr.bf16.mxu1 %v16295_v52  ;;  %v16305_v52 = vld [vmem:[%s18179_s8 + $0x2a8] ss:$16 sps:$4 sm:$0xff]  }
 0x407   : > { %v11084_v56 = vpop.f32.mrf.mxu0  ;;  %11329 = vmatmul.mubr.bf16.vlgmr.msra.gmra.mxu0 %v19371_v35 }
 0x408   : > { %v11125_v13 = vpop.f32.mrf.mxu1  ;;  %11370 = vmatmul.mubr.bf16.vlgmr.msra.gmra.mxu1 %v19381_v47  ;;  %v11085_v21 = vadd.f32 %v11084_v56, %v19310_v2  ;;  %11379 = vmatpush1.bf16.msra.mxu0 %v16290_v6  ;;  %v16311_v56 = vld [vmem:[%s18179_s8 + $0x288] ss:$16 sps:$4 sm:$0xff]  }
 0x409   : > { %11420 = vmatpush1.bf16.msra.mxu1 %v16293_v41  ;;  %v11086_v26 = vpop.f32.mrf.mxu0  ;;  %11380 = vmatprep.subr.bf16.mxu0 %v16298_v5 }
 0x40a   : > { %v11127_v12 = vpop.f32.mrf.mxu1  ;;  %11421 = vmatprep.subr.bf16.mxu1 %v16301_v60  ;;  %v19392_v17 = vadd.f32 %v11125_v13, %v11085_v21  ;;  %v11087_v55 = vadd.f32 %v11086_v26, %v19317_v27  ;;  %11410 = vmatprep.mubr.bf16.mxu0 %v18307_v16  ;;  %v16310_v27 = vld [vmem:[%s18179_s8 + $0x8c] ss:$16 sps:$4 sm:$0xff]   ;;  %v16314_v13 = vld [vmem:[%s18179_s8 + $0x68] ss:$16 sps:$4 sm:$0xff]  }
 0x40b   : > { %11451 = vmatprep.mubr.bf16.mxu1 %v18314_v20  ;;  %v11088_v2 = vpop.f32.mrf.mxu0  ;;  %v16313_v16 = vld [vmem:[%s18179_s8 + $0x28c] ss:$16 sps:$4 sm:$0xff]   ;;  %v16308_v20 = vld [vmem:[%s18179_s8 + $0x88] ss:$16 sps:$4 sm:$0xff]  }
 0x40c   : > { %v11129_v6 = vpop.f32.mrf.mxu1  ;;  %v19399_v41 = vadd.f32 %v11127_v12, %v11087_v55  ;;  %11381 = vmatpush1.bf16.msra.mxu0 %v16296_v54  ;;  %v16316_v54 = vld [vmem:[%s18179_s8 + $0x6c] ss:$16 sps:$4 sm:$0xff]   ;;  %v16317_v21 = vld [vmem:[%s18179_s8 + $0x268] ss:$16 sps:$4 sm:$0xff]  }
 0x40d   : > { %11422 = vmatpush1.bf16.msra.mxu1 %v16299_v49  ;;  %v11089_v5 = vpop.f32.mrf.mxu0  ;;  %11382 = vmatprep.subr.bf16.mxu0 %v16304_v25  ;;  %v16319_v49 = vld [vmem:[%s18179_s8 + $0x26c] ss:$16 sps:$4 sm:$0xff]   ;;  %v16320_v25 = vld [vmem:[%s18179_s8 + $0x48] ss:$16 sps:$4 sm:$0xff]  }
 0x40e   : > { %v11130_v60 = vpop.f32.mrf.mxu1  ;;  %11423 = vmatprep.subr.bf16.mxu1 %v16307_v63  ;;  %v16322_v26 = vld [vmem:[%s18179_s8 + $0x4c] ss:$16 sps:$4 sm:$0xff]   ;;  %v16323_v63 = vld [vmem:[%s18179_s8 + $0x248] ss:$16 sps:$4 sm:$0xff]  }
 0x40f   : > { %v16325_v12 = vld [vmem:[%s18179_s8 + $0x24c] ss:$16 sps:$4 sm:$0xff]   ;;  %v16329_v2 = vld [vmem:[%s18179_s8 + $0x228] ss:$16 sps:$4 sm:$0xff]  }
 0x410   : > { %11383 = vmatpush1.bf16.msra.mxu0 %v16302_v57  ;;  %v16328_v55 = vld [vmem:[%s18179_s8 + $0x2c] ss:$16 sps:$4 sm:$0xff]   ;;  %v16332_v60 = vld [vmem:[%s18179_s8 + $0x8] ss:$16 sps:$4 sm:$0xff]  }
 0x411   : > { %11424 = vmatpush1.bf16.msra.mxu1 %v16305_v52  ;;  %11384 = vmatprep.subr.bf16.mxu0 %v16310_v27  ;;  %v16331_v57 = vld [vmem:[%s18179_s8 + $0x22c] ss:$16 sps:$4 sm:$0xff]   ;;  %v16326_v52 = vld [vmem:[%s18179_s8 + $0x28] ss:$16 sps:$4 sm:$0xff]  }
 0x412   : > { %11425 = vmatprep.subr.bf16.mxu1 %v16313_v16  ;;  %v16334_v6 = vld [vmem:[%s18179_s8 + $0xc] ss:$16 sps:$4 sm:$0xff]   ;;  %v16335_v27 = vld [vmem:[%s18179_s8 + $0x208] ss:$16 sps:$4 sm:$0xff]  }
 0x413   : > { %v16337_v5 = vld [vmem:[%s18179_s8 + $0x20c] ss:$16 sps:$4 sm:$0xff]  }
 0x414   : > { %11385 = vmatpush1.bf16.msra.mxu0 %v16308_v20  ;;  %v16340_v16 = vld [vmem:[%s18179_s8 + $0x1ec] ss:$16 sps:$4 sm:$0xff]  }
 0x415   : > { %11426 = vmatpush1.bf16.msra.mxu1 %v16311_v56  ;;  %11386 = vmatprep.subr.bf16.mxu0 %v16316_v54  ;;  %v16343_v20 = vld [vmem:[%s18179_s8 + $0x3ec] ss:$16 sps:$4 sm:$0xff]   ;;  %v16338_v56 = vld [vmem:[%s18179_s8 + $0x1e8] ss:$16 sps:$4 sm:$0xff]  }
 0x416   : > { %11427 = vmatprep.subr.bf16.mxu1 %v16319_v49  ;;  %v16341_v54 = vld [vmem:[%s18179_s8 + $0x3e8] ss:$16 sps:$4 sm:$0xff]   ;;  %v16346_v49 = vld [vmem:[%s18179_s8 + $0x1cc] ss:$16 sps:$4 sm:$0xff]  }
 0x418   : > { %11387 = vmatpush1.bf16.msra.mxu0 %v16314_v13  ;;  %v16349_v13 = vld [vmem:[%s18179_s8 + $0x3cc] ss:$16 sps:$4 sm:$0xff]  }
 0x419   : > { %11428 = vmatpush1.bf16.msra.mxu1 %v16317_v21  ;;  %11388 = vmatprep.subr.bf16.mxu0 %v16322_v26  ;;  %v16344_v21 = vld [vmem:[%s18179_s8 + $0x1c8] ss:$16 sps:$4 sm:$0xff]  }
 0x41a   : > { %11429 = vmatprep.subr.bf16.mxu1 %v16325_v12  ;;  %v16347_v26 = vld [vmem:[%s18179_s8 + $0x3c8] ss:$16 sps:$4 sm:$0xff]   ;;  %v16352_v12 = vld [vmem:[%s18179_s8 + $0x1ac] ss:$16 sps:$4 sm:$0xff]  }
 0x41c   : > { %11389 = vmatpush1.bf16.msra.mxu0 %v16320_v25  ;;  %v16355_v25 = vld [vmem:[%s18179_s8 + $0x3ac] ss:$16 sps:$4 sm:$0xff]  }
 0x41d   : > { %11430 = vmatpush1.bf16.msra.mxu1 %v16323_v63  ;;  %11390 = vmatprep.subr.bf16.mxu0 %v16328_v55  ;;  %v16350_v63 = vld [vmem:[%s18179_s8 + $0x1a8] ss:$16 sps:$4 sm:$0xff]  }
 0x41e   : > { %11431 = vmatprep.subr.bf16.mxu1 %v16331_v57  ;;  %v16353_v55 = vld [vmem:[%s18179_s8 + $0x3a8] ss:$16 sps:$4 sm:$0xff]   ;;  %v16358_v57 = vld [vmem:[%s18179_s8 + $0x18c] ss:$16 sps:$4 sm:$0xff]  }
 0x420   : > { %11391 = vmatpush1.bf16.msra.mxu0 %v16326_v52  ;;  %v16361_v52 = vld [vmem:[%s18179_s8 + $0x38c] ss:$16 sps:$4 sm:$0xff]  }
 0x421   : > { %11432 = vmatpush1.bf16.msra.mxu1 %v16329_v2  ;;  %11392 = vmatprep.subr.bf16.mxu0 %v16334_v6  ;;  %v16356_v2 = vld [vmem:[%s18179_s8 + $0x188] ss:$16 sps:$4 sm:$0xff]  }
 0x422   : > { %11433 = vmatprep.subr.bf16.mxu1 %v16337_v5  ;;  %v16359_v6 = vld [vmem:[%s18179_s8 + $0x388] ss:$16 sps:$4 sm:$0xff]   ;;  %v16364_v5 = vld [vmem:[%s18179_s8 + $0x16c] ss:$16 sps:$4 sm:$0xff]  }
 0x424   : > { %11393 = vmatpush1.bf16.msra.mxu0 %v16332_v60  ;;  %v16367_v60 = vld [vmem:[%s18179_s8 + $0x36c] ss:$16 sps:$4 sm:$0xff]  }
 0x425   : > { %11434 = vmatpush1.bf16.msra.mxu1 %v16335_v27  ;;  %11394 = vmatprep.subr.bf16.mxu0 %v16340_v16  ;;  %v16362_v27 = vld [vmem:[%s18179_s8 + $0x168] ss:$16 sps:$4 sm:$0xff]  }
 0x426   : > { %11435 = vmatprep.subr.bf16.mxu1 %v16343_v20  ;;  %v16365_v16 = vld [vmem:[%s18179_s8 + $0x368] ss:$16 sps:$4 sm:$0xff]   ;;  %v16370_v20 = vld [vmem:[%s18179_s8 + $0x14c] ss:$16 sps:$4 sm:$0xff]  }
 0x428   : > { %11395 = vmatpush2.bf16.msra.mxu0 %v16338_v56  ;;  %v16373_v56 = vld [vmem:[%s18179_s8 + $0x34c] ss:$16 sps:$4 sm:$0xff]  }
 0x429   : > { %11436 = vmatpush2.bf16.msra.mxu1 %v16341_v54  ;;  %11396 = vmatprep.subr.bf16.mxu0 %v16346_v49  ;;  %v16368_v54 = vld [vmem:[%s18179_s8 + $0x148] ss:$16 sps:$4 sm:$0xff]  }
 0x42a   : > { %11437 = vmatprep.subr.bf16.mxu1 %v16349_v13  ;;  %v16371_v49 = vld [vmem:[%s18179_s8 + $0x348] ss:$16 sps:$4 sm:$0xff]   ;;  %v16376_v13 = vld [vmem:[%s18179_s8 + $0x12c] ss:$16 sps:$4 sm:$0xff]  }
 0x42c   : > { %11397 = vmatpush2.bf16.msra.mxu0 %v16344_v21  ;;  %v16379_v21 = vld [vmem:[%s18179_s8 + $0x32c] ss:$16 sps:$4 sm:$0xff]  }
 0x42d   : > { %11438 = vmatpush2.bf16.msra.mxu1 %v16347_v26  ;;  %11398 = vmatprep.subr.bf16.mxu0 %v16352_v12  ;;  %v16374_v26 = vld [vmem:[%s18179_s8 + $0x128] ss:$16 sps:$4 sm:$0xff]  }
 0x42e   : > { %11439 = vmatprep.subr.bf16.mxu1 %v16355_v25  ;;  %v16377_v12 = vld [vmem:[%s18179_s8 + $0x328] ss:$16 sps:$4 sm:$0xff]   ;;  %v16382_v25 = vld [vmem:[%s18179_s8 + $0x10c] ss:$16 sps:$4 sm:$0xff]  }
 0x430   : > { %11399 = vmatpush2.bf16.msra.mxu0 %v16350_v63  ;;  %v16385_v63 = vld [vmem:[%s18179_s8 + $0x30c] ss:$16 sps:$4 sm:$0xff]  }
 0x431   : > { %11440 = vmatpush2.bf16.msra.mxu1 %v16353_v55  ;;  %11400 = vmatprep.subr.bf16.mxu0 %v16358_v57  ;;  %v16380_v55 = vld [vmem:[%s18179_s8 + $0x108] ss:$16 sps:$4 sm:$0xff]  }
 0x432   : > { %11441 = vmatprep.subr.bf16.mxu1 %v16361_v52  ;;  %v16383_v57 = vld [vmem:[%s18179_s8 + $0x308] ss:$16 sps:$4 sm:$0xff]   ;;  %v16388_v52 = vld [vmem:[%s18179_s8 + $0x4ec] ss:$16 sps:$4 sm:$0xff]  }
 0x434   : > { %11401 = vmatpush2.bf16.msra.mxu0 %v16356_v2  ;;  %v16391_v2 = vld [vmem:[%s18179_s8 + $0x6ec] ss:$16 sps:$4 sm:$0xff]  }
 0x435   : > { %11442 = vmatpush2.bf16.msra.mxu1 %v16359_v6  ;;  %11402 = vmatprep.subr.bf16.mxu0 %v16364_v5  ;;  %v16386_v6 = vld [vmem:[%s18179_s8 + $0x4e8] ss:$16 sps:$4 sm:$0xff]  }
 0x436   : > { %11443 = vmatprep.subr.bf16.mxu1 %v16367_v60  ;;  %v16389_v5 = vld [vmem:[%s18179_s8 + $0x6e8] ss:$16 sps:$4 sm:$0xff]   ;;  %v16394_v60 = vld [vmem:[%s18179_s8 + $0x4cc] ss:$16 sps:$4 sm:$0xff]  }
 0x438   : > { %11403 = vmatpush2.bf16.msra.mxu0 %v16362_v27  ;;  %v16397_v27 = vld [vmem:[%s18179_s8 + $0x6cc] ss:$16 sps:$4 sm:$0xff]  }
 0x439   : > { %11444 = vmatpush2.bf16.msra.mxu1 %v16365_v16  ;;  %11404 = vmatprep.subr.bf16.mxu0 %v16370_v20 }
 0x43a   : > { %11445 = vmatprep.subr.bf16.mxu1 %v16373_v56 }
 0x43c   : > { %11405 = vmatpush2.bf16.msra.mxu0 %v16368_v54  ;;  %v16392_v54 = vld [vmem:[%s18179_s8 + $0x4c8] ss:$16 sps:$4 sm:$0xff]  }
 0x43d   : > { %11446 = vmatpush2.bf16.msra.mxu1 %v16371_v49  ;;  %11406 = vmatprep.subr.bf16.mxu0 %v16376_v13  ;;  %v16395_v49 = vld [vmem:[%s18179_s8 + $0x6c8] ss:$16 sps:$4 sm:$0xff]  }
 0x43e   : > { %11447 = vmatprep.subr.bf16.mxu1 %v16379_v21 }
 0x440   : > { %11407 = vmatpush2.bf16.msra.mxu0 %v16374_v26  ;;  %v16400_v26 = vld [vmem:[%s18179_s8 + $0x4ac] ss:$16 sps:$4 sm:$0xff]  }
 0x441   : > { %11448 = vmatpush2.bf16.msra.mxu1 %v16377_v12  ;;  %11408 = vmatprep.subr.bf16.mxu0 %v16382_v25  ;;  %v16403_v12 = vld [vmem:[%s18179_s8 + $0x6ac] ss:$16 sps:$4 sm:$0xff]  }
 0x442   : > { %11449 = vmatprep.subr.bf16.mxu1 %v16385_v63 }
 0x444   : > { %11409 = vmatpush2.bf16.msra.mxu0 %v16380_v55  ;;  %v16398_v55 = vld [vmem:[%s18179_s8 + $0x4a8] ss:$16 sps:$4 sm:$0xff]  }
 0x445   : > { %11450 = vmatpush2.bf16.msra.mxu1 %v16383_v57  ;;  %11460 = vmatprep.subr.bf16.mxu0 %v16388_v52  ;;  %v16401_v57 = vld [vmem:[%s18179_s8 + $0x6a8] ss:$16 sps:$4 sm:$0xff]  }
 0x446   : > { %11501 = vmatprep.subr.bf16.mxu1 %v16391_v2 }
 0x447   : > { %v11166_v16 = vpop.f32.mrf.mxu0  ;;  %11411 = vmatmul.mubr.bf16.vlgmr.msra.gmra.mxu0 %v18333_v33 }
 0x448   : > { %v11207_v20 = vpop.f32.mrf.mxu1  ;;  %11452 = vmatmul.mubr.bf16.vlgmr.msra.gmra.mxu1 %v18343_v38  ;;  %v11167_v56 = vadd.f32 %v11166_v16, %v19392_v17  ;;  %11461 = vmatpush1.bf16.msra.mxu0 %v16386_v6  ;;  %v16407_v6 = vld [vmem:[%s18179_s8 + $0x688] ss:$16 sps:$4 sm:$0xff]  }
 0x449   : > { %11502 = vmatpush1.bf16.msra.mxu1 %v16389_v5  ;;  %v11168_v13 = vpop.f32.mrf.mxu0  ;;  %11462 = vmatprep.subr.bf16.mxu0 %v16394_v60  ;;  %v16412_v5 = vld [vmem:[%s18179_s8 + $0x46c] ss:$16 sps:$4 sm:$0xff]   ;;  %v16413_v16 = vld [vmem:[%s18179_s8 + $0x668] ss:$16 sps:$4 sm:$0xff]  }
 0x44a   : > { %v11209_v21 = vpop.f32.mrf.mxu1  ;;  %11503 = vmatprep.subr.bf16.mxu1 %v16397_v27  ;;  %v19466_v25 = vadd.f32 %v11207_v20, %v11167_v56  ;;  %v11169_v33 = vadd.f32 %v11168_v13, %v19399_v41  ;;  %11492 = vmatprep.mubr.bf16.mxu0 %v18339_v37  ;;  %v16406_v37 = vld [vmem:[%s18179_s8 + $0x48c] ss:$16 sps:$4 sm:$0xff]   ;;  %v16404_v41 = vld [vmem:[%s18179_s8 + $0x488] ss:$16 sps:$4 sm:$0xff]  }
 0x44b   : > { %11533 = vmatprep.mubr.bf16.mxu1 %v18351_v43  ;;  %v11170_v38 = vpop.f32.mrf.mxu0  ;;  %v16409_v43 = vld [vmem:[%s18179_s8 + $0x68c] ss:$16 sps:$4 sm:$0xff]   ;;  %v16410_v27 = vld [vmem:[%s18179_s8 + $0x468] ss:$16 sps:$4 sm:$0xff]  }
 0x44c   : > { %v11211_v17 = vpop.f32.mrf.mxu1  ;;  %v19471_v63 = vadd.f32 %v11209_v21, %v11169_v33  ;;  %11463 = vmatpush1.bf16.msra.mxu0 %v16392_v54  ;;  %v16415_v60 = vld [vmem:[%s18179_s8 + $0x66c] ss:$16 sps:$4 sm:$0xff]   ;;  %v16416_v54 = vld [vmem:[%s18179_s8 + $0x448] ss:$16 sps:$4 sm:$0xff]  }
 0x44d   : > { %11504 = vmatpush1.bf16.msra.mxu1 %v16395_v49  ;;  %v11171_v52 = vpop.f32.mrf.mxu0  ;;  %11464 = vmatprep.subr.bf16.mxu0 %v16400_v26  ;;  %v16418_v20 = vld [vmem:[%s18179_s8 + $0x44c] ss:$16 sps:$4 sm:$0xff]   ;;  %v16419_v49 = vld [vmem:[%s18179_s8 + $0x648] ss:$16 sps:$4 sm:$0xff]  }
 0x44e   : > { %v11212_v2 = vpop.f32.mrf.mxu1  ;;  %11505 = vmatprep.subr.bf16.mxu1 %v16403_v12  ;;  %v16421_v56 = vld [vmem:[%s18179_s8 + $0x64c] ss:$16 sps:$4 sm:$0xff]   ;;  %v16422_v26 = vld [vmem:[%s18179_s8 + $0x428] ss:$16 sps:$4 sm:$0xff]  }
 0x44f   : > { %v16424_v13 = vld [vmem:[%s18179_s8 + $0x42c] ss:$16 sps:$4 sm:$0xff]   ;;  %v16425_v12 = vld [vmem:[%s18179_s8 + $0x628] ss:$16 sps:$4 sm:$0xff]  }
 0x450   : > { %11465 = vmatpush1.bf16.msra.mxu0 %v16398_v55  ;;  %v16427_v21 = vld [vmem:[%s18179_s8 + $0x62c] ss:$16 sps:$4 sm:$0xff]   ;;  %v16428_v17 = vld [vmem:[%s18179_s8 + $0x408] ss:$16 sps:$4 sm:$0xff]  }
 0x451   : > { %11506 = vmatpush1.bf16.msra.mxu1 %v16401_v57  ;;  %11466 = vmatprep.subr.bf16.mxu0 %v16406_v37  ;;  %v16430_v33 = vld [vmem:[%s18179_s8 + $0x40c] ss:$16 sps:$4 sm:$0xff]   ;;  %v16431_v55 = vld [vmem:[%s18179_s8 + $0x608] ss:$16 sps:$4 sm:$0xff]  }
 0x452   : > { %11507 = vmatprep.subr.bf16.mxu1 %v16409_v43  ;;  %v16433_v38 = vld [vmem:[%s18179_s8 + $0x60c] ss:$16 sps:$4 sm:$0xff]   ;;  %v16434_v2 = vld [vmem:[%s18179_s8 + $0x5e8] ss:$16 sps:$4 sm:$0xff]  }
 0x453   : > { %v16436_v57 = vld [vmem:[%s18179_s8 + $0x5ec] ss:$16 sps:$4 sm:$0xff]   ;;  %v16437_v37 = vld [vmem:[%s18179_s8 + $0x7e8] ss:$16 sps:$4 sm:$0xff]  }
 0x454   : > { %11467 = vmatpush1.bf16.msra.mxu0 %v16404_v41  ;;  %v16439_v52 = vld [vmem:[%s18179_s8 + $0x7ec] ss:$16 sps:$4 sm:$0xff]  }
 0x455   : > { %11508 = vmatpush1.bf16.msra.mxu1 %v16407_v6  ;;  %11468 = vmatprep.subr.bf16.mxu0 %v16412_v5  ;;  %v16442_v43 = vld [vmem:[%s18179_s8 + $0x5cc] ss:$16 sps:$4 sm:$0xff]   ;;  %v16440_v6 = vld [vmem:[%s18179_s8 + $0x5c8] ss:$16 sps:$4 sm:$0xff]  }
 0x456   : > { %11509 = vmatprep.subr.bf16.mxu1 %v16415_v60  ;;  %v16445_v41 = vld [vmem:[%s18179_s8 + $0x7cc] ss:$16 sps:$4 sm:$0xff]   ;;  %v16443_v5 = vld [vmem:[%s18179_s8 + $0x7c8] ss:$16 sps:$4 sm:$0xff]  }
 0x457   : > { %v16448_v60 = vld [vmem:[%s18179_s8 + $0x5ac] ss:$16 sps:$4 sm:$0xff]  }
 0x458   : > { %11469 = vmatpush1.bf16.msra.mxu0 %v16410_v27  ;;  %v16451_v27 = vld [vmem:[%s18179_s8 + $0x7ac] ss:$16 sps:$4 sm:$0xff]  }
 0x459   : > { %11510 = vmatpush1.bf16.msra.mxu1 %v16413_v16  ;;  %11470 = vmatprep.subr.bf16.mxu0 %v16418_v20  ;;  %v16446_v16 = vld [vmem:[%s18179_s8 + $0x5a8] ss:$16 sps:$4 sm:$0xff]  }
 0x45a   : > { %11511 = vmatprep.subr.bf16.mxu1 %v16421_v56  ;;  %v16449_v20 = vld [vmem:[%s18179_s8 + $0x7a8] ss:$16 sps:$4 sm:$0xff]   ;;  %v16454_v56 = vld [vmem:[%s18179_s8 + $0x58c] ss:$16 sps:$4 sm:$0xff]  }
 0x45c   : > { %11471 = vmatpush1.bf16.msra.mxu0 %v16416_v54  ;;  %v16457_v54 = vld [vmem:[%s18179_s8 + $0x78c] ss:$16 sps:$4 sm:$0xff]  }
 0x45d   : > { %11512 = vmatpush1.bf16.msra.mxu1 %v16419_v49  ;;  %11472 = vmatprep.subr.bf16.mxu0 %v16424_v13  ;;  %v16452_v49 = vld [vmem:[%s18179_s8 + $0x588] ss:$16 sps:$4 sm:$0xff]  }
 0x45e   : > { %11513 = vmatprep.subr.bf16.mxu1 %v16427_v21  ;;  %v16455_v13 = vld [vmem:[%s18179_s8 + $0x788] ss:$16 sps:$4 sm:$0xff]   ;;  %v16460_v21 = vld [vmem:[%s18179_s8 + $0x56c] ss:$16 sps:$4 sm:$0xff]  }
 0x460   : > { %11473 = vmatpush1.bf16.msra.mxu0 %v16422_v26  ;;  %v16463_v26 = vld [vmem:[%s18179_s8 + $0x76c] ss:$16 sps:$4 sm:$0xff]  }
 0x461   : > { %11514 = vmatpush1.bf16.msra.mxu1 %v16425_v12  ;;  %11474 = vmatprep.subr.bf16.mxu0 %v16430_v33  ;;  %v16458_v12 = vld [vmem:[%s18179_s8 + $0x568] ss:$16 sps:$4 sm:$0xff]  }
 0x462   : > { %11515 = vmatprep.subr.bf16.mxu1 %v16433_v38  ;;  %v16461_v33 = vld [vmem:[%s18179_s8 + $0x768] ss:$16 sps:$4 sm:$0xff]   ;;  %v16466_v38 = vld [vmem:[%s18179_s8 + $0x54c] ss:$16 sps:$4 sm:$0xff]  }
 0x464   : > { %11475 = vmatpush1.bf16.msra.mxu0 %v16428_v17  ;;  %v16469_v17 = vld [vmem:[%s18179_s8 + $0x74c] ss:$16 sps:$4 sm:$0xff]  }
 0x465   : > { %11516 = vmatpush1.bf16.msra.mxu1 %v16431_v55  ;;  %11476 = vmatprep.subr.bf16.mxu0 %v16436_v57  ;;  %v16464_v55 = vld [vmem:[%s18179_s8 + $0x548] ss:$16 sps:$4 sm:$0xff]  }
 0x466   : > { %11517 = vmatprep.subr.bf16.mxu1 %v16439_v52  ;;  %v16467_v57 = vld [vmem:[%s18179_s8 + $0x748] ss:$16 sps:$4 sm:$0xff]   ;;  %v16472_v52 = vld [vmem:[%s18179_s8 + $0x52c] ss:$16 sps:$4 sm:$0xff]  }
 0x468   : > { %11477 = vmatpush2.bf16.msra.mxu0 %v16434_v2  ;;  %v16475_v2 = vld [vmem:[%s18179_s8 + $0x72c] ss:$16 sps:$4 sm:$0xff]  }
 0x469   : > { %11518 = vmatpush2.bf16.msra.mxu1 %v16437_v37  ;;  %11478 = vmatprep.subr.bf16.mxu0 %v16442_v43  ;;  %v16470_v37 = vld [vmem:[%s18179_s8 + $0x528] ss:$16 sps:$4 sm:$0xff]  }
 0x46a   : > { %11519 = vmatprep.subr.bf16.mxu1 %v16445_v41  ;;  %v16473_v43 = vld [vmem:[%s18179_s8 + $0x728] ss:$16 sps:$4 sm:$0xff]   ;;  %v16478_v41 = vld [vmem:[%s18179_s8 + $0x50c] ss:$16 sps:$4 sm:$0xff]  }
 0x46c   : > { %11479 = vmatpush2.bf16.msra.mxu0 %v16440_v6  ;;  %v16481_v6 = vld [vmem:[%s18179_s8 + $0x70c] ss:$16 sps:$4 sm:$0xff]  }
 0x46d   : > { %11520 = vmatpush2.bf16.msra.mxu1 %v16443_v5  ;;  %11480 = vmatprep.subr.bf16.mxu0 %v16448_v60  ;;  %v16476_v5 = vld [vmem:[%s18179_s8 + $0x508] ss:$16 sps:$4 sm:$0xff]  }
 0x46e   : > { %11521 = vmatprep.subr.bf16.mxu1 %v16451_v27  ;;  %v16479_v60 = vld [vmem:[%s18179_s8 + $0x708] ss:$16 sps:$4 sm:$0xff]   ;;  %v16484_v27 = vld [vmem:[%s18179_s8 + $0x8ec] ss:$16 sps:$4 sm:$0xff]  }
 0x470   : > { %11481 = vmatpush2.bf16.msra.mxu0 %v16446_v16  ;;  %v16487_v16 = vld [vmem:[%s18179_s8 + $0xaec] ss:$16 sps:$4 sm:$0xff]  }
 0x471   : > { %11522 = vmatpush2.bf16.msra.mxu1 %v16449_v20  ;;  %11482 = vmatprep.subr.bf16.mxu0 %v16454_v56  ;;  %v16482_v20 = vld [vmem:[%s18179_s8 + $0x8e8] ss:$16 sps:$4 sm:$0xff]  }
 0x472   : > { %11523 = vmatprep.subr.bf16.mxu1 %v16457_v54  ;;  %v16485_v56 = vld [vmem:[%s18179_s8 + $0xae8] ss:$16 sps:$4 sm:$0xff]   ;;  %v16490_v54 = vld [vmem:[%s18179_s8 + $0x8cc] ss:$16 sps:$4 sm:$0xff]  }
 0x474   : > { %11483 = vmatpush2.bf16.msra.mxu0 %v16452_v49  ;;  %v16493_v49 = vld [vmem:[%s18179_s8 + $0xacc] ss:$16 sps:$4 sm:$0xff]  }
 0x475   : > { %11524 = vmatpush2.bf16.msra.mxu1 %v16455_v13  ;;  %11484 = vmatprep.subr.bf16.mxu0 %v16460_v21 }
 0x476   : > { %11525 = vmatprep.subr.bf16.mxu1 %v16463_v26 }
 0x478   : > { %11485 = vmatpush2.bf16.msra.mxu0 %v16458_v12  ;;  %v16488_v12 = vld [vmem:[%s18179_s8 + $0x8c8] ss:$16 sps:$4 sm:$0xff]  }
 0x479   : > { %11526 = vmatpush2.bf16.msra.mxu1 %v16461_v33  ;;  %11486 = vmatprep.subr.bf16.mxu0 %v16466_v38  ;;  %v16491_v33 = vld [vmem:[%s18179_s8 + $0xac8] ss:$16 sps:$4 sm:$0xff]  }
 0x47a   : > { %11527 = vmatprep.subr.bf16.mxu1 %v16469_v17 }
 0x47c   : > { %11487 = vmatpush2.bf16.msra.mxu0 %v16464_v55  ;;  %v16496_v55 = vld [vmem:[%s18179_s8 + $0x8ac] ss:$16 sps:$4 sm:$0xff]  }
 0x47d   : > { %11528 = vmatpush2.bf16.msra.mxu1 %v16467_v57  ;;  %11488 = vmatprep.subr.bf16.mxu0 %v16472_v52  ;;  %v16499_v57 = vld [vmem:[%s18179_s8 + $0xaac] ss:$16 sps:$4 sm:$0xff]  }
 0x47e   : > { %11529 = vmatprep.subr.bf16.mxu1 %v16475_v2 }
 0x480   : > { %11489 = vmatpush2.bf16.msra.mxu0 %v16470_v37  ;;  %v16494_v37 = vld [vmem:[%s18179_s8 + $0x8a8] ss:$16 sps:$4 sm:$0xff]  }
 0x481   : > { %11530 = vmatpush2.bf16.msra.mxu1 %v16473_v43  ;;  %11490 = vmatprep.subr.bf16.mxu0 %v16478_v41  ;;  %v16497_v43 = vld [vmem:[%s18179_s8 + $0xaa8] ss:$16 sps:$4 sm:$0xff]  }
 0x482   : > { %11531 = vmatprep.subr.bf16.mxu1 %v16481_v6 }
 0x484   : > { %11491 = vmatpush2.bf16.msra.mxu0 %v16476_v5  ;;  %v16503_v5 = vld [vmem:[%s18179_s8 + $0xa88] ss:$16 sps:$4 sm:$0xff]  }
 0x485   : > { %11532 = vmatpush2.bf16.msra.mxu1 %v16479_v60  ;;  %11542 = vmatprep.subr.bf16.mxu0 %v16484_v27  ;;  %v16508_v60 = vld [vmem:[%s18179_s8 + $0x86c] ss:$16 sps:$4 sm:$0xff]  }
 0x486   : > { %11583 = vmatprep.subr.bf16.mxu1 %v16487_v16  ;;  %v16511_v27 = vld [vmem:[%s18179_s8 + $0xa6c] ss:$16 sps:$4 sm:$0xff]   ;;  %v16506_v16 = vld [vmem:[%s18179_s8 + $0x868] ss:$16 sps:$4 sm:$0xff]  }
 0x487   : > { %v11248_v13 = vpop.f32.mrf.mxu0  ;;  %11493 = vmatmul.mubr.bf16.vlgmr.msra.gmra.mxu0 %v18416_v46 }
 0x488   : > { %v11289_v21 = vpop.f32.mrf.mxu1  ;;  %11534 = vmatmul.mubr.bf16.vlgmr.msra.gmra.mxu1 %v18423_v50  ;;  %v11249_v26 = vadd.f32 %v11248_v13, %v19466_v25  ;;  %11543 = vmatpush1.bf16.msra.mxu0 %v16482_v20  ;;  %v16509_v20 = vld [vmem:[%s18179_s8 + $0xa68] ss:$16 sps:$4 sm:$0xff]  }
 0x489   : > { %11584 = vmatpush1.bf16.msra.mxu1 %v16485_v56  ;;  %v11250_v38 = vpop.f32.mrf.mxu0  ;;  %11544 = vmatprep.subr.bf16.mxu0 %v16490_v54  ;;  %v16514_v56 = vld [vmem:[%s18179_s8 + $0x84c] ss:$16 sps:$4 sm:$0xff]   ;;  %v16515_v13 = vld [vmem:[%s18179_s8 + $0xa48] ss:$16 sps:$4 sm:$0xff]  }
 0x48a   : > { %v11291_v17 = vpop.f32.mrf.mxu1  ;;  %11585 = vmatprep.subr.bf16.mxu1 %v16493_v49  ;;  %v19540_v52 = vadd.f32 %v11289_v21, %v11249_v26  ;;  %v11251_v46 = vadd.f32 %v11250_v38, %v19471_v63  ;;  %11574 = vmatprep.mubr.bf16.mxu0 %v18445_v61  ;;  %v16502_v61 = vld [vmem:[%s18179_s8 + $0x88c] ss:$16 sps:$4 sm:$0xff]   ;;  %v16500_v63 = vld [vmem:[%s18179_s8 + $0x888] ss:$16 sps:$4 sm:$0xff]  }
 0x48b   : > { %11615 = vmatprep.mubr.bf16.mxu1 %v18450_v62  ;;  %v11252_v50 = vpop.f32.mrf.mxu0  ;;  %v16505_v62 = vld [vmem:[%s18179_s8 + $0xa8c] ss:$16 sps:$4 sm:$0xff]   ;;  %v16512_v49 = vld [vmem:[%s18179_s8 + $0x848] ss:$16 sps:$4 sm:$0xff]  }
 0x48c   : > { %v11293_v25 = vpop.f32.mrf.mxu1  ;;  %v19545_v2 = vadd.f32 %v11291_v17, %v11251_v46  ;;  %11545 = vmatpush1.bf16.msra.mxu0 %v16488_v12  ;;  %v16517_v54 = vld [vmem:[%s18179_s8 + $0xa4c] ss:$16 sps:$4 sm:$0xff]   ;;  %v16518_v12 = vld [vmem:[%s18179_s8 + $0x828] ss:$16 sps:$4 sm:$0xff]  }
 0x48d   : > { %11586 = vmatpush1.bf16.msra.mxu1 %v16491_v33  ;;  %v11253_v41 = vpop.f32.mrf.mxu0  ;;  %11546 = vmatprep.subr.bf16.mxu0 %v16496_v55  ;;  %v16520_v21 = vld [vmem:[%s18179_s8 + $0x82c] ss:$16 sps:$4 sm:$0xff]   ;;  %v16521_v33 = vld [vmem:[%s18179_s8 + $0xa28] ss:$16 sps:$4 sm:$0xff]  }
 0x48e   : > { %v11294_v6 = vpop.f32.mrf.mxu1  ;;  %11587 = vmatprep.subr.bf16.mxu1 %v16499_v57  ;;  %v16523_v26 = vld [vmem:[%s18179_s8 + $0xa2c] ss:$16 sps:$4 sm:$0xff]   ;;  %v16524_v55 = vld [vmem:[%s18179_s8 + $0x808] ss:$16 sps:$4 sm:$0xff]  }
 0x48f   : > { %v16526_v38 = vld [vmem:[%s18179_s8 + $0x80c] ss:$16 sps:$4 sm:$0xff]   ;;  %v16527_v57 = vld [vmem:[%s18179_s8 + $0xa08] ss:$16 sps:$4 sm:$0xff]  }
 0x490   : > { %11547 = vmatpush1.bf16.msra.mxu0 %v16494_v37  ;;  %v16529_v17 = vld [vmem:[%s18179_s8 + $0xa0c] ss:$16 sps:$4 sm:$0xff]   ;;  %v16530_v25 = vld [vmem:[%s18179_s8 + $0x9e8] ss:$16 sps:$4 sm:$0xff]  }
 0x491   : > { %11588 = vmatpush1.bf16.msra.mxu1 %v16497_v43  ;;  %11548 = vmatprep.subr.bf16.mxu0 %v16502_v61  ;;  %v16532_v46 = vld [vmem:[%s18179_s8 + $0x9ec] ss:$16 sps:$4 sm:$0xff]   ;;  %v16533_v37 = vld [vmem:[%s18179_s8 + $0xbe8] ss:$16 sps:$4 sm:$0xff]  }
 0x492   : > { %11589 = vmatprep.subr.bf16.mxu1 %v16505_v62  ;;  %v16535_v50 = vld [vmem:[%s18179_s8 + $0xbec] ss:$16 sps:$4 sm:$0xff]   ;;  %v16536_v6 = vld [vmem:[%s18179_s8 + $0x9c8] ss:$16 sps:$4 sm:$0xff]  }
 0x493   : > { %v16538_v43 = vld [vmem:[%s18179_s8 + $0x9cc] ss:$16 sps:$4 sm:$0xff]   ;;  %v16539_v61 = vld [vmem:[%s18179_s8 + $0xbc8] ss:$16 sps:$4 sm:$0xff]  }
 0x494   : > { %11549 = vmatpush1.bf16.msra.mxu0 %v16500_v63  ;;  %v16541_v41 = vld [vmem:[%s18179_s8 + $0xbcc] ss:$16 sps:$4 sm:$0xff]  }
 0x495   : > { %11590 = vmatpush1.bf16.msra.mxu1 %v16503_v5  ;;  %11550 = vmatprep.subr.bf16.mxu0 %v16508_v60  ;;  %v16544_v62 = vld [vmem:[%s18179_s8 + $0x9ac] ss:$16 sps:$4 sm:$0xff]   ;;  %v16542_v5 = vld [vmem:[%s18179_s8 + $0x9a8] ss:$16 sps:$4 sm:$0xff]  }
 0x496   : > { %11591 = vmatprep.subr.bf16.mxu1 %v16511_v27  ;;  %v16547_v63 = vld [vmem:[%s18179_s8 + $0xbac] ss:$16 sps:$4 sm:$0xff]   ;;  %v16545_v60 = vld [vmem:[%s18179_s8 + $0xba8] ss:$16 sps:$4 sm:$0xff]  }
 0x497   : > { %v16550_v27 = vld [vmem:[%s18179_s8 + $0x98c] ss:$16 sps:$4 sm:$0xff]  }
 0x498   : > { %11551 = vmatpush1.bf16.msra.mxu0 %v16506_v16  ;;  %v16553_v16 = vld [vmem:[%s18179_s8 + $0xb8c] ss:$16 sps:$4 sm:$0xff]  }
 0x499   : > { %11592 = vmatpush1.bf16.msra.mxu1 %v16509_v20  ;;  %11552 = vmatprep.subr.bf16.mxu0 %v16514_v56  ;;  %v16548_v20 = vld [vmem:[%s18179_s8 + $0x988] ss:$16 sps:$4 sm:$0xff]  }
 0x49a   : > { %11593 = vmatprep.subr.bf16.mxu1 %v16517_v54  ;;  %v16551_v56 = vld [vmem:[%s18179_s8 + $0xb88] ss:$16 sps:$4 sm:$0xff]   ;;  %v16556_v54 = vld [vmem:[%s18179_s8 + $0x96c] ss:$16 sps:$4 sm:$0xff]  }
 0x49c   : > { %11553 = vmatpush1.bf16.msra.mxu0 %v16512_v49  ;;  %v16559_v49 = vld [vmem:[%s18179_s8 + $0xb6c] ss:$16 sps:$4 sm:$0xff]  }
 0x49d   : > { %11594 = vmatpush1.bf16.msra.mxu1 %v16515_v13  ;;  %11554 = vmatprep.subr.bf16.mxu0 %v16520_v21  ;;  %v16554_v13 = vld [vmem:[%s18179_s8 + $0x968] ss:$16 sps:$4 sm:$0xff]  }
 0x49e   : > { %11595 = vmatprep.subr.bf16.mxu1 %v16523_v26  ;;  %v16557_v21 = vld [vmem:[%s18179_s8 + $0xb68] ss:$16 sps:$4 sm:$0xff]   ;;  %v16562_v26 = vld [vmem:[%s18179_s8 + $0x94c] ss:$16 sps:$4 sm:$0xff]  }
 0x4a0   : > { %11555 = vmatpush1.bf16.msra.mxu0 %v16518_v12  ;;  %v16565_v12 = vld [vmem:[%s18179_s8 + $0xb4c] ss:$16 sps:$4 sm:$0xff]  }
 0x4a1   : > { %11596 = vmatpush1.bf16.msra.mxu1 %v16521_v33  ;;  %11556 = vmatprep.subr.bf16.mxu0 %v16526_v38  ;;  %v16560_v33 = vld [vmem:[%s18179_s8 + $0x948] ss:$16 sps:$4 sm:$0xff]  }
 0x4a2   : > { %11597 = vmatprep.subr.bf16.mxu1 %v16529_v17  ;;  %v16563_v38 = vld [vmem:[%s18179_s8 + $0xb48] ss:$16 sps:$4 sm:$0xff]   ;;  %v16568_v17 = vld [vmem:[%s18179_s8 + $0x92c] ss:$16 sps:$4 sm:$0xff]  }
 0x4a4   : > { %11557 = vmatpush1.bf16.msra.mxu0 %v16524_v55  ;;  %v16571_v55 = vld [vmem:[%s18179_s8 + $0xb2c] ss:$16 sps:$4 sm:$0xff]  }
 0x4a5   : > { %11598 = vmatpush1.bf16.msra.mxu1 %v16527_v57  ;;  %11558 = vmatprep.subr.bf16.mxu0 %v16532_v46  ;;  %v16566_v57 = vld [vmem:[%s18179_s8 + $0x928] ss:$16 sps:$4 sm:$0xff]  }
 0x4a6   : > { %11599 = vmatprep.subr.bf16.mxu1 %v16535_v50  ;;  %v16569_v46 = vld [vmem:[%s18179_s8 + $0xb28] ss:$16 sps:$4 sm:$0xff]   ;;  %v16574_v50 = vld [vmem:[%s18179_s8 + $0x90c] ss:$16 sps:$4 sm:$0xff]  }
 0x4a8   : > { %11559 = vmatpush2.bf16.msra.mxu0 %v16530_v25  ;;  %v16577_v25 = vld [vmem:[%s18179_s8 + $0xb0c] ss:$16 sps:$4 sm:$0xff]  }
 0x4a9   : > { %11600 = vmatpush2.bf16.msra.mxu1 %v16533_v37  ;;  %11560 = vmatprep.subr.bf16.mxu0 %v16538_v43  ;;  %v16572_v37 = vld [vmem:[%s18179_s8 + $0x908] ss:$16 sps:$4 sm:$0xff]  }
 0x4aa   : > { %11601 = vmatprep.subr.bf16.mxu1 %v16541_v41  ;;  %v16575_v43 = vld [vmem:[%s18179_s8 + $0xb08] ss:$16 sps:$4 sm:$0xff]   ;;  %v16580_v41 = vld [vmem:[%s18179_s8 + $0xcec] ss:$16 sps:$4 sm:$0xff]  }
 0x4ac   : > { %11561 = vmatpush2.bf16.msra.mxu0 %v16536_v6  ;;  %v16583_v6 = vld [vmem:[%s18179_s8 + $0xeec] ss:$16 sps:$4 sm:$0xff]  }
 0x4ad   : > { %11602 = vmatpush2.bf16.msra.mxu1 %v16539_v61  ;;  %11562 = vmatprep.subr.bf16.mxu0 %v16544_v62  ;;  %v16578_v61 = vld [vmem:[%s18179_s8 + $0xce8] ss:$16 sps:$4 sm:$0xff]  }
 0x4ae   : > { %11603 = vmatprep.subr.bf16.mxu1 %v16547_v63  ;;  %v16581_v62 = vld [vmem:[%s18179_s8 + $0xee8] ss:$16 sps:$4 sm:$0xff]   ;;  %v16586_v63 = vld [vmem:[%s18179_s8 + $0xccc] ss:$16 sps:$4 sm:$0xff]  }
 0x4b0   : > { %11563 = vmatpush2.bf16.msra.mxu0 %v16542_v5  ;;  %v16589_v5 = vld [vmem:[%s18179_s8 + $0xecc] ss:$16 sps:$4 sm:$0xff]  }
 0x4b1   : > { %11604 = vmatpush2.bf16.msra.mxu1 %v16545_v60  ;;  %11564 = vmatprep.subr.bf16.mxu0 %v16550_v27 }
 0x4b2   : > { %11605 = vmatprep.subr.bf16.mxu1 %v16553_v16 }
 0x4b4   : > { %11565 = vmatpush2.bf16.msra.mxu0 %v16548_v20  ;;  %v16584_v20 = vld [vmem:[%s18179_s8 + $0xcc8] ss:$16 sps:$4 sm:$0xff]  }
 0x4b5   : > { %11606 = vmatpush2.bf16.msra.mxu1 %v16551_v56  ;;  %11566 = vmatprep.subr.bf16.mxu0 %v16556_v54  ;;  %v16587_v56 = vld [vmem:[%s18179_s8 + $0xec8] ss:$16 sps:$4 sm:$0xff]  }
 0x4b6   : > { %11607 = vmatprep.subr.bf16.mxu1 %v16559_v49 }
 0x4b8   : > { %11567 = vmatpush2.bf16.msra.mxu0 %v16554_v13  ;;  %v16592_v13 = vld [vmem:[%s18179_s8 + $0xcac] ss:$16 sps:$4 sm:$0xff]  }
 0x4b9   : > { %11608 = vmatpush2.bf16.msra.mxu1 %v16557_v21  ;;  %11568 = vmatprep.subr.bf16.mxu0 %v16562_v26  ;;  %v16595_v21 = vld [vmem:[%s18179_s8 + $0xeac] ss:$16 sps:$4 sm:$0xff]  }
 0x4ba   : > { %11609 = vmatprep.subr.bf16.mxu1 %v16565_v12 }
 0x4bc   : > { %11569 = vmatpush2.bf16.msra.mxu0 %v16560_v33  ;;  %v16590_v33 = vld [vmem:[%s18179_s8 + $0xca8] ss:$16 sps:$4 sm:$0xff]  }
 0x4bd   : > { %11610 = vmatpush2.bf16.msra.mxu1 %v16563_v38  ;;  %11570 = vmatprep.subr.bf16.mxu0 %v16568_v17  ;;  %v16593_v38 = vld [vmem:[%s18179_s8 + $0xea8] ss:$16 sps:$4 sm:$0xff]  }
 0x4be   : > { %11611 = vmatprep.subr.bf16.mxu1 %v16571_v55 }
 0x4c0   : > { %11571 = vmatpush2.bf16.msra.mxu0 %v16566_v57  ;;  %v16596_v57 = vld [vmem:[%s18179_s8 + $0xc88] ss:$16 sps:$4 sm:$0xff]  }
 0x4c1   : > { %11612 = vmatpush2.bf16.msra.mxu1 %v16569_v46  ;;  %11572 = vmatprep.subr.bf16.mxu0 %v16574_v50  ;;  %v16599_v46 = vld [vmem:[%s18179_s8 + $0xe88] ss:$16 sps:$4 sm:$0xff]   ;;  %v16604_v50 = vld [vmem:[%s18179_s8 + $0xc6c] ss:$16 sps:$4 sm:$0xff]  }
 0x4c2   : > { %11613 = vmatprep.subr.bf16.mxu1 %v16577_v25  ;;  %v16607_v25 = vld [vmem:[%s18179_s8 + $0xe6c] ss:$16 sps:$4 sm:$0xff]  }
 0x4c4   : > { %11573 = vmatpush2.bf16.msra.mxu0 %v16572_v37  ;;  %v16602_v37 = vld [vmem:[%s18179_s8 + $0xc68] ss:$16 sps:$4 sm:$0xff]  }
 0x4c5   : > { %11614 = vmatpush2.bf16.msra.mxu1 %v16575_v43  ;;  %11624 = vmatprep.subr.bf16.mxu0 %v16580_v41  ;;  %v16605_v43 = vld [vmem:[%s18179_s8 + $0xe68] ss:$16 sps:$4 sm:$0xff]   ;;  %v16610_v41 = vld [vmem:[%s18179_s8 + $0xc4c] ss:$16 sps:$4 sm:$0xff]  }
 0x4c6   : > { %11665 = vmatprep.subr.bf16.mxu1 %v16583_v6  ;;  %v16613_v6 = vld [vmem:[%s18179_s8 + $0xe4c] ss:$16 sps:$4 sm:$0xff]  }
 0x4c7   : > { %v11330_v60 = vpop.f32.mrf.mxu0  ;;  %11575 = vmatmul.mubr.bf16.vlgmr.msra.gmra.mxu0 %v18514_v4 }
 0x4c8   : > { %v11371_v27 = vpop.f32.mrf.mxu1  ;;  %11616 = vmatmul.mubr.bf16.vlgmr.msra.gmra.mxu1 %v18525_v11  ;;  %v11331_v16 = vadd.f32 %v11330_v60, %v19540_v52  ;;  %11625 = vmatpush1.bf16.msra.mxu0 %v16578_v61  ;;  %v16608_v61 = vld [vmem:[%s18179_s8 + $0xc48] ss:$16 sps:$4 sm:$0xff]  }
 0x4c9   : > { %11666 = vmatpush1.bf16.msra.mxu1 %v16581_v62  ;;  %v11332_v54 = vpop.f32.mrf.mxu0  ;;  %11626 = vmatprep.subr.bf16.mxu0 %v16586_v63  ;;  %v16611_v62 = vld [vmem:[%s18179_s8 + $0xe48] ss:$16 sps:$4 sm:$0xff]   ;;  %v16616_v63 = vld [vmem:[%s18179_s8 + $0xc2c] ss:$16 sps:$4 sm:$0xff]  }
 0x4ca   : > { %v11373_v49 = vpop.f32.mrf.mxu1  ;;  %11667 = vmatprep.subr.bf16.mxu1 %v16589_v5  ;;  %v19614_v26 = vadd.f32 %v11371_v27, %v11331_v16  ;;  %v11333_v4 = vadd.f32 %v11332_v54, %v19545_v2  ;;  %11656 = vmatprep.mubr.bf16.mxu0 %v18521_v10  ;;  %v16598_v10 = vld [vmem:[%s18179_s8 + $0xc8c] ss:$16 sps:$4 sm:$0xff]   ;;  %v16614_v60 = vld [vmem:[%s18179_s8 + $0xc28] ss:$16 sps:$4 sm:$0xff]  }
 0x4cb   : > { %11697 = vmatprep.mubr.bf16.mxu1 %v18533_v15  ;;  %v11334_v11 = vpop.f32.mrf.mxu0  ;;  %v16601_v15 = vld [vmem:[%s18179_s8 + $0xe8c] ss:$16 sps:$4 sm:$0xff]   ;;  %v16617_v27 = vld [vmem:[%s18179_s8 + $0xe28] ss:$16 sps:$4 sm:$0xff]  }
 0x4cc   : > { %v11375_v52 = vpop.f32.mrf.mxu1  ;;  %v19619_v12 = vadd.f32 %v11373_v49, %v11333_v4  ;;  %11627 = vmatpush1.bf16.msra.mxu0 %v16584_v20  ;;  %v16619_v5 = vld [vmem:[%s18179_s8 + $0xe2c] ss:$16 sps:$4 sm:$0xff]   ;;  %v16623_v54 = vld [vmem:[%s18179_s8 + $0xe08] ss:$16 sps:$4 sm:$0xff]  }
 0x4cd   : > { %11668 = vmatpush1.bf16.msra.mxu1 %v16587_v56  ;;  %v11335_v17 = vpop.f32.mrf.mxu0  ;;  %11628 = vmatprep.subr.bf16.mxu0 %v16592_v13  ;;  %v16622_v16 = vld [vmem:[%s18179_s8 + $0xc0c] ss:$16 sps:$4 sm:$0xff]   ;;  %v16620_v56 = vld [vmem:[%s18179_s8 + $0xc08] ss:$16 sps:$4 sm:$0xff]  }
 0x4ce   : > { %v11376_v55 = vpop.f32.mrf.mxu1  ;;  %11669 = vmatprep.subr.bf16.mxu1 %v16595_v21  ;;  %v12366_v2 = vcombine.low %v19614_v26, %v19619_v12  ;;  %v16625_v20 = vld [vmem:[%s18179_s8 + $0xe0c] ss:$16 sps:$4 sm:$0xff]   ;;  %v16626_v21 = vld [vmem:[%s18179_s8 + $0xde8] ss:$16 sps:$4 sm:$0xff]  }
 0x4cf   : > { %v16628_v49 = vld [vmem:[%s18179_s8 + $0xdec] ss:$16 sps:$4 sm:$0xff]   ;;  %v16629_v4 = vld [vmem:[%s18179_s8 + $0xfe8] ss:$16 sps:$4 sm:$0xff]  }
 0x4d0   : > { %11629 = vmatpush1.bf16.msra.mxu0 %v16590_v33  ;;  %v16631_v13 = vld [vmem:[%s18179_s8 + $0xfec] ss:$16 sps:$4 sm:$0xff]   ;;  %v16632_v33 = vld [vmem:[%s18179_s8 + $0xdc8] ss:$16 sps:$4 sm:$0xff]  }
 0x4d1   : > { %11670 = vmatpush1.bf16.msra.mxu1 %v16593_v38  ;;  %11630 = vmatprep.subr.bf16.mxu0 %v16598_v10  ;;  %v16634_v11 = vld [vmem:[%s18179_s8 + $0xdcc] ss:$16 sps:$4 sm:$0xff]   ;;  %v16635_v38 = vld [vmem:[%s18179_s8 + $0xfc8] ss:$16 sps:$4 sm:$0xff]  }
 0x4d2   : > { %11671 = vmatprep.subr.bf16.mxu1 %v16601_v15  ;;  %v16637_v52 = vld [vmem:[%s18179_s8 + $0xfcc] ss:$16 sps:$4 sm:$0xff]   ;;  %v16638_v10 = vld [vmem:[%s18179_s8 + $0xda8] ss:$16 sps:$4 sm:$0xff]  }
 0x4d3   : > { %v16640_v17 = vld [vmem:[%s18179_s8 + $0xdac] ss:$16 sps:$4 sm:$0xff]   ;;  %v16641_v15 = vld [vmem:[%s18179_s8 + $0xfa8] ss:$16 sps:$4 sm:$0xff]  }
 0x4d4   : > { %11631 = vmatpush1.bf16.msra.mxu0 %v16596_v57  ;;  %v16643_v55 = vld [vmem:[%s18179_s8 + $0xfac] ss:$16 sps:$4 sm:$0xff]  }
 0x4d5   : > { %11672 = vmatpush1.bf16.msra.mxu1 %v16599_v46  ;;  %11632 = vmatprep.subr.bf16.mxu0 %v16604_v50  ;;  %v16646_v57 = vld [vmem:[%s18179_s8 + $0xd8c] ss:$16 sps:$4 sm:$0xff]   ;;  %v16644_v50 = vld [vmem:[%s18179_s8 + $0xd88] ss:$16 sps:$4 sm:$0xff]  }
 0x4d6   : > { %11673 = vmatprep.subr.bf16.mxu1 %v16607_v25  ;;  %v16649_v46 = vld [vmem:[%s18179_s8 + $0xf8c] ss:$16 sps:$4 sm:$0xff]   ;;  %v16647_v25 = vld [vmem:[%s18179_s8 + $0xf88] ss:$16 sps:$4 sm:$0xff]  }
 0x4d8   : > { %11633 = vmatpush1.bf16.msra.mxu0 %v16602_v37  ;;  %v16652_v37 = vld [vmem:[%s18179_s8 + $0xd6c] ss:$16 sps:$4 sm:$0xff]  }
 0x4d9   : > { %11674 = vmatpush1.bf16.msra.mxu1 %v16605_v43  ;;  %11634 = vmatprep.subr.bf16.mxu0 %v16610_v41  ;;  %v16655_v43 = vld [vmem:[%s18179_s8 + $0xf6c] ss:$16 sps:$4 sm:$0xff]   ;;  %v16650_v41 = vld [vmem:[%s18179_s8 + $0xd68] ss:$16 sps:$4 sm:$0xff]  }
 0x4da   : > { %11675 = vmatprep.subr.bf16.mxu1 %v16613_v6  ;;  %v16653_v6 = vld [vmem:[%s18179_s8 + $0xf68] ss:$16 sps:$4 sm:$0xff]  }
 0x4dc   : > { %11635 = vmatpush1.bf16.msra.mxu0 %v16608_v61  ;;  %v16658_v61 = vld [vmem:[%s18179_s8 + $0xd4c] ss:$16 sps:$4 sm:$0xff]  }
 0x4dd   : > { %11676 = vmatpush1.bf16.msra.mxu1 %v16611_v62  ;;  %11636 = vmatprep.subr.bf16.mxu0 %v16616_v63  ;;  %v16661_v62 = vld [vmem:[%s18179_s8 + $0xf4c] ss:$16 sps:$4 sm:$0xff]   ;;  %v16656_v63 = vld [vmem:[%s18179_s8 + $0xd48] ss:$16 sps:$4 sm:$0xff]  }
 0x4de   : > { %11677 = vmatprep.subr.bf16.mxu1 %v16619_v5  ;;  %v16659_v5 = vld [vmem:[%s18179_s8 + $0xf48] ss:$16 sps:$4 sm:$0xff]  }
 0x4e0   : > { %11637 = vmatpush1.bf16.msra.mxu0 %v16614_v60  ;;  %v16664_v60 = vld [vmem:[%s18179_s8 + $0xd2c] ss:$16 sps:$4 sm:$0xff]  }
 0x4e1   : > { %11678 = vmatpush1.bf16.msra.mxu1 %v16617_v27  ;;  %11638 = vmatprep.subr.bf16.mxu0 %v16622_v16  ;;  %v16667_v27 = vld [vmem:[%s18179_s8 + $0xf2c] ss:$16 sps:$4 sm:$0xff]   ;;  %v16662_v16 = vld [vmem:[%s18179_s8 + $0xd28] ss:$16 sps:$4 sm:$0xff]  }
 0x4e2   : > { %11679 = vmatprep.subr.bf16.mxu1 %v16625_v20  ;;  %v16665_v20 = vld [vmem:[%s18179_s8 + $0xf28] ss:$16 sps:$4 sm:$0xff]  }
 0x4e4   : > { %11639 = vmatpush1.bf16.msra.mxu0 %v16620_v56  ;;  %v16670_v56 = vld [vmem:[%s18179_s8 + $0xd0c] ss:$16 sps:$4 sm:$0xff]  }
 0x4e5   : > { %11680 = vmatpush1.bf16.msra.mxu1 %v16623_v54  ;;  %11640 = vmatprep.subr.bf16.mxu0 %v16628_v49  ;;  %v16673_v54 = vld [vmem:[%s18179_s8 + $0xf0c] ss:$16 sps:$4 sm:$0xff]   ;;  %v16668_v49 = vld [vmem:[%s18179_s8 + $0xd08] ss:$16 sps:$4 sm:$0xff]  }
 0x4e6   : > { %11681 = vmatprep.subr.bf16.mxu1 %v16631_v13  ;;  %v16671_v13 = vld [vmem:[%s18179_s8 + $0xf08] ss:$16 sps:$4 sm:$0xff]  }
 0x4e8   : > { %11641 = vmatpush2.bf16.msra.mxu0 %v16626_v21  ;;  %v16676_v21 = vld [vmem:[%s18179_s8 + $0x10ec] ss:$16 sps:$4 sm:$0xff]  }
 0x4e9   : > { %11682 = vmatpush2.bf16.msra.mxu1 %v16629_v4  ;;  %11642 = vmatprep.subr.bf16.mxu0 %v16634_v11  ;;  %v16679_v4 = vld [vmem:[%s18179_s8 + $0x12ec] ss:$16 sps:$4 sm:$0xff]   ;;  %v16674_v11 = vld [vmem:[%s18179_s8 + $0x10e8] ss:$16 sps:$4 sm:$0xff]  }
 0x4ea   : > { %11683 = vmatprep.subr.bf16.mxu1 %v16637_v52  ;;  %v16677_v52 = vld [vmem:[%s18179_s8 + $0x12e8] ss:$16 sps:$4 sm:$0xff]  }
 0x4ec   : > { %11643 = vmatpush2.bf16.msra.mxu0 %v16632_v33  ;;  %v16682_v33 = vld [vmem:[%s18179_s8 + $0x10cc] ss:$16 sps:$4 sm:$0xff]  }
 0x4ed   : > { %11684 = vmatpush2.bf16.msra.mxu1 %v16635_v38  ;;  %11644 = vmatprep.subr.bf16.mxu0 %v16640_v17  ;;  %v16685_v38 = vld [vmem:[%s18179_s8 + $0x12cc] ss:$16 sps:$4 sm:$0xff]  }
 0x4ee   : > { %11685 = vmatprep.subr.bf16.mxu1 %v16643_v55 }
 0x4f0   : > { %11645 = vmatpush2.bf16.msra.mxu0 %v16638_v10 }
 0x4f1   : > { %11686 = vmatpush2.bf16.msra.mxu1 %v16641_v15  ;;  %11646 = vmatprep.subr.bf16.mxu0 %v16646_v57  ;;  %v16680_v15 = vld [vmem:[%s18179_s8 + $0x10c8] ss:$16 sps:$4 sm:$0xff]  }
 0x4f2   : > { %11687 = vmatprep.subr.bf16.mxu1 %v16649_v46  ;;  %v16683_v57 = vld [vmem:[%s18179_s8 + $0x12c8] ss:$16 sps:$4 sm:$0xff]  }
 0x4f4   : > { %11647 = vmatpush2.bf16.msra.mxu0 %v16644_v50 }
 0x4f5   : > { %11688 = vmatpush2.bf16.msra.mxu1 %v16647_v25  ;;  %11648 = vmatprep.subr.bf16.mxu0 %v16652_v37  ;;  %v16688_v25 = vld [vmem:[%s18179_s8 + $0x10ac] ss:$16 sps:$4 sm:$0xff]  }
 0x4f6   : > { %11689 = vmatprep.subr.bf16.mxu1 %v16655_v43  ;;  %v16691_v37 = vld [vmem:[%s18179_s8 + $0x12ac] ss:$16 sps:$4 sm:$0xff]  }
 0x4f8   : > { %11649 = vmatpush2.bf16.msra.mxu0 %v16650_v41  ;;  %v16686_v41 = vld [vmem:[%s18179_s8 + $0x10a8] ss:$16 sps:$4 sm:$0xff]  }
 0x4f9   : > { %11690 = vmatpush2.bf16.msra.mxu1 %v16653_v6  ;;  %11650 = vmatprep.subr.bf16.mxu0 %v16658_v61  ;;  %v16689_v6 = vld [vmem:[%s18179_s8 + $0x12a8] ss:$16 sps:$4 sm:$0xff]  }
 0x4fa   : > { %11691 = vmatprep.subr.bf16.mxu1 %v16661_v62 }
 0x4fc   : > { %11651 = vmatpush2.bf16.msra.mxu0 %v16656_v63  ;;  %v16694_v63 = vld [vmem:[%s18179_s8 + $0x108c] ss:$16 sps:$4 sm:$0xff]  }
 0x4fd   : > { %11692 = vmatpush2.bf16.msra.mxu1 %v16659_v5  ;;  %11652 = vmatprep.subr.bf16.mxu0 %v16664_v60  ;;  %v16695_v5 = vld [vmem:[%s18179_s8 + $0x1288] ss:$16 sps:$4 sm:$0xff]   ;;  %v16700_v60 = vld [vmem:[%s18179_s8 + $0x106c] ss:$16 sps:$4 sm:$0xff]  }
 0x4fe   : > { %11693 = vmatprep.subr.bf16.mxu1 %v16667_v27  ;;  %v16703_v27 = vld [vmem:[%s18179_s8 + $0x126c] ss:$16 sps:$4 sm:$0xff]  }
 0x500   : > { %11653 = vmatpush2.bf16.msra.mxu0 %v16662_v16  ;;  %v16698_v16 = vld [vmem:[%s18179_s8 + $0x1068] ss:$16 sps:$4 sm:$0xff]  }
 0x501   : > { %11694 = vmatpush2.bf16.msra.mxu1 %v16665_v20  ;;  %11654 = vmatprep.subr.bf16.mxu0 %v16670_v56  ;;  %v16701_v20 = vld [vmem:[%s18179_s8 + $0x1268] ss:$16 sps:$4 sm:$0xff]   ;;  %v16706_v56 = vld [vmem:[%s18179_s8 + $0x104c] ss:$16 sps:$4 sm:$0xff]  }
 0x502   : > { %11695 = vmatprep.subr.bf16.mxu1 %v16673_v54  ;;  %v16709_v54 = vld [vmem:[%s18179_s8 + $0x124c] ss:$16 sps:$4 sm:$0xff]  }
 0x504   : > { %11655 = vmatpush2.bf16.msra.mxu0 %v16668_v49  ;;  %v16704_v49 = vld [vmem:[%s18179_s8 + $0x1048] ss:$16 sps:$4 sm:$0xff]  }
 0x505   : > { %11696 = vmatpush2.bf16.msra.mxu1 %v16671_v13  ;;  %11706 = vmatprep.subr.bf16.mxu0 %v16676_v21  ;;  %v16707_v13 = vld [vmem:[%s18179_s8 + $0x1248] ss:$16 sps:$4 sm:$0xff]   ;;  %v16712_v21 = vld [vmem:[%s18179_s8 + $0x102c] ss:$16 sps:$4 sm:$0xff]  }
 0x506   : > { %11747 = vmatprep.subr.bf16.mxu1 %v16679_v4  ;;  %v16715_v4 = vld [vmem:[%s18179_s8 + $0x122c] ss:$16 sps:$4 sm:$0xff]  }
 0x507   : > { %v11412_v17 = vpop.f32.mrf.mxu0  ;;  %11657 = vmatmul.mubr.bf16.vlgmr.msra.gmra.mxu0 %v18607_v32 }
 0x508   : > { %v11453_v55 = vpop.f32.mrf.mxu1  ;;  %11698 = vmatmul.mubr.bf16.vlgmr.msra.gmra.mxu1 %v18617_v40  ;;  %11707 = vmatpush1.bf16.msra.mxu0 %v16674_v11  ;;  %v16710_v11 = vld [vmem:[%s18179_s8 + $0x1028] ss:$16 sps:$4 sm:$0xff]  }
 0x509   : > { %v19685_v10 = vadd.f32 %v11453_v55, %v11412_v17  ;;  %11748 = vmatpush1.bf16.msra.mxu1 %v16677_v52  ;;  %v11414_v46 = vpop.f32.mrf.mxu0  ;;  %11708 = vmatprep.subr.bf16.mxu0 %v16682_v33  ;;  %v16713_v52 = vld [vmem:[%s18179_s8 + $0x1228] ss:$16 sps:$4 sm:$0xff]   ;;  %v16718_v33 = vld [vmem:[%s18179_s8 + $0x100c] ss:$16 sps:$4 sm:$0xff]  }
 0x50a   : > { %v11455_v50 = vpop.f32.mrf.mxu1  ;;  %11749 = vmatprep.subr.bf16.mxu1 %v16685_v38  ;;  %11738 = vmatprep.mubr.bf16.mxu0 %v18613_v39  ;;  %v16697_v39 = vld [vmem:[%s18179_s8 + $0x128c] ss:$16 sps:$4 sm:$0xff]   ;;  %v16716_v17 = vld [vmem:[%s18179_s8 + $0x1008] ss:$16 sps:$4 sm:$0xff]  }
 0x50b   : > { %v19691_v43 = vadd.f32 %v11455_v50, %v11414_v46  ;;  %11779 = vmatprep.mubr.bf16.mxu1 %v18625_v45  ;;  %v11416_v32 = vpop.f32.mrf.mxu0  ;;  %v16692_v45 = vld [vmem:[%s18179_s8 + $0x1088] ss:$16 sps:$4 sm:$0xff]   ;;  %v16721_v38 = vld [vmem:[%s18179_s8 + $0x120c] ss:$16 sps:$4 sm:$0xff]  }
 0x50c   : > { %v11457_v40 = vpop.f32.mrf.mxu1  ;;  %11709 = vmatpush1.bf16.msra.mxu0 %v16680_v15  ;;  %v16719_v55 = vld [vmem:[%s18179_s8 + $0x1208] ss:$16 sps:$4 sm:$0xff]   ;;  %v16724_v15 = vld [vmem:[%s18179_s8 + $0x11ec] ss:$16 sps:$4 sm:$0xff]  }
 0x50d   : > { %11750 = vmatpush1.bf16.msra.mxu1 %v16683_v57  ;;  %v11417_v61 = vpop.f32.mrf.mxu0  ;;  %11710 = vmatprep.subr.bf16.mxu0 %v16688_v25  ;;  %v16727_v57 = vld [vmem:[%s18179_s8 + $0x13ec] ss:$16 sps:$4 sm:$0xff]   ;;  %v16722_v46 = vld [vmem:[%s18179_s8 + $0x11e8] ss:$16 sps:$4 sm:$0xff]  }
 0x50e   : > { %v11458_v62 = vpop.f32.mrf.mxu1  ;;  %11751 = vmatprep.subr.bf16.mxu1 %v16691_v37  ;;  %v16725_v50 = vld [vmem:[%s18179_s8 + $0x13e8] ss:$16 sps:$4 sm:$0xff]   ;;  %v16730_v25 = vld [vmem:[%s18179_s8 + $0x11cc] ss:$16 sps:$4 sm:$0xff]  }
 0x50f   : > { %v16733_v37 = vld [vmem:[%s18179_s8 + $0x13cc] ss:$16 sps:$4 sm:$0xff]   ;;  %v16728_v32 = vld [vmem:[%s18179_s8 + $0x11c8] ss:$16 sps:$4 sm:$0xff]  }
 0x510   : > { %11711 = vmatpush1.bf16.msra.mxu0 %v16686_v41  ;;  %v16731_v40 = vld [vmem:[%s18179_s8 + $0x13c8] ss:$16 sps:$4 sm:$0xff]   ;;  %v16736_v41 = vld [vmem:[%s18179_s8 + $0x11ac] ss:$16 sps:$4 sm:$0xff]  }
 0x511   : > { %11752 = vmatpush1.bf16.msra.mxu1 %v16689_v6  ;;  %11712 = vmatprep.subr.bf16.mxu0 %v16694_v63  ;;  %v16739_v6 = vld [vmem:[%s18179_s8 + $0x13ac] ss:$16 sps:$4 sm:$0xff]   ;;  %v16734_v61 = vld [vmem:[%s18179_s8 + $0x11a8] ss:$16 sps:$4 sm:$0xff]  }
 0x512   : > { %11753 = vmatprep.subr.bf16.mxu1 %v16697_v39  ;;  %v16737_v62 = vld [vmem:[%s18179_s8 + $0x13a8] ss:$16 sps:$4 sm:$0xff]   ;;  %v16742_v63 = vld [vmem:[%s18179_s8 + $0x118c] ss:$16 sps:$4 sm:$0xff]  }
 0x513   : > { %v16745_v39 = vld [vmem:[%s18179_s8 + $0x138c] ss:$16 sps:$4 sm:$0xff]  }
 0x514   : > { %11713 = vmatpush1.bf16.msra.mxu0 %v16692_v45  ;;  %v16740_v45 = vld [vmem:[%s18179_s8 + $0x1188] ss:$16 sps:$4 sm:$0xff]  }
 0x515   : > { %11754 = vmatpush1.bf16.msra.mxu1 %v16695_v5  ;;  %11714 = vmatprep.subr.bf16.mxu0 %v16700_v60  ;;  %v16743_v5 = vld [vmem:[%s18179_s8 + $0x1388] ss:$16 sps:$4 sm:$0xff]   ;;  %v16748_v60 = vld [vmem:[%s18179_s8 + $0x116c] ss:$16 sps:$4 sm:$0xff]  }
 0x516   : > { %11755 = vmatprep.subr.bf16.mxu1 %v16703_v27  ;;  %v16751_v27 = vld [vmem:[%s18179_s8 + $0x136c] ss:$16 sps:$4 sm:$0xff]  }
 0x518   : > { %11715 = vmatpush1.bf16.msra.mxu0 %v16698_v16  ;;  %v16746_v16 = vld [vmem:[%s18179_s8 + $0x1168] ss:$16 sps:$4 sm:$0xff]  }
 0x519   : > { %11756 = vmatpush1.bf16.msra.mxu1 %v16701_v20  ;;  %11716 = vmatprep.subr.bf16.mxu0 %v16706_v56  ;;  %v16749_v20 = vld [vmem:[%s18179_s8 + $0x1368] ss:$16 sps:$4 sm:$0xff]   ;;  %v16754_v56 = vld [vmem:[%s18179_s8 + $0x114c] ss:$16 sps:$4 sm:$0xff]  }
 0x51a   : > { %11757 = vmatprep.subr.bf16.mxu1 %v16709_v54  ;;  %v16757_v54 = vld [vmem:[%s18179_s8 + $0x134c] ss:$16 sps:$4 sm:$0xff]  }
 0x51c   : > { %11717 = vmatpush1.bf16.msra.mxu0 %v16704_v49  ;;  %v16752_v49 = vld [vmem:[%s18179_s8 + $0x1148] ss:$16 sps:$4 sm:$0xff]  }
 0x51d   : > { %11758 = vmatpush1.bf16.msra.mxu1 %v16707_v13  ;;  %11718 = vmatprep.subr.bf16.mxu0 %v16712_v21  ;;  %v16755_v13 = vld [vmem:[%s18179_s8 + $0x1348] ss:$16 sps:$4 sm:$0xff]   ;;  %v16760_v21 = vld [vmem:[%s18179_s8 + $0x112c] ss:$16 sps:$4 sm:$0xff]  }
 0x51e   : > { %11759 = vmatprep.subr.bf16.mxu1 %v16715_v4  ;;  %v16763_v4 = vld [vmem:[%s18179_s8 + $0x132c] ss:$16 sps:$4 sm:$0xff]  }
 0x520   : > { %11719 = vmatpush1.bf16.msra.mxu0 %v16710_v11  ;;  %v16758_v11 = vld [vmem:[%s18179_s8 + $0x1128] ss:$16 sps:$4 sm:$0xff]  }
 0x521   : > { %11760 = vmatpush1.bf16.msra.mxu1 %v16713_v52  ;;  %11720 = vmatprep.subr.bf16.mxu0 %v16718_v33  ;;  %v16761_v52 = vld [vmem:[%s18179_s8 + $0x1328] ss:$16 sps:$4 sm:$0xff]   ;;  %v16766_v33 = vld [vmem:[%s18179_s8 + $0x110c] ss:$16 sps:$4 sm:$0xff]  }
 0x522   : > { %11761 = vmatprep.subr.bf16.mxu1 %v16721_v38  ;;  %v16769_v38 = vld [vmem:[%s18179_s8 + $0x130c] ss:$16 sps:$4 sm:$0xff]  }
 0x524   : > { %11721 = vmatpush1.bf16.msra.mxu0 %v16716_v17  ;;  %v16764_v17 = vld [vmem:[%s18179_s8 + $0x1108] ss:$16 sps:$4 sm:$0xff]  }
 0x525   : > { %11762 = vmatpush1.bf16.msra.mxu1 %v16719_v55  ;;  %11722 = vmatprep.subr.bf16.mxu0 %v16724_v15  ;;  %v16767_v55 = vld [vmem:[%s18179_s8 + $0x1308] ss:$16 sps:$4 sm:$0xff]   ;;  %v16772_v15 = vld [vmem:[%s18179_s8 + $0x14ec] ss:$16 sps:$4 sm:$0xff]  }
 0x526   : > { %11763 = vmatprep.subr.bf16.mxu1 %v16727_v57  ;;  %v16775_v57 = vld [vmem:[%s18179_s8 + $0x16ec] ss:$16 sps:$4 sm:$0xff]  }
 0x528   : > { %11723 = vmatpush2.bf16.msra.mxu0 %v16722_v46  ;;  %v16770_v46 = vld [vmem:[%s18179_s8 + $0x14e8] ss:$16 sps:$4 sm:$0xff]  }
 0x529   : > { %11764 = vmatpush2.bf16.msra.mxu1 %v16725_v50  ;;  %11724 = vmatprep.subr.bf16.mxu0 %v16730_v25  ;;  %v16773_v50 = vld [vmem:[%s18179_s8 + $0x16e8] ss:$16 sps:$4 sm:$0xff]   ;;  %v16778_v25 = vld [vmem:[%s18179_s8 + $0x14cc] ss:$16 sps:$4 sm:$0xff]  }
 0x52a   : > { %11765 = vmatprep.subr.bf16.mxu1 %v16733_v37  ;;  %v16781_v37 = vld [vmem:[%s18179_s8 + $0x16cc] ss:$16 sps:$4 sm:$0xff]  }
 0x52c   : > { %11725 = vmatpush2.bf16.msra.mxu0 %v16728_v32 }
 0x52d   : > { %11766 = vmatpush2.bf16.msra.mxu1 %v16731_v40  ;;  %11726 = vmatprep.subr.bf16.mxu0 %v16736_v41 }
 0x52e   : > { %11767 = vmatprep.subr.bf16.mxu1 %v16739_v6  ;;  %v16776_v6 = vld [vmem:[%s18179_s8 + $0x14c8] ss:$16 sps:$4 sm:$0xff]  }
 0x530   : > { %11727 = vmatpush2.bf16.msra.mxu0 %v16734_v61  ;;  %v16779_v61 = vld [vmem:[%s18179_s8 + $0x16c8] ss:$16 sps:$4 sm:$0xff]  }
 0x531   : > { %11768 = vmatpush2.bf16.msra.mxu1 %v16737_v62  ;;  %11728 = vmatprep.subr.bf16.mxu0 %v16742_v63 }
 0x532   : > { %11769 = vmatprep.subr.bf16.mxu1 %v16745_v39  ;;  %v16784_v39 = vld [vmem:[%s18179_s8 + $0x14ac] ss:$16 sps:$4 sm:$0xff]  }
 0x534   : > { %11729 = vmatpush2.bf16.msra.mxu0 %v16740_v45  ;;  %v16787_v45 = vld [vmem:[%s18179_s8 + $0x16ac] ss:$16 sps:$4 sm:$0xff]  }
 0x535   : > { %11770 = vmatpush2.bf16.msra.mxu1 %v16743_v5  ;;  %11730 = vmatprep.subr.bf16.mxu0 %v16748_v60 }
 0x536   : > { %11771 = vmatprep.subr.bf16.mxu1 %v16751_v27  ;;  %v16782_v27 = vld [vmem:[%s18179_s8 + $0x14a8] ss:$16 sps:$4 sm:$0xff]  }
 0x538   : > { %11731 = vmatpush2.bf16.msra.mxu0 %v16746_v16  ;;  %v16785_v16 = vld [vmem:[%s18179_s8 + $0x16a8] ss:$16 sps:$4 sm:$0xff]  }
 0x539   : > { %11772 = vmatpush2.bf16.msra.mxu1 %v16749_v20  ;;  %11732 = vmatprep.subr.bf16.mxu0 %v16754_v56 }
 0x53a   : > { %11773 = vmatprep.subr.bf16.mxu1 %v16757_v54  ;;  %v16791_v54 = vld [vmem:[%s18179_s8 + $0x1688] ss:$16 sps:$4 sm:$0xff]  }
 0x53c   : > { %11733 = vmatpush2.bf16.msra.mxu0 %v16752_v49  ;;  %v16796_v49 = vld [vmem:[%s18179_s8 + $0x146c] ss:$16 sps:$4 sm:$0xff]  }
 0x53d   : > { %11774 = vmatpush2.bf16.msra.mxu1 %v16755_v13  ;;  %11734 = vmatprep.subr.bf16.mxu0 %v16760_v21  ;;  %v16799_v13 = vld [vmem:[%s18179_s8 + $0x166c] ss:$16 sps:$4 sm:$0xff]   ;;  %v16794_v21 = vld [vmem:[%s18179_s8 + $0x1468] ss:$16 sps:$4 sm:$0xff]  }
 0x53e   : > { %11775 = vmatprep.subr.bf16.mxu1 %v16763_v4  ;;  %v16797_v4 = vld [vmem:[%s18179_s8 + $0x1668] ss:$16 sps:$4 sm:$0xff]  }
 0x540   : > { %11735 = vmatpush2.bf16.msra.mxu0 %v16758_v11  ;;  %v16802_v11 = vld [vmem:[%s18179_s8 + $0x144c] ss:$16 sps:$4 sm:$0xff]  }
 0x541   : > { %11776 = vmatpush2.bf16.msra.mxu1 %v16761_v52  ;;  %11736 = vmatprep.subr.bf16.mxu0 %v16766_v33  ;;  %v16805_v52 = vld [vmem:[%s18179_s8 + $0x164c] ss:$16 sps:$4 sm:$0xff]   ;;  %v16800_v33 = vld [vmem:[%s18179_s8 + $0x1448] ss:$16 sps:$4 sm:$0xff]  }
 0x542   : > { %11777 = vmatprep.subr.bf16.mxu1 %v16769_v38  ;;  %v16803_v38 = vld [vmem:[%s18179_s8 + $0x1648] ss:$16 sps:$4 sm:$0xff]  }
 0x544   : > { %11737 = vmatpush2.bf16.msra.mxu0 %v16764_v17  ;;  %v16808_v17 = vld [vmem:[%s18179_s8 + $0x142c] ss:$16 sps:$4 sm:$0xff]  }
 0x545   : > { %11778 = vmatpush2.bf16.msra.mxu1 %v16767_v55  ;;  %11788 = vmatprep.subr.bf16.mxu0 %v16772_v15  ;;  %v16811_v55 = vld [vmem:[%s18179_s8 + $0x162c] ss:$16 sps:$4 sm:$0xff]   ;;  %v16806_v15 = vld [vmem:[%s18179_s8 + $0x1428] ss:$16 sps:$4 sm:$0xff]  }
 0x546   : > { %11829 = vmatprep.subr.bf16.mxu1 %v16775_v57  ;;  %v16809_v57 = vld [vmem:[%s18179_s8 + $0x1628] ss:$16 sps:$4 sm:$0xff]  }
 0x547   : > { %v11494_v32 = vpop.f32.mrf.mxu0  ;;  %11739 = vmatmul.mubr.bf16.vlgmr.msra.gmra.mxu0 %v18700_v23 }
 0x548   : > { %v11535_v40 = vpop.f32.mrf.mxu1  ;;  %11780 = vmatmul.mubr.bf16.vlgmr.msra.gmra.mxu1 %v18713_v24  ;;  %v11495_v41 = vadd.f32 %v11494_v32, %v19685_v10  ;;  %11789 = vmatpush1.bf16.msra.mxu0 %v16770_v46  ;;  %v16814_v46 = vld [vmem:[%s18179_s8 + $0x140c] ss:$16 sps:$4 sm:$0xff]  }
 0x549   : > { %11830 = vmatpush1.bf16.msra.mxu1 %v16773_v50  ;;  %v11496_v62 = vpop.f32.mrf.mxu0  ;;  %11790 = vmatprep.subr.bf16.mxu0 %v16778_v25  ;;  %v16817_v50 = vld [vmem:[%s18179_s8 + $0x160c] ss:$16 sps:$4 sm:$0xff]   ;;  %v16812_v25 = vld [vmem:[%s18179_s8 + $0x1408] ss:$16 sps:$4 sm:$0xff]  }
 0x54a   : > { %v11537_v63 = vpop.f32.mrf.mxu1  ;;  %11831 = vmatprep.subr.bf16.mxu1 %v16781_v37  ;;  %v19762_v5 = vadd.f32 %v11535_v40, %v11495_v41  ;;  %v11497_v23 = vadd.f32 %v11496_v62, %v19691_v43  ;;  %11820 = vmatprep.mubr.bf16.mxu0 %v18709_v34  ;;  %v16790_v34 = vld [vmem:[%s18179_s8 + $0x148c] ss:$16 sps:$4 sm:$0xff]   ;;  %v16788_v43 = vld [vmem:[%s18179_s8 + $0x1488] ss:$16 sps:$4 sm:$0xff]  }
 0x54b   : > { %11861 = vmatprep.mubr.bf16.mxu1 %v18721_v42  ;;  %v11498_v24 = vpop.f32.mrf.mxu0  ;;  %v16793_v42 = vld [vmem:[%s18179_s8 + $0x168c] ss:$16 sps:$4 sm:$0xff]   ;;  %v16815_v37 = vld [vmem:[%s18179_s8 + $0x1608] ss:$16 sps:$4 sm:$0xff]  }
 0x54c   : > { %v11539_v10 = vpop.f32.mrf.mxu1  ;;  %v19767_v60 = vadd.f32 %v11537_v63, %v11497_v23  ;;  %11791 = vmatpush1.bf16.msra.mxu0 %v16776_v6  ;;  %v16820_v32 = vld [vmem:[%s18179_s8 + $0x15ec] ss:$16 sps:$4 sm:$0xff]   ;;  %v16818_v41 = vld [vmem:[%s18179_s8 + $0x15e8] ss:$16 sps:$4 sm:$0xff]  }
 0x54d   : > { %11832 = vmatpush1.bf16.msra.mxu1 %v16779_v61  ;;  %v11499_v20 = vpop.f32.mrf.mxu0  ;;  %11792 = vmatprep.subr.bf16.mxu0 %v16784_v39  ;;  %v16823_v40 = vld [vmem:[%s18179_s8 + $0x17ec] ss:$16 sps:$4 sm:$0xff]   ;;  %v16821_v6 = vld [vmem:[%s18179_s8 + $0x17e8] ss:$16 sps:$4 sm:$0xff]  }
 0x54e   : > { %v11540_v56 = vpop.f32.mrf.mxu1  ;;  %11833 = vmatprep.subr.bf16.mxu1 %v16787_v45  ;;  %v16826_v61 = vld [vmem:[%s18179_s8 + $0x15cc] ss:$16 sps:$4 sm:$0xff]   ;;  %v16824_v63 = vld [vmem:[%s18179_s8 + $0x15c8] ss:$16 sps:$4 sm:$0xff]  }
 0x54f   : > { %v16829_v62 = vld [vmem:[%s18179_s8 + $0x17cc] ss:$16 sps:$4 sm:$0xff]   ;;  %v16827_v39 = vld [vmem:[%s18179_s8 + $0x17c8] ss:$16 sps:$4 sm:$0xff]  }
 0x550   : > { %11793 = vmatpush1.bf16.msra.mxu0 %v16782_v27  ;;  %v16832_v45 = vld [vmem:[%s18179_s8 + $0x15ac] ss:$16 sps:$4 sm:$0xff]   ;;  %v16830_v24 = vld [vmem:[%s18179_s8 + $0x15a8] ss:$16 sps:$4 sm:$0xff]  }
 0x551   : > { %11834 = vmatpush1.bf16.msra.mxu1 %v16785_v16  ;;  %11794 = vmatprep.subr.bf16.mxu0 %v16790_v34  ;;  %v16835_v23 = vld [vmem:[%s18179_s8 + $0x17ac] ss:$16 sps:$4 sm:$0xff]   ;;  %v16833_v10 = vld [vmem:[%s18179_s8 + $0x17a8] ss:$16 sps:$4 sm:$0xff]  }
 0x552   : > { %11835 = vmatprep.subr.bf16.mxu1 %v16793_v42  ;;  %v16838_v27 = vld [vmem:[%s18179_s8 + $0x158c] ss:$16 sps:$4 sm:$0xff]   ;;  %v16836_v20 = vld [vmem:[%s18179_s8 + $0x1588] ss:$16 sps:$4 sm:$0xff]  }
 0x553   : > { %v16841_v16 = vld [vmem:[%s18179_s8 + $0x178c] ss:$16 sps:$4 sm:$0xff]   ;;  %v16839_v56 = vld [vmem:[%s18179_s8 + $0x1788] ss:$16 sps:$4 sm:$0xff]  }
 0x554   : > { %11795 = vmatpush1.bf16.msra.mxu0 %v16788_v43  ;;  %v16844_v34 = vld [vmem:[%s18179_s8 + $0x156c] ss:$16 sps:$4 sm:$0xff]   ;;  %v16842_v43 = vld [vmem:[%s18179_s8 + $0x1568] ss:$16 sps:$4 sm:$0xff]  }
 0x555   : > { %11836 = vmatpush1.bf16.msra.mxu1 %v16791_v54  ;;  %11796 = vmatprep.subr.bf16.mxu0 %v16796_v49  ;;  %v16847_v42 = vld [vmem:[%s18179_s8 + $0x176c] ss:$16 sps:$4 sm:$0xff]   ;;  %v16845_v54 = vld [vmem:[%s18179_s8 + $0x1768] ss:$16 sps:$4 sm:$0xff]  }
 0x556   : > { %11837 = vmatprep.subr.bf16.mxu1 %v16799_v13  ;;  %v16850_v49 = vld [vmem:[%s18179_s8 + $0x154c] ss:$16 sps:$4 sm:$0xff]  }
 0x557   : > { %v16853_v13 = vld [vmem:[%s18179_s8 + $0x174c] ss:$16 sps:$4 sm:$0xff]  }
 0x558   : > { %11797 = vmatpush1.bf16.msra.mxu0 %v16794_v21  ;;  %v16848_v21 = vld [vmem:[%s18179_s8 + $0x1548] ss:$16 sps:$4 sm:$0xff]  }
 0x559   : > { %11838 = vmatpush1.bf16.msra.mxu1 %v16797_v4  ;;  %11798 = vmatprep.subr.bf16.mxu0 %v16802_v11  ;;  %v16851_v4 = vld [vmem:[%s18179_s8 + $0x1748] ss:$16 sps:$4 sm:$0xff]   ;;  %v16856_v11 = vld [vmem:[%s18179_s8 + $0x152c] ss:$16 sps:$4 sm:$0xff]  }
 0x55a   : > { %11839 = vmatprep.subr.bf16.mxu1 %v16805_v52  ;;  %v16859_v52 = vld [vmem:[%s18179_s8 + $0x172c] ss:$16 sps:$4 sm:$0xff]  }
 0x55c   : > { %11799 = vmatpush1.bf16.msra.mxu0 %v16800_v33  ;;  %v16854_v33 = vld [vmem:[%s18179_s8 + $0x1528] ss:$16 sps:$4 sm:$0xff]  }
 0x55d   : > { %11840 = vmatpush1.bf16.msra.mxu1 %v16803_v38  ;;  %11800 = vmatprep.subr.bf16.mxu0 %v16808_v17  ;;  %v16857_v38 = vld [vmem:[%s18179_s8 + $0x1728] ss:$16 sps:$4 sm:$0xff]   ;;  %v16862_v17 = vld [vmem:[%s18179_s8 + $0x150c] ss:$16 sps:$4 sm:$0xff]  }
 0x55e   : > { %11841 = vmatprep.subr.bf16.mxu1 %v16811_v55  ;;  %v16865_v55 = vld [vmem:[%s18179_s8 + $0x170c] ss:$16 sps:$4 sm:$0xff]  }
 0x560   : > { %11801 = vmatpush1.bf16.msra.mxu0 %v16806_v15  ;;  %v16860_v15 = vld [vmem:[%s18179_s8 + $0x1508] ss:$16 sps:$4 sm:$0xff]  }
 0x561   : > { %11842 = vmatpush1.bf16.msra.mxu1 %v16809_v57  ;;  %11802 = vmatprep.subr.bf16.mxu0 %v16814_v46  ;;  %v16863_v57 = vld [vmem:[%s18179_s8 + $0x1708] ss:$16 sps:$4 sm:$0xff]   ;;  %v16868_v46 = vld [vmem:[%s18179_s8 + $0x18ec] ss:$16 sps:$4 sm:$0xff]  }
 0x562   : > { %11843 = vmatprep.subr.bf16.mxu1 %v16817_v50  ;;  %v16871_v50 = vld [vmem:[%s18179_s8 + $0x1aec] ss:$16 sps:$4 sm:$0xff]  }
 0x564   : > { %11803 = vmatpush1.bf16.msra.mxu0 %v16812_v25  ;;  %v16866_v25 = vld [vmem:[%s18179_s8 + $0x18e8] ss:$16 sps:$4 sm:$0xff]  }
 0x565   : > { %11844 = vmatpush1.bf16.msra.mxu1 %v16815_v37  ;;  %11804 = vmatprep.subr.bf16.mxu0 %v16820_v32  ;;  %v16869_v37 = vld [vmem:[%s18179_s8 + $0x1ae8] ss:$16 sps:$4 sm:$0xff]   ;;  %v16874_v32 = vld [vmem:[%s18179_s8 + $0x18cc] ss:$16 sps:$4 sm:$0xff]  }
 0x566   : > { %11845 = vmatprep.subr.bf16.mxu1 %v16823_v40  ;;  %v16877_v40 = vld [vmem:[%s18179_s8 + $0x1acc] ss:$16 sps:$4 sm:$0xff]  }
 0x568   : > { %11805 = vmatpush2.bf16.msra.mxu0 %v16818_v41 }
 0x569   : > { %11846 = vmatpush2.bf16.msra.mxu1 %v16821_v6  ;;  %11806 = vmatprep.subr.bf16.mxu0 %v16826_v61 }
 0x56a   : > { %11847 = vmatprep.subr.bf16.mxu1 %v16829_v62  ;;  %v16872_v62 = vld [vmem:[%s18179_s8 + $0x18c8] ss:$16 sps:$4 sm:$0xff]  }
 0x56c   : > { %11807 = vmatpush2.bf16.msra.mxu0 %v16824_v63  ;;  %v16875_v63 = vld [vmem:[%s18179_s8 + $0x1ac8] ss:$16 sps:$4 sm:$0xff]  }
 0x56d   : > { %11848 = vmatpush2.bf16.msra.mxu1 %v16827_v39  ;;  %11808 = vmatprep.subr.bf16.mxu0 %v16832_v45 }
 0x56e   : > { %11849 = vmatprep.subr.bf16.mxu1 %v16835_v23  ;;  %v16880_v23 = vld [vmem:[%s18179_s8 + $0x18ac] ss:$16 sps:$4 sm:$0xff]  }
 0x570   : > { %11809 = vmatpush2.bf16.msra.mxu0 %v16830_v24  ;;  %v16883_v24 = vld [vmem:[%s18179_s8 + $0x1aac] ss:$16 sps:$4 sm:$0xff]  }
 0x571   : > { %11850 = vmatpush2.bf16.msra.mxu1 %v16833_v10  ;;  %11810 = vmatprep.subr.bf16.mxu0 %v16838_v27 }
 0x572   : > { %11851 = vmatprep.subr.bf16.mxu1 %v16841_v16  ;;  %v16878_v16 = vld [vmem:[%s18179_s8 + $0x18a8] ss:$16 sps:$4 sm:$0xff]  }
 0x574   : > { %11811 = vmatpush2.bf16.msra.mxu0 %v16836_v20  ;;  %v16881_v20 = vld [vmem:[%s18179_s8 + $0x1aa8] ss:$16 sps:$4 sm:$0xff]  }
 0x575   : > { %11852 = vmatpush2.bf16.msra.mxu1 %v16839_v56  ;;  %11812 = vmatprep.subr.bf16.mxu0 %v16844_v34 }
 0x576   : > { %11853 = vmatprep.subr.bf16.mxu1 %v16847_v42  ;;  %v16887_v42 = vld [vmem:[%s18179_s8 + $0x1a88] ss:$16 sps:$4 sm:$0xff]  }
 0x578   : > { %11813 = vmatpush2.bf16.msra.mxu0 %v16842_v43  ;;  %v16892_v43 = vld [vmem:[%s18179_s8 + $0x186c] ss:$16 sps:$4 sm:$0xff]  }
 0x579   : > { %11854 = vmatpush2.bf16.msra.mxu1 %v16845_v54  ;;  %11814 = vmatprep.subr.bf16.mxu0 %v16850_v49  ;;  %v16895_v54 = vld [vmem:[%s18179_s8 + $0x1a6c] ss:$16 sps:$4 sm:$0xff]   ;;  %v16890_v49 = vld [vmem:[%s18179_s8 + $0x1868] ss:$16 sps:$4 sm:$0xff]  }
 0x57a   : > { %11855 = vmatprep.subr.bf16.mxu1 %v16853_v13  ;;  %v16893_v13 = vld [vmem:[%s18179_s8 + $0x1a68] ss:$16 sps:$4 sm:$0xff]  }
 0x57c   : > { %11815 = vmatpush2.bf16.msra.mxu0 %v16848_v21  ;;  %v16898_v21 = vld [vmem:[%s18179_s8 + $0x184c] ss:$16 sps:$4 sm:$0xff]  }
 0x57d   : > { %11856 = vmatpush2.bf16.msra.mxu1 %v16851_v4  ;;  %11816 = vmatprep.subr.bf16.mxu0 %v16856_v11  ;;  %v16901_v4 = vld [vmem:[%s18179_s8 + $0x1a4c] ss:$16 sps:$4 sm:$0xff]   ;;  %v16896_v11 = vld [vmem:[%s18179_s8 + $0x1848] ss:$16 sps:$4 sm:$0xff]  }
 0x57e   : > { %11857 = vmatprep.subr.bf16.mxu1 %v16859_v52  ;;  %v16899_v52 = vld [vmem:[%s18179_s8 + $0x1a48] ss:$16 sps:$4 sm:$0xff]  }
 0x580   : > { %11817 = vmatpush2.bf16.msra.mxu0 %v16854_v33  ;;  %v16904_v33 = vld [vmem:[%s18179_s8 + $0x182c] ss:$16 sps:$4 sm:$0xff]  }
 0x581   : > { %11858 = vmatpush2.bf16.msra.mxu1 %v16857_v38  ;;  %11818 = vmatprep.subr.bf16.mxu0 %v16862_v17  ;;  %v16907_v38 = vld [vmem:[%s18179_s8 + $0x1a2c] ss:$16 sps:$4 sm:$0xff]   ;;  %v16902_v17 = vld [vmem:[%s18179_s8 + $0x1828] ss:$16 sps:$4 sm:$0xff]  }
 0x582   : > { %11859 = vmatprep.subr.bf16.mxu1 %v16865_v55  ;;  %v16905_v55 = vld [vmem:[%s18179_s8 + $0x1a28] ss:$16 sps:$4 sm:$0xff]  }
 0x584   : > { %11819 = vmatpush2.bf16.msra.mxu0 %v16860_v15  ;;  %v16910_v15 = vld [vmem:[%s18179_s8 + $0x180c] ss:$16 sps:$4 sm:$0xff]  }
 0x585   : > { %11860 = vmatpush2.bf16.msra.mxu1 %v16863_v57  ;;  %11870 = vmatprep.subr.bf16.mxu0 %v16868_v46  ;;  %v16913_v57 = vld [vmem:[%s18179_s8 + $0x1a0c] ss:$16 sps:$4 sm:$0xff]   ;;  %v16908_v46 = vld [vmem:[%s18179_s8 + $0x1808] ss:$16 sps:$4 sm:$0xff]  }
 0x586   : > { %11911 = vmatprep.subr.bf16.mxu1 %v16871_v50  ;;  %v16911_v50 = vld [vmem:[%s18179_s8 + $0x1a08] ss:$16 sps:$4 sm:$0xff]  }
 0x587   : > { %v11576_v41 = vpop.f32.mrf.mxu0  ;;  %11821 = vmatmul.mubr.bf16.vlgmr.msra.gmra.mxu0 %v18798_v29 }
 0x588   : > { %v11617_v6 = vpop.f32.mrf.mxu1  ;;  %11862 = vmatmul.mubr.bf16.vlgmr.msra.gmra.mxu1 %v18811_v14  ;;  %v11577_v61 = vadd.f32 %v11576_v41, %v19762_v5  ;;  %11871 = vmatpush1.bf16.msra.mxu0 %v16866_v25  ;;  %v16916_v25 = vld [vmem:[%s18179_s8 + $0x19ec] ss:$16 sps:$4 sm:$0xff]  }
 0x589   : > { %11912 = vmatpush1.bf16.msra.mxu1 %v16869_v37  ;;  %v11578_v39 = vpop.f32.mrf.mxu0  ;;  %11872 = vmatprep.subr.bf16.mxu0 %v16874_v32  ;;  %v16919_v37 = vld [vmem:[%s18179_s8 + $0x1bec] ss:$16 sps:$4 sm:$0xff]   ;;  %v16914_v32 = vld [vmem:[%s18179_s8 + $0x19e8] ss:$16 sps:$4 sm:$0xff]  }
 0x58a   : > { %v11619_v45 = vpop.f32.mrf.mxu1  ;;  %11913 = vmatprep.subr.bf16.mxu1 %v16877_v40  ;;  %v19836_v10 = vadd.f32 %v11617_v6, %v11577_v61  ;;  %v11579_v29 = vadd.f32 %v11578_v39, %v19767_v60  ;;  %11902 = vmatprep.mubr.bf16.mxu0 %v18807_v44  ;;  %v16886_v44 = vld [vmem:[%s18179_s8 + $0x188c] ss:$16 sps:$4 sm:$0xff]   ;;  %v16884_v60 = vld [vmem:[%s18179_s8 + $0x1888] ss:$16 sps:$4 sm:$0xff]  }
 0x58b   : > { %11943 = vmatprep.mubr.bf16.mxu1 %v18819_v53  ;;  %v11580_v14 = vpop.f32.mrf.mxu0  ;;  %v16889_v53 = vld [vmem:[%s18179_s8 + $0x1a8c] ss:$16 sps:$4 sm:$0xff]   ;;  %v16917_v40 = vld [vmem:[%s18179_s8 + $0x1be8] ss:$16 sps:$4 sm:$0xff]  }
 0x58c   : > { %v11621_v5 = vpop.f32.mrf.mxu1  ;;  %v19841_v27 = vadd.f32 %v11619_v45, %v11579_v29  ;;  %11873 = vmatpush1.bf16.msra.mxu0 %v16872_v62  ;;  %v16922_v41 = vld [vmem:[%s18179_s8 + $0x19cc] ss:$16 sps:$4 sm:$0xff]   ;;  %v16920_v61 = vld [vmem:[%s18179_s8 + $0x19c8] ss:$16 sps:$4 sm:$0xff]  }
 0x58d   : > { %11914 = vmatpush1.bf16.msra.mxu1 %v16875_v63  ;;  %v11581_v56 = vpop.f32.mrf.mxu0  ;;  %11874 = vmatprep.subr.bf16.mxu0 %v16880_v23  ;;  %v16925_v6 = vld [vmem:[%s18179_s8 + $0x1bcc] ss:$16 sps:$4 sm:$0xff]   ;;  %v16923_v62 = vld [vmem:[%s18179_s8 + $0x1bc8] ss:$16 sps:$4 sm:$0xff]  }
 0x58e   : > { %v11622_v34 = vpop.f32.mrf.mxu1  ;;  %11915 = vmatprep.subr.bf16.mxu1 %v16883_v24  ;;  %v16928_v63 = vld [vmem:[%s18179_s8 + $0x19ac] ss:$16 sps:$4 sm:$0xff]   ;;  %v16926_v45 = vld [vmem:[%s18179_s8 + $0x19a8] ss:$16 sps:$4 sm:$0xff]  }
 0x58f   : > { %v16931_v39 = vld [vmem:[%s18179_s8 + $0x1bac] ss:$16 sps:$4 sm:$0xff]   ;;  %v16929_v23 = vld [vmem:[%s18179_s8 + $0x1ba8] ss:$16 sps:$4 sm:$0xff]  }
 0x590   : > { %11875 = vmatpush1.bf16.msra.mxu0 %v16878_v16  ;;  %v16934_v24 = vld [vmem:[%s18179_s8 + $0x198c] ss:$16 sps:$4 sm:$0xff]   ;;  %v16932_v14 = vld [vmem:[%s18179_s8 + $0x1988] ss:$16 sps:$4 sm:$0xff]  }
 0x591   : > { %11916 = vmatpush1.bf16.msra.mxu1 %v16881_v20  ;;  %11876 = vmatprep.subr.bf16.mxu0 %v16886_v44  ;;  %v16937_v29 = vld [vmem:[%s18179_s8 + $0x1b8c] ss:$16 sps:$4 sm:$0xff]   ;;  %v16935_v5 = vld [vmem:[%s18179_s8 + $0x1b88] ss:$16 sps:$4 sm:$0xff]  }
 0x592   : > { %11917 = vmatprep.subr.bf16.mxu1 %v16889_v53  ;;  %v16940_v16 = vld [vmem:[%s18179_s8 + $0x196c] ss:$16 sps:$4 sm:$0xff]   ;;  %v16938_v56 = vld [vmem:[%s18179_s8 + $0x1968] ss:$16 sps:$4 sm:$0xff]  }
 0x593   : > { %v16943_v20 = vld [vmem:[%s18179_s8 + $0x1b6c] ss:$16 sps:$4 sm:$0xff]   ;;  %v16941_v34 = vld [vmem:[%s18179_s8 + $0x1b68] ss:$16 sps:$4 sm:$0xff]  }
 0x594   : > { %11877 = vmatpush1.bf16.msra.mxu0 %v16884_v60  ;;  %v16946_v44 = vld [vmem:[%s18179_s8 + $0x194c] ss:$16 sps:$4 sm:$0xff]   ;;  %v16944_v60 = vld [vmem:[%s18179_s8 + $0x1948] ss:$16 sps:$4 sm:$0xff]  }
 0x595   : > { %11918 = vmatpush1.bf16.msra.mxu1 %v16887_v42  ;;  %11878 = vmatprep.subr.bf16.mxu0 %v16892_v43  ;;  %v16949_v53 = vld [vmem:[%s18179_s8 + $0x1b4c] ss:$16 sps:$4 sm:$0xff]   ;;  %v16947_v42 = vld [vmem:[%s18179_s8 + $0x1b48] ss:$16 sps:$4 sm:$0xff]  }
 0x596   : > { %11919 = vmatprep.subr.bf16.mxu1 %v16895_v54  ;;  %v16952_v43 = vld [vmem:[%s18179_s8 + $0x192c] ss:$16 sps:$4 sm:$0xff]  }
 0x597   : > { %v16955_v54 = vld [vmem:[%s18179_s8 + $0x1b2c] ss:$16 sps:$4 sm:$0xff]  }
 0x598   : > { %11879 = vmatpush1.bf16.msra.mxu0 %v16890_v49  ;;  %v16950_v49 = vld [vmem:[%s18179_s8 + $0x1928] ss:$16 sps:$4 sm:$0xff]  }
 0x599   : > { %11920 = vmatpush1.bf16.msra.mxu1 %v16893_v13  ;;  %11880 = vmatprep.subr.bf16.mxu0 %v16898_v21  ;;  %v16953_v13 = vld [vmem:[%s18179_s8 + $0x1b28] ss:$16 sps:$4 sm:$0xff]   ;;  %v16958_v21 = vld [vmem:[%s18179_s8 + $0x190c] ss:$16 sps:$4 sm:$0xff]  }
 0x59a   : > { %11921 = vmatprep.subr.bf16.mxu1 %v16901_v4  ;;  %v16961_v4 = vld [vmem:[%s18179_s8 + $0x1b0c] ss:$16 sps:$4 sm:$0xff]  }
 0x59c   : > { %11881 = vmatpush1.bf16.msra.mxu0 %v16896_v11  ;;  %v16956_v11 = vld [vmem:[%s18179_s8 + $0x1908] ss:$16 sps:$4 sm:$0xff]  }
 0x59d   : > { %11922 = vmatpush1.bf16.msra.mxu1 %v16899_v52  ;;  %11882 = vmatprep.subr.bf16.mxu0 %v16904_v33  ;;  %v16959_v52 = vld [vmem:[%s18179_s8 + $0x1b08] ss:$16 sps:$4 sm:$0xff]   ;;  %v16964_v33 = vld [vmem:[%s18179_s8 + $0x1cec] ss:$16 sps:$4 sm:$0xff]  }
 0x59e   : > { %11923 = vmatprep.subr.bf16.mxu1 %v16907_v38  ;;  %v16967_v38 = vld [vmem:[%s18179_s8 + $0x1eec] ss:$16 sps:$4 sm:$0xff]  }
 0x5a0   : > { %11883 = vmatpush1.bf16.msra.mxu0 %v16902_v17  ;;  %v16962_v17 = vld [vmem:[%s18179_s8 + $0x1ce8] ss:$16 sps:$4 sm:$0xff]  }
 0x5a1   : > { %11924 = vmatpush1.bf16.msra.mxu1 %v16905_v55  ;;  %11884 = vmatprep.subr.bf16.mxu0 %v16910_v15  ;;  %v16965_v55 = vld [vmem:[%s18179_s8 + $0x1ee8] ss:$16 sps:$4 sm:$0xff]   ;;  %v16970_v15 = vld [vmem:[%s18179_s8 + $0x1ccc] ss:$16 sps:$4 sm:$0xff]  }
 0x5a2   : > { %11925 = vmatprep.subr.bf16.mxu1 %v16913_v57  ;;  %v16973_v57 = vld [vmem:[%s18179_s8 + $0x1ecc] ss:$16 sps:$4 sm:$0xff]  }
 0x5a4   : > { %11885 = vmatpush1.bf16.msra.mxu0 %v16908_v46 }
 0x5a5   : > { %11926 = vmatpush1.bf16.msra.mxu1 %v16911_v50  ;;  %11886 = vmatprep.subr.bf16.mxu0 %v16916_v25 }
 0x5a6   : > { %11927 = vmatprep.subr.bf16.mxu1 %v16919_v37  ;;  %v16968_v37 = vld [vmem:[%s18179_s8 + $0x1cc8] ss:$16 sps:$4 sm:$0xff]  }
 0x5a8   : > { %11887 = vmatpush2.bf16.msra.mxu0 %v16914_v32  ;;  %v16971_v32 = vld [vmem:[%s18179_s8 + $0x1ec8] ss:$16 sps:$4 sm:$0xff]  }
 0x5a9   : > { %11928 = vmatpush2.bf16.msra.mxu1 %v16917_v40  ;;  %11888 = vmatprep.subr.bf16.mxu0 %v16922_v41 }
 0x5aa   : > { %11929 = vmatprep.subr.bf16.mxu1 %v16925_v6  ;;  %v16976_v6 = vld [vmem:[%s18179_s8 + $0x1cac] ss:$16 sps:$4 sm:$0xff]  }
 0x5ac   : > { %11889 = vmatpush2.bf16.msra.mxu0 %v16920_v61  ;;  %v16979_v61 = vld [vmem:[%s18179_s8 + $0x1eac] ss:$16 sps:$4 sm:$0xff]  }
 0x5ad   : > { %11930 = vmatpush2.bf16.msra.mxu1 %v16923_v62  ;;  %11890 = vmatprep.subr.bf16.mxu0 %v16928_v63 }
 0x5ae   : > { %11931 = vmatprep.subr.bf16.mxu1 %v16931_v39  ;;  %v16974_v39 = vld [vmem:[%s18179_s8 + $0x1ca8] ss:$16 sps:$4 sm:$0xff]  }
 0x5b0   : > { %11891 = vmatpush2.bf16.msra.mxu0 %v16926_v45  ;;  %v16977_v45 = vld [vmem:[%s18179_s8 + $0x1ea8] ss:$16 sps:$4 sm:$0xff]  }
 0x5b1   : > { %11932 = vmatpush2.bf16.msra.mxu1 %v16929_v23  ;;  %11892 = vmatprep.subr.bf16.mxu0 %v16934_v24 }
 0x5b2   : > { %11933 = vmatprep.subr.bf16.mxu1 %v16937_v29  ;;  %v16983_v29 = vld [vmem:[%s18179_s8 + $0x1e88] ss:$16 sps:$4 sm:$0xff]  }
 0x5b4   : > { %11893 = vmatpush2.bf16.msra.mxu0 %v16932_v14  ;;  %v16988_v14 = vld [vmem:[%s18179_s8 + $0x1c6c] ss:$16 sps:$4 sm:$0xff]  }
 0x5b5   : > { %11934 = vmatpush2.bf16.msra.mxu1 %v16935_v5  ;;  %11894 = vmatprep.subr.bf16.mxu0 %v16940_v16  ;;  %v16991_v5 = vld [vmem:[%s18179_s8 + $0x1e6c] ss:$16 sps:$4 sm:$0xff]   ;;  %v16986_v16 = vld [vmem:[%s18179_s8 + $0x1c68] ss:$16 sps:$4 sm:$0xff]  }
 0x5b6   : > { %11935 = vmatprep.subr.bf16.mxu1 %v16943_v20  ;;  %v16989_v20 = vld [vmem:[%s18179_s8 + $0x1e68] ss:$16 sps:$4 sm:$0xff]  }
 0x5b8   : > { %11895 = vmatpush2.bf16.msra.mxu0 %v16938_v56  ;;  %v16994_v56 = vld [vmem:[%s18179_s8 + $0x1c4c] ss:$16 sps:$4 sm:$0xff]  }
 0x5b9   : > { %11936 = vmatpush2.bf16.msra.mxu1 %v16941_v34  ;;  %11896 = vmatprep.subr.bf16.mxu0 %v16946_v44  ;;  %v16997_v34 = vld [vmem:[%s18179_s8 + $0x1e4c] ss:$16 sps:$4 sm:$0xff]   ;;  %v16992_v44 = vld [vmem:[%s18179_s8 + $0x1c48] ss:$16 sps:$4 sm:$0xff]  }
 0x5ba   : > { %11937 = vmatprep.subr.bf16.mxu1 %v16949_v53  ;;  %v16995_v53 = vld [vmem:[%s18179_s8 + $0x1e48] ss:$16 sps:$4 sm:$0xff]  }
 0x5bc   : > { %11897 = vmatpush2.bf16.msra.mxu0 %v16944_v60  ;;  %v17000_v60 = vld [vmem:[%s18179_s8 + $0x1c2c] ss:$16 sps:$4 sm:$0xff]  }
 0x5bd   : > { %11938 = vmatpush2.bf16.msra.mxu1 %v16947_v42  ;;  %11898 = vmatprep.subr.bf16.mxu0 %v16952_v43  ;;  %v17003_v42 = vld [vmem:[%s18179_s8 + $0x1e2c] ss:$16 sps:$4 sm:$0xff]   ;;  %v16998_v43 = vld [vmem:[%s18179_s8 + $0x1c28] ss:$16 sps:$4 sm:$0xff]  }
 0x5be   : > { %11939 = vmatprep.subr.bf16.mxu1 %v16955_v54  ;;  %v17001_v54 = vld [vmem:[%s18179_s8 + $0x1e28] ss:$16 sps:$4 sm:$0xff]  }
 0x5c0   : > { %11899 = vmatpush2.bf16.msra.mxu0 %v16950_v49  ;;  %v17006_v49 = vld [vmem:[%s18179_s8 + $0x1c0c] ss:$16 sps:$4 sm:$0xff]  }
 0x5c1   : > { %11940 = vmatpush2.bf16.msra.mxu1 %v16953_v13  ;;  %11900 = vmatprep.subr.bf16.mxu0 %v16958_v21  ;;  %v17009_v13 = vld [vmem:[%s18179_s8 + $0x1e0c] ss:$16 sps:$4 sm:$0xff]   ;;  %v17004_v21 = vld [vmem:[%s18179_s8 + $0x1c08] ss:$16 sps:$4 sm:$0xff]  }
 0x5c2   : > { %11941 = vmatprep.subr.bf16.mxu1 %v16961_v4  ;;  %v17007_v4 = vld [vmem:[%s18179_s8 + $0x1e08] ss:$16 sps:$4 sm:$0xff]  }
 0x5c4   : > { %11901 = vmatpush2.bf16.msra.mxu0 %v16956_v11  ;;  %v17012_v11 = vld [vmem:[%s18179_s8 + $0x1dec] ss:$16 sps:$4 sm:$0xff]  }
 0x5c5   : > { %11942 = vmatpush2.bf16.msra.mxu1 %v16959_v52  ;;  %11952 = vmatprep.subr.bf16.mxu0 %v16964_v33  ;;  %v17015_v52 = vld [vmem:[%s18179_s8 + $0x1fec] ss:$16 sps:$4 sm:$0xff]   ;;  %v17010_v33 = vld [vmem:[%s18179_s8 + $0x1de8] ss:$16 sps:$4 sm:$0xff]  }
 0x5c6   : > { %11993 = vmatprep.subr.bf16.mxu1 %v16967_v38  ;;  %v17013_v38 = vld [vmem:[%s18179_s8 + $0x1fe8] ss:$16 sps:$4 sm:$0xff]  }
 0x5c7   : > { %v11658_v46 = vpop.f32.mrf.mxu0  ;;  %11903 = vmatmul.mubr.bf16.vlgmr.msra.gmra.mxu0 %v18894_v59 }
 0x5c8   : > { %v11699_v50 = vpop.f32.mrf.mxu1  ;;  %11944 = vmatmul.mubr.bf16.vlgmr.msra.gmra.mxu1 %v18907_v18  ;;  %v11659_v25 = vadd.f32 %v11658_v46, %v19836_v10  ;;  %11953 = vmatpush1.bf16.msra.mxu0 %v16962_v17  ;;  %v17018_v17 = vld [vmem:[%s18179_s8 + $0x1dcc] ss:$16 sps:$4 sm:$0xff]  }
 0x5c9   : > { %11994 = vmatpush1.bf16.msra.mxu1 %v16965_v55  ;;  %v11660_v40 = vpop.f32.mrf.mxu0  ;;  %11954 = vmatprep.subr.bf16.mxu0 %v16970_v15  ;;  %v17021_v55 = vld [vmem:[%s18179_s8 + $0x1fcc] ss:$16 sps:$4 sm:$0xff]   ;;  %v17016_v15 = vld [vmem:[%s18179_s8 + $0x1dc8] ss:$16 sps:$4 sm:$0xff]  }
 0x5ca   : > { %v11701_v41 = vpop.f32.mrf.mxu1  ;;  %11995 = vmatprep.subr.bf16.mxu1 %v16973_v57  ;;  %v19910_v62 = vadd.f32 %v11699_v50, %v11659_v25  ;;  %v11661_v59 = vadd.f32 %v11660_v40, %v19841_v27  ;;  %11984 = vmatprep.mubr.bf16.mxu0 %v18903_v7  ;;  %v16982_v7 = vld [vmem:[%s18179_s8 + $0x1c8c] ss:$16 sps:$4 sm:$0xff]   ;;  %v16980_v27 = vld [vmem:[%s18179_s8 + $0x1c88] ss:$16 sps:$4 sm:$0xff]  }
 0x5cb   : > { %12025 = vmatprep.mubr.bf16.mxu1 %v18915_v1  ;;  %v11662_v18 = vpop.f32.mrf.mxu0  ;;  %v16985_v1 = vld [vmem:[%s18179_s8 + $0x1e8c] ss:$16 sps:$4 sm:$0xff]   ;;  %v17019_v57 = vld [vmem:[%s18179_s8 + $0x1fc8] ss:$16 sps:$4 sm:$0xff]  }
 0x5cc   : > { %v11703_v10 = vpop.f32.mrf.mxu1  ;;  %v19915_v63 = vadd.f32 %v11701_v41, %v11661_v59  ;;  %11955 = vmatpush1.bf16.msra.mxu0 %v16968_v37  ;;  %v17024_v46 = vld [vmem:[%s18179_s8 + $0x1dac] ss:$16 sps:$4 sm:$0xff]   ;;  %v17022_v25 = vld [vmem:[%s18179_s8 + $0x1da8] ss:$16 sps:$4 sm:$0xff]  }
 0x5cd   : > { %11996 = vmatpush1.bf16.msra.mxu1 %v16971_v32  ;;  %v11663_v23 = vpop.f32.mrf.mxu0  ;;  %11956 = vmatprep.subr.bf16.mxu0 %v16976_v6  ;;  %v17027_v50 = vld [vmem:[%s18179_s8 + $0x1fac] ss:$16 sps:$4 sm:$0xff]   ;;  %v17025_v37 = vld [vmem:[%s18179_s8 + $0x1fa8] ss:$16 sps:$4 sm:$0xff]  }
 0x5ce   : > { %v11704_v24 = vpop.f32.mrf.mxu1  ;;  %11997 = vmatprep.subr.bf16.mxu1 %v16979_v61  ;;  %v17030_v32 = vld [vmem:[%s18179_s8 + $0x1d8c] ss:$16 sps:$4 sm:$0xff]   ;;  %v17028_v41 = vld [vmem:[%s18179_s8 + $0x1d88] ss:$16 sps:$4 sm:$0xff]  }
 0x5cf   : > { %v17033_v40 = vld [vmem:[%s18179_s8 + $0x1f8c] ss:$16 sps:$4 sm:$0xff]   ;;  %v17031_v6 = vld [vmem:[%s18179_s8 + $0x1f88] ss:$16 sps:$4 sm:$0xff]  }
 0x5d0   : > { %11957 = vmatpush1.bf16.msra.mxu0 %v16974_v39  ;;  %v17036_v61 = vld [vmem:[%s18179_s8 + $0x1d6c] ss:$16 sps:$4 sm:$0xff]   ;;  %v17034_v18 = vld [vmem:[%s18179_s8 + $0x1d68] ss:$16 sps:$4 sm:$0xff]  }
 0x5d1   : > { %11998 = vmatpush1.bf16.msra.mxu1 %v16977_v45  ;;  %11958 = vmatprep.subr.bf16.mxu0 %v16982_v7  ;;  %v17039_v59 = vld [vmem:[%s18179_s8 + $0x1f6c] ss:$16 sps:$4 sm:$0xff]   ;;  %v17037_v10 = vld [vmem:[%s18179_s8 + $0x1f68] ss:$16 sps:$4 sm:$0xff]  }
 0x5d2   : > { %11999 = vmatprep.subr.bf16.mxu1 %v16985_v1  ;;  %v17042_v39 = vld [vmem:[%s18179_s8 + $0x1d4c] ss:$16 sps:$4 sm:$0xff]   ;;  %v17040_v23 = vld [vmem:[%s18179_s8 + $0x1d48] ss:$16 sps:$4 sm:$0xff]  }
 0x5d3   : > { %v17045_v45 = vld [vmem:[%s18179_s8 + $0x1f4c] ss:$16 sps:$4 sm:$0xff]   ;;  %v17043_v24 = vld [vmem:[%s18179_s8 + $0x1f48] ss:$16 sps:$4 sm:$0xff]  }
 0x5d4   : > { %11959 = vmatpush1.bf16.msra.mxu0 %v16980_v27  ;;  %v17048_v7 = vld [vmem:[%s18179_s8 + $0x1d2c] ss:$16 sps:$4 sm:$0xff]   ;;  %v17046_v27 = vld [vmem:[%s18179_s8 + $0x1d28] ss:$16 sps:$4 sm:$0xff]  }
 0x5d5   : > { %12000 = vmatpush1.bf16.msra.mxu1 %v16983_v29  ;;  %11960 = vmatprep.subr.bf16.mxu0 %v16988_v14  ;;  %v17051_v1 = vld [vmem:[%s18179_s8 + $0x1f2c] ss:$16 sps:$4 sm:$0xff]   ;;  %v17049_v29 = vld [vmem:[%s18179_s8 + $0x1f28] ss:$16 sps:$4 sm:$0xff]  }
 0x5d6   : > { %12001 = vmatprep.subr.bf16.mxu1 %v16991_v5  ;;  %v17054_v14 = vld [vmem:[%s18179_s8 + $0x1d0c] ss:$16 sps:$4 sm:$0xff]  }
 0x5d7   : > { %v17057_v5 = vld [vmem:[%s18179_s8 + $0x1f0c] ss:$16 sps:$4 sm:$0xff]  }
 0x5d8   : > { %11961 = vmatpush1.bf16.msra.mxu0 %v16986_v16  ;;  %v17052_v16 = vld [vmem:[%s18179_s8 + $0x1d08] ss:$16 sps:$4 sm:$0xff]  }
 0x5d9   : > { %12002 = vmatpush1.bf16.msra.mxu1 %v16989_v20  ;;  %11962 = vmatprep.subr.bf16.mxu0 %v16994_v56  ;;  %v17055_v20 = vld [vmem:[%s18179_s8 + $0x1f08] ss:$16 sps:$4 sm:$0xff]   ;;  %v17060_v56 = vld [vmem:[%s18179_s8 + $0x20ec] ss:$16 sps:$4 sm:$0xff]  }
 0x5da   : > { %12003 = vmatprep.subr.bf16.mxu1 %v16997_v34  ;;  %v17063_v34 = vld [vmem:[%s18179_s8 + $0x22ec] ss:$16 sps:$4 sm:$0xff]  }
 0x5dc   : > { %11963 = vmatpush1.bf16.msra.mxu0 %v16992_v44  ;;  %v17058_v44 = vld [vmem:[%s18179_s8 + $0x20e8] ss:$16 sps:$4 sm:$0xff]  }
 0x5dd   : > { %12004 = vmatpush1.bf16.msra.mxu1 %v16995_v53  ;;  %11964 = vmatprep.subr.bf16.mxu0 %v17000_v60  ;;  %v17061_v53 = vld [vmem:[%s18179_s8 + $0x22e8] ss:$16 sps:$4 sm:$0xff]   ;;  %v17066_v60 = vld [vmem:[%s18179_s8 + $0x20cc] ss:$16 sps:$4 sm:$0xff]  }
 0x5de   : > { %12005 = vmatprep.subr.bf16.mxu1 %v17003_v42  ;;  %v17069_v42 = vld [vmem:[%s18179_s8 + $0x22cc] ss:$16 sps:$4 sm:$0xff]  }
 0x5e0   : > { %11965 = vmatpush1.bf16.msra.mxu0 %v16998_v43 }
 0x5e1   : > { %12006 = vmatpush1.bf16.msra.mxu1 %v17001_v54  ;;  %11966 = vmatprep.subr.bf16.mxu0 %v17006_v49 }
 0x5e2   : > { %12007 = vmatprep.subr.bf16.mxu1 %v17009_v13  ;;  %v17064_v13 = vld [vmem:[%s18179_s8 + $0x20c8] ss:$16 sps:$4 sm:$0xff]  }
 0x5e4   : > { %11967 = vmatpush1.bf16.msra.mxu0 %v17004_v21  ;;  %v17067_v21 = vld [vmem:[%s18179_s8 + $0x22c8] ss:$16 sps:$4 sm:$0xff]  }
 0x5e5   : > { %12008 = vmatpush1.bf16.msra.mxu1 %v17007_v4  ;;  %11968 = vmatprep.subr.bf16.mxu0 %v17012_v11 }
 0x5e6   : > { %12009 = vmatprep.subr.bf16.mxu1 %v17015_v52  ;;  %v17072_v52 = vld [vmem:[%s18179_s8 + $0x20ac] ss:$16 sps:$4 sm:$0xff]  }
 0x5e8   : > { %11969 = vmatpush2.bf16.msra.mxu0 %v17010_v33  ;;  %v17075_v33 = vld [vmem:[%s18179_s8 + $0x22ac] ss:$16 sps:$4 sm:$0xff]  }
 0x5e9   : > { %12010 = vmatpush2.bf16.msra.mxu1 %v17013_v38  ;;  %11970 = vmatprep.subr.bf16.mxu0 %v17018_v17 }
 0x5ea   : > { %12011 = vmatprep.subr.bf16.mxu1 %v17021_v55  ;;  %v17070_v55 = vld [vmem:[%s18179_s8 + $0x20a8] ss:$16 sps:$4 sm:$0xff]  }
 0x5ec   : > { %11971 = vmatpush2.bf16.msra.mxu0 %v17016_v15  ;;  %v17073_v15 = vld [vmem:[%s18179_s8 + $0x22a8] ss:$16 sps:$4 sm:$0xff]  }
 0x5ed   : > { %12012 = vmatpush2.bf16.msra.mxu1 %v17019_v57  ;;  %11972 = vmatprep.subr.bf16.mxu0 %v17024_v46 }
 0x5ee   : > { %12013 = vmatprep.subr.bf16.mxu1 %v17027_v50  ;;  %v17079_v50 = vld [vmem:[%s18179_s8 + $0x2288] ss:$16 sps:$4 sm:$0xff]  }
 0x5f0   : > { %11973 = vmatpush2.bf16.msra.mxu0 %v17022_v25  ;;  %v17084_v25 = vld [vmem:[%s18179_s8 + $0x206c] ss:$16 sps:$4 sm:$0xff]  }
 0x5f1   : > { %12014 = vmatpush2.bf16.msra.mxu1 %v17025_v37  ;;  %11974 = vmatprep.subr.bf16.mxu0 %v17030_v32  ;;  %v17087_v37 = vld [vmem:[%s18179_s8 + $0x226c] ss:$16 sps:$4 sm:$0xff]   ;;  %v17082_v32 = vld [vmem:[%s18179_s8 + $0x2068] ss:$16 sps:$4 sm:$0xff]  }
 0x5f2   : > { %12015 = vmatprep.subr.bf16.mxu1 %v17033_v40  ;;  %v17085_v40 = vld [vmem:[%s18179_s8 + $0x2268] ss:$16 sps:$4 sm:$0xff]  }
 0x5f4   : > { %11975 = vmatpush2.bf16.msra.mxu0 %v17028_v41  ;;  %v17090_v41 = vld [vmem:[%s18179_s8 + $0x204c] ss:$16 sps:$4 sm:$0xff]  }
 0x5f5   : > { %12016 = vmatpush2.bf16.msra.mxu1 %v17031_v6  ;;  %11976 = vmatprep.subr.bf16.mxu0 %v17036_v61  ;;  %v17093_v6 = vld [vmem:[%s18179_s8 + $0x224c] ss:$16 sps:$4 sm:$0xff]   ;;  %v17088_v61 = vld [vmem:[%s18179_s8 + $0x2048] ss:$16 sps:$4 sm:$0xff]  }
 0x5f6   : > { %12017 = vmatprep.subr.bf16.mxu1 %v17039_v59  ;;  %v17091_v59 = vld [vmem:[%s18179_s8 + $0x2248] ss:$16 sps:$4 sm:$0xff]  }
 0x5f8   : > { %11977 = vmatpush2.bf16.msra.mxu0 %v17034_v18  ;;  %v17096_v18 = vld [vmem:[%s18179_s8 + $0x202c] ss:$16 sps:$4 sm:$0xff]  }
 0x5f9   : > { %12018 = vmatpush2.bf16.msra.mxu1 %v17037_v10  ;;  %11978 = vmatprep.subr.bf16.mxu0 %v17042_v39  ;;  %v17099_v10 = vld [vmem:[%s18179_s8 + $0x222c] ss:$16 sps:$4 sm:$0xff]   ;;  %v17094_v39 = vld [vmem:[%s18179_s8 + $0x2028] ss:$16 sps:$4 sm:$0xff]  }
 0x5fa   : > { %12019 = vmatprep.subr.bf16.mxu1 %v17045_v45  ;;  %v17097_v45 = vld [vmem:[%s18179_s8 + $0x2228] ss:$16 sps:$4 sm:$0xff]  }
 0x5fc   : > { %11979 = vmatpush2.bf16.msra.mxu0 %v17040_v23  ;;  %v17102_v23 = vld [vmem:[%s18179_s8 + $0x200c] ss:$16 sps:$4 sm:$0xff]  }
 0x5fd   : > { %12020 = vmatpush2.bf16.msra.mxu1 %v17043_v24  ;;  %11980 = vmatprep.subr.bf16.mxu0 %v17048_v7  ;;  %v17105_v24 = vld [vmem:[%s18179_s8 + $0x220c] ss:$16 sps:$4 sm:$0xff]   ;;  %v17100_v7 = vld [vmem:[%s18179_s8 + $0x2008] ss:$16 sps:$4 sm:$0xff]  }
 0x5fe   : > { %12021 = vmatprep.subr.bf16.mxu1 %v17051_v1  ;;  %v17103_v1 = vld [vmem:[%s18179_s8 + $0x2208] ss:$16 sps:$4 sm:$0xff]  }
 0x600   : > { %11981 = vmatpush2.bf16.msra.mxu0 %v17046_v27  ;;  %v17108_v27 = vld [vmem:[%s18179_s8 + $0x21ec] ss:$16 sps:$4 sm:$0xff]  }
 0x601   : > { %12022 = vmatpush2.bf16.msra.mxu1 %v17049_v29  ;;  %11982 = vmatprep.subr.bf16.mxu0 %v17054_v14  ;;  %v17111_v29 = vld [vmem:[%s18179_s8 + $0x23ec] ss:$16 sps:$4 sm:$0xff]   ;;  %v17106_v14 = vld [vmem:[%s18179_s8 + $0x21e8] ss:$16 sps:$4 sm:$0xff]  }
 0x602   : > { %12023 = vmatprep.subr.bf16.mxu1 %v17057_v5  ;;  %v17109_v5 = vld [vmem:[%s18179_s8 + $0x23e8] ss:$16 sps:$4 sm:$0xff]  }
 0x604   : > { %11983 = vmatpush2.bf16.msra.mxu0 %v17052_v16  ;;  %v17114_v16 = vld [vmem:[%s18179_s8 + $0x21cc] ss:$16 sps:$4 sm:$0xff]  }
 0x605   : > { %12024 = vmatpush2.bf16.msra.mxu1 %v17055_v20  ;;  %12034 = vmatprep.subr.bf16.mxu0 %v17060_v56  ;;  %v17117_v20 = vld [vmem:[%s18179_s8 + $0x23cc] ss:$16 sps:$4 sm:$0xff]   ;;  %v17112_v56 = vld [vmem:[%s18179_s8 + $0x21c8] ss:$16 sps:$4 sm:$0xff]  }
 0x606   : > { %12075 = vmatprep.subr.bf16.mxu1 %v17063_v34  ;;  %v17115_v34 = vld [vmem:[%s18179_s8 + $0x23c8] ss:$16 sps:$4 sm:$0xff]  }
 0x607   : > { %v11740_v43 = vpop.f32.mrf.mxu0  ;;  %11985 = vmatmul.mubr.bf16.vlgmr.msra.gmra.mxu0 %v18992_v36 }
 0x608   : > { %v11781_v54 = vpop.f32.mrf.mxu1  ;;  %12026 = vmatmul.mubr.bf16.vlgmr.msra.gmra.mxu1 %v19005_v48  ;;  %v11741_v49 = vadd.f32 %v11740_v43, %v19910_v62  ;;  %12035 = vmatpush1.bf16.msra.mxu0 %v17058_v44  ;;  %v17120_v44 = vld [vmem:[%s18179_s8 + $0x21ac] ss:$16 sps:$4 sm:$0xff]  }
 0x609   : > { %12076 = vmatpush1.bf16.msra.mxu1 %v17061_v53  ;;  %v11742_v4 = vpop.f32.mrf.mxu0  ;;  %12036 = vmatprep.subr.bf16.mxu0 %v17066_v60  ;;  %v17123_v53 = vld [vmem:[%s18179_s8 + $0x23ac] ss:$16 sps:$4 sm:$0xff]   ;;  %v17118_v60 = vld [vmem:[%s18179_s8 + $0x21a8] ss:$16 sps:$4 sm:$0xff]  }
 0x60a   : > { %v11783_v11 = vpop.f32.mrf.mxu1  ;;  %12077 = vmatprep.subr.bf16.mxu1 %v17069_v42  ;;  %v19984_v38 = vadd.f32 %v11781_v54, %v11741_v49  ;;  %v11743_v36 = vadd.f32 %v11742_v4, %v19915_v63  ;;  %12066 = vmatprep.mubr.bf16.mxu0 %v19001_v51  ;;  %v17078_v51 = vld [vmem:[%s18179_s8 + $0x208c] ss:$16 sps:$4 sm:$0xff]   ;;  %v17076_v63 = vld [vmem:[%s18179_s8 + $0x2088] ss:$16 sps:$4 sm:$0xff]  }
 0x60b   : > { %12107 = vmatprep.mubr.bf16.mxu1 %v19013_v0  ;;  %v11744_v48 = vpop.f32.mrf.mxu0  ;;  %v17081_v0 = vld [vmem:[%s18179_s8 + $0x228c] ss:$16 sps:$4 sm:$0xff]   ;;  %v17121_v42 = vld [vmem:[%s18179_s8 + $0x23a8] ss:$16 sps:$4 sm:$0xff]  }
 0x60c   : > { %v11785_v62 = vpop.f32.mrf.mxu1  ;;  %v19989_v17 = vadd.f32 %v11783_v11, %v11743_v36  ;;  %12037 = vmatpush1.bf16.msra.mxu0 %v17064_v13  ;;  %v17126_v43 = vld [vmem:[%s18179_s8 + $0x218c] ss:$16 sps:$4 sm:$0xff]   ;;  %v17124_v49 = vld [vmem:[%s18179_s8 + $0x2188] ss:$16 sps:$4 sm:$0xff]  }
 0x60d   : > { %12078 = vmatpush1.bf16.msra.mxu1 %v17067_v21  ;;  %v11745_v57 = vpop.f32.mrf.mxu0  ;;  %12038 = vmatprep.subr.bf16.mxu0 %v17072_v52  ;;  %v17129_v54 = vld [vmem:[%s18179_s8 + $0x238c] ss:$16 sps:$4 sm:$0xff]   ;;  %v17127_v13 = vld [vmem:[%s18179_s8 + $0x2388] ss:$16 sps:$4 sm:$0xff]  }
 0x60e   : > { %v11786_v46 = vpop.f32.mrf.mxu1  ;;  %12079 = vmatprep.subr.bf16.mxu1 %v17075_v33  ;;  %v17132_v21 = vld [vmem:[%s18179_s8 + $0x216c] ss:$16 sps:$4 sm:$0xff]   ;;  %v17130_v11 = vld [vmem:[%s18179_s8 + $0x2168] ss:$16 sps:$4 sm:$0xff]  }
 0x60f   : > { %v17135_v4 = vld [vmem:[%s18179_s8 + $0x236c] ss:$16 sps:$4 sm:$0xff]   ;;  %v17133_v52 = vld [vmem:[%s18179_s8 + $0x2368] ss:$16 sps:$4 sm:$0xff]  }
 0x610   : > { %12039 = vmatpush1.bf16.msra.mxu0 %v17070_v55  ;;  %v17138_v33 = vld [vmem:[%s18179_s8 + $0x214c] ss:$16 sps:$4 sm:$0xff]   ;;  %v17136_v48 = vld [vmem:[%s18179_s8 + $0x2148] ss:$16 sps:$4 sm:$0xff]  }
 0x611   : > { %12080 = vmatpush1.bf16.msra.mxu1 %v17073_v15  ;;  %12040 = vmatprep.subr.bf16.mxu0 %v17078_v51  ;;  %v17141_v36 = vld [vmem:[%s18179_s8 + $0x234c] ss:$16 sps:$4 sm:$0xff]   ;;  %v17139_v62 = vld [vmem:[%s18179_s8 + $0x2348] ss:$16 sps:$4 sm:$0xff]  }
 0x612   : > { %12081 = vmatprep.subr.bf16.mxu1 %v17081_v0  ;;  %v17144_v55 = vld [vmem:[%s18179_s8 + $0x212c] ss:$16 sps:$4 sm:$0xff]   ;;  %v17142_v57 = vld [vmem:[%s18179_s8 + $0x2128] ss:$16 sps:$4 sm:$0xff]  }
 0x613   : > { %v17147_v15 = vld [vmem:[%s18179_s8 + $0x232c] ss:$16 sps:$4 sm:$0xff]   ;;  %v17145_v46 = vld [vmem:[%s18179_s8 + $0x2328] ss:$16 sps:$4 sm:$0xff]  }
 0x614   : > { %12041 = vmatpush1.bf16.msra.mxu0 %v17076_v63  ;;  %v17150_v51 = vld [vmem:[%s18179_s8 + $0x210c] ss:$16 sps:$4 sm:$0xff]   ;;  %v17148_v63 = vld [vmem:[%s18179_s8 + $0x2108] ss:$16 sps:$4 sm:$0xff]  }
 0x615   : > { %12082 = vmatpush1.bf16.msra.mxu1 %v17079_v50  ;;  %12042 = vmatprep.subr.bf16.mxu0 %v17084_v25  ;;  %v17153_v0 = vld [vmem:[%s18179_s8 + $0x230c] ss:$16 sps:$4 sm:$0xff]   ;;  %v17151_v50 = vld [vmem:[%s18179_s8 + $0x2308] ss:$16 sps:$4 sm:$0xff]  }
 0x616   : > { %12083 = vmatprep.subr.bf16.mxu1 %v17087_v37  ;;  %v17156_v25 = vld [vmem:[%s18179_s8 + $0x24ec] ss:$16 sps:$4 sm:$0xff]  }
 0x617   : > { %v17159_v37 = vld [vmem:[%s18179_s8 + $0x26ec] ss:$16 sps:$4 sm:$0xff]  }
 0x618   : > { %12043 = vmatpush1.bf16.msra.mxu0 %v17082_v32  ;;  %v17154_v32 = vld [vmem:[%s18179_s8 + $0x24e8] ss:$16 sps:$4 sm:$0xff]  }
 0x619   : > { %12084 = vmatpush1.bf16.msra.mxu1 %v17085_v40  ;;  %12044 = vmatprep.subr.bf16.mxu0 %v17090_v41  ;;  %v17157_v40 = vld [vmem:[%s18179_s8 + $0x26e8] ss:$16 sps:$4 sm:$0xff]   ;;  %v17162_v41 = vld [vmem:[%s18179_s8 + $0x24cc] ss:$16 sps:$4 sm:$0xff]  }
 0x61a   : > { %12085 = vmatprep.subr.bf16.mxu1 %v17093_v6  ;;  %v17165_v6 = vld [vmem:[%s18179_s8 + $0x26cc] ss:$16 sps:$4 sm:$0xff]  }
 0x61c   : > { %12045 = vmatpush1.bf16.msra.mxu0 %v17088_v61 }
 0x61d   : > { %12086 = vmatpush1.bf16.msra.mxu1 %v17091_v59  ;;  %12046 = vmatprep.subr.bf16.mxu0 %v17096_v18 }
 0x61e   : > { %12087 = vmatprep.subr.bf16.mxu1 %v17099_v10  ;;  %v17160_v10 = vld [vmem:[%s18179_s8 + $0x24c8] ss:$16 sps:$4 sm:$0xff]  }
 0x620   : > { %12047 = vmatpush1.bf16.msra.mxu0 %v17094_v39  ;;  %v17163_v39 = vld [vmem:[%s18179_s8 + $0x26c8] ss:$16 sps:$4 sm:$0xff]  }
 0x621   : > { %12088 = vmatpush1.bf16.msra.mxu1 %v17097_v45  ;;  %12048 = vmatprep.subr.bf16.mxu0 %v17102_v23 }
 0x622   : > { %12089 = vmatprep.subr.bf16.mxu1 %v17105_v24  ;;  %v17168_v24 = vld [vmem:[%s18179_s8 + $0x24ac] ss:$16 sps:$4 sm:$0xff]  }
 0x624   : > { %12049 = vmatpush1.bf16.msra.mxu0 %v17100_v7  ;;  %v17171_v7 = vld [vmem:[%s18179_s8 + $0x26ac] ss:$16 sps:$4 sm:$0xff]  }
 0x625   : > { %12090 = vmatpush1.bf16.msra.mxu1 %v17103_v1  ;;  %12050 = vmatprep.subr.bf16.mxu0 %v17108_v27 }
 0x626   : > { %12091 = vmatprep.subr.bf16.mxu1 %v17111_v29  ;;  %v17166_v29 = vld [vmem:[%s18179_s8 + $0x24a8] ss:$16 sps:$4 sm:$0xff]  }
 0x628   : > { %12051 = vmatpush2.bf16.msra.mxu0 %v17106_v14  ;;  %v17169_v14 = vld [vmem:[%s18179_s8 + $0x26a8] ss:$16 sps:$4 sm:$0xff]  }
 0x629   : > { %12092 = vmatpush2.bf16.msra.mxu1 %v17109_v5  ;;  %12052 = vmatprep.subr.bf16.mxu0 %v17114_v16 }
 0x62a   : > { %12093 = vmatprep.subr.bf16.mxu1 %v17117_v20  ;;  %v17175_v20 = vld [vmem:[%s18179_s8 + $0x2688] ss:$16 sps:$4 sm:$0xff]  }
 0x62c   : > { %12053 = vmatpush2.bf16.msra.mxu0 %v17112_v56  ;;  %v17180_v56 = vld [vmem:[%s18179_s8 + $0x246c] ss:$16 sps:$4 sm:$0xff]  }
 0x62d   : > { %12094 = vmatpush2.bf16.msra.mxu1 %v17115_v34  ;;  %12054 = vmatprep.subr.bf16.mxu0 %v17120_v44  ;;  %v17183_v34 = vld [vmem:[%s18179_s8 + $0x266c] ss:$16 sps:$4 sm:$0xff]   ;;  %v17178_v44 = vld [vmem:[%s18179_s8 + $0x2468] ss:$16 sps:$4 sm:$0xff]  }
 0x62e   : > { %12095 = vmatprep.subr.bf16.mxu1 %v17123_v53  ;;  %v17181_v53 = vld [vmem:[%s18179_s8 + $0x2668] ss:$16 sps:$4 sm:$0xff]  }
 0x630   : > { %12055 = vmatpush2.bf16.msra.mxu0 %v17118_v60  ;;  %v17186_v60 = vld [vmem:[%s18179_s8 + $0x244c] ss:$16 sps:$4 sm:$0xff]  }
 0x631   : > { %12096 = vmatpush2.bf16.msra.mxu1 %v17121_v42  ;;  %12056 = vmatprep.subr.bf16.mxu0 %v17126_v43  ;;  %v17189_v42 = vld [vmem:[%s18179_s8 + $0x264c] ss:$16 sps:$4 sm:$0xff]   ;;  %v17184_v43 = vld [vmem:[%s18179_s8 + $0x2448] ss:$16 sps:$4 sm:$0xff]  }
 0x632   : > { %12097 = vmatprep.subr.bf16.mxu1 %v17129_v54  ;;  %v17187_v54 = vld [vmem:[%s18179_s8 + $0x2648] ss:$16 sps:$4 sm:$0xff]  }
 0x634   : > { %12057 = vmatpush2.bf16.msra.mxu0 %v17124_v49  ;;  %v17192_v49 = vld [vmem:[%s18179_s8 + $0x242c] ss:$16 sps:$4 sm:$0xff]  }
 0x635   : > { %12098 = vmatpush2.bf16.msra.mxu1 %v17127_v13  ;;  %12058 = vmatprep.subr.bf16.mxu0 %v17132_v21  ;;  %v17195_v13 = vld [vmem:[%s18179_s8 + $0x262c] ss:$16 sps:$4 sm:$0xff]   ;;  %v17190_v21 = vld [vmem:[%s18179_s8 + $0x2428] ss:$16 sps:$4 sm:$0xff]  }
 0x636   : > { %12099 = vmatprep.subr.bf16.mxu1 %v17135_v4  ;;  %v17193_v4 = vld [vmem:[%s18179_s8 + $0x2628] ss:$16 sps:$4 sm:$0xff]  }
 0x638   : > { %12059 = vmatpush2.bf16.msra.mxu0 %v17130_v11  ;;  %v17198_v11 = vld [vmem:[%s18179_s8 + $0x240c] ss:$16 sps:$4 sm:$0xff]  }
 0x639   : > { %12100 = vmatpush2.bf16.msra.mxu1 %v17133_v52  ;;  %12060 = vmatprep.subr.bf16.mxu0 %v17138_v33  ;;  %v17201_v52 = vld [vmem:[%s18179_s8 + $0x260c] ss:$16 sps:$4 sm:$0xff]   ;;  %v17196_v33 = vld [vmem:[%s18179_s8 + $0x2408] ss:$16 sps:$4 sm:$0xff]  }
 0x63a   : > { %12101 = vmatprep.subr.bf16.mxu1 %v17141_v36  ;;  %v17199_v36 = vld [vmem:[%s18179_s8 + $0x2608] ss:$16 sps:$4 sm:$0xff]  }
 0x63c   : > { %12061 = vmatpush2.bf16.msra.mxu0 %v17136_v48  ;;  %v17204_v48 = vld [vmem:[%s18179_s8 + $0x25ec] ss:$16 sps:$4 sm:$0xff]  }
 0x63d   : > { %12102 = vmatpush2.bf16.msra.mxu1 %v17139_v62  ;;  %12062 = vmatprep.subr.bf16.mxu0 %v17144_v55  ;;  %v17207_v62 = vld [vmem:[%s18179_s8 + $0x27ec] ss:$16 sps:$4 sm:$0xff]   ;;  %v17202_v55 = vld [vmem:[%s18179_s8 + $0x25e8] ss:$16 sps:$4 sm:$0xff]  }
 0x63e   : > { %12103 = vmatprep.subr.bf16.mxu1 %v17147_v15  ;;  %v17205_v15 = vld [vmem:[%s18179_s8 + $0x27e8] ss:$16 sps:$4 sm:$0xff]  }
 0x640   : > { %12063 = vmatpush2.bf16.msra.mxu0 %v17142_v57  ;;  %v17210_v57 = vld [vmem:[%s18179_s8 + $0x25cc] ss:$16 sps:$4 sm:$0xff]  }
 0x641   : > { %12104 = vmatpush2.bf16.msra.mxu1 %v17145_v46  ;;  %12064 = vmatprep.subr.bf16.mxu0 %v17150_v51  ;;  %v17213_v46 = vld [vmem:[%s18179_s8 + $0x27cc] ss:$16 sps:$4 sm:$0xff]   ;;  %v17208_v51 = vld [vmem:[%s18179_s8 + $0x25c8] ss:$16 sps:$4 sm:$0xff]  }
 0x642   : > { %12105 = vmatprep.subr.bf16.mxu1 %v17153_v0  ;;  %v17211_v0 = vld [vmem:[%s18179_s8 + $0x27c8] ss:$16 sps:$4 sm:$0xff]  }
 0x644   : > { %12065 = vmatpush2.bf16.msra.mxu0 %v17148_v63  ;;  %v17216_v63 = vld [vmem:[%s18179_s8 + $0x25ac] ss:$16 sps:$4 sm:$0xff]  }
 0x645   : > { %12106 = vmatpush2.bf16.msra.mxu1 %v17151_v50  ;;  %12116 = vmatprep.subr.bf16.mxu0 %v17156_v25  ;;  %v17219_v50 = vld [vmem:[%s18179_s8 + $0x27ac] ss:$16 sps:$4 sm:$0xff]   ;;  %v17214_v25 = vld [vmem:[%s18179_s8 + $0x25a8] ss:$16 sps:$4 sm:$0xff]  }
 0x646   : > { %12157 = vmatprep.subr.bf16.mxu1 %v17159_v37  ;;  %v17217_v37 = vld [vmem:[%s18179_s8 + $0x27a8] ss:$16 sps:$4 sm:$0xff]  }
 0x647   : > { %v11822_v61 = vpop.f32.mrf.mxu0  ;;  %12067 = vmatmul.mubr.bf16.vlgmr.msra.gmra.mxu0 %v19088_v9 }
 0x648   : > { %v11863_v59 = vpop.f32.mrf.mxu1  ;;  %12108 = vmatmul.mubr.bf16.vlgmr.msra.gmra.mxu1 %v19101_v22  ;;  %v11823_v18 = vadd.f32 %v11822_v61, %v19984_v38  ;;  %12117 = vmatpush1.bf16.msra.mxu0 %v17154_v32  ;;  %v17222_v32 = vld [vmem:[%s18179_s8 + $0x258c] ss:$16 sps:$4 sm:$0xff]  }
 0x649   : > { %12158 = vmatpush1.bf16.msra.mxu1 %v17157_v40  ;;  %v11824_v45 = vpop.f32.mrf.mxu0  ;;  %12118 = vmatprep.subr.bf16.mxu0 %v17162_v41  ;;  %v17225_v40 = vld [vmem:[%s18179_s8 + $0x278c] ss:$16 sps:$4 sm:$0xff]   ;;  %v17220_v41 = vld [vmem:[%s18179_s8 + $0x2588] ss:$16 sps:$4 sm:$0xff]  }
 0x64a   : > { %v11865_v23 = vpop.f32.mrf.mxu1  ;;  %12159 = vmatprep.subr.bf16.mxu1 %v17165_v6  ;;  %v20058_v1 = vadd.f32 %v11863_v59, %v11823_v18  ;;  %v11825_v9 = vadd.f32 %v11824_v45, %v19989_v17  ;;  %12148 = vmatprep.mubr.bf16.mxu0 %v19097_v58  ;;  %v17174_v58 = vld [vmem:[%s18179_s8 + $0x248c] ss:$16 sps:$4 sm:$0xff]   ;;  %v17172_v17 = vld [vmem:[%s18179_s8 + $0x2488] ss:$16 sps:$4 sm:$0xff]  }
 0x64b   : > { %12189 = vmatprep.mubr.bf16.mxu1 %v19109_v19  ;;  %v11826_v22 = vpop.f32.mrf.mxu0  ;;  %v17177_v19 = vld [vmem:[%s18179_s8 + $0x268c] ss:$16 sps:$4 sm:$0xff]   ;;  %v17223_v6 = vld [vmem:[%s18179_s8 + $0x2788] ss:$16 sps:$4 sm:$0xff]  }
 0x64c   : > { %v11867_v38 = vpop.f32.mrf.mxu1  ;;  %v20063_v27 = vadd.f32 %v11865_v23, %v11825_v9  ;;  %12119 = vmatpush1.bf16.msra.mxu0 %v17160_v10  ;;  %v17228_v61 = vld [vmem:[%s18179_s8 + $0x256c] ss:$16 sps:$4 sm:$0xff]   ;;  %v17226_v18 = vld [vmem:[%s18179_s8 + $0x2568] ss:$16 sps:$4 sm:$0xff]  }
 0x64d   : > { %12160 = vmatpush1.bf16.msra.mxu1 %v17163_v39  ;;  %v11827_v5 = vpop.f32.mrf.mxu0  ;;  %12120 = vmatprep.subr.bf16.mxu0 %v17168_v24  ;;  %v17231_v59 = vld [vmem:[%s18179_s8 + $0x276c] ss:$16 sps:$4 sm:$0xff]   ;;  %v17229_v10 = vld [vmem:[%s18179_s8 + $0x2768] ss:$16 sps:$4 sm:$0xff]  }
 0x64e   : > { %v11868_v16 = vpop.f32.mrf.mxu1  ;;  %12161 = vmatprep.subr.bf16.mxu1 %v17171_v7  ;;  %v17234_v39 = vld [vmem:[%s18179_s8 + $0x254c] ss:$16 sps:$4 sm:$0xff]   ;;  %v17232_v23 = vld [vmem:[%s18179_s8 + $0x2548] ss:$16 sps:$4 sm:$0xff]  }
 0x64f   : > { %v17237_v45 = vld [vmem:[%s18179_s8 + $0x274c] ss:$16 sps:$4 sm:$0xff]   ;;  %v17235_v24 = vld [vmem:[%s18179_s8 + $0x2748] ss:$16 sps:$4 sm:$0xff]  }
 0x650   : > { %12121 = vmatpush1.bf16.msra.mxu0 %v17166_v29  ;;  %v17240_v7 = vld [vmem:[%s18179_s8 + $0x252c] ss:$16 sps:$4 sm:$0xff]   ;;  %v17238_v22 = vld [vmem:[%s18179_s8 + $0x2528] ss:$16 sps:$4 sm:$0xff]  }
 0x651   : > { %12162 = vmatpush1.bf16.msra.mxu1 %v17169_v14  ;;  %12122 = vmatprep.subr.bf16.mxu0 %v17174_v58  ;;  %v17243_v9 = vld [vmem:[%s18179_s8 + $0x272c] ss:$16 sps:$4 sm:$0xff]   ;;  %v17241_v38 = vld [vmem:[%s18179_s8 + $0x2728] ss:$16 sps:$4 sm:$0xff]  }
 0x652   : > { %12163 = vmatprep.subr.bf16.mxu1 %v17177_v19  ;;  %v17246_v29 = vld [vmem:[%s18179_s8 + $0x250c] ss:$16 sps:$4 sm:$0xff]   ;;  %v17244_v5 = vld [vmem:[%s18179_s8 + $0x2508] ss:$16 sps:$4 sm:$0xff]  }
 0x653   : > { %v17249_v14 = vld [vmem:[%s18179_s8 + $0x270c] ss:$16 sps:$4 sm:$0xff]   ;;  %v17247_v16 = vld [vmem:[%s18179_s8 + $0x2708] ss:$16 sps:$4 sm:$0xff]  }
 0x654   : > { %12123 = vmatpush1.bf16.msra.mxu0 %v17172_v17  ;;  %v17252_v58 = vld [vmem:[%s18179_s8 + $0x28ec] ss:$16 sps:$4 sm:$0xff]   ;;  %v17250_v17 = vld [vmem:[%s18179_s8 + $0x28e8] ss:$16 sps:$4 sm:$0xff]  }
 0x655   : > { %12164 = vmatpush1.bf16.msra.mxu1 %v17175_v20  ;;  %12124 = vmatprep.subr.bf16.mxu0 %v17180_v56  ;;  %v17255_v19 = vld [vmem:[%s18179_s8 + $0x2aec] ss:$16 sps:$4 sm:$0xff]   ;;  %v17253_v20 = vld [vmem:[%s18179_s8 + $0x2ae8] ss:$16 sps:$4 sm:$0xff]  }
 0x656   : > { %12165 = vmatprep.subr.bf16.mxu1 %v17183_v34  ;;  %v17258_v56 = vld [vmem:[%s18179_s8 + $0x28cc] ss:$16 sps:$4 sm:$0xff]  }
 0x657   : > { %v17261_v34 = vld [vmem:[%s18179_s8 + $0x2acc] ss:$16 sps:$4 sm:$0xff]  }
 0x658   : > { %12125 = vmatpush1.bf16.msra.mxu0 %v17178_v44 }
 0x659   : > { %12166 = vmatpush1.bf16.msra.mxu1 %v17181_v53  ;;  %12126 = vmatprep.subr.bf16.mxu0 %v17186_v60 }
 0x65a   : > { %12167 = vmatprep.subr.bf16.mxu1 %v17189_v42  ;;  %v17256_v42 = vld [vmem:[%s18179_s8 + $0x28c8] ss:$16 sps:$4 sm:$0xff]  }
 0x65c   : > { %12127 = vmatpush1.bf16.msra.mxu0 %v17184_v43  ;;  %v17259_v43 = vld [vmem:[%s18179_s8 + $0x2ac8] ss:$16 sps:$4 sm:$0xff]  }
 0x65d   : > { %12168 = vmatpush1.bf16.msra.mxu1 %v17187_v54  ;;  %12128 = vmatprep.subr.bf16.mxu0 %v17192_v49 }
 0x65e   : > { %12169 = vmatprep.subr.bf16.mxu1 %v17195_v13  ;;  %v17264_v13 = vld [vmem:[%s18179_s8 + $0x28ac] ss:$16 sps:$4 sm:$0xff]  }
 0x660   : > { %12129 = vmatpush1.bf16.msra.mxu0 %v17190_v21  ;;  %v17267_v21 = vld [vmem:[%s18179_s8 + $0x2aac] ss:$16 sps:$4 sm:$0xff]  }
 0x661   : > { %12170 = vmatpush1.bf16.msra.mxu1 %v17193_v4  ;;  %12130 = vmatprep.subr.bf16.mxu0 %v17198_v11 }
 0x662   : > { %12171 = vmatprep.subr.bf16.mxu1 %v17201_v52 }
 0x664   : > { %12131 = vmatpush1.bf16.msra.mxu0 %v17196_v33 }
 0x665   : > { %12172 = vmatpush1.bf16.msra.mxu1 %v17199_v36  ;;  %12132 = vmatprep.subr.bf16.mxu0 %v17204_v48  ;;  %v17262_v36 = vld [vmem:[%s18179_s8 + $0x28a8] ss:$16 sps:$4 sm:$0xff]  }
 0x666   : > { %12173 = vmatprep.subr.bf16.mxu1 %v17207_v62  ;;  %v17265_v48 = vld [vmem:[%s18179_s8 + $0x2aa8] ss:$16 sps:$4 sm:$0xff]  }
 0x668   : > { %12133 = vmatpush2.bf16.msra.mxu0 %v17202_v55 }
 0x669   : > { %12174 = vmatpush2.bf16.msra.mxu1 %v17205_v15  ;;  %12134 = vmatprep.subr.bf16.mxu0 %v17210_v57  ;;  %v17273_v15 = vld [vmem:[%s18179_s8 + $0x2a8c] ss:$16 sps:$4 sm:$0xff]   ;;  %v17268_v57 = vld [vmem:[%s18179_s8 + $0x2888] ss:$16 sps:$4 sm:$0xff]  }
 0x66a   : > { %12175 = vmatprep.subr.bf16.mxu1 %v17213_v46  ;;  %v17271_v46 = vld [vmem:[%s18179_s8 + $0x2a88] ss:$16 sps:$4 sm:$0xff]  }
 0x66c   : > { %12135 = vmatpush2.bf16.msra.mxu0 %v17208_v51  ;;  %v17276_v51 = vld [vmem:[%s18179_s8 + $0x286c] ss:$16 sps:$4 sm:$0xff]  }
 0x66d   : > { %12176 = vmatpush2.bf16.msra.mxu1 %v17211_v0  ;;  %12136 = vmatprep.subr.bf16.mxu0 %v17216_v63  ;;  %v17279_v0 = vld [vmem:[%s18179_s8 + $0x2a6c] ss:$16 sps:$4 sm:$0xff]   ;;  %v17274_v63 = vld [vmem:[%s18179_s8 + $0x2868] ss:$16 sps:$4 sm:$0xff]  }
 0x66e   : > { %12177 = vmatprep.subr.bf16.mxu1 %v17219_v50  ;;  %v17277_v50 = vld [vmem:[%s18179_s8 + $0x2a68] ss:$16 sps:$4 sm:$0xff]  }
 0x670   : > { %12137 = vmatpush2.bf16.msra.mxu0 %v17214_v25  ;;  %v17282_v25 = vld [vmem:[%s18179_s8 + $0x284c] ss:$16 sps:$4 sm:$0xff]  }
 0x671   : > { %12178 = vmatpush2.bf16.msra.mxu1 %v17217_v37  ;;  %12138 = vmatprep.subr.bf16.mxu0 %v17222_v32  ;;  %v17285_v37 = vld [vmem:[%s18179_s8 + $0x2a4c] ss:$16 sps:$4 sm:$0xff]   ;;  %v17280_v32 = vld [vmem:[%s18179_s8 + $0x2848] ss:$16 sps:$4 sm:$0xff]  }
 0x672   : > { %12179 = vmatprep.subr.bf16.mxu1 %v17225_v40  ;;  %v17283_v40 = vld [vmem:[%s18179_s8 + $0x2a48] ss:$16 sps:$4 sm:$0xff]  }
 0x674   : > { %12139 = vmatpush2.bf16.msra.mxu0 %v17220_v41  ;;  %v17288_v41 = vld [vmem:[%s18179_s8 + $0x282c] ss:$16 sps:$4 sm:$0xff]  }
 0x675   : > { %12180 = vmatpush2.bf16.msra.mxu1 %v17223_v6  ;;  %12140 = vmatprep.subr.bf16.mxu0 %v17228_v61  ;;  %v17291_v6 = vld [vmem:[%s18179_s8 + $0x2a2c] ss:$16 sps:$4 sm:$0xff]   ;;  %v17286_v61 = vld [vmem:[%s18179_s8 + $0x2828] ss:$16 sps:$4 sm:$0xff]  }
 0x676   : > { %12181 = vmatprep.subr.bf16.mxu1 %v17231_v59  ;;  %v17289_v59 = vld [vmem:[%s18179_s8 + $0x2a28] ss:$16 sps:$4 sm:$0xff]  }
 0x678   : > { %12141 = vmatpush2.bf16.msra.mxu0 %v17226_v18  ;;  %v17294_v18 = vld [vmem:[%s18179_s8 + $0x280c] ss:$16 sps:$4 sm:$0xff]  }
 0x679   : > { %12182 = vmatpush2.bf16.msra.mxu1 %v17229_v10  ;;  %12142 = vmatprep.subr.bf16.mxu0 %v17234_v39  ;;  %v17297_v10 = vld [vmem:[%s18179_s8 + $0x2a0c] ss:$16 sps:$4 sm:$0xff]   ;;  %v17292_v39 = vld [vmem:[%s18179_s8 + $0x2808] ss:$16 sps:$4 sm:$0xff]  }
 0x67a   : > { %12183 = vmatprep.subr.bf16.mxu1 %v17237_v45  ;;  %v17295_v45 = vld [vmem:[%s18179_s8 + $0x2a08] ss:$16 sps:$4 sm:$0xff]  }
 0x67c   : > { %12143 = vmatpush2.bf16.msra.mxu0 %v17232_v23  ;;  %v17300_v23 = vld [vmem:[%s18179_s8 + $0x29ec] ss:$16 sps:$4 sm:$0xff]  }
 0x67d   : > { %12184 = vmatpush2.bf16.msra.mxu1 %v17235_v24  ;;  %12144 = vmatprep.subr.bf16.mxu0 %v17240_v7  ;;  %v17303_v24 = vld [vmem:[%s18179_s8 + $0x2bec] ss:$16 sps:$4 sm:$0xff]   ;;  %v17298_v7 = vld [vmem:[%s18179_s8 + $0x29e8] ss:$16 sps:$4 sm:$0xff]  }
 0x67e   : > { %12185 = vmatprep.subr.bf16.mxu1 %v17243_v9  ;;  %v17301_v9 = vld [vmem:[%s18179_s8 + $0x2be8] ss:$16 sps:$4 sm:$0xff]  }
 0x680   : > { %12145 = vmatpush2.bf16.msra.mxu0 %v17238_v22  ;;  %v17306_v22 = vld [vmem:[%s18179_s8 + $0x29cc] ss:$16 sps:$4 sm:$0xff]  }
 0x681   : > { %12186 = vmatpush2.bf16.msra.mxu1 %v17241_v38  ;;  %12146 = vmatprep.subr.bf16.mxu0 %v17246_v29  ;;  %v17309_v38 = vld [vmem:[%s18179_s8 + $0x2bcc] ss:$16 sps:$4 sm:$0xff]   ;;  %v17304_v29 = vld [vmem:[%s18179_s8 + $0x29c8] ss:$16 sps:$4 sm:$0xff]  }
 0x682   : > { %12187 = vmatprep.subr.bf16.mxu1 %v17249_v14  ;;  %v17307_v14 = vld [vmem:[%s18179_s8 + $0x2bc8] ss:$16 sps:$4 sm:$0xff]  }
 0x684   : > { %12147 = vmatpush2.bf16.msra.mxu0 %v17244_v5  ;;  %v17312_v5 = vld [vmem:[%s18179_s8 + $0x29ac] ss:$16 sps:$4 sm:$0xff]  }
 0x685   : > { %12188 = vmatpush2.bf16.msra.mxu1 %v17247_v16  ;;  %12198 = vmatprep.subr.bf16.mxu0 %v17252_v58  ;;  %v17315_v16 = vld [vmem:[%s18179_s8 + $0x2bac] ss:$16 sps:$4 sm:$0xff]   ;;  %v17310_v58 = vld [vmem:[%s18179_s8 + $0x29a8] ss:$16 sps:$4 sm:$0xff]  }
 0x686   : > { %12239 = vmatprep.subr.bf16.mxu1 %v17255_v19  ;;  %v17313_v19 = vld [vmem:[%s18179_s8 + $0x2ba8] ss:$16 sps:$4 sm:$0xff]  }
 0x687   : > { %v11904_v44 = vpop.f32.mrf.mxu0  ;;  %12149 = vmatmul.mubr.bf16.vlgmr.msra.gmra.mxu0 %v19186_v28 }
 0x688   : > { %v11945_v53 = vpop.f32.mrf.mxu1  ;;  %12190 = vmatmul.mubr.bf16.vlgmr.msra.gmra.mxu1 %v19199_v3  ;;  %v11905_v60 = vadd.f32 %v11904_v44, %v20058_v1  ;;  %12199 = vmatpush1.bf16.msra.mxu0 %v17250_v17  ;;  %v20617_v3 = vld [vmem:[#allocation35_spill] sm:$0xff]  ;;  %v20618_v1 = vld [vmem:[#allocation36_spill] sm:$0xff] }
 0x689   : > { %12240 = vmatpush1.bf16.msra.mxu1 %v17253_v20  ;;  %v11906_v54 = vpop.f32.mrf.mxu0  ;;  %12200 = vmatprep.subr.bf16.mxu0 %v17258_v56  ;;  %v17318_v17 = vld [vmem:[%s18179_s8 + $0x298c] ss:$16 sps:$4 sm:$0xff]   ;;  %v17316_v56 = vld [vmem:[%s18179_s8 + $0x2988] ss:$16 sps:$4 sm:$0xff]  }
 0x68a   : > { %v11947_v49 = vpop.f32.mrf.mxu1  ;;  %12241 = vmatprep.subr.bf16.mxu1 %v17261_v34  ;;  %v20132_v4 = vadd.f32 %v11945_v53, %v11905_v60  ;;  %v11907_v28 = vadd.f32 %v11906_v54, %v20063_v27  ;;  %12230 = vmatprep.mubr.bf16.mxu0 %v20617_v3  ;;  %v17270_v27 = vld [vmem:[%s18179_s8 + $0x288c] ss:$16 sps:$4 sm:$0xff]   ;;  %v17319_v34 = vld [vmem:[%s18179_s8 + $0x2b88] ss:$16 sps:$4 sm:$0xff]  }
 0x68b   : > { %12271 = vmatprep.mubr.bf16.mxu1 %v20618_v1  ;;  %v11908_v11 = vpop.f32.mrf.mxu0  ;;  %v17321_v20 = vld [vmem:[%s18179_s8 + $0x2b8c] ss:$16 sps:$4 sm:$0xff]   ;;  %v17322_v60 = vld [vmem:[%s18179_s8 + $0x2968] ss:$16 sps:$4 sm:$0xff]  }
 0x68c   : > { %v11949_v52 = vpop.f32.mrf.mxu1  ;;  %v20137_v33 = vadd.f32 %v11947_v49, %v11907_v28  ;;  %12201 = vmatpush1.bf16.msra.mxu0 %v17256_v42  ;;  %v17324_v44 = vld [vmem:[%s18179_s8 + $0x296c] ss:$16 sps:$4 sm:$0xff]   ;;  %v17325_v42 = vld [vmem:[%s18179_s8 + $0x2b68] ss:$16 sps:$4 sm:$0xff]  }
 0x68d   : > { %12242 = vmatpush1.bf16.msra.mxu1 %v17259_v43  ;;  %v11909_v62 = vpop.f32.mrf.mxu0  ;;  %12202 = vmatprep.subr.bf16.mxu0 %v17264_v13  ;;  %v17327_v53 = vld [vmem:[%s18179_s8 + $0x2b6c] ss:$16 sps:$4 sm:$0xff]   ;;  %v17328_v49 = vld [vmem:[%s18179_s8 + $0x2948] ss:$16 sps:$4 sm:$0xff]  }
 0x68e   : > { %v11950_v55 = vpop.f32.mrf.mxu1  ;;  %12243 = vmatprep.subr.bf16.mxu1 %v17267_v21  ;;  %v17330_v43 = vld [vmem:[%s18179_s8 + $0x294c] ss:$16 sps:$4 sm:$0xff]   ;;  %v17331_v13 = vld [vmem:[%s18179_s8 + $0x2b48] ss:$16 sps:$4 sm:$0xff]  }
 0x68f   : > { %v17333_v54 = vld [vmem:[%s18179_s8 + $0x2b4c] ss:$16 sps:$4 sm:$0xff]   ;;  %v17334_v3 = vld [vmem:[%s18179_s8 + $0x2928] ss:$16 sps:$4 sm:$0xff]  }
 0x690   : > { %12203 = vmatpush1.bf16.msra.mxu0 %v17262_v36  ;;  %v17336_v21 = vld [vmem:[%s18179_s8 + $0x292c] ss:$16 sps:$4 sm:$0xff]   ;;  %v17337_v1 = vld [vmem:[%s18179_s8 + $0x2b28] ss:$16 sps:$4 sm:$0xff]  }
 0x691   : > { %12244 = vmatpush1.bf16.msra.mxu1 %v17265_v48  ;;  %12204 = vmatprep.subr.bf16.mxu0 %v17270_v27  ;;  %v17339_v28 = vld [vmem:[%s18179_s8 + $0x2b2c] ss:$16 sps:$4 sm:$0xff]   ;;  %v17340_v36 = vld [vmem:[%s18179_s8 + $0x2908] ss:$16 sps:$4 sm:$0xff]  }
 0x692   : > { %12245 = vmatprep.subr.bf16.mxu1 %v17273_v15  ;;  %v17342_v11 = vld [vmem:[%s18179_s8 + $0x290c] ss:$16 sps:$4 sm:$0xff]   ;;  %v17343_v48 = vld [vmem:[%s18179_s8 + $0x2b08] ss:$16 sps:$4 sm:$0xff]  }
 0x693   : > { %v17345_v52 = vld [vmem:[%s18179_s8 + $0x2b0c] ss:$16 sps:$4 sm:$0xff]   ;;  %v17346_v27 = vld [vmem:[%s18179_s8 + $0x2ce8] ss:$16 sps:$4 sm:$0xff]  }
 0x694   : > { %12205 = vmatpush1.bf16.msra.mxu0 %v17268_v57  ;;  %v17348_v62 = vld [vmem:[%s18179_s8 + $0x2cec] ss:$16 sps:$4 sm:$0xff]   ;;  %v17349_v15 = vld [vmem:[%s18179_s8 + $0x2ee8] ss:$16 sps:$4 sm:$0xff]  }
 0x695   : > { %12246 = vmatpush1.bf16.msra.mxu1 %v17271_v46  ;;  %12206 = vmatprep.subr.bf16.mxu0 %v17276_v51  ;;  %v17351_v55 = vld [vmem:[%s18179_s8 + $0x2eec] ss:$16 sps:$4 sm:$0xff]  }
 0x696   : > { %12247 = vmatprep.subr.bf16.mxu1 %v17279_v0  ;;  %v17354_v57 = vld [vmem:[%s18179_s8 + $0x2ccc] ss:$16 sps:$4 sm:$0xff]  }
 0x697   : > { %v17357_v46 = vld [vmem:[%s18179_s8 + $0x2ecc] ss:$16 sps:$4 sm:$0xff]  }
 0x698   : > { %12207 = vmatpush1.bf16.msra.mxu0 %v17274_v63  ;;  %v20619_v63 = vld [vmem:[#allocation37_spill] sm:$0xff] }
 0x699   : > { %12248 = vmatpush1.bf16.msra.mxu1 %v17277_v50  ;;  %12208 = vmatprep.subr.bf16.mxu0 %v17282_v25  ;;  %v17352_v25 = vld [vmem:[%s18179_s8 + $0x2cc8] ss:$16 sps:$4 sm:$0xff]  }
 0x69a   : > { %12249 = vmatprep.subr.bf16.mxu1 %v17285_v37  ;;  %v17355_v37 = vld [vmem:[%s18179_s8 + $0x2ec8] ss:$16 sps:$4 sm:$0xff]  }
 0x69c   : > { %12209 = vmatpush1.bf16.msra.mxu0 %v17280_v32 }
 0x69d   : > { %12250 = vmatpush1.bf16.msra.mxu1 %v17283_v40  ;;  %12210 = vmatprep.subr.bf16.mxu0 %v17288_v41  ;;  %v17360_v41 = vld [vmem:[%s18179_s8 + $0x2cac] ss:$16 sps:$4 sm:$0xff]  }
 0x69e   : > { %12251 = vmatprep.subr.bf16.mxu1 %v17291_v6  ;;  %v17363_v6 = vld [vmem:[%s18179_s8 + $0x2eac] ss:$16 sps:$4 sm:$0xff]  }
 0x6a0   : > { %12211 = vmatpush1.bf16.msra.mxu0 %v17286_v61 }
 0x6a1   : > { %12252 = vmatpush1.bf16.msra.mxu1 %v17289_v59  ;;  %12212 = vmatprep.subr.bf16.mxu0 %v17294_v18 }
 0x6a2   : > { %12253 = vmatprep.subr.bf16.mxu1 %v17297_v10  ;;  %v17358_v10 = vld [vmem:[%s18179_s8 + $0x2ca8] ss:$16 sps:$4 sm:$0xff]  }
 0x6a4   : > { %12213 = vmatpush1.bf16.msra.mxu0 %v17292_v39  ;;  %v17361_v39 = vld [vmem:[%s18179_s8 + $0x2ea8] ss:$16 sps:$4 sm:$0xff]  }
 0x6a5   : > { %12254 = vmatpush1.bf16.msra.mxu1 %v17295_v45  ;;  %12214 = vmatprep.subr.bf16.mxu0 %v17300_v23 }
 0x6a6   : > { %12255 = vmatprep.subr.bf16.mxu1 %v17303_v24  ;;  %v17367_v24 = vld [vmem:[%s18179_s8 + $0x2e88] ss:$16 sps:$4 sm:$0xff]  }
 0x6a8   : > { %12215 = vmatpush2.bf16.msra.mxu0 %v17298_v7  ;;  %v17372_v7 = vld [vmem:[%s18179_s8 + $0x2c6c] ss:$16 sps:$4 sm:$0xff]  }
 0x6a9   : > { %12256 = vmatpush2.bf16.msra.mxu1 %v17301_v9  ;;  %12216 = vmatprep.subr.bf16.mxu0 %v17306_v22  ;;  %v17375_v9 = vld [vmem:[%s18179_s8 + $0x2e6c] ss:$16 sps:$4 sm:$0xff]   ;;  %v17370_v22 = vld [vmem:[%s18179_s8 + $0x2c68] ss:$16 sps:$4 sm:$0xff]  }
 0x6aa   : > { %12257 = vmatprep.subr.bf16.mxu1 %v17309_v38  ;;  %v17373_v38 = vld [vmem:[%s18179_s8 + $0x2e68] ss:$16 sps:$4 sm:$0xff]  }
 0x6ac   : > { %12217 = vmatpush2.bf16.msra.mxu0 %v17304_v29  ;;  %v17378_v29 = vld [vmem:[%s18179_s8 + $0x2c4c] ss:$16 sps:$4 sm:$0xff]  }
 0x6ad   : > { %12258 = vmatpush2.bf16.msra.mxu1 %v17307_v14  ;;  %12218 = vmatprep.subr.bf16.mxu0 %v17312_v5  ;;  %v17381_v14 = vld [vmem:[%s18179_s8 + $0x2e4c] ss:$16 sps:$4 sm:$0xff]   ;;  %v17376_v5 = vld [vmem:[%s18179_s8 + $0x2c48] ss:$16 sps:$4 sm:$0xff]  }
 0x6ae   : > { %12259 = vmatprep.subr.bf16.mxu1 %v17315_v16  ;;  %v17379_v16 = vld [vmem:[%s18179_s8 + $0x2e48] ss:$16 sps:$4 sm:$0xff]  }
 0x6b0   : > { %12219 = vmatpush2.bf16.msra.mxu0 %v17310_v58  ;;  %v17384_v58 = vld [vmem:[%s18179_s8 + $0x2c2c] ss:$16 sps:$4 sm:$0xff]  }
 0x6b1   : > { %12260 = vmatpush2.bf16.msra.mxu1 %v17313_v19  ;;  %12220 = vmatprep.subr.bf16.mxu0 %v17318_v17  ;;  %v17387_v19 = vld [vmem:[%s18179_s8 + $0x2e2c] ss:$16 sps:$4 sm:$0xff]   ;;  %v17382_v17 = vld [vmem:[%s18179_s8 + $0x2c28] ss:$16 sps:$4 sm:$0xff]  }
 0x6b2   : > { %12261 = vmatprep.subr.bf16.mxu1 %v17321_v20  ;;  %v17385_v20 = vld [vmem:[%s18179_s8 + $0x2e28] ss:$16 sps:$4 sm:$0xff]  }
 0x6b4   : > { %12221 = vmatpush2.bf16.msra.mxu0 %v17316_v56  ;;  %v17390_v56 = vld [vmem:[%s18179_s8 + $0x2c0c] ss:$16 sps:$4 sm:$0xff]  }
 0x6b5   : > { %12262 = vmatpush2.bf16.msra.mxu1 %v17319_v34  ;;  %12222 = vmatprep.subr.bf16.mxu0 %v17324_v44  ;;  %v17393_v34 = vld [vmem:[%s18179_s8 + $0x2e0c] ss:$16 sps:$4 sm:$0xff]   ;;  %v17388_v44 = vld [vmem:[%s18179_s8 + $0x2c08] ss:$16 sps:$4 sm:$0xff]  }
 0x6b6   : > { %12263 = vmatprep.subr.bf16.mxu1 %v17327_v53  ;;  %v17391_v53 = vld [vmem:[%s18179_s8 + $0x2e08] ss:$16 sps:$4 sm:$0xff]  }
 0x6b8   : > { %12223 = vmatpush2.bf16.msra.mxu0 %v17322_v60  ;;  %v17396_v60 = vld [vmem:[%s18179_s8 + $0x2dec] ss:$16 sps:$4 sm:$0xff]  }
 0x6b9   : > { %12264 = vmatpush2.bf16.msra.mxu1 %v17325_v42  ;;  %12224 = vmatprep.subr.bf16.mxu0 %v17330_v43  ;;  %v17399_v42 = vld [vmem:[%s18179_s8 + $0x2fec] ss:$16 sps:$4 sm:$0xff]   ;;  %v17394_v43 = vld [vmem:[%s18179_s8 + $0x2de8] ss:$16 sps:$4 sm:$0xff]  }
 0x6ba   : > { %12265 = vmatprep.subr.bf16.mxu1 %v17333_v54  ;;  %v17397_v54 = vld [vmem:[%s18179_s8 + $0x2fe8] ss:$16 sps:$4 sm:$0xff]  }
 0x6bc   : > { %12225 = vmatpush2.bf16.msra.mxu0 %v17328_v49  ;;  %v17402_v49 = vld [vmem:[%s18179_s8 + $0x2dcc] ss:$16 sps:$4 sm:$0xff]  }
 0x6bd   : > { %12266 = vmatpush2.bf16.msra.mxu1 %v17331_v13  ;;  %12226 = vmatprep.subr.bf16.mxu0 %v17336_v21  ;;  %v17405_v13 = vld [vmem:[%s18179_s8 + $0x2fcc] ss:$16 sps:$4 sm:$0xff]   ;;  %v17400_v21 = vld [vmem:[%s18179_s8 + $0x2dc8] ss:$16 sps:$4 sm:$0xff]  }
 0x6be   : > { %12267 = vmatprep.subr.bf16.mxu1 %v17339_v28  ;;  %v17403_v28 = vld [vmem:[%s18179_s8 + $0x2fc8] ss:$16 sps:$4 sm:$0xff]  }
 0x6c0   : > { %12227 = vmatpush2.bf16.msra.mxu0 %v17334_v3  ;;  %v17408_v3 = vld [vmem:[%s18179_s8 + $0x2dac] ss:$16 sps:$4 sm:$0xff]  }
 0x6c1   : > { %12268 = vmatpush2.bf16.msra.mxu1 %v17337_v1  ;;  %12228 = vmatprep.subr.bf16.mxu0 %v17342_v11  ;;  %v17411_v1 = vld [vmem:[%s18179_s8 + $0x2fac] ss:$16 sps:$4 sm:$0xff]   ;;  %v17406_v11 = vld [vmem:[%s18179_s8 + $0x2da8] ss:$16 sps:$4 sm:$0xff]  }
 0x6c2   : > { %12269 = vmatprep.subr.bf16.mxu1 %v17345_v52  ;;  %v17409_v52 = vld [vmem:[%s18179_s8 + $0x2fa8] ss:$16 sps:$4 sm:$0xff]  }
 0x6c4   : > { %12229 = vmatpush2.bf16.msra.mxu0 %v17340_v36  ;;  %v17414_v36 = vld [vmem:[%s18179_s8 + $0x2d8c] ss:$16 sps:$4 sm:$0xff]  }
 0x6c5   : > { %12270 = vmatpush2.bf16.msra.mxu1 %v17343_v48  ;;  %12280 = vmatprep.subr.bf16.mxu0 %v17348_v62  ;;  %v17417_v48 = vld [vmem:[%s18179_s8 + $0x2f8c] ss:$16 sps:$4 sm:$0xff]   ;;  %v17412_v62 = vld [vmem:[%s18179_s8 + $0x2d88] ss:$16 sps:$4 sm:$0xff]  }
 0x6c6   : > { %12321 = vmatprep.subr.bf16.mxu1 %v17351_v55  ;;  %v17415_v55 = vld [vmem:[%s18179_s8 + $0x2f88] ss:$16 sps:$4 sm:$0xff]  }
 0x6c7   : > { %v11986_v51 = vpop.f32.mrf.mxu0  ;;  %12231 = vmatmul.mubr.bf16.vlgmr.msra.gmra.mxu0 %v20619_v63  ;;  %v17424_v63 = vld [vmem:[%s18179_s8 + $0x2d48] ss:$16 sps:$4 sm:$0xff]  }
 0x6c8   : > { %v12027_v0 = vpop.f32.mrf.mxu1  ;;  %12272 = vmatmul.mubr.bf16.vlgmr.msra.gmra.mxu1 %v19295_v8  ;;  %v11987_v50 = vadd.f32 %v11986_v51, %v20132_v4  ;;  %12281 = vmatpush1.bf16.msra.mxu0 %v17346_v27  ;;  %v17420_v27 = vld [vmem:[%s18179_s8 + $0x2d6c] ss:$16 sps:$4 sm:$0xff]  }
 0x6c9   : > { %12322 = vmatpush1.bf16.msra.mxu1 %v17349_v15  ;;  %v11988_v32 = vpop.f32.mrf.mxu0  ;;  %12282 = vmatprep.subr.bf16.mxu0 %v17354_v57  ;;  %v17423_v15 = vld [vmem:[%s18179_s8 + $0x2f6c] ss:$16 sps:$4 sm:$0xff]   ;;  %v17418_v57 = vld [vmem:[%s18179_s8 + $0x2d68] ss:$16 sps:$4 sm:$0xff]  }
 0x6ca   : > { %v12029_v40 = vpop.f32.mrf.mxu1  ;;  %12323 = vmatprep.subr.bf16.mxu1 %v17357_v46  ;;  %v20206_v61 = vadd.f32 %v12027_v0, %v11987_v50  ;;  %v11989_v8 = vadd.f32 %v11988_v32, %v20137_v33  ;;  %12312 = vmatprep.mubr.bf16.mxu0 %v19291_v30  ;;  %v17366_v30 = vld [vmem:[%s18179_s8 + $0x2c8c] ss:$16 sps:$4 sm:$0xff]   ;;  %v17364_v33 = vld [vmem:[%s18179_s8 + $0x2c88] ss:$16 sps:$4 sm:$0xff]  }
 0x6cb   : > { %12353 = vmatprep.mubr.bf16.mxu1 %v19303_v31  ;;  %v11990_v4 = vpop.f32.mrf.mxu0  ;;  %v17369_v31 = vld [vmem:[%s18179_s8 + $0x2e8c] ss:$16 sps:$4 sm:$0xff]   ;;  %v17421_v46 = vld [vmem:[%s18179_s8 + $0x2f68] ss:$16 sps:$4 sm:$0xff]  }
 0x6cc   : > { %v12031_v59 = vpop.f32.mrf.mxu1  ;;  %v20211_v18 = vadd.f32 %v12029_v40, %v11989_v8  ;;  %12283 = vmatpush1.bf16.msra.mxu0 %v17352_v25  ;;  %v17426_v51 = vld [vmem:[%s18179_s8 + $0x2d4c] ss:$16 sps:$4 sm:$0xff]   ;;  %v17427_v50 = vld [vmem:[%s18179_s8 + $0x2f48] ss:$16 sps:$4 sm:$0xff]  }
 0x6cd   : > { %12324 = vmatpush1.bf16.msra.mxu1 %v17355_v37  ;;  %v11991_v45 = vpop.f32.mrf.mxu0  ;;  %12284 = vmatprep.subr.bf16.mxu0 %v17360_v41  ;;  %v17429_v0 = vld [vmem:[%s18179_s8 + $0x2f4c] ss:$16 sps:$4 sm:$0xff]   ;;  %v17430_v32 = vld [vmem:[%s18179_s8 + $0x2d28] ss:$16 sps:$4 sm:$0xff]  }
 0x6ce   : > { %v12032_v23 = vpop.f32.mrf.mxu1  ;;  %12325 = vmatprep.subr.bf16.mxu1 %v17363_v6  ;;  %v17432_v25 = vld [vmem:[%s18179_s8 + $0x2d2c] ss:$16 sps:$4 sm:$0xff]   ;;  %v17433_v40 = vld [vmem:[%s18179_s8 + $0x2f28] ss:$16 sps:$4 sm:$0xff]  }
 0x6cf   : > { %v17435_v37 = vld [vmem:[%s18179_s8 + $0x2f2c] ss:$16 sps:$4 sm:$0xff]   ;;  %v17436_v8 = vld [vmem:[%s18179_s8 + $0x2d08] ss:$16 sps:$4 sm:$0xff]  }
 0x6d0   : > { %12285 = vmatpush1.bf16.msra.mxu0 %v17358_v10  ;;  %v17438_v41 = vld [vmem:[%s18179_s8 + $0x2d0c] ss:$16 sps:$4 sm:$0xff]   ;;  %v17439_v4 = vld [vmem:[%s18179_s8 + $0x2f08] ss:$16 sps:$4 sm:$0xff]  }
 0x6d1   : > { %12326 = vmatpush1.bf16.msra.mxu1 %v17361_v39  ;;  %12286 = vmatprep.subr.bf16.mxu0 %v17366_v30  ;;  %v17441_v6 = vld [vmem:[%s18179_s8 + $0x2f0c] ss:$16 sps:$4 sm:$0xff]   ;;  %s20621_s8 = sld [smem:[#allocation27_spill]] }
 0x6d2   : > { %12327 = vmatprep.subr.bf16.mxu1 %v17369_v31 }
 0x6d4   : > { %12287 = vmatpush1.bf16.msra.mxu0 %v17364_v33 }
 0x6d5   : > { %12328 = vmatpush1.bf16.msra.mxu1 %v17367_v24  ;;  %12288 = vmatprep.subr.bf16.mxu0 %v17372_v7 }
 0x6d6   : > { %12329 = vmatprep.subr.bf16.mxu1 %v17375_v9 }
 0x6d7   : > { %p14851_p9 = scmp.ne.s32.totalorder %s20621_s8, 1 }
 0x6d8   : > { %12289 = vmatpush1.bf16.msra.mxu0 %v17370_v22 }
 0x6d9   : > { %12330 = vmatpush1.bf16.msra.mxu1 %v17373_v38  ;;  %12290 = vmatprep.subr.bf16.mxu0 %v17378_v29 }
 0x6da   : > { %12331 = vmatprep.subr.bf16.mxu1 %v17381_v14 }
 0x6dc   : > { %12291 = vmatpush1.bf16.msra.mxu0 %v17376_v5 }
 0x6dd   : > { %12332 = vmatpush1.bf16.msra.mxu1 %v17379_v16  ;;  %12292 = vmatprep.subr.bf16.mxu0 %v17384_v58 }
 0x6de   : > { %12333 = vmatprep.subr.bf16.mxu1 %v17387_v19 }
 0x6e0   : > { %12293 = vmatpush1.bf16.msra.mxu0 %v17382_v17 }
 0x6e1   : > { %12334 = vmatpush1.bf16.msra.mxu1 %v17385_v20  ;;  %12294 = vmatprep.subr.bf16.mxu0 %v17390_v56 }
 0x6e2   : > { %12335 = vmatprep.subr.bf16.mxu1 %v17393_v34 }
 0x6e4   : > { %12295 = vmatpush1.bf16.msra.mxu0 %v17388_v44 }
 0x6e5   : > { %12336 = vmatpush1.bf16.msra.mxu1 %v17391_v53  ;;  %12296 = vmatprep.subr.bf16.mxu0 %v17396_v60 }
 0x6e6   : > { %12337 = vmatprep.subr.bf16.mxu1 %v17399_v42 }
 0x6e8   : > { %12297 = vmatpush2.bf16.msra.mxu0 %v17394_v43 }
 0x6e9   : > { %12338 = vmatpush2.bf16.msra.mxu1 %v17397_v54  ;;  %12298 = vmatprep.subr.bf16.mxu0 %v17402_v49 }
 0x6ea   : > { %12339 = vmatprep.subr.bf16.mxu1 %v17405_v13  ;;  %v17850_v13 = vmov 1983009808  }
 0x6ec   : > { %12299 = vmatpush2.bf16.msra.mxu0 %v17400_v21  ;;  %v12369_v21 = vunpack.c.l.s4 %v17850_v13 }
 0x6ed   : > { %12340 = vmatpush2.bf16.msra.mxu1 %v17403_v28  ;;  %12300 = vmatprep.subr.bf16.mxu0 %v17408_v3 }
 0x6ee   : > { %12341 = vmatprep.subr.bf16.mxu1 %v17411_v1 }
 0x6f0   : > { %12301 = vmatpush2.bf16.msra.mxu0 %v17406_v11  ;;  %v12370_v11 = vunpack.c.0.s8 %v12369_v21 }
 0x6f1   : > { %12342 = vmatpush2.bf16.msra.mxu1 %v17409_v52  ;;  %12302 = vmatprep.subr.bf16.mxu0 %v17414_v36 }
 0x6f2   : > { %12343 = vmatprep.subr.bf16.mxu1 %v17417_v48 }
 0x6f4   : > { %12303 = vmatpush2.bf16.msra.mxu0 %v17412_v62 }
 0x6f5   : > { %12344 = vmatpush2.bf16.msra.mxu1 %v17415_v55  ;;  %12304 = vmatprep.subr.bf16.mxu0 %v17420_v27 }
 0x6f6   : > { %12345 = vmatprep.subr.bf16.mxu1 %v17423_v15 }
 0x6f8   : > { %12305 = vmatpush2.bf16.msra.mxu0 %v17418_v57  ;;  %v20620_v57 = vld [vmem:[#allocation34_spill] sm:$0xff] }
 0x6f9   : > { %12346 = vmatpush2.bf16.msra.mxu1 %v17421_v46  ;;  %12306 = vmatprep.subr.bf16.mxu0 %v17426_v51  ;;  %v20272_v46 = vsub.s32 %v12370_v11, %v20620_v57 }
 0x6fa   : > { %12347 = vmatprep.subr.bf16.mxu1 %v17429_v0 }
 0x6fc   : > { %12307 = vmatpush2.bf16.msra.mxu0 %v17424_v63 }
 0x6fd   : > { %12348 = vmatpush2.bf16.msra.mxu1 %v17427_v50  ;;  %12308 = vmatprep.subr.bf16.mxu0 %v17432_v25 }
 0x6fe   : > { %12349 = vmatprep.subr.bf16.mxu1 %v17435_v37  ;;  %v12374_v37 = vrot.slane %v12366_v2, %v20272_v46 }
 0x700   : > { %12309 = vmatpush2.bf16.msra.mxu0 %v17430_v32 }
 0x701   : > { %12350 = vmatpush2.bf16.msra.mxu1 %v17433_v40  ;;  %12310 = vmatprep.subr.bf16.mxu0 %v17438_v41  ;;  %v823_v40 = vld [vmem:[#allocation2] sm:$0xff] }
 0x702   : > { %12351 = vmatprep.subr.bf16.mxu1 %v17441_v6 }
 0x704   : > { %12311 = vmatpush2.bf16.msra.mxu0 %v17436_v8 }
 0x705   : > { %12352 = vmatpush2.bf16.msra.mxu1 %v17439_v4 }
 0x707   : > { %v12068_v59 = vpop.f32.mrf.mxu0  ;;  %12313 = vmatmul.mubr.bf16.vlgmr.msra.gmra.mxu0 %v19371_v35 }
 0x708   : > { %v12109_v10 = vpop.f32.mrf.mxu1  ;;  %12354 = vmatmul.mubr.bf16.vlgmr.msra.gmra.mxu1 %v19381_v47  ;;  %v12069_v39 = vadd.f32 %v12068_v59, %v20206_v61 }
 0x709   : > { %v12070_v45 = vpop.f32.mrf.mxu0 }
 0x70a   : > { %v12111_v23 = vpop.f32.mrf.mxu1  ;;  %v12110_v30 = vadd.f32 %v12109_v10, %v12069_v39  ;;  %v12071_v31 = vadd.f32 %v12070_v45, %v20211_v18 }
 0x70b   : > { %v12072_v33 = vpop.f32.mrf.mxu0 }
 0x70c   : > { %v12113_v24 = vpop.f32.mrf.mxu1  ;;  %v12112_v7 = vadd.f32 %v12111_v23, %v12071_v31 }
 0x70d   : > { %v12073_v9 = vpop.f32.mrf.mxu0 }
 0x70e   : > { %v12114_v22 = vpop.f32.mrf.mxu1 }
 0x747   : > { %v12150_v38 = vpop.f32.mrf.mxu0 }
 0x748   : > { %v12191_v29 = vpop.f32.mrf.mxu1  ;;  %v12151_v14 = vadd.f32 %v12150_v38, %v12110_v30 }
 0x749   : > { %v12152_v5 = vpop.f32.mrf.mxu0 }
 0x74a   : > { %v12193_v16 = vpop.f32.mrf.mxu1  ;;  %v12192_v35 = vadd.f32 %v12191_v29, %v12151_v14  ;;  %v12153_v58 = vadd.f32 %v12152_v5, %v12112_v7 }
 0x74b   : > { %v12154_v47 = vpop.f32.mrf.mxu0 }
 0x74c   : > { %v12195_v19 = vpop.f32.mrf.mxu1  ;;  %v12194_v61 = vadd.f32 %v12193_v16, %v12153_v58 }
 0x74d   : > { %v12155_v17 = vpop.f32.mrf.mxu0 }
 0x74e   : > { %v12196_v20 = vpop.f32.mrf.mxu1 }
 0x787   : > { %v12232_v56 = vpop.f32.mrf.mxu0 }
 0x788   : > { %v12273_v34 = vpop.f32.mrf.mxu1  ;;  %v12233_v18 = vadd.f32 %v12232_v56, %v12192_v35 }
 0x789   : > { %v12234_v44 = vpop.f32.mrf.mxu0 }
 0x78a   : > { %v12275_v53 = vpop.f32.mrf.mxu1  ;;  %v12274_v60 = vadd.f32 %v12273_v34, %v12233_v18  ;;  %v12235_v28 = vadd.f32 %v12234_v44, %v12194_v61 }
 0x78b   : > { %v12236_v42 = vpop.f32.mrf.mxu0 }
 0x78c   : > { %v12277_v43 = vpop.f32.mrf.mxu1  ;;  %v12276_v52 = vadd.f32 %v12275_v53, %v12235_v28 }
 0x78d   : > { %v12237_v54 = vpop.f32.mrf.mxu0 }
 0x78e   : > { %v12278_v49 = vpop.f32.mrf.mxu1 }
 0x7c7   : > { %v12314_v3 = vpop.f32.mrf.mxu0 }
 0x7c8   : > { %v12355_v1 = vpop.f32.mrf.mxu1  ;;  %v12315_v36 = vadd.f32 %v12314_v3, %v12274_v60 }
 0x7c9   : > { %v12316_v48 = vpop.f32.mrf.mxu0 }
 0x7ca   : > { %v12357_v62 = vpop.f32.mrf.mxu1  ;;  %v12317_v55 = vadd.f32 %v12316_v48, %v12276_v52  ;;  %v12356_v51 = vadd.f32 %v12355_v1, %v12315_v36 }
 0x7cb   : > { %v12318_v27 = vpop.f32.mrf.mxu0 }
 0x7cc   : > { %v12359_v15 = vpop.f32.mrf.mxu1  ;;  %v12358_v0 = vadd.f32 %v12357_v62, %v12317_v55 }
 0x7cd   : > { %v12319_v63 = vpop.f32.mrf.mxu0 }
 0x7ce   : > { %v12360_v50 = vpop.f32.mrf.mxu1  ;;  %v12367_v25 = vcombine.low %v12356_v51, %v12358_v0 }
 0x7d0   : > { %v12381_v32 = vrot.slane %v12367_v25, %v20272_v46 }
 0x7d2   : > { %v12382_v41 = vcombine.low %v12374_v37, %v12381_v32  ;;  %12389 = sbr.rel (%p14851_p9) target bundleno = 2872 (0xb38), region = 112 }
 0x7d4   : > { %v12384_v6 = vadd.f32 %v12382_v41, %v823_v40 }
 0x7d6   : > { %12385 = vst [vmem:[#allocation2] sm:$0xff] %v12384_v6 }
 0x7d7   : > { %v12425_v26 = vld [vmem:[%s18199_s2 + $0xf8] sm:$0xff]  ;;  %v12424_v2 = vld [vmem:[%s18199_s2 + $0xf0] sm:$0xff]  ;;  %v12423_v4 = vld [vmem:[%s18199_s2 + $0xe8] sm:$0xff]  ;;  %vm17852_vm3 = vmmov 0   ;;  %vm12927_vm6 = vcmask 523264  }
 0x7d8   : > { %v12489_v12 = vld [vmem:[%s18199_s2 + $0x2f8] sm:$0xff]  ;;  %12556 = vmatprep.subr.mxu0 %v12425_v26  ;;  %v12488_v8 = vld [vmem:[%s18199_s2 + $0x2f0] sm:$0xff]  ;;  %v12487_v59 = vld [vmem:[%s18199_s2 + $0x2e8] sm:$0xff] }
 0x7d9   : > { %12627 = vmatprep.subr.mxu1 %v12489_v12  ;;  %12557 = vmatpush1.msra.mxu0 %v12424_v2  ;;  %v12422_v10 = vld [vmem:[%s18199_s2 + $0xe0] sm:$0xff]  ;;  %v12421_v45 = vld [vmem:[%s18199_s2 + $0xd8] sm:$0xff]  ;;  %v12420_v30 = vld [vmem:[%s18199_s2 + $0xd0] sm:$0xff] }
 0x7da   : > { %12628 = vmatpush1.msra.mxu1 %v12488_v8  ;;  %v12486_v39 = vld [vmem:[%s18199_s2 + $0x2e0] sm:$0xff]  ;;  %12558 = vmatprep.subr.mxu0 %v12423_v4  ;;  %v12485_v23 = vld [vmem:[%s18199_s2 + $0x2d8] sm:$0xff]  ;;  %v12484_v31 = vld [vmem:[%s18199_s2 + $0x2d0] sm:$0xff] }
 0x7db   : > { %12629 = vmatprep.subr.mxu1 %v12487_v59  ;;  %12559 = vmatpush1.msra.mxu0 %v12422_v10  ;;  %v12419_v33 = vld [vmem:[%s18199_s2 + $0xc8] sm:$0xff]  ;;  %v12418_v7 = vld [vmem:[%s18199_s2 + $0xc0] sm:$0xff]  ;;  %v12417_v22 = vld [vmem:[%s18199_s2 + $0xb8] sm:$0xff] }
 0x7dc   : > { %12630 = vmatpush1.msra.mxu1 %v12486_v39  ;;  %v12483_v24 = vld [vmem:[%s18199_s2 + $0x2c8] sm:$0xff]  ;;  %12560 = vmatprep.subr.mxu0 %v12421_v45  ;;  %v12482_v9 = vld [vmem:[%s18199_s2 + $0x2c0] sm:$0xff]  ;;  %v12481_v38 = vld [vmem:[%s18199_s2 + $0x2b8] sm:$0xff] }
 0x7dd   : > { %12631 = vmatprep.subr.mxu1 %v12485_v23  ;;  %12561 = vmatpush1.msra.mxu0 %v12420_v30  ;;  %v12416_v29 = vld [vmem:[%s18199_s2 + $0xb0] sm:$0xff]  ;;  %v12415_v5 = vld [vmem:[%s18199_s2 + $0xa8] sm:$0xff]  ;;  %v12414_v35 = vld [vmem:[%s18199_s2 + $0xa0] sm:$0xff] }
 0x7de   : > { %12632 = vmatpush1.msra.mxu1 %v12484_v31  ;;  %12562 = vmatprep.subr.mxu0 %v12419_v33  ;;  %v12480_v14 = vld [vmem:[%s18199_s2 + $0x2b0] sm:$0xff]  ;;  %v12479_v16 = vld [vmem:[%s18199_s2 + $0x2a8] sm:$0xff]  ;;  %v12478_v58 = vld [vmem:[%s18199_s2 + $0x2a0] sm:$0xff] }
 0x7df   : > { %12633 = vmatprep.subr.mxu1 %v12483_v24  ;;  %12563 = vmatpush1.msra.mxu0 %v12418_v7  ;;  %v12413_v47 = vld [vmem:[%s18199_s2 + $0x98] sm:$0xff]  ;;  %v12412_v61 = vld [vmem:[%s18199_s2 + $0x90] sm:$0xff]  ;;  %v12411_v20 = vld [vmem:[%s18199_s2 + $0x88] sm:$0xff] }
 0x7e0   : > { %12634 = vmatpush1.msra.mxu1 %v12482_v9  ;;  %12564 = vmatprep.subr.mxu0 %v12417_v22  ;;  %v12477_v19 = vld [vmem:[%s18199_s2 + $0x298] sm:$0xff]  ;;  %v12476_v17 = vld [vmem:[%s18199_s2 + $0x290] sm:$0xff]  ;;  %v12475_v56 = vld [vmem:[%s18199_s2 + $0x288] sm:$0xff] }
 0x7e1   : > { %12635 = vmatprep.subr.mxu1 %v12481_v38  ;;  %12565 = vmatpush1.msra.mxu0 %v12416_v29  ;;  %v12410_v34 = vld [vmem:[%s18199_s2 + $0x80] sm:$0xff]  ;;  %v12409_v44 = vld [vmem:[%s18199_s2 + $0x78] sm:$0xff]  ;;  %v12408_v60 = vld [vmem:[%s18199_s2 + $0x70] sm:$0xff] }
 0x7e2   : > { %12636 = vmatpush1.msra.mxu1 %v12480_v14  ;;  %12566 = vmatprep.subr.mxu0 %v12415_v5  ;;  %v12474_v18 = vld [vmem:[%s18199_s2 + $0x280] sm:$0xff]  ;;  %v12473_v53 = vld [vmem:[%s18199_s2 + $0x278] sm:$0xff]  ;;  %v12472_v42 = vld [vmem:[%s18199_s2 + $0x270] sm:$0xff] }
 0x7e3   : > { %12637 = vmatprep.subr.mxu1 %v12479_v16  ;;  %12567 = vmatpush1.msra.mxu0 %v12414_v35  ;;  %v12407_v43 = vld [vmem:[%s18199_s2 + $0x68] sm:$0xff]  ;;  %v12406_v49 = vld [vmem:[%s18199_s2 + $0x60] sm:$0xff]  ;;  %v12405_v21 = vld [vmem:[%s18199_s2 + $0x58] sm:$0xff] }
 0x7e4   : > { %12638 = vmatpush1.msra.mxu1 %v12478_v58  ;;  %12568 = vmatprep.subr.mxu0 %v12413_v47  ;;  %v12471_v54 = vld [vmem:[%s18199_s2 + $0x268] sm:$0xff]  ;;  %v12470_v13 = vld [vmem:[%s18199_s2 + $0x260] sm:$0xff]  ;;  %v12469_v28 = vld [vmem:[%s18199_s2 + $0x258] sm:$0xff] }
 0x7e5   : > { %12639 = vmatprep.subr.mxu1 %v12477_v19  ;;  %12569 = vmatpush1.msra.mxu0 %v12412_v61  ;;  %v12404_v3 = vld [vmem:[%s18199_s2 + $0x50] sm:$0xff]  ;;  %v12403_v11 = vld [vmem:[%s18199_s2 + $0x48] sm:$0xff]  ;;  %v12402_v36 = vld [vmem:[%s18199_s2 + $0x40] sm:$0xff] }
 0x7e6   : > { %12640 = vmatpush1.msra.mxu1 %v12476_v17  ;;  %12570 = vmatprep.subr.mxu0 %v12411_v20  ;;  %v12468_v1 = vld [vmem:[%s18199_s2 + $0x250] sm:$0xff]  ;;  %v12467_v52 = vld [vmem:[%s18199_s2 + $0x248] sm:$0xff]  ;;  %v12466_v48 = vld [vmem:[%s18199_s2 + $0x240] sm:$0xff] }
 0x7e7   : > { %12641 = vmatprep.subr.mxu1 %v12475_v56  ;;  %12571 = vmatpush1.msra.mxu0 %v12410_v34  ;;  %v12401_v62 = vld [vmem:[%s18199_s2 + $0x38] sm:$0xff]  ;;  %v12400_v27 = vld [vmem:[%s18199_s2 + $0x30] sm:$0xff]  ;;  %v12399_v57 = vld [vmem:[%s18199_s2 + $0x28] sm:$0xff] }
 0x7e8   : > { %12642 = vmatpush1.msra.mxu1 %v12474_v18  ;;  %12572 = vmatprep.subr.mxu0 %v12409_v44  ;;  %v12465_v55 = vld [vmem:[%s18199_s2 + $0x238] sm:$0xff]  ;;  %v12464_v15 = vld [vmem:[%s18199_s2 + $0x230] sm:$0xff]  ;;  %v12463_v51 = vld [vmem:[%s18199_s2 + $0x228] sm:$0xff] }
 0x7e9   : > { %12643 = vmatprep.subr.mxu1 %v12473_v53  ;;  %12573 = vmatpush1.msra.mxu0 %v12408_v60  ;;  %v12398_v0 = vld [vmem:[%s18199_s2 + $0x20] sm:$0xff]  ;;  %v12397_v50 = vld [vmem:[%s18199_s2 + $0x18] sm:$0xff]  ;;  %v12396_v37 = vld [vmem:[%s18199_s2 + $0x10] sm:$0xff] }
 0x7ea   : > { %12644 = vmatpush1.msra.mxu1 %v12472_v42  ;;  %12574 = vmatprep.subr.mxu0 %v12407_v43  ;;  %v12462_v63 = vld [vmem:[%s18199_s2 + $0x220] sm:$0xff]  ;;  %v12461_v25 = vld [vmem:[%s18199_s2 + $0x218] sm:$0xff]  ;;  %v12460_v32 = vld [vmem:[%s18199_s2 + $0x210] sm:$0xff] }
 0x7eb   : > { %12645 = vmatprep.subr.mxu1 %v12471_v54  ;;  %12575 = vmatpush1.msra.mxu0 %v12406_v49  ;;  %v12395_v40 = vld [vmem:[%s18199_s2 + $0x8] sm:$0xff]  ;;  %v12394_v6 = vld [vmem:[%s18199_s2] sm:$0xff]  ;;  %v12457_v12 = vld [vmem:[%s18199_s2 + $0x1f8] sm:$0xff] }
 0x7ec   : > { %12646 = vmatpush1.msra.mxu1 %v12470_v13  ;;  %12576 = vmatprep.subr.mxu0 %v12405_v21  ;;  %v12459_v41 = vld [vmem:[%s18199_s2 + $0x208] sm:$0xff]  ;;  %v12458_v26 = vld [vmem:[%s18199_s2 + $0x200] sm:$0xff]  ;;  %v12521_v2 = vld [vmem:[%s18199_s2 + $0x3f8] sm:$0xff] }
 0x7ed   : > { %12647 = vmatprep.subr.mxu1 %v12469_v28  ;;  %12577 = vmatpush1.msra.mxu0 %v12404_v3  ;;  %v12456_v8 = vld [vmem:[%s18199_s2 + $0x1f0] sm:$0xff]  ;;  %v12455_v59 = vld [vmem:[%s18199_s2 + $0x1e8] sm:$0xff]  ;;  %v12454_v39 = vld [vmem:[%s18199_s2 + $0x1e0] sm:$0xff] }
 0x7ee   : > { %12648 = vmatpush1.msra.mxu1 %v12468_v1  ;;  %12578 = vmatprep.subr.mxu0 %v12403_v11  ;;  %v12520_v4 = vld [vmem:[%s18199_s2 + $0x3f0] sm:$0xff]  ;;  %v12519_v10 = vld [vmem:[%s18199_s2 + $0x3e8] sm:$0xff]  ;;  %v12518_v45 = vld [vmem:[%s18199_s2 + $0x3e0] sm:$0xff] }
 0x7ef   : > { %12649 = vmatprep.subr.mxu1 %v12467_v52  ;;  %12579 = vmatpush1.msra.mxu0 %v12402_v36  ;;  %v12453_v23 = vld [vmem:[%s18199_s2 + $0x1d8] sm:$0xff]  ;;  %v12452_v31 = vld [vmem:[%s18199_s2 + $0x1d0] sm:$0xff]  ;;  %v12451_v24 = vld [vmem:[%s18199_s2 + $0x1c8] sm:$0xff] }
 0x7f0   : > { %12650 = vmatpush1.msra.mxu1 %v12466_v48  ;;  %12580 = vmatprep.subr.mxu0 %v12401_v62  ;;  %v12517_v30 = vld [vmem:[%s18199_s2 + $0x3d8] sm:$0xff]  ;;  %v12516_v33 = vld [vmem:[%s18199_s2 + $0x3d0] sm:$0xff]  ;;  %v12515_v7 = vld [vmem:[%s18199_s2 + $0x3c8] sm:$0xff] }
 0x7f1   : > { %12651 = vmatprep.subr.mxu1 %v12465_v55  ;;  %12581 = vmatpush1.msra.mxu0 %v12400_v27  ;;  %v12450_v9 = vld [vmem:[%s18199_s2 + $0x1c0] sm:$0xff]  ;;  %v12449_v38 = vld [vmem:[%s18199_s2 + $0x1b8] sm:$0xff]  ;;  %v12448_v14 = vld [vmem:[%s18199_s2 + $0x1b0] sm:$0xff] }
 0x7f2   : > { %12652 = vmatpush1.msra.mxu1 %v12464_v15  ;;  %12582 = vmatprep.subr.mxu0 %v12399_v57  ;;  %v12514_v22 = vld [vmem:[%s18199_s2 + $0x3c0] sm:$0xff]  ;;  %v12513_v29 = vld [vmem:[%s18199_s2 + $0x3b8] sm:$0xff]  ;;  %v12512_v5 = vld [vmem:[%s18199_s2 + $0x3b0] sm:$0xff] }
 0x7f3   : > { %12653 = vmatprep.subr.mxu1 %v12463_v51  ;;  %12583 = vmatpush1.msra.mxu0 %v12398_v0  ;;  %v12447_v16 = vld [vmem:[%s18199_s2 + $0x1a8] sm:$0xff]  ;;  %v12446_v58 = vld [vmem:[%s18199_s2 + $0x1a0] sm:$0xff]  ;;  %v12445_v19 = vld [vmem:[%s18199_s2 + $0x198] sm:$0xff] }
 0x7f4   : > { %12654 = vmatpush1.msra.mxu1 %v12462_v63  ;;  %12584 = vmatprep.subr.mxu0 %v12397_v50  ;;  %v12511_v35 = vld [vmem:[%s18199_s2 + $0x3a8] sm:$0xff]  ;;  %v12510_v47 = vld [vmem:[%s18199_s2 + $0x3a0] sm:$0xff]  ;;  %v12509_v61 = vld [vmem:[%s18199_s2 + $0x398] sm:$0xff] }
 0x7f5   : > { %12655 = vmatprep.subr.mxu1 %v12461_v25  ;;  %12585 = vmatpush1.msra.mxu0 %v12396_v37  ;;  %v12444_v17 = vld [vmem:[%s18199_s2 + $0x190] sm:$0xff]  ;;  %v12443_v34 = vld [vmem:[%s18199_s2 + $0x188] sm:$0xff]  ;;  %v12442_v44 = vld [vmem:[%s18199_s2 + $0x180] sm:$0xff] }
 0x7f6   : > { %12656 = vmatpush1.msra.mxu1 %v12460_v32  ;;  %12586 = vmatprep.subr.mxu0 %v12395_v40  ;;  %v12508_v20 = vld [vmem:[%s18199_s2 + $0x390] sm:$0xff]  ;;  %v12507_v18 = vld [vmem:[%s18199_s2 + $0x388] sm:$0xff]  ;;  %v12506_v53 = vld [vmem:[%s18199_s2 + $0x380] sm:$0xff] }
 0x7f7   : > { %12657 = vmatprep.subr.mxu1 %v12459_v41  ;;  %12587 = vmatpush1.msra.mxu0 %v12394_v6  ;;  %v12390_v56 = vld [vmem:[#allocation2] sm:$0xff]  ;;  %v12441_v60 = vld [vmem:[%s18199_s2 + $0x178] sm:$0xff]  ;;  %v12439_v13 = vld [vmem:[%s18199_s2 + $0x168] sm:$0xff] }
 0x7f8   : > { %12658 = vmatpush1.msra.mxu1 %v12458_v26  ;;  %12588 = vmatprep.subr.mxu0 %v12457_v12  ;;  %v12505_v42 = vld [vmem:[%s18199_s2 + $0x378] sm:$0xff]  ;;  %v12392_v43 = vmul.f32 0.2, %v12390_v56  ;;  %v12440_v54 = vld [vmem:[%s18199_s2 + $0x170] sm:$0xff]  ;;  %vm12391_vm0 = vcmp.gt.f32.partialorder %v12390_v56, 0.0  ;;  %v12503_v21 = vld [vmem:[%s18199_s2 + $0x368] sm:$0xff] }
 0x7f9   : > { %12659 = vmatprep.subr.mxu1 %v12521_v2  ;;  %12589 = vmatpush2.msra.mxu0 %v12456_v8  ;;  %v12504_v49 = vld [vmem:[%s18199_s2 + $0x370] sm:$0xff]  ;;  %v12438_v28 = vld [vmem:[%s18199_s2 + $0x160] sm:$0xff]  ;;  %v12437_v1 = vld [vmem:[%s18199_s2 + $0x158] sm:$0xff] }
 0x7fa   : > { %12660 = vmatpush2.msra.mxu1 %v12520_v4  ;;  %12590 = vmatprep.subr.mxu0 %v12455_v59  ;;  %v12502_v3 = vld [vmem:[%s18199_s2 + $0x360] sm:$0xff]  ;;  %v12501_v11 = vld [vmem:[%s18199_s2 + $0x358] sm:$0xff]  ;;  %v12393_v52 = vsel %vm12391_vm0, %v12390_v56, %v12392_v43  ;;  %v12436_v36 = vld [vmem:[%s18199_s2 + $0x150] sm:$0xff] }
 0x7fb   : > { %12661 = vmatprep.subr.mxu1 %v12519_v10  ;;  %12591 = vmatpush2.msra.mxu0 %v12454_v39  ;;  %v12500_v48 = vld [vmem:[%s18199_s2 + $0x350] sm:$0xff]  ;;  %v12435_v62 = vld [vmem:[%s18199_s2 + $0x148] sm:$0xff]  ;;  %v12434_v27 = vld [vmem:[%s18199_s2 + $0x140] sm:$0xff]  ;;  %v12535_v57 = vcombine.high %v12393_v52, %v12393_v52  ;;  %v12542_v32 = vrot.slane %v12393_v52, %v20272_v46 }
 0x7fc   : > { %12662 = vmatpush2.msra.mxu1 %v12518_v45  ;;  %12592 = vmatprep.subr.mxu0 %v12453_v23  ;;  %v12499_v55 = vld [vmem:[%s18199_s2 + $0x348] sm:$0xff]  ;;  %v12498_v15 = vld [vmem:[%s18199_s2 + $0x340] sm:$0xff]  ;;  %v12433_v51 = vld [vmem:[%s18199_s2 + $0x138] sm:$0xff] }
 0x7fd   : > { %12663 = vmatprep.subr.mxu1 %v12517_v30  ;;  %12593 = vmatpush2.msra.mxu0 %v12452_v31  ;;  %v12497_v0 = vld [vmem:[%s18199_s2 + $0x338] sm:$0xff]  ;;  %v12432_v63 = vld [vmem:[%s18199_s2 + $0x130] sm:$0xff]  ;;  %v12431_v25 = vld [vmem:[%s18199_s2 + $0x128] sm:$0xff]  ;;  %v12549_v6 = vrot.slane %v12535_v57, %v20272_v46  ;;  %v12550_v10 = vcombine.high %v12542_v32, %v12542_v32 }
 0x7fe   : > { %12664 = vmatpush2.msra.mxu1 %v12516_v33  ;;  %12594 = vmatprep.subr.mxu0 %v12451_v24  ;;  %v12496_v50 = vld [vmem:[%s18199_s2 + $0x330] sm:$0xff]  ;;  %v12495_v37 = vld [vmem:[%s18199_s2 + $0x328] sm:$0xff]  ;;  %v12430_v40 = vld [vmem:[%s18199_s2 + $0x120] sm:$0xff] }
 0x7ff   : > { %12665 = vmatprep.subr.mxu1 %v12515_v7  ;;  %12595 = vmatpush2.msra.mxu0 %v12450_v9  ;;  %v12494_v41 = vld [vmem:[%s18199_s2 + $0x320] sm:$0xff]  ;;  %v12429_v26 = vld [vmem:[%s18199_s2 + $0x118] sm:$0xff]  ;;  %v12428_v2 = vld [vmem:[%s18199_s2 + $0x110] sm:$0xff]  ;;  %v12551_v39 = vcombine.high %v12549_v6, %v12549_v6 }
 0x800   : > { %12666 = vmatpush2.msra.mxu1 %v12514_v22  ;;  %12596 = vmatprep.subr.mxu0 %v12449_v38  ;;  %v12493_v12 = vld [vmem:[%s18199_s2 + $0x318] sm:$0xff]  ;;  %v12492_v8 = vld [vmem:[%s18199_s2 + $0x310] sm:$0xff]  ;;  %v12427_v4 = vld [vmem:[%s18199_s2 + $0x108] sm:$0xff] }
 0x801   : > { %12667 = vmatprep.subr.mxu1 %v12513_v29  ;;  %12597 = vmatpush2.msra.mxu0 %v12448_v14  ;;  %v12491_v59 = vld [vmem:[%s18199_s2 + $0x308] sm:$0xff]  ;;  %v12426_v46 = vld [vmem:[%s18199_s2 + $0x100] sm:$0xff]  ;;  %v12734_v31 = vld [vmem:[%s18208_s0 + $0xf0] sm:$0xff] }
 0x802   : > { %12668 = vmatpush2.msra.mxu1 %v12512_v5  ;;  %12598 = vmatprep.subr.mxu0 %v12447_v16  ;;  %v12490_v45 = vld [vmem:[%s18199_s2 + $0x300] sm:$0xff]  ;;  %v12718_v33 = vld [vmem:[%s18208_s0 + $0x70] sm:$0xff]  ;;  %v12733_v24 = vld [vmem:[%s18208_s0 + $0xe8] sm:$0xff] }
 0x803   : > { %12669 = vmatprep.subr.mxu1 %v12511_v35  ;;  %12599 = vmatpush2.msra.mxu0 %v12446_v58  ;;  %v12735_v23 = vld [vmem:[%s18208_s0 + $0xf8] sm:$0xff]  ;;  %v12717_v7 = vld [vmem:[%s18208_s0 + $0x68] sm:$0xff]  ;;  %v12732_v9 = vld [vmem:[%s18208_s0 + $0xe0] sm:$0xff] }
 0x804   : > { %12670 = vmatpush2.msra.mxu1 %v12510_v47  ;;  %12600 = vmatprep.subr.mxu0 %v12445_v19  ;;  %v12719_v30 = vld [vmem:[%s18208_s0 + $0x78] sm:$0xff]  ;;  %v12716_v22 = vld [vmem:[%s18208_s0 + $0x60] sm:$0xff]  ;;  %v12730_v14 = vld [vmem:[%s18208_s0 + $0xd0] sm:$0xff] }
 0x805   : > { %12671 = vmatprep.subr.mxu1 %v12509_v61  ;;  %12601 = vmatpush2.msra.mxu0 %v12444_v17  ;;  %v12731_v38 = vld [vmem:[%s18208_s0 + $0xd8] sm:$0xff]  ;;  %v12714_v5 = vld [vmem:[%s18208_s0 + $0x50] sm:$0xff]  ;;  %v12729_v16 = vld [vmem:[%s18208_s0 + $0xc8] sm:$0xff] }
 0x806   : > { %12672 = vmatpush2.msra.mxu1 %v12508_v20  ;;  %12602 = vmatprep.subr.mxu0 %v12443_v34  ;;  %v12715_v29 = vld [vmem:[%s18208_s0 + $0x58] sm:$0xff]  ;;  %v12713_v35 = vld [vmem:[%s18208_s0 + $0x48] sm:$0xff]  ;;  %v12728_v58 = vld [vmem:[%s18208_s0 + $0xc0] sm:$0xff] }
 0x807   : > { %12673 = vmatprep.subr.mxu1 %v12507_v18  ;;  %12603 = vmatpush2.msra.mxu0 %v12442_v44  ;;  %v12712_v47 = vld [vmem:[%s18208_s0 + $0x40] sm:$0xff]  ;;  %v12727_v19 = vld [vmem:[%s18208_s0 + $0xb8] sm:$0xff]  ;;  %v12726_v17 = vld [vmem:[%s18208_s0 + $0xb0] sm:$0xff] }
 0x808   : > { %12674 = vmatpush2.msra.mxu1 %v12506_v53  ;;  %12604 = vmatprep.subr.mxu0 %v12441_v60  ;;  %v12711_v61 = vld [vmem:[%s18208_s0 + $0x38] sm:$0xff]  ;;  %v12710_v20 = vld [vmem:[%s18208_s0 + $0x30] sm:$0xff]  ;;  %v12725_v56 = vld [vmem:[%s18208_s0 + $0xa8] sm:$0xff] }
 0x809   : > { %12675 = vmatprep.subr.mxu1 %v12505_v42  ;;  %12605 = vmatpush2.msra.mxu0 %v12440_v54  ;;  %v12709_v34 = vld [vmem:[%s18208_s0 + $0x28] sm:$0xff]  ;;  %v12724_v18 = vld [vmem:[%s18208_s0 + $0xa0] sm:$0xff]  ;;  %v12723_v53 = vld [vmem:[%s18208_s0 + $0x98] sm:$0xff] }
 0x80a   : > { %12676 = vmatpush2.msra.mxu1 %v12504_v49  ;;  %12606 = vmatprep.subr.mxu0 %v12439_v13  ;;  %v12708_v44 = vld [vmem:[%s18208_s0 + $0x20] sm:$0xff]  ;;  %v12707_v60 = vld [vmem:[%s18208_s0 + $0x18] sm:$0xff]  ;;  %v12722_v42 = vld [vmem:[%s18208_s0 + $0x90] sm:$0xff] }
 0x80b   : > { %12677 = vmatprep.subr.mxu1 %v12503_v21  ;;  %12607 = vmatpush2.msra.mxu0 %v12438_v28  ;;  %v12706_v43 = vld [vmem:[%s18208_s0 + $0x10] sm:$0xff]  ;;  %v12721_v54 = vld [vmem:[%s18208_s0 + $0x88] sm:$0xff]  ;;  %v12720_v13 = vld [vmem:[%s18208_s0 + $0x80] sm:$0xff] }
 0x80c   : > { %12678 = vmatpush2.msra.mxu1 %v12502_v3  ;;  %12608 = vmatprep.subr.mxu0 %v12437_v1  ;;  %v12705_v49 = vld [vmem:[%s18208_s0 + $0x8] sm:$0xff]  ;;  %v12704_v21 = vld [vmem:[%s18208_s0] sm:$0xff]  ;;  %v17851_v3 = vmov 0.0   ;;  %v12830_v1 = vld [vmem:[%s18216_s23 + $0x70] sm:$0xff] }
 0x80d   : > { %12679 = vmatprep.subr.mxu1 %v12501_v11  ;;  %12609 = vmatpush2.msra.mxu0 %v12436_v36  ;;  %v12831_v28 = vld [vmem:[%s18216_s23 + $0x78] sm:$0xff]  ;;  %v12829_v11 = vld [vmem:[%s18216_s23 + $0x68] sm:$0xff]  ;;  %v12828_v52 = vld [vmem:[%s18216_s23 + $0x60] sm:$0xff] }
 0x80e   : > { %12680 = vmatpush2.msra.mxu1 %v12500_v48  ;;  %12610 = vmatprep.subr.mxu0 %v12435_v62  ;;  %v12827_v36 = vld [vmem:[%s18216_s23 + $0x58] sm:$0xff]  ;;  %v12826_v48 = vld [vmem:[%s18216_s23 + $0x50] sm:$0xff]  ;;  %v12825_v62 = vld [vmem:[%s18216_s23 + $0x48] sm:$0xff] }
 0x80f   : > { %12681 = vmatprep.subr.mxu1 %v12499_v55  ;;  %12611 = vmatpush2.msra.mxu0 %v12434_v27  ;;  %v12824_v55 = vld [vmem:[%s18216_s23 + $0x40] sm:$0xff]  ;;  %v12823_v27 = vld [vmem:[%s18216_s23 + $0x38] sm:$0xff]  ;;  %v12821_v57 = vld [vmem:[%s18216_s23 + $0x28] sm:$0xff] }
 0x810   : > { %12682 = vmatpush2.msra.mxu1 %v12498_v15  ;;  %12612 = vmatprep.subr.mxu0 %v12433_v51  ;;  %v12822_v15 = vld [vmem:[%s18216_s23 + $0x30] sm:$0xff]  ;;  %v20622_v51 = vld [vmem:[#allocation34_spill] sm:$0xff] }
 0x811   : > { %12683 = vmatprep.subr.mxu1 %v12497_v0  ;;  %12613 = vmatpush2.msra.mxu0 %v12432_v63  ;;  %v12526_v0 = vsub.s32 0, %v20622_v51  ;;  %v12522_v63 = vld [vmem:[%s18201_s4] sm:$0x3] }
 0x812   : > { %12684 = vmatpush2.msra.mxu1 %v12496_v50  ;;  %12614 = vmatprep.subr.mxu0 %v12431_v25  ;;  %v12530_v50 = vsub.s32 1, %v20622_v51 }
 0x813   : > { %12685 = vmatprep.subr.mxu1 %v12495_v37  ;;  %12615 = vmatpush2.msra.mxu0 %v12430_v40  ;;  %v12527_v25 = vrot.slane %v12522_v63, %v12526_v0 }
 0x814   : > { %12686 = vmatpush2.msra.mxu1 %v12494_v41  ;;  %12616 = vmatprep.subr.mxu0 %v12429_v26  ;;  %v12531_v37 = vrot.slane %v12522_v63, %v12530_v50 }
 0x815   : > { %12687 = vmatprep.subr.mxu1 %v12493_v12  ;;  %12617 = vmatpush2.msra.mxu0 %v12428_v2 }
 0x816   : > { %12688 = vmatpush2.msra.mxu1 %v12492_v8  ;;  %12618 = vmatprep.subr.mxu0 %v12427_v4 }
 0x817   : > { %12689 = vmatprep.subr.mxu1 %v12491_v59  ;;  %12619 = vmatpush2.msra.mxu0 %v12426_v46 }
 0x818   : > { %12620 = vmatprep.mubr.f32.mxu0 %v12550_v10  ;;  %12690 = vmatpush2.msra.mxu1 %v12490_v45  ;;  %v12819_v45 = vld [vmem:[%s18216_s23 + $0x18] sm:$0xff] }
 0x819   : > { %12691 = vmatprep.mubr.f32.mxu1 %v12551_v39  ;;  %12621 = vmatmul.mubr.f32.vlgmr.msra.gmra.mxu0 %v12542_v32  ;;  %v12820_v39 = vld [vmem:[%s18216_s23 + $0x20] sm:$0xff] }
 0x81a   : > { %12692 = vmatmul.mubr.f32.vlgmr.msra.gmra.mxu1 %v12549_v6  ;;  %14865 = vmatprep.subr.mxu0 %v12735_v23  ;;  %v12818_v23 = vld [vmem:[%s18216_s23 + $0x10] sm:$0xff] }
 0x81b   : > { %14866 = vmatpush3.msra.mxu0 %v12719_v30  ;;  %14926 = vmatprep.subr.mxu1 %v17851_v3  ;;  %v12817_v30 = vld [vmem:[%s18216_s23 + $0x8] sm:$0xff] }
 0x81c   : > { %14867 = vmatprep.subr.mxu0 %v12734_v31  ;;  %14927 = vmatpush3.msra.mxu1 %v12831_v28  ;;  %v12816_v31 = vld [vmem:[%s18216_s23] sm:$0xff] }
 0x81d   : > { %14868 = vmatpush3.msra.mxu0 %v12718_v33  ;;  %14928 = vmatprep.subr.mxu1 %v17851_v3  ;;  %v12919_v33 = vld [vmem:[%s18224_s29 + $0x38] sm:$0xff] }
 0x81e   : > { %14869 = vmatprep.subr.mxu0 %v12733_v24  ;;  %14929 = vmatpush3.msra.mxu1 %v12830_v1  ;;  %v12918_v24 = vld [vmem:[%s18224_s29 + $0x30] sm:$0xff] }
 0x81f   : > { %14870 = vmatpush3.msra.mxu0 %v12717_v7  ;;  %14930 = vmatprep.subr.mxu1 %v17851_v3  ;;  %v12917_v7 = vld [vmem:[%s18224_s29 + $0x28] sm:$0xff] }
 0x820   : > { %14871 = vmatprep.subr.mxu0 %v12732_v9  ;;  %14931 = vmatpush3.msra.mxu1 %v12829_v11  ;;  %v12916_v9 = vld [vmem:[%s18224_s29 + $0x20] sm:$0xff] }
 0x821   : > { %14872 = vmatpush3.msra.mxu0 %v12716_v22  ;;  %14932 = vmatprep.subr.mxu1 %v17851_v3  ;;  %v12915_v22 = vld [vmem:[%s18224_s29 + $0x18] sm:$0xff] }
 0x822   : > { %14873 = vmatprep.subr.mxu0 %v12731_v38  ;;  %14933 = vmatpush3.msra.mxu1 %v12828_v52 }
 0x823   : > { %14874 = vmatpush3.msra.mxu0 %v12715_v29  ;;  %14934 = vmatprep.subr.mxu1 %v17851_v3  ;;  %v14852_v29 = vld [vmem:[%s648_s22] ss:$0 sm:$0xff] }
 0x824   : > { %14875 = vmatprep.subr.mxu0 %v12730_v14  ;;  %14935 = vmatpush3.msra.mxu1 %v12827_v36 }
 0x825   : > { %14876 = vmatpush3.msra.mxu0 %v12714_v5  ;;  %14936 = vmatprep.subr.mxu1 %v17851_v3 }
 0x826   : > { %14877 = vmatprep.subr.mxu0 %v12729_v16  ;;  %14937 = vmatpush3.msra.mxu1 %v12826_v48 }
 0x827   : > { %14878 = vmatpush3.msra.mxu0 %v12713_v35  ;;  %14938 = vmatprep.subr.mxu1 %v17851_v3 }
 0x828   : > { %14879 = vmatprep.subr.mxu0 %v12728_v58  ;;  %14939 = vmatpush3.msra.mxu1 %v12825_v62 }
 0x829   : > { %14880 = vmatpush3.msra.mxu0 %v12712_v47  ;;  %14940 = vmatprep.subr.mxu1 %v17851_v3  ;;  %v12914_v47 = vld [vmem:[%s18224_s29 + $0x10] sm:$0xff] }
 0x82a   : > { %14881 = vmatprep.subr.mxu0 %v12727_v19  ;;  %14941 = vmatpush3.msra.mxu1 %v12824_v55  ;;  %v12913_v19 = vld [vmem:[%s18224_s29 + $0x8] sm:$0xff] }
 0x82b   : > { %14882 = vmatpush3.msra.mxu0 %v12711_v61  ;;  %14942 = vmatprep.subr.mxu1 %v17851_v3  ;;  %v12912_v61 = vld [vmem:[%s18224_s29] sm:$0xff] }
 0x82c   : > { %14883 = vmatprep.subr.mxu0 %v12726_v17  ;;  %14943 = vmatpush3.msra.mxu1 %v12823_v27  ;;  %v14853_v17 = vld [vmem:[%s665_s5] ss:$0 sm:$0xff] }
 0x82d   : > { %14884 = vmatpush3.msra.mxu0 %v12710_v20  ;;  %14944 = vmatprep.subr.mxu1 %v17851_v3 }
 0x82e   : > { %14885 = vmatprep.subr.mxu0 %v12725_v56  ;;  %14945 = vmatpush3.msra.mxu1 %v12822_v15 }
 0x82f   : > { %14886 = vmatpush3.msra.mxu0 %v12709_v34  ;;  %14946 = vmatprep.subr.mxu1 %v17851_v3 }
 0x830   : > { %14887 = vmatprep.subr.mxu0 %v12724_v18  ;;  %14947 = vmatpush3.msra.mxu1 %v12821_v57 }
 0x831   : > { %14888 = vmatpush3.msra.mxu0 %v12708_v44  ;;  %14948 = vmatprep.subr.mxu1 %v17851_v3 }
 0x832   : > { %14889 = vmatprep.subr.mxu0 %v12723_v53  ;;  %14949 = vmatpush3.msra.mxu1 %v12820_v39  ;;  %v14854_v53 = vld [vmem:[%s682_s18] ss:$0 sm:$0xff] }
 0x833   : > { %14890 = vmatpush3.msra.mxu0 %v12707_v60  ;;  %14950 = vmatprep.subr.mxu1 %v17851_v3 }
 0x834   : > { %14891 = vmatprep.subr.mxu0 %v12722_v42  ;;  %14951 = vmatpush3.msra.mxu1 %v12819_v45 }
 0x835   : > { %14892 = vmatpush3.msra.mxu0 %v12706_v43  ;;  %14952 = vmatprep.subr.mxu1 %v17851_v3 }
 0x836   : > { %14893 = vmatprep.subr.mxu0 %v12721_v54  ;;  %14953 = vmatpush3.msra.mxu1 %v12818_v23 }
 0x837   : > { %14894 = vmatpush3.msra.mxu0 %v12705_v49  ;;  %14954 = vmatprep.subr.mxu1 %v17851_v3 }
 0x838   : > { %14895 = vmatprep.subr.mxu0 %v12720_v13  ;;  %14955 = vmatpush3.msra.mxu1 %v12817_v30 }
 0x839   : > { %14896 = vmatpush3.msra.mxu0 %v12704_v21  ;;  %14956 = vmatprep.subr.mxu1 %v17851_v3 }
 0x83a   : > { %14961 = vmatprep.subr.mxu0 %v17851_v3  ;;  %14958 = vmatprep.mubr.msk.f32.mxu1 %vm17852_vm3, %v17851_v3 }
 0x83b   : > { %14957 = vmatpush3.msra.mxu1 %v12816_v31 }
 0x8d9   : > { %v12622_v32 = vpop.f32.mrf.mxu0 }
 0x8da   : > { %v12693_v40 = vpop.f32.mrf.mxu1  ;;  %v12623_v41 = vadd.f32 %v12622_v32, %v12527_v25 }
 0x8db   : > { %v12624_v6 = vpop.f32.mrf.mxu0 }
 0x8dc   : > { %v12694_v26 = vadd.f32 %v12693_v40, %v12623_v41  ;;  %v12625_v12 = vadd.f32 %v12624_v6, %v12531_v37  ;;  %v12695_v2 = vpop.f32.mrf.mxu1 }
 0x8de   : > { %v12696_v8 = vadd.f32 %v12695_v2, %v12625_v12  ;;  %v12700_v4 = vmul.f32 0.2, %v12694_v26  ;;  %vm12698_vm1 = vcmp.gt.f32.partialorder %v12694_v26, 0.0 }
 0x8e0   : > { %v12701_v59 = vmul.f32 0.2, %v12696_v8  ;;  %vm12699_vm2 = vcmp.gt.f32.partialorder %v12696_v8, 0.0  ;;  %v12702_v46 = vsel %vm12698_vm1, %v12694_v26, %v12700_v4 }
 0x8e2   : > { %v12703_v10 = vsel %vm12699_vm2, %v12696_v8, %v12701_v59 }
 0x8e3   : > { %12807 = vmatprep.mubr.f32.mxu0 %v12703_v10 }
 0x8e4   : > { %12808 = vmatmul.mubr.f32.vlgmr.msra.gmra.mxu0 %v12702_v46 }
 0x8e5   : > { %14977 = vmatprep.mubr.msk.f32.mxu0 %vm17852_vm3, %v17851_v3  ;;  %14962 = vmatpush3.msra.mxu0 %v12919_v33 }
 0x8e6   : > { %14963 = vmatprep.subr.mxu0 %v17851_v3 }
 0x8e7   : > { %14964 = vmatpush3.msra.mxu0 %v12918_v24 }
 0x8e8   : > { %14965 = vmatprep.subr.mxu0 %v17851_v3 }
 0x8e9   : > { %14966 = vmatpush3.msra.mxu0 %v12917_v7 }
 0x8ea   : > { %14967 = vmatprep.subr.mxu0 %v17851_v3 }
 0x8eb   : > { %14968 = vmatpush3.msra.mxu0 %v12916_v9 }
 0x8ec   : > { %14969 = vmatprep.subr.mxu0 %v17851_v3 }
 0x8ed   : > { %14970 = vmatpush3.msra.mxu0 %v12915_v22 }
 0x8ee   : > { %14971 = vmatprep.subr.mxu0 %v17851_v3 }
 0x8ef   : > { %14972 = vmatpush3.msra.mxu0 %v12914_v47 }
 0x8f0   : > { %14973 = vmatprep.subr.mxu0 %v17851_v3 }
 0x8f1   : > { %14974 = vmatpush3.msra.mxu0 %v12913_v19 }
 0x8f2   : > { %14975 = vmatprep.subr.mxu0 %v17851_v3 }
 0x8f3   : > { %14976 = vmatpush3.msra.mxu0 %v12912_v61 }
 0x9a4   : > { %v14897_v38 = vpop.f32.mrf.mxu0 }
 0x9a6   : > { %v14898_v14 = vpop.f32.mrf.mxu0 }
 0x9a7   : > { %v14899_v5 = vadd.f32 %v14898_v14, %v14897_v38 }
 0x9a9   : > { %v12810_v16 = vadd.f32 %v14899_v5, %v14852_v29 }
 0x9ab   : > { %v12814_v35 = vmul.f32 0.2, %v12810_v16  ;;  %vm12813_vm4 = vcmp.gt.f32.partialorder %v12810_v16, 0.0 }
 0x9ad   : > { %v12815_v58 = vsel %vm12813_vm4, %v12810_v16, %v12814_v35 }
 0x9ae   : > { %14959 = vmatmul.mubr.f32.vlgmr.msra.gmra.mxu1 %v12815_v58 }
 0xa6e   : > { %v12905_v20 = vpop.f32.mrf.mxu1 }
 0xa6f   : > { %v12906_v56 = vadd.f32 %v14853_v17, %v12905_v20 }
 0xa70   : > { %v14960_v34 = vpop.f32.mrf.mxu1 }
 0xa71   : > { %vm12909_vm5 = vcmp.gt.f32.partialorder %v12906_v56, 0.0  ;;  %v12910_v18 = vmul.f32 0.2, %v12906_v56 }
 0xa73   : > { %v12911_v44 = vsel %vm12909_vm5, %v12906_v56, %v12910_v18 }
 0xa74   : > { %14978 = vmatmul.mubr.msk.f32.vlgmr.msra.gmra.mxu0 %vm12927_vm6, %v12911_v44 }
 0xb34   : > { %v12997_v60 = vpop.f32.mrf.mxu0 }
 0xb35   : > { %v12998_v42 = vadd.f32 %v14854_v53, %v12997_v60 }
 0xb36   : > { %v14979_v43 = vpop.f32.mrf.mxu0 }
 0xb37   : > { %13001 = vst [vmem:[%s18239_s15] sm:$0x3] %v12998_v42 }
 0xb38 PF: > { %s39_s27 = sadd.s32 1, %s17832_s27   ;;  %s20623_s17 = sld [smem:[#allocation25_spill]] }
 0xb39   : > { %p36_p0 = scmp.ge.s32.totalorder %s39_s27, 10   ;;  %s20624_s13 = sld [smem:[#allocation26_spill]] }
 0xb3a   : > { %s20625_s22 = sld [smem:[#allocation33_spill]]  ;;  %s20629_s18 = smov %s17800_s19 }
 0xb3b   : > { %s20626_s23 = sld [smem:[#allocation29_spill]]  ;;  %s20630_s19 = smov %s18091_s6 }
 0xb3c   : > { %s20627_s25 = sld [smem:[#allocation30_spill]]  ;;  %s20631_s20 = smov %s17808_s21 }
 0xb3d   : > { %s20628_s9 = sld [smem:[#allocation31_spill]]  ;;  %s20633_s24 = smov %s17828_s26 }
 0xb3f   : > { %s20632_s21 = smov %s20624_s13  ;;  %38 = sbr.rel (!%p36_p0) target bundleno = 29 (0x1d), region = 224 }
 0xb43   : > { %s20634_s26 = smov %s20628_s9 }
 0xb44   :  { %13021 = vsyncpa [#allocation4], 1 }
 0xb45   :  { %13023 = vsyncpa [#allocation4 + $0x1], 1 }
 0xb46   :  { %13024 = vsyncpa [#allocation6], 1 }
 0xb47   :  { %13026 = vsyncpa [#allocation6 + $0x1], 1 }
 0xb48   :  { %13027 = vsyncpa [#allocation9], 1 }
 0xb49   :  { %13029 = vsyncpa [#allocation9 + $0x1], 1 }
 0xb4a   :  { %13030 = vsyncpa [#allocation12], 1 }
 0xb4b   :  { %13032 = vsyncpa [#allocation12 + $0x1], 1 }
 0xb4c   :  { %13033 = vsyncpa [#allocation15], 1 }
 0xb4d   :  { %13035 = vsyncpa [#allocation15 + $0x1], 1 }
 0xb4e   :  { %13036 = vsyncpa [#allocation18], 1 }
 0xb4f   :  { %13038 = vsyncpa [#allocation18 + $0x1], 1 }

</bundles_post_ra>
